<compile_context>
chip_gen: v7x
topology: tpu7x:2x2x1
jax: 0.10.0
libtpu: 0.0.40
codegen_flags: <defaults>
</compile_context>

<pallas_src>
import jax
import jax.numpy as jnp
from jax.experimental import pallas as pl
from jax.experimental.pallas import tpu as pltpu

VMEM_LIMIT = 32 * 1024 * 1024  # safe on v5e/v6e/v7x (v7x has only 64 MiB physical)


# --------------------------- Pallas kernels ---------------------------

def conv_pool_kernel(p_ref, w_ref, b_ref, o_ref):
    """3x3 conv (valid) + bias + ReLU + 2x2 max-pool for one batch element.

    p_ref: (1, 4, P, K) bf16   im2col patches grouped by the 4 pool phases
                               (P = pooled pixels row-major, K = 9*Cin, (dh,dw,cin) order)
    w_ref: (K, Cout)    bf16   flattened conv weights
    b_ref: (1, Cout)    f32
    o_ref: (1, P, Cout) bf16   pooled output
    """
    w = w_ref[...]
    y0 = jnp.dot(p_ref[0, 0], w, preferred_element_type=jnp.float32)
    y1 = jnp.dot(p_ref[0, 1], w, preferred_element_type=jnp.float32)
    y2 = jnp.dot(p_ref[0, 2], w, preferred_element_type=jnp.float32)
    y3 = jnp.dot(p_ref[0, 3], w, preferred_element_type=jnp.float32)
    # bias is phase-independent and ReLU is monotone, so max/bias/ReLU commute.
    y = jnp.maximum(jnp.maximum(y0, y1), jnp.maximum(y2, y3))
    o_ref[0] = jnp.maximum(y + b_ref[...], 0.0).astype(o_ref.dtype)


def conv_relu_kernel(p_ref, w_ref, b_ref, o_ref):
    """3x3 conv (valid) + bias + ReLU (no pool), one batch element.

    p_ref: (1, P, K) bf16; w_ref: (K, Cout) bf16; b_ref: (1, Cout) f32; o_ref: (1, P, Cout) bf16
    """
    y = jnp.dot(p_ref[0], w_ref[...], preferred_element_type=jnp.float32)
    o_ref[0] = jnp.maximum(y + b_ref[...], 0.0).astype(o_ref.dtype)


def mlp_kernel(x_ref, w1_ref, b1_ref, w2_ref, b2_ref, o_ref, acc_ref):
    """Linear(18432,128) + ReLU + Linear(128,4), K-tiled over fc1's reduction dim.

    Grid axis 0 iterates K tiles; bf16 wfc1 tiles stream and overlap with compute.
    x_ref: (N, TK) bf16; w1_ref: (TK, 128) bf16; acc_ref: (N, 128) f32 scratch.
    """
    k = pl.program_id(0)

    @pl.when(k == 0)
    def _():
        acc_ref[...] = jnp.zeros_like(acc_ref)

    acc_ref[...] += jnp.dot(x_ref[...], w1_ref[...],
                            preferred_element_type=jnp.float32)

    @pl.when(k == pl.num_programs(0) - 1)
    def _():
        h = jnp.maximum(acc_ref[...] + b1_ref[...], 0.0)
        o_ref[...] = jnp.dot(h, w2_ref[...],
                             preferred_element_type=jnp.float32) + b2_ref[...]


# --------------------------- XLA-side patch construction (single fusion) ---------------------------

def _pool_phase_patches(x):
    """x: (N,H,W,C) bf16 -> (N, 4, Hp*Wp, 9C) bf16 patches grouped by 2x2 pool phase.

    Built with strided slices directly in phase order: one XLA fusion, one
    materialization of the (already bf16) patch tensor.
    """
    n, h, w, c = x.shape
    ho, wo = h - 2, w - 2
    assert ho % 2 == 0 and wo % 2 == 0, (ho, wo)   # fused-pool path needs even conv dims
    hp, wp = ho // 2, wo // 2
    cols = []
    for dh in range(3):
        for dw in range(3):
            phases = [
                x[:, ph + dh: ph + dh + 2 * (hp - 1) + 1: 2,
                     pw + dw: pw + dw + 2 * (wp - 1) + 1: 2, :]
                for ph in range(2) for pw in range(2)
            ]                                          # 4 x (N, Hp, Wp, C)
            cols.append(jnp.stack(phases, axis=1))     # (N, 4, Hp, Wp, C)
    p = jnp.concatenate(cols, axis=-1)                 # (N, 4, Hp, Wp, 9C)
    return p.reshape(n, 4, hp * wp, 9 * c), hp, wp


def _patches(x):
    """x: (N,H,W,C) bf16 -> lane-dense patches (N, Ho*Wo, 9C) bf16, pixels row-major."""
    n, h, w, c = x.shape
    ho, wo = h - 2, w - 2
    taps = [x[:, dh:dh + ho, dw:dw + wo, :] for dh in range(3) for dw in range(3)]
    p = jnp.concatenate(taps, axis=-1)                 # (N, Ho, Wo, 9C)
    return p.reshape(n, ho * wo, 9 * c), ho, wo


# --------------------------- wrappers (pallas_call) ---------------------------

def conv3x3_relu_pool(x_nhwc, w_flat, b):
    """Conv(3x3,valid)+ReLU+MaxPool(2).  Returns (N, Hp, Wp, Cout) bf16."""
    p, hp, wp = _pool_phase_patches(x_nhwc)
    n, _, pp, k9 = p.shape
    cout = w_flat.shape[-1]
    # Full-array block dims -> the (8,128) divisibility rule does not apply; Mosaic
    # pads K=27/288 internally (no XLA-side _pad_k copy needed).
    y = pl.pallas_call(
        conv_pool_kernel,
        out_shape=jax.ShapeDtypeStruct((n, pp, cout), jnp.bfloat16),
        grid=(n,),
        in_specs=[
            pl.BlockSpec((1, 4, pp, k9), lambda i: (i, 0, 0, 0)),
            pl.BlockSpec((k9, cout), lambda i: (0, 0)),
            pl.BlockSpec((1, cout), lambda i: (0, 0)),
        ],
        out_specs=pl.BlockSpec((1, pp, cout), lambda i: (i, 0, 0)),
        compiler_params=pltpu.CompilerParams(
            dimension_semantics=("parallel",),
            vmem_limit_bytes=VMEM_LIMIT),
    )(p, w_flat, b)
    return y.reshape(n, hp, wp, cout)


def conv3x3_relu(x_nhwc, w_flat, b):
    """Conv(3x3,valid)+ReLU.  Returns (N, Ho*Wo, Cout) bf16, pixels row-major."""
    p, ho, wo = _patches(x_nhwc)
    n, pp, k9 = p.shape
    cout = w_flat.shape[-1]
    return pl.pallas_call(
        conv_relu_kernel,
        out_shape=jax.ShapeDtypeStruct((n, pp, cout), jnp.bfloat16),
        grid=(n,),
        in_specs=[
            pl.BlockSpec((1, pp, k9), lambda i: (i, 0, 0)),
            pl.BlockSpec((k9, cout), lambda i: (0, 0)),
            pl.BlockSpec((1, cout), lambda i: (0, 0)),
        ],
        out_specs=pl.BlockSpec((1, pp, cout), lambda i: (i, 0, 0)),
        compiler_params=pltpu.CompilerParams(
            dimension_semantics=("parallel",),
            vmem_limit_bytes=VMEM_LIMIT),
    )(p, w_flat, b)


def mlp_head(x_flat, w1_bf16, b1, w2, b2, tk=4608):
    """Linear(18432,128)+ReLU+Linear(128,4).

    K-tiled with tk=4608 (kt=4): fat enough that per-step overhead is negligible and
    the bf16 wfc1 stream (1.2 MB/block x 2 buffers) pipelines against the MXU work.
    """
    n, d = x_flat.shape
    h = w1_bf16.shape[1]
    o = w2.shape[1]
    assert d % tk == 0, (d, tk)
    kt = d // tk
    return pl.pallas_call(
        mlp_kernel,
        out_shape=jax.ShapeDtypeStruct((n, o), jnp.float32),
        grid=(kt,),
        in_specs=[
            pl.BlockSpec((n, tk), lambda k: (0, k)),
            pl.BlockSpec((tk, h), lambda k: (k, 0)),
            pl.BlockSpec((1, h), lambda k: (0, 0)),
            pl.BlockSpec((h, o), lambda k: (0, 0)),
            pl.BlockSpec((1, o), lambda k: (0, 0)),
        ],
        out_specs=pl.BlockSpec((n, o), lambda k: (0, 0)),
        scratch_shapes=[pltpu.VMEM((n, h), jnp.float32)],
        compiler_params=pltpu.CompilerParams(
            dimension_semantics=("arbitrary",),
            vmem_limit_bytes=VMEM_LIMIT),
    )(x_flat, w1_bf16, b1, w2, b2)


def classifier_forward(x_nchw, params):
    # NCHW in (PyTorch), NHWC bf16 inside (channels on lanes).
    x = jnp.transpose(x_nchw, (0, 2, 3, 1)).astype(jnp.bfloat16)   # (N, 62, 62, 3)
    x = conv3x3_relu_pool(x, params["w1"], params["b1"])           # (N, 30, 30, 32)
    x = conv3x3_relu_pool(x, params["w2"], params["b2"])           # (N, 14, 14, 64)
    y = conv3x3_relu(x, params["w3"], params["b3"])                # (N, 144, 128)
    x_flat = y.reshape(y.shape[0], -1)                             # HWC flatten -> (N, 18432) bf16
    return mlp_head(x_flat, params["wfc1"], params["bfc1"],
                    params["wfc2"], params["bfc2"])                # (N, 4) f32


# --------------------------- deterministic synthetic params ---------------------------

def init_params(key):
    ks = jax.random.split(key, 10)

    def conv_w(k, cout, cin):
        # PyTorch conv weight (Cout, Cin, 3, 3) -> flattened (9*Cin, Cout) bf16,
        # row order (dh, dw, cin) to match the patch column order.
        w_pt = jax.random.normal(k, (cout, cin, 3, 3), jnp.float32) * 0.1
        return w_pt.transpose(2, 3, 1, 0).reshape(9 * cin, cout).astype(jnp.bfloat16)

    params = {}
    params["w1"] = conv_w(ks[0], 32, 3)
    params["b1"] = (jax.random.normal(ks[1], (32,), jnp.float32) * 0.1).reshape(1, 32)
    params["w2"] = conv_w(ks[2], 64, 32)
    params["b2"] = (jax.random.normal(ks[3], (64,), jnp.float32) * 0.1).reshape(1, 64)
    params["w3"] = conv_w(ks[4], 128, 64)
    params["b3"] = (jax.random.normal(ks[5], (128,), jnp.float32) * 0.1).reshape(1, 128)

    # fc1: PyTorch Linear(128*12*12, 128) acts on CHW-flattened input; permute its rows
    # so it acts identically on our HWC-flattened activations.  Stored bf16 (the wfc1
    # HBM read dominates the MLP stage; bf16 halves it and is MXU-native).
    wfc1_pt = jax.random.normal(ks[6], (128, 128, 12, 12), jnp.float32) * 0.01
    params["wfc1"] = (wfc1_pt.transpose(2, 3, 1, 0)
                      .reshape(12 * 12 * 128, 128).astype(jnp.bfloat16))
    params["bfc1"] = (jax.random.normal(ks[7], (128,), jnp.float32) * 0.1).reshape(1, 128)

    wfc2_pt = jax.random.normal(ks[8], (4, 128), jnp.float32) * 0.1
    params["wfc2"] = wfc2_pt.T
    params["bfc2"] = (jax.random.normal(ks[9], (4,), jnp.float32) * 0.1).reshape(1, 4)
    return params


# --------------------------- pure-JAX f32 reference (same weights, no Pallas) ---------------------------

def reference_forward(x_nchw, params):
    hi = jax.lax.Precision.HIGHEST
    x = jnp.transpose(x_nchw, (0, 2, 3, 1)).astype(jnp.float32)

    def conv(x, w_flat, b):
        n, h, w, cin = x.shape
        cout = w_flat.shape[-1]
        wt = w_flat.astype(jnp.float32).reshape(3, 3, cin, cout)
        ho, wo = h - 2, w - 2
        acc = jnp.zeros((n, ho, wo, cout), jnp.float32)
        for dh in range(3):
            for dw in range(3):
                acc = acc + jnp.einsum('nhwc,cd->nhwd',
                                       x[:, dh:dh + ho, dw:dw + wo, :],
                                       wt[dh, dw], precision=hi)
        return jnp.maximum(acc + b.reshape(1, 1, 1, -1), 0.0)

    def pool(x):
        n, h, w, c = x.shape
        return jnp.max(x.reshape(n, h // 2, 2, w // 2, 2, c), axis=(2, 4))

    x = pool(conv(x, params["w1"], params["b1"]))
    x = pool(conv(x, params["w2"], params["b2"]))
    x = conv(x, params["w3"], params["b3"])
    xf = x.reshape(x.shape[0], -1)
    w1 = params["wfc1"].astype(jnp.float32)
    h = jnp.maximum(jnp.dot(xf, w1, precision=hi) + params["bfc1"], 0.0)
    return jnp.dot(h, params["wfc2"], precision=hi) + params["bfc2"]


# --------------------------- main ---------------------------

if __name__ == "__main__":
    key = jax.random.PRNGKey(0)
    kx, kp = jax.random.split(key)
    params = init_params(kp)
    # Input spatial size 62x62 is fixed by the Linear(128*12*12, 128) layer.
    x = jax.random.normal(kx, (2, 3, 62, 62), jnp.float32)   # NCHW, like PyTorch

    out = jax.jit(classifier_forward)(x, params)
    out = jax.block_until_ready(out)

    assert out.shape == (2, 4), out.shape
    ref = reference_forward(x, params)
    # bf16 patches/activations/weights vs. an f32 reference -> slightly looser tolerance.
    if not bool(jnp.allclose(out, ref, rtol=3e-2, atol=3e-2)):
        raise AssertionError("Pallas output does not match JAX reference")
    print("KERNEL_OK")
</pallas_src>

<mosaic_0001>
module attributes {stable_mosaic.version = 11 : i64} {
  func.func @conv_pool_kernel(%arg0: i32, %arg1: memref<1x4x900x27xbf16, #tpu.memory_space<vmem>>, %arg2: memref<27x32xbf16, #tpu.memory_space<vmem>>, %arg3: memref<1x32xf32, #tpu.memory_space<vmem>>, %arg4: memref<1x900x32xbf16, #tpu.memory_space<vmem>>) attributes {dimension_semantics = [#tpu.dimension_semantics<parallel>], iteration_bounds = array<i64: 2>, scalar_prefetch = 0 : i64, scratch_operands = 0 : i64, tpu.core_type = #tpu.core_type<tc>, window_params = [{transform_indices = @transform_0, window_bounds = array<i64: 1, 4, 900, 27>}, {pipeline_mode = #tpu.pipeline_mode<synchronous>, transform_indices = @transform_1, window_bounds = array<i64: 27, 32>}, {pipeline_mode = #tpu.pipeline_mode<synchronous>, transform_indices = @transform_2, window_bounds = array<i64: 1, 32>}, {transform_indices = @transform_3, window_bounds = array<i64: 1, 900, 32>}]} {
    %c0 = arith.constant 0 : index
    %c0_0 = arith.constant 0 : index
    %0 = vector.load %arg2[%c0, %c0_0] : memref<27x32xbf16, #tpu.memory_space<vmem>>, vector<27x32xbf16>
    %c0_1 = arith.constant 0 : index
    %c0_2 = arith.constant 0 : index
    %c0_3 = arith.constant 0 : index
    %c0_4 = arith.constant 0 : index
    %1 = vector.load %arg1[%c0_1, %c0_2, %c0_3, %c0_4] : memref<1x4x900x27xbf16, #tpu.memory_space<vmem>>, vector<1x1x900x27xbf16>
    %2 = vector.shape_cast %1 : vector<1x1x900x27xbf16> to vector<900x27xbf16>
    %cst = arith.constant dense<0.000000e+00> : vector<900x32xf32>
    %3 = tpu.matmul %2, %0, %cst {dimension_numbers = #tpu.dot_dimension_numbers<[1], [0], [0], [1], [0, 0, 1, 1], [], []>} : vector<900x27xbf16>, vector<27x32xbf16>, vector<900x32xf32> -> vector<900x32xf32>
    %c0_5 = arith.constant 0 : index
    %c1 = arith.constant 1 : index
    %c0_6 = arith.constant 0 : index
    %c0_7 = arith.constant 0 : index
    %4 = vector.load %arg1[%c0_5, %c1, %c0_6, %c0_7] : memref<1x4x900x27xbf16, #tpu.memory_space<vmem>>, vector<1x1x900x27xbf16>
    %5 = vector.shape_cast %4 : vector<1x1x900x27xbf16> to vector<900x27xbf16>
    %cst_8 = arith.constant dense<0.000000e+00> : vector<900x32xf32>
    %6 = tpu.matmul %5, %0, %cst_8 {dimension_numbers = #tpu.dot_dimension_numbers<[1], [0], [0], [1], [0, 0, 1, 1], [], []>} : vector<900x27xbf16>, vector<27x32xbf16>, vector<900x32xf32> -> vector<900x32xf32>
    %c0_9 = arith.constant 0 : index
    %c2 = arith.constant 2 : index
    %c0_10 = arith.constant 0 : index
    %c0_11 = arith.constant 0 : index
    %7 = vector.load %arg1[%c0_9, %c2, %c0_10, %c0_11] : memref<1x4x900x27xbf16, #tpu.memory_space<vmem>>, vector<1x1x900x27xbf16>
    %8 = vector.shape_cast %7 : vector<1x1x900x27xbf16> to vector<900x27xbf16>
    %cst_12 = arith.constant dense<0.000000e+00> : vector<900x32xf32>
    %9 = tpu.matmul %8, %0, %cst_12 {dimension_numbers = #tpu.dot_dimension_numbers<[1], [0], [0], [1], [0, 0, 1, 1], [], []>} : vector<900x27xbf16>, vector<27x32xbf16>, vector<900x32xf32> -> vector<900x32xf32>
    %c0_13 = arith.constant 0 : index
    %c3 = arith.constant 3 : index
    %c0_14 = arith.constant 0 : index
    %c0_15 = arith.constant 0 : index
    %10 = vector.load %arg1[%c0_13, %c3, %c0_14, %c0_15] : memref<1x4x900x27xbf16, #tpu.memory_space<vmem>>, vector<1x1x900x27xbf16>
    %11 = vector.shape_cast %10 : vector<1x1x900x27xbf16> to vector<900x27xbf16>
    %cst_16 = arith.constant dense<0.000000e+00> : vector<900x32xf32>
    %12 = tpu.matmul %11, %0, %cst_16 {dimension_numbers = #tpu.dot_dimension_numbers<[1], [0], [0], [1], [0, 0, 1, 1], [], []>} : vector<900x27xbf16>, vector<27x32xbf16>, vector<900x32xf32> -> vector<900x32xf32>
    %13 = arith.maximumf %3, %6 : vector<900x32xf32>
    %14 = arith.maximumf %9, %12 : vector<900x32xf32>
    %15 = arith.maximumf %13, %14 : vector<900x32xf32>
    %c0_17 = arith.constant 0 : index
    %c0_18 = arith.constant 0 : index
    %16 = vector.load %arg3[%c0_17, %c0_18] : memref<1x32xf32, #tpu.memory_space<vmem>>, vector<1x32xf32>
    %17 = vector.broadcast %16 : vector<1x32xf32> to vector<900x32xf32>
    %18 = arith.addf %15, %17 : vector<900x32xf32>
    %cst_19 = arith.constant 0.000000e+00 : f32
    %19 = vector.broadcast %cst_19 : f32 to vector<900x32xf32>
    %20 = arith.maximumf %18, %19 : vector<900x32xf32>
    %21 = arith.truncf %20 : vector<900x32xf32> to vector<900x32xbf16>
    %c0_20 = arith.constant 0 : index
    %c0_21 = arith.constant 0 : index
    %c0_22 = arith.constant 0 : index
    %22 = vector.load %arg4[%c0_20, %c0_21, %c0_22] : memref<1x900x32xbf16, #tpu.memory_space<vmem>>, vector<1x900x32xbf16>
    %23 = vector.shape_cast %22 : vector<1x900x32xbf16> to vector<900x32xbf16>
    %24 = vector.shape_cast %21 : vector<900x32xbf16> to vector<1x900x32xbf16>
    tpu.vector_store %arg4[%c0_20, %c0_21, %c0_22], %24 {strides = array<i32>} : memref<1x900x32xbf16, #tpu.memory_space<vmem>>, vector<1x900x32xbf16>,
    return
  }
  func.func @transform_0(%arg0: i32) -> (i32, i32, i32, i32) {
    %c0_i32 = arith.constant 0 : i32
    %c0_i32_0 = arith.constant 0 : i32
    %c0_i32_1 = arith.constant 0 : i32
    %c0_i32_2 = arith.constant 0 : i32
    return %arg0, %c0_i32, %c0_i32_0, %c0_i32_1 : i32, i32, i32, i32
  }
  func.func @transform_1(%arg0: i32) -> (i32, i32) {
    %c0_i32 = arith.constant 0 : i32
    %c0_i32_0 = arith.constant 0 : i32
    %c0_i32_1 = arith.constant 0 : i32
    return %c0_i32, %c0_i32_0 : i32, i32
  }
  func.func @transform_2(%arg0: i32) -> (i32, i32) {
    %c0_i32 = arith.constant 0 : i32
    %c0_i32_0 = arith.constant 0 : i32
    %c0_i32_1 = arith.constant 0 : i32
    return %c0_i32, %c0_i32_0 : i32, i32
  }
  func.func @transform_3(%arg0: i32) -> (i32, i32, i32) {
    %c0_i32 = arith.constant 0 : i32
    %c0_i32_0 = arith.constant 0 : i32
    %c0_i32_1 = arith.constant 0 : i32
    return %arg0, %c0_i32, %c0_i32_0 : i32, i32, i32
  }
}

module attributes {stable_mosaic.version = 11 : i64} {
  func.func @conv_pool_kernel(%arg0: i32, %arg1: memref<1x4x196x288xbf16, #tpu.memory_space<vmem>>, %arg2: memref<288x64xbf16, #tpu.memory_space<vmem>>, %arg3: memref<1x64xf32, #tpu.memory_space<vmem>>, %arg4: memref<1x196x64xbf16, #tpu.memory_space<vmem>>) attributes {dimension_semantics = [#tpu.dimension_semantics<parallel>], iteration_bounds = array<i64: 2>, scalar_prefetch = 0 : i64, scratch_operands = 0 : i64, tpu.core_type = #tpu.core_type<tc>, window_params = [{transform_indices = @transform_0, window_bounds = array<i64: 1, 4, 196, 288>}, {pipeline_mode = #tpu.pipeline_mode<synchronous>, transform_indices = @transform_1, window_bounds = array<i64: 288, 64>}, {pipeline_mode = #tpu.pipeline_mode<synchronous>, transform_indices = @transform_2, window_bounds = array<i64: 1, 64>}, {transform_indices = @transform_3, window_bounds = array<i64: 1, 196, 64>}]} {
    %c0 = arith.constant 0 : index
    %c0_0 = arith.constant 0 : index
    %0 = vector.load %arg2[%c0, %c0_0] : memref<288x64xbf16, #tpu.memory_space<vmem>>, vector<288x64xbf16>
    %c0_1 = arith.constant 0 : index
    %c0_2 = arith.constant 0 : index
    %c0_3 = arith.constant 0 : index
    %c0_4 = arith.constant 0 : index
    %1 = vector.load %arg1[%c0_1, %c0_2, %c0_3, %c0_4] : memref<1x4x196x288xbf16, #tpu.memory_space<vmem>>, vector<1x1x196x288xbf16>
    %2 = vector.shape_cast %1 : vector<1x1x196x288xbf16> to vector<196x288xbf16>
    %cst = arith.constant dense<0.000000e+00> : vector<196x64xf32>
    %3 = tpu.matmul %2, %0, %cst {dimension_numbers = #tpu.dot_dimension_numbers<[1], [0], [0], [1], [0, 0, 1, 1], [], []>} : vector<196x288xbf16>, vector<288x64xbf16>, vector<196x64xf32> -> vector<196x64xf32>
    %c0_5 = arith.constant 0 : index
    %c1 = arith.constant 1 : index
    %c0_6 = arith.constant 0 : index
    %c0_7 = arith.constant 0 : index
    %4 = vector.load %arg1[%c0_5, %c1, %c0_6, %c0_7] : memref<1x4x196x288xbf16, #tpu.memory_space<vmem>>, vector<1x1x196x288xbf16>
    %5 = vector.shape_cast %4 : vector<1x1x196x288xbf16> to vector<196x288xbf16>
    %cst_8 = arith.constant dense<0.000000e+00> : vector<196x64xf32>
    %6 = tpu.matmul %5, %0, %cst_8 {dimension_numbers = #tpu.dot_dimension_numbers<[1], [0], [0], [1], [0, 0, 1, 1], [], []>} : vector<196x288xbf16>, vector<288x64xbf16>, vector<196x64xf32> -> vector<196x64xf32>
    %c0_9 = arith.constant 0 : index
    %c2 = arith.constant 2 : index
    %c0_10 = arith.constant 0 : index
    %c0_11 = arith.constant 0 : index
    %7 = vector.load %arg1[%c0_9, %c2, %c0_10, %c0_11] : memref<1x4x196x288xbf16, #tpu.memory_space<vmem>>, vector<1x1x196x288xbf16>
    %8 = vector.shape_cast %7 : vector<1x1x196x288xbf16> to vector<196x288xbf16>
    %cst_12 = arith.constant dense<0.000000e+00> : vector<196x64xf32>
    %9 = tpu.matmul %8, %0, %cst_12 {dimension_numbers = #tpu.dot_dimension_numbers<[1], [0], [0], [1], [0, 0, 1, 1], [], []>} : vector<196x288xbf16>, vector<288x64xbf16>, vector<196x64xf32> -> vector<196x64xf32>
    %c0_13 = arith.constant 0 : index
    %c3 = arith.constant 3 : index
    %c0_14 = arith.constant 0 : index
    %c0_15 = arith.constant 0 : index
    %10 = vector.load %arg1[%c0_13, %c3, %c0_14, %c0_15] : memref<1x4x196x288xbf16, #tpu.memory_space<vmem>>, vector<1x1x196x288xbf16>
    %11 = vector.shape_cast %10 : vector<1x1x196x288xbf16> to vector<196x288xbf16>
    %cst_16 = arith.constant dense<0.000000e+00> : vector<196x64xf32>
    %12 = tpu.matmul %11, %0, %cst_16 {dimension_numbers = #tpu.dot_dimension_numbers<[1], [0], [0], [1], [0, 0, 1, 1], [], []>} : vector<196x288xbf16>, vector<288x64xbf16>, vector<196x64xf32> -> vector<196x64xf32>
    %13 = arith.maximumf %3, %6 : vector<196x64xf32>
    %14 = arith.maximumf %9, %12 : vector<196x64xf32>
    %15 = arith.maximumf %13, %14 : vector<196x64xf32>
    %c0_17 = arith.constant 0 : index
    %c0_18 = arith.constant 0 : index
    %16 = vector.load %arg3[%c0_17, %c0_18] : memref<1x64xf32, #tpu.memory_space<vmem>>, vector<1x64xf32>
    %17 = vector.broadcast %16 : vector<1x64xf32> to vector<196x64xf32>
    %18 = arith.addf %15, %17 : vector<196x64xf32>
    %cst_19 = arith.constant 0.000000e+00 : f32
    %19 = vector.broadcast %cst_19 : f32 to vector<196x64xf32>
    %20 = arith.maximumf %18, %19 : vector<196x64xf32>
    %21 = arith.truncf %20 : vector<196x64xf32> to vector<196x64xbf16>
    %c0_20 = arith.constant 0 : index
    %c0_21 = arith.constant 0 : index
    %c0_22 = arith.constant 0 : index
    %22 = vector.load %arg4[%c0_20, %c0_21, %c0_22] : memref<1x196x64xbf16, #tpu.memory_space<vmem>>, vector<1x196x64xbf16>
    %23 = vector.shape_cast %22 : vector<1x196x64xbf16> to vector<196x64xbf16>
    %24 = vector.shape_cast %21 : vector<196x64xbf16> to vector<1x196x64xbf16>
    tpu.vector_store %arg4[%c0_20, %c0_21, %c0_22], %24 {strides = array<i32>} : memref<1x196x64xbf16, #tpu.memory_space<vmem>>, vector<1x196x64xbf16>,
    return
  }
  func.func @transform_0(%arg0: i32) -> (i32, i32, i32, i32) {
    %c0_i32 = arith.constant 0 : i32
    %c0_i32_0 = arith.constant 0 : i32
    %c0_i32_1 = arith.constant 0 : i32
    %c0_i32_2 = arith.constant 0 : i32
    return %arg0, %c0_i32, %c0_i32_0, %c0_i32_1 : i32, i32, i32, i32
  }
  func.func @transform_1(%arg0: i32) -> (i32, i32) {
    %c0_i32 = arith.constant 0 : i32
    %c0_i32_0 = arith.constant 0 : i32
    %c0_i32_1 = arith.constant 0 : i32
    return %c0_i32, %c0_i32_0 : i32, i32
  }
  func.func @transform_2(%arg0: i32) -> (i32, i32) {
    %c0_i32 = arith.constant 0 : i32
    %c0_i32_0 = arith.constant 0 : i32
    %c0_i32_1 = arith.constant 0 : i32
    return %c0_i32, %c0_i32_0 : i32, i32
  }
  func.func @transform_3(%arg0: i32) -> (i32, i32, i32) {
    %c0_i32 = arith.constant 0 : i32
    %c0_i32_0 = arith.constant 0 : i32
    %c0_i32_1 = arith.constant 0 : i32
    return %arg0, %c0_i32, %c0_i32_0 : i32, i32, i32
  }
}

module attributes {stable_mosaic.version = 11 : i64} {
  func.func @conv_relu_kernel(%arg0: i32, %arg1: memref<1x144x576xbf16, #tpu.memory_space<vmem>>, %arg2: memref<576x128xbf16, #tpu.memory_space<vmem>>, %arg3: memref<1x128xf32, #tpu.memory_space<vmem>>, %arg4: memref<1x144x128xbf16, #tpu.memory_space<vmem>>) attributes {dimension_semantics = [#tpu.dimension_semantics<parallel>], iteration_bounds = array<i64: 2>, scalar_prefetch = 0 : i64, scratch_operands = 0 : i64, tpu.core_type = #tpu.core_type<tc>, window_params = [{transform_indices = @transform_0, window_bounds = array<i64: 1, 144, 576>}, {pipeline_mode = #tpu.pipeline_mode<synchronous>, transform_indices = @transform_1, window_bounds = array<i64: 576, 128>}, {pipeline_mode = #tpu.pipeline_mode<synchronous>, transform_indices = @transform_2, window_bounds = array<i64: 1, 128>}, {transform_indices = @transform_3, window_bounds = array<i64: 1, 144, 128>}]} {
    %c0 = arith.constant 0 : index
    %c0_0 = arith.constant 0 : index
    %c0_1 = arith.constant 0 : index
    %0 = vector.load %arg1[%c0, %c0_0, %c0_1] : memref<1x144x576xbf16, #tpu.memory_space<vmem>>, vector<1x144x576xbf16>
    %1 = vector.shape_cast %0 : vector<1x144x576xbf16> to vector<144x576xbf16>
    %c0_2 = arith.constant 0 : index
    %c0_3 = arith.constant 0 : index
    %2 = vector.load %arg2[%c0_2, %c0_3] : memref<576x128xbf16, #tpu.memory_space<vmem>>, vector<576x128xbf16>
    %cst = arith.constant dense<0.000000e+00> : vector<144x128xf32>
    %3 = tpu.matmul %1, %2, %cst {dimension_numbers = #tpu.dot_dimension_numbers<[1], [0], [0], [1], [0, 0, 1, 1], [], []>} : vector<144x576xbf16>, vector<576x128xbf16>, vector<144x128xf32> -> vector<144x128xf32>
    %c0_4 = arith.constant 0 : index
    %c0_5 = arith.constant 0 : index
    %4 = vector.load %arg3[%c0_4, %c0_5] : memref<1x128xf32, #tpu.memory_space<vmem>>, vector<1x128xf32>
    %5 = vector.broadcast %4 : vector<1x128xf32> to vector<144x128xf32>
    %6 = arith.addf %3, %5 : vector<144x128xf32>
    %cst_6 = arith.constant 0.000000e+00 : f32
    %7 = vector.broadcast %cst_6 : f32 to vector<144x128xf32>
    %8 = arith.maximumf %6, %7 : vector<144x128xf32>
    %9 = arith.truncf %8 : vector<144x128xf32> to vector<144x128xbf16>
    %c0_7 = arith.constant 0 : index
    %c0_8 = arith.constant 0 : index
    %c0_9 = arith.constant 0 : index
    %10 = vector.load %arg4[%c0_7, %c0_8, %c0_9] : memref<1x144x128xbf16, #tpu.memory_space<vmem>>, vector<1x144x128xbf16>
    %11 = vector.shape_cast %10 : vector<1x144x128xbf16> to vector<144x128xbf16>
    %12 = vector.shape_cast %9 : vector<144x128xbf16> to vector<1x144x128xbf16>
    tpu.vector_store %arg4[%c0_7, %c0_8, %c0_9], %12 {strides = array<i32>} : memref<1x144x128xbf16, #tpu.memory_space<vmem>>, vector<1x144x128xbf16>,
    return
  }
  func.func @transform_0(%arg0: i32) -> (i32, i32, i32) {
    %c0_i32 = arith.constant 0 : i32
    %c0_i32_0 = arith.constant 0 : i32
    %c0_i32_1 = arith.constant 0 : i32
    return %arg0, %c0_i32, %c0_i32_0 : i32, i32, i32
  }
  func.func @transform_1(%arg0: i32) -> (i32, i32) {
    %c0_i32 = arith.constant 0 : i32
    %c0_i32_0 = arith.constant 0 : i32
    %c0_i32_1 = arith.constant 0 : i32
    return %c0_i32, %c0_i32_0 : i32, i32
  }
  func.func @transform_2(%arg0: i32) -> (i32, i32) {
    %c0_i32 = arith.constant 0 : i32
    %c0_i32_0 = arith.constant 0 : i32
    %c0_i32_1 = arith.constant 0 : i32
    return %c0_i32, %c0_i32_0 : i32, i32
  }
  func.func @transform_3(%arg0: i32) -> (i32, i32, i32) {
    %c0_i32 = arith.constant 0 : i32
    %c0_i32_0 = arith.constant 0 : i32
    %c0_i32_1 = arith.constant 0 : i32
    return %arg0, %c0_i32, %c0_i32_0 : i32, i32, i32
  }
}

module attributes {stable_mosaic.version = 11 : i64} {
  func.func @mlp_kernel(%arg0: i32, %arg1: memref<2x4608xbf16, #tpu.memory_space<vmem>>, %arg2: memref<4608x128xbf16, #tpu.memory_space<vmem>>, %arg3: memref<1x128xf32, #tpu.memory_space<vmem>>, %arg4: memref<128x4xf32, #tpu.memory_space<vmem>>, %arg5: memref<1x4xf32, #tpu.memory_space<vmem>>, %arg6: memref<2x4xf32, #tpu.memory_space<vmem>>, %arg7: memref<2x128xf32, #tpu.memory_space<vmem>>) attributes {dimension_semantics = [#tpu.dimension_semantics<arbitrary>], iteration_bounds = array<i64: 4>, scalar_prefetch = 0 : i64, scratch_operands = 1 : i64, tpu.core_type = #tpu.core_type<tc>, window_params = [{transform_indices = @transform_0, window_bounds = array<i64: 2, 4608>}, {transform_indices = @transform_1, window_bounds = array<i64: 4608, 128>}, {pipeline_mode = #tpu.pipeline_mode<synchronous>, transform_indices = @transform_2, window_bounds = array<i64: 1, 128>}, {pipeline_mode = #tpu.pipeline_mode<synchronous>, transform_indices = @transform_3, window_bounds = array<i64: 128, 4>}, {pipeline_mode = #tpu.pipeline_mode<synchronous>, transform_indices = @transform_4, window_bounds = array<i64: 1, 4>}, {pipeline_mode = #tpu.pipeline_mode<synchronous>, transform_indices = @transform_5, window_bounds = array<i64: 2, 4>}]} {
    %c0_i32 = arith.constant 0 : i32
    %0 = arith.cmpi eq, %arg0, %c0_i32 : i32
    %1 = arith.extui %0 : i1 to i32
    %c0_i32_0 = arith.constant 0 : i32
    %2 = arith.cmpi ne, %1, %c0_i32_0 : i32
    scf.if %2 {
      %cst_9 = arith.constant 0.000000e+00 : f32
      %12 = vector.broadcast %cst_9 : f32 to vector<2x128xf32>
      %c0_10 = arith.constant 0 : index
      %c0_11 = arith.constant 0 : index
      %13 = vector.load %arg7[%c0_10, %c0_11] : memref<2x128xf32, #tpu.memory_space<vmem>>, vector<2x128xf32>
      tpu.vector_store %arg7[%c0_10, %c0_11], %12 {strides = array<i32>} : memref<2x128xf32, #tpu.memory_space<vmem>>, vector<2x128xf32>,
    } else {
    }
    %c0 = arith.constant 0 : index
    %c0_1 = arith.constant 0 : index
    %3 = vector.load %arg7[%c0, %c0_1] : memref<2x128xf32, #tpu.memory_space<vmem>>, vector<2x128xf32>
    %c0_2 = arith.constant 0 : index
    %c0_3 = arith.constant 0 : index
    %4 = vector.load %arg1[%c0_2, %c0_3] : memref<2x4608xbf16, #tpu.memory_space<vmem>>, vector<2x4608xbf16>
    %c0_4 = arith.constant 0 : index
    %c0_5 = arith.constant 0 : index
    %5 = vector.load %arg2[%c0_4, %c0_5] : memref<4608x128xbf16, #tpu.memory_space<vmem>>, vector<4608x128xbf16>
    %cst = arith.constant dense<0.000000e+00> : vector<2x128xf32>
    %6 = tpu.matmul %4, %5, %cst {dimension_numbers = #tpu.dot_dimension_numbers<[1], [0], [0], [1], [0, 0, 1, 1], [], []>} : vector<2x4608xbf16>, vector<4608x128xbf16>, vector<2x128xf32> -> vector<2x128xf32>
    %7 = arith.addf %3, %6 : vector<2x128xf32>
    %c0_6 = arith.constant 0 : index
    %c0_7 = arith.constant 0 : index
    %8 = vector.load %arg7[%c0_6, %c0_7] : memref<2x128xf32, #tpu.memory_space<vmem>>, vector<2x128xf32>
    tpu.vector_store %arg7[%c0_6, %c0_7], %7 {strides = array<i32>} : memref<2x128xf32, #tpu.memory_space<vmem>>, vector<2x128xf32>,
    %c3_i32 = arith.constant 3 : i32
    %9 = arith.cmpi eq, %arg0, %c3_i32 : i32
    %10 = arith.extui %9 : i1 to i32
    %c0_i32_8 = arith.constant 0 : i32
    %11 = arith.cmpi ne, %10, %c0_i32_8 : i32
    scf.if %11 {
      %c0_9 = arith.constant 0 : index
      %c0_10 = arith.constant 0 : index
      %12 = vector.load %arg7[%c0_9, %c0_10] : memref<2x128xf32, #tpu.memory_space<vmem>>, vector<2x128xf32>
      %c0_11 = arith.constant 0 : index
      %c0_12 = arith.constant 0 : index
      %13 = vector.load %arg3[%c0_11, %c0_12] : memref<1x128xf32, #tpu.memory_space<vmem>>, vector<1x128xf32>
      %14 = vector.broadcast %13 : vector<1x128xf32> to vector<2x128xf32>
      %15 = arith.addf %12, %14 : vector<2x128xf32>
      %cst_13 = arith.constant 0.000000e+00 : f32
      %16 = vector.broadcast %cst_13 : f32 to vector<2x128xf32>
      %17 = arith.maximumf %15, %16 : vector<2x128xf32>
      %c0_14 = arith.constant 0 : index
      %c0_15 = arith.constant 0 : index
      %18 = vector.load %arg4[%c0_14, %c0_15] : memref<128x4xf32, #tpu.memory_space<vmem>>, vector<128x4xf32>
      %cst_16 = arith.constant dense<0.000000e+00> : vector<2x4xf32>
      %19 = tpu.matmul %17, %18, %cst_16 {dimension_numbers = #tpu.dot_dimension_numbers<[1], [0], [0], [1], [0, 0, 1, 1], [], []>} : vector<2x128xf32>, vector<128x4xf32>, vector<2x4xf32> -> vector<2x4xf32>
      %c0_17 = arith.constant 0 : index
      %c0_18 = arith.constant 0 : index
      %20 = vector.load %arg5[%c0_17, %c0_18] : memref<1x4xf32, #tpu.memory_space<vmem>>, vector<1x4xf32>
      %21 = vector.broadcast %20 : vector<1x4xf32> to vector<2x4xf32>
      %22 = arith.addf %19, %21 : vector<2x4xf32>
      %c0_19 = arith.constant 0 : index
      %c0_20 = arith.constant 0 : index
      %23 = vector.load %arg6[%c0_19, %c0_20] : memref<2x4xf32, #tpu.memory_space<vmem>>, vector<2x4xf32>
      tpu.vector_store %arg6[%c0_19, %c0_20], %22 {strides = array<i32>} : memref<2x4xf32, #tpu.memory_space<vmem>>, vector<2x4xf32>,
    } else {
    }
    return
  }
  func.func @transform_0(%arg0: i32) -> (i32, i32) {
    %c0_i32 = arith.constant 0 : i32
    %c0_i32_0 = arith.constant 0 : i32
    return %c0_i32, %arg0 : i32, i32
  }
  func.func @transform_1(%arg0: i32) -> (i32, i32) {
    %c0_i32 = arith.constant 0 : i32
    %c0_i32_0 = arith.constant 0 : i32
    return %arg0, %c0_i32 : i32, i32
  }
  func.func @transform_2(%arg0: i32) -> (i32, i32) {
    %c0_i32 = arith.constant 0 : i32
    %c0_i32_0 = arith.constant 0 : i32
    %c0_i32_1 = arith.constant 0 : i32
    return %c0_i32, %c0_i32_0 : i32, i32
  }
  func.func @transform_3(%arg0: i32) -> (i32, i32) {
    %c0_i32 = arith.constant 0 : i32
    %c0_i32_0 = arith.constant 0 : i32
    %c0_i32_1 = arith.constant 0 : i32
    return %c0_i32, %c0_i32_0 : i32, i32
  }
  func.func @transform_4(%arg0: i32) -> (i32, i32) {
    %c0_i32 = arith.constant 0 : i32
    %c0_i32_0 = arith.constant 0 : i32
    %c0_i32_1 = arith.constant 0 : i32
    return %c0_i32, %c0_i32_0 : i32, i32
  }
  func.func @transform_5(%arg0: i32) -> (i32, i32) {
    %c0_i32 = arith.constant 0 : i32
    %c0_i32_0 = arith.constant 0 : i32
    %c0_i32_1 = arith.constant 0 : i32
    return %c0_i32, %c0_i32_0 : i32, i32
  }
}

</mosaic_0001>

<bundles_post_ra>
// kernel: classifier_forward.4
= control target key start
LH: loop header
LB: loop body
LE: loop exit
PB: predicated region body
PF: predicated region fallthrough
CT: control target
= control target key end

     0   :  { %s8086_s12 = smov 0   ;;  %s10407_s0 = inlined_call_operand.vmem [shape: bf16[2,4,900,27], index: 0, kind: input, shape index: {}]   ;;  %s10408_s1 = inlined_call_operand.vmem [shape: bf16[27,32], index: 1, kind: input, shape index: {}]   ;;  %s10409_s2 = inlined_call_operand.vmem [shape: f32[1,32], index: 2, kind: input, shape index: {}]   ;;  %s10410_s3 = inlined_call_operand.vmem [shape: bf16[2,900,32], index: 3, kind: output, shape index: {}]  }
   0x1 LB: > { %s5613_s13 = sadd.s32 4294967295, %s8061_s12   ;;  %p5617_p0 = scmp.ge.s32.totalorder %s8061_s12, 1  ;;  %s8061_s12 = sphi %s8086_s12, %s13_s12  }
   0x2   : > { %p137_p1 = scmp.lt.s32.totalorder %s8061_s12, 3 }
   0x4   : > { %p138_p2 = pnand %p5617_p0, %p137_p1 }
   0x6   : > { %141 = sbr.rel (%p138_p2) target bundleno = 1149 (0x47d), region = 32 }
   0xd   : > { %v7823_v0 = vld [vmem:[%s10408_s1] sm:$0xff]   ;;  %v10411_v1 = vmov 0.0   ;;  %v7824_v2 = vld [vmem:[%s10408_s1 + $0x8] sm:$0x3f]   ;;  %vm755_vm0 = vcmask 1044480   ;;  %vm756_vm1 = vcmask 1045504  }
   0xe   : > { %6882 = vmatprep.subr.bf16.mxu0 %v10411_v1  ;;  %7114 = vmatprep.subr.bf16.mxu1 %v10411_v1  ;;  %p161_p3 = scmp.lt.s32.totalorder %s5613_s13, 1  ;;  %v8064_v3 = vmov 65535   ;;  %vm8065_vm2 = vmmov 0   ;;  %vm583_vm3 = vcmask 220160   ;;  %vm5443_vm4 = vcmask 257024  }
   0xf   : > { %6883 = vmatpush3.bf16.msra.mxu0 %v7823_v0  ;;  %7115 = vmatpush3.bf16.msra.mxu1 %v7823_v0  ;;  %v757_v4 = vsel %vm755_vm0, 4294967295, %v8064_v3  ;;  %vm5556_vm5 = vcmask 254976  }
  0x10   : > { %6884 = vmatprep.subr.bf16.mxu0 %v10411_v1  ;;  %7116 = vmatprep.subr.bf16.mxu1 %v10411_v1  ;;  %v758_v5 = vsel %vm756_vm1, %v757_v4, 0  ;;  %s11062_s13 = smov (!%p161_p3, %s5613_s13), 1 }
  0x11   : > { %6886 = vmatprep.mubr.msk.bf16.mxu0 %vm8065_vm2, %v10411_v1  ;;  %7118 = vmatprep.mubr.msk.bf16.mxu1 %vm8065_vm2, %v10411_v1  ;;  %v760_v6 = vand.u32 %v7824_v2, %v758_v5  ;;  %s7810_s18 = smul.u32 1808, %s11062_s13 }
  0x12   : > { %s7811_s24 = smul.u32 452, %s11062_s13 }
  0x13   : > { %6885 = vmatpush3.bf16.msra.mxu0 %v760_v6  ;;  %7117 = vmatpush3.bf16.msra.mxu1 %v760_v6  ;;  %s8114_s21 = scalar_lea.vmem %s10407_s0, %s7810_s18 }
  0x14   : > { %7346 = vmatprep.subr.bf16.mxu0 %v10411_v1  ;;  %7578 = vmatprep.subr.bf16.mxu1 %v10411_v1  ;;  %v7825_v7 = vld [vmem:[%s8114_s21] sm:$0xff]   ;;  %v7827_v9 = vld [vmem:[%s8114_s21 + $0x8] sm:$0xff]   ;;  %v7829_v11 = vld [vmem:[%s8114_s21 + $0x10] sm:$0xff]   ;;  %s9495_s27 = scalar_lea.vmem %s10410_s3, %s7811_s24 }
  0x15   : > { %v7826_v8 = vld [vmem:[%s8114_s21 + $0x1c4] sm:$0xff]   ;;  %v7828_v10 = vld [vmem:[%s8114_s21 + $0x1cc] sm:$0xff]   ;;  %v7830_v12 = vld [vmem:[%s8114_s21 + $0x1d4] sm:$0xff]  }
  0x16   : > { %6887 = vmatmul.mubr.msk.bf16.vlgmr.msra.gmra.mrb[0].mxu0 %vm583_vm3, %v7825_v7  ;;  %7119 = vmatmul.mubr.msk.bf16.vlgmr.msra.gmra.mrb[0].mxu1 %vm583_vm3, %v7826_v8  ;;  %v7831_v13 = vld [vmem:[%s8114_s21 + $0x18] sm:$0xff]   ;;  %v7833_v15 = vld [vmem:[%s8114_s21 + $0x20] sm:$0xff]   ;;  %v7835_v17 = vld [vmem:[%s8114_s21 + $0x28] sm:$0xff]  }
  0x17   : > { %7347 = vmatpush3.bf16.msra.mxu0 %v7823_v0  ;;  %7579 = vmatpush3.bf16.msra.mxu1 %v7823_v0  ;;  %v7832_v14 = vld [vmem:[%s8114_s21 + $0x1dc] sm:$0xff]   ;;  %v7834_v16 = vld [vmem:[%s8114_s21 + $0x1e4] sm:$0xff]   ;;  %v7836_v18 = vld [vmem:[%s8114_s21 + $0x1ec] sm:$0xff]  }
  0x18   : > { %6890 = vmatprep.mubr.msk.bf16.mxu0 %vm8065_vm2, %v10411_v1  ;;  %7122 = vmatprep.mubr.msk.bf16.mxu1 %vm8065_vm2, %v10411_v1  ;;  %v7837_v19 = vld [vmem:[%s8114_s21 + $0x30] sm:$0xff]   ;;  %v7839_v21 = vld [vmem:[%s8114_s21 + $0x38] sm:$0xff]   ;;  %v7841_v23 = vld [vmem:[%s8114_s21 + $0x40] sm:$0xff]  }
  0x19   : > { %7348 = vmatprep.subr.bf16.mxu0 %v10411_v1  ;;  %7580 = vmatprep.subr.bf16.mxu1 %v10411_v1  ;;  %v7838_v20 = vld [vmem:[%s8114_s21 + $0x1f4] sm:$0xff]   ;;  %v7840_v22 = vld [vmem:[%s8114_s21 + $0x1fc] sm:$0xff]   ;;  %v7842_v24 = vld [vmem:[%s8114_s21 + $0x204] sm:$0xff]  }
  0x1a   : > { %v7843_v25 = vld [vmem:[%s8114_s21 + $0x48] sm:$0xff]   ;;  %v7845_v27 = vld [vmem:[%s8114_s21 + $0x50] sm:$0xff]   ;;  %v7847_v29 = vld [vmem:[%s8114_s21 + $0x58] sm:$0xff]  }
  0x1b   : > { %7349 = vmatpush3.bf16.msra.mxu0 %v760_v6  ;;  %7581 = vmatpush3.bf16.msra.mxu1 %v760_v6  ;;  %v7844_v26 = vld [vmem:[%s8114_s21 + $0x20c] sm:$0xff]   ;;  %v7846_v28 = vld [vmem:[%s8114_s21 + $0x214] sm:$0xff]   ;;  %v7848_v30 = vld [vmem:[%s8114_s21 + $0x21c] sm:$0xff]  }
  0x1c   : > { %v7849_v31 = vld [vmem:[%s8114_s21 + $0x60] sm:$0xff]   ;;  %v7851_v33 = vld [vmem:[%s8114_s21 + $0x68] sm:$0xff]   ;;  %v7853_v35 = vld [vmem:[%s8114_s21 + $0x70] sm:$0xff]  }
  0x1d   : > { %v7850_v32 = vld [vmem:[%s8114_s21 + $0x224] sm:$0xff]   ;;  %v7852_v34 = vld [vmem:[%s8114_s21 + $0x22c] sm:$0xff]   ;;  %v7854_v36 = vld [vmem:[%s8114_s21 + $0x234] sm:$0xff]  }
  0x1e   : > { %6891 = vmatmul.mubr.msk.bf16.gmra.mrb[4].mxu0 %vm583_vm3, %v7827_v9  ;;  %7123 = vmatmul.mubr.msk.bf16.gmra.mrb[4].mxu1 %vm583_vm3, %v7828_v10  ;;  %v7855_v37 = vld [vmem:[%s8114_s21 + $0x78] sm:$0xff]   ;;  %v7857_v39 = vld [vmem:[%s8114_s21 + $0x80] sm:$0xff]   ;;  %v7859_v41 = vld [vmem:[%s8114_s21 + $0x88] sm:$0xff]  }
  0x1f   : > { %6894 = vmatprep.mubr.msk.bf16.mxu0 %vm8065_vm2, %v10411_v1  ;;  %7126 = vmatprep.mubr.msk.bf16.mxu1 %vm8065_vm2, %v10411_v1  ;;  %v7856_v38 = vld [vmem:[%s8114_s21 + $0x23c] sm:$0xff]   ;;  %v7858_v40 = vld [vmem:[%s8114_s21 + $0x244] sm:$0xff]   ;;  %v7860_v42 = vld [vmem:[%s8114_s21 + $0x24c] sm:$0xff]  }
  0x20   : > { %v7861_v43 = vld [vmem:[%s8114_s21 + $0x90] sm:$0xff]   ;;  %v7863_v45 = vld [vmem:[%s8114_s21 + $0x98] sm:$0xff]   ;;  %v7865_v47 = vld [vmem:[%s8114_s21 + $0xa0] sm:$0xff]  }
  0x21   : > { %v7862_v44 = vld [vmem:[%s8114_s21 + $0x254] sm:$0xff]   ;;  %v7864_v46 = vld [vmem:[%s8114_s21 + $0x25c] sm:$0xff]   ;;  %v7866_v48 = vld [vmem:[%s8114_s21 + $0x264] sm:$0xff]  }
  0x22   : > { %v7867_v49 = vld [vmem:[%s8114_s21 + $0xa8] sm:$0xff]   ;;  %v7869_v51 = vld [vmem:[%s8114_s21 + $0xb0] sm:$0xff]   ;;  %v7871_v53 = vld [vmem:[%s8114_s21 + $0xb8] sm:$0xff]  }
  0x23   : > { %v7868_v50 = vld [vmem:[%s8114_s21 + $0x26c] sm:$0xff]   ;;  %v7870_v52 = vld [vmem:[%s8114_s21 + $0x274] sm:$0xff]   ;;  %v7872_v54 = vld [vmem:[%s8114_s21 + $0x27c] sm:$0xff]  }
  0x24   : > { %v7873_v55 = vld [vmem:[%s8114_s21 + $0xc0] sm:$0xff]   ;;  %v7875_v57 = vld [vmem:[%s8114_s21 + $0xc8] sm:$0xff]   ;;  %v7877_v59 = vld [vmem:[%s8114_s21 + $0xd0] sm:$0xff]  }
  0x25   : > { %v7874_v56 = vld [vmem:[%s8114_s21 + $0x284] sm:$0xff]   ;;  %v7876_v58 = vld [vmem:[%s8114_s21 + $0x28c] sm:$0xff]   ;;  %v7878_v60 = vld [vmem:[%s8114_s21 + $0x294] sm:$0xff]  }
  0x26   : > { %6895 = vmatmul.mubr.msk.bf16.gmra.mrb[8].mxu0 %vm583_vm3, %v7829_v11  ;;  %7127 = vmatmul.mubr.msk.bf16.gmra.mrb[8].mxu1 %vm583_vm3, %v7830_v12  ;;  %v7879_v0 = vld [vmem:[%s8114_s21 + $0xd8] sm:$0xff]  }
  0x27   : > { %6898 = vmatprep.mubr.msk.bf16.mxu0 %vm8065_vm2, %v10411_v1  ;;  %7130 = vmatprep.mubr.msk.bf16.mxu1 %vm8065_vm2, %v10411_v1  ;;  %v7880_v5 = vld [vmem:[%s8114_s21 + $0x29c] sm:$0xff]  }
  0x2e   : > { %6899 = vmatmul.mubr.msk.bf16.gmra.mrb[12].mxu0 %vm583_vm3, %v7831_v13  ;;  %7131 = vmatmul.mubr.msk.bf16.gmra.mrb[12].mxu1 %vm583_vm3, %v7832_v14  ;;  %v7881_v13 = vld [vmem:[%s8114_s21 + $0xe0] sm:$0xff]  }
  0x2f   : > { %6902 = vmatprep.mubr.msk.bf16.mxu0 %vm8065_vm2, %v10411_v1  ;;  %7134 = vmatprep.mubr.msk.bf16.mxu1 %vm8065_vm2, %v10411_v1 }
  0x36   : > { %6903 = vmatmul.mubr.msk.bf16.gmra.mrb[16].mxu0 %vm583_vm3, %v7833_v15  ;;  %7135 = vmatmul.mubr.msk.bf16.gmra.mrb[16].mxu1 %vm583_vm3, %v7834_v16 }
  0x37   : > { %6906 = vmatprep.mubr.msk.bf16.mxu0 %vm8065_vm2, %v10411_v1  ;;  %7138 = vmatprep.mubr.msk.bf16.mxu1 %vm8065_vm2, %v10411_v1 }
  0x3e   : > { %6907 = vmatmul.mubr.msk.bf16.gmra.mrb[20].mxu0 %vm583_vm3, %v7835_v17  ;;  %7139 = vmatmul.mubr.msk.bf16.gmra.mrb[20].mxu1 %vm583_vm3, %v7836_v18  ;;  %v7882_v17 = vld [vmem:[%s8114_s21 + $0x2a4] sm:$0xff]  }
  0x3f   : > { %6910 = vmatprep.mubr.msk.bf16.mxu0 %vm8065_vm2, %v10411_v1  ;;  %7142 = vmatprep.mubr.msk.bf16.mxu1 %vm8065_vm2, %v10411_v1 }
  0x46   : > { %6911 = vmatmul.mubr.msk.bf16.gmra.mrb[24].mxu0 %vm583_vm3, %v7837_v19  ;;  %7143 = vmatmul.mubr.msk.bf16.gmra.mrb[24].mxu1 %vm583_vm3, %v7838_v20 }
  0x47   : > { %6914 = vmatprep.mubr.msk.bf16.mxu0 %vm8065_vm2, %v10411_v1  ;;  %7146 = vmatprep.mubr.msk.bf16.mxu1 %vm8065_vm2, %v10411_v1 }
  0x4e   : > { %6915 = vmatmul.mubr.msk.bf16.gmra.mrb[28].mxu0 %vm583_vm3, %v7839_v21  ;;  %7147 = vmatmul.mubr.msk.bf16.gmra.mrb[28].mxu1 %vm583_vm3, %v7840_v22 }
  0x4f   : > { %6918 = vmatprep.mubr.msk.bf16.mxu0 %vm8065_vm2, %v10411_v1  ;;  %7150 = vmatprep.mubr.msk.bf16.mxu1 %vm8065_vm2, %v10411_v1 }
  0x56   : > { %6919 = vmatmul.mubr.msk.bf16.gmra.mrb[32].mxu0 %vm583_vm3, %v7841_v23  ;;  %7151 = vmatmul.mubr.msk.bf16.gmra.mrb[32].mxu1 %vm583_vm3, %v7842_v24 }
  0x57   : > { %6922 = vmatprep.mubr.msk.bf16.mxu0 %vm8065_vm2, %v10411_v1  ;;  %7154 = vmatprep.mubr.msk.bf16.mxu1 %vm8065_vm2, %v10411_v1 }
  0x5e   : > { %6923 = vmatmul.mubr.msk.bf16.gmra.mrb[36].mxu0 %vm583_vm3, %v7843_v25  ;;  %7155 = vmatmul.mubr.msk.bf16.gmra.mrb[36].mxu1 %vm583_vm3, %v7844_v26  ;;  %v7883_v25 = vld [vmem:[%s8114_s21 + $0xe8] sm:$0xff]  }
  0x5f   : > { %6926 = vmatprep.mubr.msk.bf16.mxu0 %vm8065_vm2, %v10411_v1  ;;  %7158 = vmatprep.mubr.msk.bf16.mxu1 %vm8065_vm2, %v10411_v1 }
  0x66   : > { %6927 = vmatmul.mubr.msk.bf16.gmra.mrb[40].mxu0 %vm583_vm3, %v7845_v27  ;;  %7159 = vmatmul.mubr.msk.bf16.gmra.mrb[40].mxu1 %vm583_vm3, %v7846_v28 }
  0x67   : > { %6930 = vmatprep.mubr.msk.bf16.mxu0 %vm8065_vm2, %v10411_v1  ;;  %7162 = vmatprep.mubr.msk.bf16.mxu1 %vm8065_vm2, %v10411_v1 }
  0x6e   : > { %6931 = vmatmul.mubr.msk.bf16.gmra.mrb[44].mxu0 %vm583_vm3, %v7847_v29  ;;  %7163 = vmatmul.mubr.msk.bf16.gmra.mrb[44].mxu1 %vm583_vm3, %v7848_v30  ;;  %v7884_v29 = vld [vmem:[%s8114_s21 + $0x2ac] sm:$0xff]  }
  0x6f   : > { %6934 = vmatprep.mubr.msk.bf16.mxu0 %vm8065_vm2, %v10411_v1  ;;  %7166 = vmatprep.mubr.msk.bf16.mxu1 %vm8065_vm2, %v10411_v1 }
  0x76   : > { %6935 = vmatmul.mubr.msk.bf16.gmra.mrb[48].mxu0 %vm583_vm3, %v7849_v31  ;;  %7167 = vmatmul.mubr.msk.bf16.gmra.mrb[48].mxu1 %vm583_vm3, %v7850_v32 }
  0x77   : > { %6938 = vmatprep.mubr.msk.bf16.mxu0 %vm8065_vm2, %v10411_v1  ;;  %7170 = vmatprep.mubr.msk.bf16.mxu1 %vm8065_vm2, %v10411_v1 }
  0x7e   : > { %6939 = vmatmul.mubr.msk.bf16.gmra.mrb[52].mxu0 %vm583_vm3, %v7851_v33  ;;  %7171 = vmatmul.mubr.msk.bf16.gmra.mrb[52].mxu1 %vm583_vm3, %v7852_v34 }
  0x7f   : > { %6942 = vmatprep.mubr.msk.bf16.mxu0 %vm8065_vm2, %v10411_v1  ;;  %7174 = vmatprep.mubr.msk.bf16.mxu1 %vm8065_vm2, %v10411_v1 }
  0x86   : > { %6943 = vmatmul.mubr.msk.bf16.gmra.mrb[56].mxu0 %vm583_vm3, %v7853_v35  ;;  %7175 = vmatmul.mubr.msk.bf16.gmra.mrb[56].mxu1 %vm583_vm3, %v7854_v36 }
  0x87   : > { %6946 = vmatprep.mubr.msk.bf16.mxu0 %vm8065_vm2, %v10411_v1  ;;  %7178 = vmatprep.mubr.msk.bf16.mxu1 %vm8065_vm2, %v10411_v1 }
  0x8e   : > { %6947 = vmatmul.mubr.msk.bf16.gmra.mrb[60].mxu0 %vm583_vm3, %v7855_v37  ;;  %7179 = vmatmul.mubr.msk.bf16.gmra.mrb[60].mxu1 %vm583_vm3, %v7856_v38  ;;  %v7885_v37 = vld [vmem:[%s8114_s21 + $0xf0] sm:$0xff]  }
  0x8f   : > { %6950 = vmatprep.mubr.msk.bf16.mxu0 %vm8065_vm2, %v10411_v1  ;;  %7182 = vmatprep.mubr.msk.bf16.mxu1 %vm8065_vm2, %v10411_v1 }
  0x96   : > { %6951 = vmatmul.mubr.msk.bf16.gmra.mrb[64].mxu0 %vm583_vm3, %v7857_v39  ;;  %7183 = vmatmul.mubr.msk.bf16.gmra.mrb[64].mxu1 %vm583_vm3, %v7858_v40 }
  0x97   : > { %6954 = vmatprep.mubr.msk.bf16.mxu0 %vm8065_vm2, %v10411_v1  ;;  %7186 = vmatprep.mubr.msk.bf16.mxu1 %vm8065_vm2, %v10411_v1 }
  0x9e   : > { %6955 = vmatmul.mubr.msk.bf16.gmra.mrb[68].mxu0 %vm583_vm3, %v7859_v41  ;;  %7187 = vmatmul.mubr.msk.bf16.gmra.mrb[68].mxu1 %vm583_vm3, %v7860_v42  ;;  %v7886_v41 = vld [vmem:[%s8114_s21 + $0x2b4] sm:$0xff]  }
  0x9f   : > { %6958 = vmatprep.mubr.msk.bf16.mxu0 %vm8065_vm2, %v10411_v1  ;;  %7190 = vmatprep.mubr.msk.bf16.mxu1 %vm8065_vm2, %v10411_v1 }
  0xa6   : > { %6959 = vmatmul.mubr.msk.bf16.gmra.mrb[72].mxu0 %vm583_vm3, %v7861_v43  ;;  %7191 = vmatmul.mubr.msk.bf16.gmra.mrb[72].mxu1 %vm583_vm3, %v7862_v44 }
  0xa7   : > { %6962 = vmatprep.mubr.msk.bf16.mxu0 %vm8065_vm2, %v10411_v1  ;;  %7194 = vmatprep.mubr.msk.bf16.mxu1 %vm8065_vm2, %v10411_v1 }
  0xae   : > { %6963 = vmatmul.mubr.msk.bf16.gmra.mrb[76].mxu0 %vm583_vm3, %v7863_v45  ;;  %7195 = vmatmul.mubr.msk.bf16.gmra.mrb[76].mxu1 %vm583_vm3, %v7864_v46 }
  0xaf   : > { %6966 = vmatprep.mubr.msk.bf16.mxu0 %vm8065_vm2, %v10411_v1  ;;  %7198 = vmatprep.mubr.msk.bf16.mxu1 %vm8065_vm2, %v10411_v1 }
  0xb6   : > { %6967 = vmatmul.mubr.msk.bf16.gmra.mrb[80].mxu0 %vm583_vm3, %v7865_v47  ;;  %7199 = vmatmul.mubr.msk.bf16.gmra.mrb[80].mxu1 %vm583_vm3, %v7866_v48 }
  0xb7   : > { %6970 = vmatprep.mubr.msk.bf16.mxu0 %vm8065_vm2, %v10411_v1  ;;  %7202 = vmatprep.mubr.msk.bf16.mxu1 %vm8065_vm2, %v10411_v1 }
  0xbe   : > { %6971 = vmatmul.mubr.msk.bf16.gmra.mrb[84].mxu0 %vm583_vm3, %v7867_v49  ;;  %7203 = vmatmul.mubr.msk.bf16.gmra.mrb[84].mxu1 %vm583_vm3, %v7868_v50  ;;  %v7887_v49 = vld [vmem:[%s8114_s21 + $0xf8] sm:$0xff]  }
  0xbf   : > { %6974 = vmatprep.mubr.msk.bf16.mxu0 %vm8065_vm2, %v10411_v1  ;;  %7206 = vmatprep.mubr.msk.bf16.mxu1 %vm8065_vm2, %v10411_v1 }
  0xc6   : > { %6975 = vmatmul.mubr.msk.bf16.gmra.mrb[88].mxu0 %vm583_vm3, %v7869_v51  ;;  %7207 = vmatmul.mubr.msk.bf16.gmra.mrb[88].mxu1 %vm583_vm3, %v7870_v52 }
  0xc7   : > { %6978 = vmatprep.mubr.msk.bf16.mxu0 %vm8065_vm2, %v10411_v1  ;;  %7210 = vmatprep.mubr.msk.bf16.mxu1 %vm8065_vm2, %v10411_v1 }
  0xce   : > { %6979 = vmatmul.mubr.msk.bf16.gmra.mrb[92].mxu0 %vm583_vm3, %v7871_v53  ;;  %7211 = vmatmul.mubr.msk.bf16.gmra.mrb[92].mxu1 %vm583_vm3, %v7872_v54  ;;  %v7888_v53 = vld [vmem:[%s8114_s21 + $0x2bc] sm:$0xff]  }
  0xcf   : > { %6982 = vmatprep.mubr.msk.bf16.mxu0 %vm8065_vm2, %v10411_v1  ;;  %7214 = vmatprep.mubr.msk.bf16.mxu1 %vm8065_vm2, %v10411_v1 }
  0xd6   : > { %6983 = vmatmul.mubr.msk.bf16.gmra.mrb[96].mxu0 %vm583_vm3, %v7873_v55  ;;  %7215 = vmatmul.mubr.msk.bf16.gmra.mrb[96].mxu1 %vm583_vm3, %v7874_v56 }
  0xd7   : > { %6986 = vmatprep.mubr.msk.bf16.mxu0 %vm8065_vm2, %v10411_v1  ;;  %7218 = vmatprep.mubr.msk.bf16.mxu1 %vm8065_vm2, %v10411_v1 }
  0xde   : > { %6987 = vmatmul.mubr.msk.bf16.gmra.mrb[100].mxu0 %vm583_vm3, %v7875_v57  ;;  %7219 = vmatmul.mubr.msk.bf16.gmra.mrb[100].mxu1 %vm583_vm3, %v7876_v58 }
  0xdf   : > { %6990 = vmatprep.mubr.msk.bf16.mxu0 %vm8065_vm2, %v10411_v1  ;;  %7222 = vmatprep.mubr.msk.bf16.mxu1 %vm8065_vm2, %v10411_v1 }
  0xe6   : > { %6991 = vmatmul.mubr.msk.bf16.gmra.mrb[104].mxu0 %vm583_vm3, %v7877_v59  ;;  %7223 = vmatmul.mubr.msk.bf16.gmra.mrb[104].mxu1 %vm583_vm3, %v7878_v60 }
  0xe7   : > { %6994 = vmatprep.mubr.msk.bf16.mxu0 %vm8065_vm2, %v10411_v1  ;;  %7226 = vmatprep.mubr.msk.bf16.mxu1 %vm8065_vm2, %v10411_v1 }
  0xe9   : > { %v8336_v61 = vpop.f32.mrb[0].mxu0  ;;  %v8338_v62 = vpop.f32.mrb[0].mxu1 }
  0xea   : > { %v6888_v63 = vpop.f32.mrb[1].mxu0  ;;  %v7120_v3 = vpop.f32.mrb[1].mxu1 }
  0xeb   : > { %v8343_v4 = vpop.f32.mrb[2].mxu0  ;;  %v8346_v6 = vpop.f32.mrb[2].mxu1  ;;  %v7889_v63 = vld [vmem:[%s8114_s21 + $0x100] sm:$0xff]  }
  0xec   : > { %v6889_v7 = vpop.f32.mrb[3].mxu0  ;;  %v7121_v9 = vpop.f32.mrb[3].mxu1 }
  0xed   : > { %v7890_v7 = vld [vmem:[%s8114_s21 + $0x2c4] sm:$0xff]  }
  0xee   : > { %6995 = vmatmul.mubr.msk.bf16.gmra.mrb[108].mxu0 %vm583_vm3, %v7879_v0  ;;  %7227 = vmatmul.mubr.msk.bf16.gmra.mrb[108].mxu1 %vm583_vm3, %v7880_v5 }
  0xef   : > { %6998 = vmatprep.mubr.msk.bf16.mxu0 %vm8065_vm2, %v10411_v1  ;;  %7230 = vmatprep.mubr.msk.bf16.mxu1 %vm8065_vm2, %v10411_v1 }
  0xf1   : > { %v8356_v10 = vpop.f32.mrb[4].mxu0  ;;  %v8358_v11 = vpop.f32.mrb[4].mxu1 }
  0xf2   : > { %v6892_v12 = vpop.f32.mrb[5].mxu0  ;;  %v7124_v15 = vpop.f32.mrb[5].mxu1 }
  0xf3   : > { %v8363_v16 = vpop.f32.mrb[6].mxu0  ;;  %v8366_v18 = vpop.f32.mrb[6].mxu1 }
  0xf4   : > { %v6893_v19 = vpop.f32.mrb[7].mxu0  ;;  %v7125_v21 = vpop.f32.mrb[7].mxu1 }
  0xf6   : > { %6999 = vmatmul.mubr.msk.bf16.gmra.mrb[112].mxu0 %vm583_vm3, %v7881_v13  ;;  %7231 = vmatmul.mubr.msk.bf16.gmra.mrb[112].mxu1 %vm583_vm3, %v7882_v17 }
  0xf7   : > { %7002 = vmatprep.mubr.msk.bf16.mxu0 %vm8065_vm2, %v10411_v1  ;;  %7234 = vmatprep.mubr.msk.bf16.mxu1 %vm8065_vm2, %v10411_v1 }
  0xf9   : > { %v8376_v22 = vpop.f32.mrb[8].mxu0  ;;  %v8378_v23 = vpop.f32.mrb[8].mxu1 }
  0xfa   : > { %v6896_v24 = vpop.f32.mrb[9].mxu0  ;;  %v7128_v27 = vpop.f32.mrb[9].mxu1 }
  0xfb   : > { %v8383_v28 = vpop.f32.mrb[10].mxu0  ;;  %v8386_v30 = vpop.f32.mrb[10].mxu1  ;;  %v7891_v24 = vld [vmem:[%s8114_s21 + $0x108] sm:$0xff]  }
  0xfc   : > { %v6897_v31 = vpop.f32.mrb[11].mxu0  ;;  %v7129_v33 = vpop.f32.mrb[11].mxu1 }
  0xfd   : > { %v7892_v31 = vld [vmem:[%s8114_s21 + $0x2cc] sm:$0xff]  }
  0xfe   : > { %7003 = vmatmul.mubr.msk.bf16.gmra.mrb[116].mxu0 %vm583_vm3, %v7883_v25  ;;  %7235 = vmatmul.mubr.msk.bf16.gmra.mrb[116].mxu1 %vm583_vm3, %v7884_v29 }
  0xff   : > { %7006 = vmatprep.mubr.msk.bf16.mxu0 %vm8065_vm2, %v10411_v1  ;;  %7238 = vmatprep.mubr.msk.bf16.mxu1 %vm8065_vm2, %v10411_v1 }
 0x101   : > { %v8396_v34 = vpop.f32.mrb[12].mxu0  ;;  %v8398_v35 = vpop.f32.mrb[12].mxu1 }
 0x102   : > { %v6900_v36 = vpop.f32.mrb[13].mxu0  ;;  %v7132_v39 = vpop.f32.mrb[13].mxu1 }
 0x103   : > { %v8403_v40 = vpop.f32.mrb[14].mxu0  ;;  %v8406_v42 = vpop.f32.mrb[14].mxu1 }
 0x104   : > { %v6901_v43 = vpop.f32.mrb[15].mxu0  ;;  %v7133_v45 = vpop.f32.mrb[15].mxu1 }
 0x106   : > { %7007 = vmatmul.mubr.msk.bf16.gmra.mrb[120].mxu0 %vm583_vm3, %v7885_v37  ;;  %7239 = vmatmul.mubr.msk.bf16.gmra.mrb[120].mxu1 %vm583_vm3, %v7886_v41 }
 0x107   : > { %7010 = vmatprep.mubr.msk.bf16.mxu0 %vm8065_vm2, %v10411_v1  ;;  %7242 = vmatprep.mubr.msk.bf16.mxu1 %vm8065_vm2, %v10411_v1 }
 0x109   : > { %v8416_v46 = vpop.f32.mrb[16].mxu0  ;;  %v8418_v47 = vpop.f32.mrb[16].mxu1 }
 0x10a   : > { %v6904_v48 = vpop.f32.mrb[17].mxu0  ;;  %v7136_v51 = vpop.f32.mrb[17].mxu1 }
 0x10b   : > { %v8423_v52 = vpop.f32.mrb[18].mxu0  ;;  %v8426_v54 = vpop.f32.mrb[18].mxu1  ;;  %v7893_v48 = vld [vmem:[%s8114_s21 + $0x110] sm:$0xff]  }
 0x10c   : > { %v6905_v55 = vpop.f32.mrb[19].mxu0  ;;  %v7137_v57 = vpop.f32.mrb[19].mxu1 }
 0x10d   : > { %v7894_v55 = vld [vmem:[%s8114_s21 + $0x2d4] sm:$0xff]  }
 0x10e   : > { %7011 = vmatmul.mubr.msk.bf16.gmra.mrb[124].mxu0 %vm583_vm3, %v7887_v49  ;;  %7243 = vmatmul.mubr.msk.bf16.gmra.mrb[124].mxu1 %vm583_vm3, %v7888_v53 }
 0x10f   : > { %7014 = vmatprep.mubr.msk.bf16.mxu0 %vm8065_vm2, %v10411_v1  ;;  %7246 = vmatprep.mubr.msk.bf16.mxu1 %vm8065_vm2, %v10411_v1 }
 0x111   : > { %v8436_v58 = vpop.f32.mrb[20].mxu0  ;;  %v8438_v59 = vpop.f32.mrb[20].mxu1 }
 0x112   : > { %v6908_v60 = vpop.f32.mrb[21].mxu0  ;;  %v7140_v3 = vpop.f32.mrb[21].mxu1 }
 0x113   : > { %v8443_v5 = vpop.f32.mrb[22].mxu0  ;;  %v8446_v9 = vpop.f32.mrb[22].mxu1 }
 0x114   : > { %v6909_v12 = vpop.f32.mrb[23].mxu0  ;;  %v7141_v15 = vpop.f32.mrb[23].mxu1 }
 0x116   : > { %7015 = vmatmul.mubr.msk.bf16.gmra.mrb[128].mxu0 %vm583_vm3, %v7889_v63  ;;  %7247 = vmatmul.mubr.msk.bf16.gmra.mrb[128].mxu1 %vm583_vm3, %v7890_v7 }
 0x117   : > { %7018 = vmatprep.mubr.msk.bf16.mxu0 %vm8065_vm2, %v10411_v1  ;;  %7250 = vmatprep.mubr.msk.bf16.mxu1 %vm8065_vm2, %v10411_v1 }
 0x119   : > { %v8456_v17 = vpop.f32.mrb[24].mxu0  ;;  %v8458_v19 = vpop.f32.mrb[24].mxu1 }
 0x11a   : > { %v6912_v21 = vpop.f32.mrb[25].mxu0  ;;  %v7144_v27 = vpop.f32.mrb[25].mxu1 }
 0x11b   : > { %v8463_v29 = vpop.f32.mrb[26].mxu0  ;;  %v8466_v33 = vpop.f32.mrb[26].mxu1  ;;  %v7895_v21 = vld [vmem:[%s8114_s21 + $0x118] sm:$0xff]  }
 0x11c   : > { %v6913_v36 = vpop.f32.mrb[27].mxu0  ;;  %v7145_v39 = vpop.f32.mrb[27].mxu1 }
 0x11d   : > { %v7896_v36 = vld [vmem:[%s8114_s21 + $0x2dc] sm:$0xff]  }
 0x11e   : > { %7019 = vmatmul.mubr.msk.bf16.gmra.mrb[132].mxu0 %vm583_vm3, %v7891_v24  ;;  %7251 = vmatmul.mubr.msk.bf16.gmra.mrb[132].mxu1 %vm583_vm3, %v7892_v31 }
 0x11f   : > { %7022 = vmatprep.mubr.msk.bf16.mxu0 %vm8065_vm2, %v10411_v1  ;;  %7254 = vmatprep.mubr.msk.bf16.mxu1 %vm8065_vm2, %v10411_v1 }
 0x121   : > { %v8476_v41 = vpop.f32.mrb[28].mxu0  ;;  %v8478_v43 = vpop.f32.mrb[28].mxu1 }
 0x122   : > { %v6916_v45 = vpop.f32.mrb[29].mxu0  ;;  %v7148_v51 = vpop.f32.mrb[29].mxu1 }
 0x123   : > { %v8483_v53 = vpop.f32.mrb[30].mxu0  ;;  %v8486_v57 = vpop.f32.mrb[30].mxu1 }
 0x124   : > { %v6917_v60 = vpop.f32.mrb[31].mxu0  ;;  %v7149_v3 = vpop.f32.mrb[31].mxu1 }
 0x126   : > { %7023 = vmatmul.mubr.msk.bf16.gmra.mrb[136].mxu0 %vm583_vm3, %v7893_v48  ;;  %7255 = vmatmul.mubr.msk.bf16.gmra.mrb[136].mxu1 %vm583_vm3, %v7894_v55 }
 0x127   : > { %7026 = vmatprep.mubr.msk.bf16.mxu0 %vm8065_vm2, %v10411_v1  ;;  %7258 = vmatprep.mubr.msk.bf16.mxu1 %vm8065_vm2, %v10411_v1 }
 0x129   : > { %v8496_v7 = vpop.f32.mrb[32].mxu0  ;;  %v8498_v12 = vpop.f32.mrb[32].mxu1 }
 0x12a   : > { %v6920_v15 = vpop.f32.mrb[33].mxu0  ;;  %v7152_v27 = vpop.f32.mrb[33].mxu1 }
 0x12b   : > { %v8503_v31 = vpop.f32.mrb[34].mxu0  ;;  %v8506_v39 = vpop.f32.mrb[34].mxu1  ;;  %v7897_v15 = vld [vmem:[%s8114_s21 + $0x120] sm:$0xff]  }
 0x12c   : > { %v6921_v45 = vpop.f32.mrb[35].mxu0  ;;  %v7153_v51 = vpop.f32.mrb[35].mxu1 }
 0x12e   : > { %7027 = vmatmul.mubr.msk.bf16.gmra.mrb[140].mxu0 %vm583_vm3, %v7895_v21  ;;  %7259 = vmatmul.mubr.msk.bf16.gmra.mrb[140].mxu1 %vm583_vm3, %v7896_v36  ;;  %v7898_v36 = vld [vmem:[%s8114_s21 + $0x2e4] sm:$0xff]  }
 0x12f   : > { %7030 = vmatprep.mubr.msk.bf16.mxu0 %vm8065_vm2, %v10411_v1  ;;  %7262 = vmatprep.mubr.msk.bf16.mxu1 %vm8065_vm2, %v10411_v1 }
 0x131   : > { %v8516_v55 = vpop.f32.mrb[36].mxu0  ;;  %v8518_v60 = vpop.f32.mrb[36].mxu1 }
 0x132   : > { %v6924_v3 = vpop.f32.mrb[37].mxu0  ;;  %v7156_v45 = vpop.f32.mrb[37].mxu1 }
 0x133   : > { %v8523_v21 = vpop.f32.mrb[38].mxu0  ;;  %v8526_v51 = vpop.f32.mrb[38].mxu1 }
 0x134   : > { %v6925_v48 = vpop.f32.mrb[39].mxu0  ;;  %v7157_v63 = vpop.f32.mrb[39].mxu1 }
 0x135   : > { %v7899_v48 = vld [vmem:[%s8114_s21 + $0x128] sm:$0xff]  }
 0x136   : > { %7031 = vmatmul.mubr.msk.bf16.gmra.mrb[144].mxu0 %vm583_vm3, %v7897_v15  ;;  %7263 = vmatmul.mubr.msk.bf16.gmra.mrb[144].mxu1 %vm583_vm3, %v7898_v36  ;;  %v7900_v36 = vld [vmem:[%s8114_s21 + $0x2ec] sm:$0xff]  }
 0x137   : > { %7034 = vmatprep.mubr.msk.bf16.mxu0 %vm8065_vm2, %v10411_v1  ;;  %7266 = vmatprep.mubr.msk.bf16.mxu1 %vm8065_vm2, %v10411_v1 }
 0x139   : > { %v8536_v3 = vpop.f32.mrb[40].mxu0  ;;  %v8538_v45 = vpop.f32.mrb[40].mxu1 }
 0x13a   : > { %v6928_v27 = vpop.f32.mrb[41].mxu0  ;;  %v7160_v24 = vpop.f32.mrb[41].mxu1 }
 0x13b   : > { %v8543_v15 = vpop.f32.mrb[42].mxu0  ;;  %v8546_v49 = vpop.f32.mrb[42].mxu1 }
 0x13c   : > { %v6929_v37 = vpop.f32.mrb[43].mxu0  ;;  %v7161_v13 = vpop.f32.mrb[43].mxu1 }
 0x13d   : > { %v7901_v37 = vld [vmem:[%s8114_s21 + $0x130] sm:$0xff]  }
 0x13e   : > { %7035 = vmatmul.mubr.msk.bf16.gmra.mrb[148].mxu0 %vm583_vm3, %v7899_v48  ;;  %7267 = vmatmul.mubr.msk.bf16.gmra.mrb[148].mxu1 %vm583_vm3, %v7900_v36  ;;  %v7902_v36 = vld [vmem:[%s8114_s21 + $0x2f4] sm:$0xff]  }
 0x13f   : > { %7038 = vmatprep.mubr.msk.bf16.mxu0 %vm8065_vm2, %v10411_v1  ;;  %7270 = vmatprep.mubr.msk.bf16.mxu1 %vm8065_vm2, %v10411_v1 }
 0x141   : > { %v8556_v24 = vpop.f32.mrb[44].mxu0  ;;  %v8558_v27 = vpop.f32.mrb[44].mxu1 }
 0x142   : > { %v6932_v63 = vpop.f32.mrb[45].mxu0  ;;  %v7164_v25 = vpop.f32.mrb[45].mxu1 }
 0x143   : > { %v8563_v48 = vpop.f32.mrb[46].mxu0  ;;  %v8566_v0 = vpop.f32.mrb[46].mxu1 }
 0x144   : > { %v6933_v56 = vpop.f32.mrb[47].mxu0  ;;  %v7165_v44 = vpop.f32.mrb[47].mxu1 }
 0x145   : > { %v7903_v56 = vld [vmem:[%s8114_s21 + $0x138] sm:$0xff]  }
 0x146   : > { %7039 = vmatmul.mubr.msk.bf16.gmra.mrb[152].mxu0 %vm583_vm3, %v7901_v37  ;;  %7271 = vmatmul.mubr.msk.bf16.gmra.mrb[152].mxu1 %vm583_vm3, %v7902_v36  ;;  %v7904_v36 = vld [vmem:[%s8114_s21 + $0x2fc] sm:$0xff]  }
 0x147   : > { %7042 = vmatprep.mubr.msk.bf16.mxu0 %vm8065_vm2, %v10411_v1  ;;  %7274 = vmatprep.mubr.msk.bf16.mxu1 %vm8065_vm2, %v10411_v1 }
 0x149   : > { %v8576_v25 = vpop.f32.mrb[48].mxu0  ;;  %v8578_v63 = vpop.f32.mrb[48].mxu1 }
 0x14a   : > { %10591 = vst [vmem:[#allocation2_spill] sm:$0xff] %v8576_v25  ;;  %10592 = vst [vmem:[#allocation3_spill] sm:$0xff] %v8578_v63  ;;  %v6936_v13 = vpop.f32.mrb[49].mxu0  ;;  %v7168_v50 = vpop.f32.mrb[49].mxu1 }
 0x14b   : > { %v8583_v37 = vpop.f32.mrb[50].mxu0  ;;  %v8586_v38 = vpop.f32.mrb[50].mxu1 }
 0x14c   : > { %10593 = vst [vmem:[#allocation4_spill] sm:$0xff] %v8583_v37  ;;  %10594 = vst [vmem:[#allocation5_spill] sm:$0xff] %v8586_v38  ;;  %v6937_v32 = vpop.f32.mrb[51].mxu0  ;;  %v7169_v20 = vpop.f32.mrb[51].mxu1 }
 0x14d   : > { %v7905_v32 = vld [vmem:[%s8114_s21 + $0x140] sm:$0xff]  }
 0x14e   : > { %7043 = vmatmul.mubr.msk.bf16.gmra.mrb[156].mxu0 %vm583_vm3, %v7903_v56  ;;  %7275 = vmatmul.mubr.msk.bf16.gmra.mrb[156].mxu1 %vm583_vm3, %v7904_v36  ;;  %v7906_v36 = vld [vmem:[%s8114_s21 + $0x304] sm:$0xff]  }
 0x14f   : > { %7046 = vmatprep.mubr.msk.bf16.mxu0 %vm8065_vm2, %v10411_v1  ;;  %7278 = vmatprep.mubr.msk.bf16.mxu1 %vm8065_vm2, %v10411_v1 }
 0x151   : > { %v8596_v50 = vpop.f32.mrb[52].mxu0  ;;  %v8598_v13 = vpop.f32.mrb[52].mxu1 }
 0x152   : > { %10595 = vst [vmem:[#allocation6_spill] sm:$0xff] %v8596_v50  ;;  %10596 = vst [vmem:[#allocation7_spill] sm:$0xff] %v8598_v13  ;;  %v6940_v44 = vpop.f32.mrb[53].mxu0  ;;  %v7172_v26 = vpop.f32.mrb[53].mxu1 }
 0x153   : > { %v8603_v56 = vpop.f32.mrb[54].mxu0  ;;  %v8606_v14 = vpop.f32.mrb[54].mxu1  ;;  %v10599_v44 = vmov 0.0  }
 0x154   : > { %10597 = vst [vmem:[#allocation8_spill] sm:$0xff] %v8603_v56  ;;  %10598 = vst [vmem:[#allocation9_spill] sm:$0xff] %v8606_v14  ;;  %v6941_v8 = vpop.f32.mrb[55].mxu0  ;;  %v7173_v1 = vpop.f32.mrb[55].mxu1 }
 0x155   : > { %v7907_v8 = vld [vmem:[%s8114_s21 + $0x148] sm:$0xff]  }
 0x156   : > { %7047 = vmatmul.mubr.msk.bf16.gmra.mrb[160].mxu0 %vm583_vm3, %v7905_v32  ;;  %7279 = vmatmul.mubr.msk.bf16.gmra.mrb[160].mxu1 %vm583_vm3, %v7906_v36  ;;  %v7908_v36 = vld [vmem:[%s8114_s21 + $0x30c] sm:$0xff]  }
 0x157   : > { %7050 = vmatprep.mubr.msk.bf16.mxu0 %vm8065_vm2, %v10599_v44  ;;  %7282 = vmatprep.mubr.msk.bf16.mxu1 %vm8065_vm2, %v10599_v44 }
 0x159   : > { %v8616_v26 = vpop.f32.mrb[56].mxu0  ;;  %v8618_v20 = vpop.f32.mrb[56].mxu1 }
 0x15a   : > { %10600 = vst [vmem:[#allocation10_spill] sm:$0xff] %v8616_v26  ;;  %10601 = vst [vmem:[#allocation11_spill] sm:$0xff] %v8618_v20  ;;  %v6944_v13 = vpop.f32.mrb[57].mxu0  ;;  %v7176_v2 = vpop.f32.mrb[57].mxu1 }
 0x15b   : > { %v8623_v32 = vpop.f32.mrb[58].mxu0  ;;  %v8626_v14 = vpop.f32.mrb[58].mxu1 }
 0x15c   : > { %10602 = vst [vmem:[#allocation12_spill] sm:$0xff] %v8623_v32  ;;  %10603 = vst [vmem:[#allocation13_spill] sm:$0xff] %v8626_v14  ;;  %v6945_v56 = vpop.f32.mrb[59].mxu0  ;;  %v7177_v38 = vpop.f32.mrb[59].mxu1 }
 0x15d   : > { %v7909_v56 = vld [vmem:[%s8114_s21 + $0x150] sm:$0xff]  }
 0x15e   : > { %7051 = vmatmul.mubr.msk.bf16.gmra.mrb[164].mxu0 %vm583_vm3, %v7907_v8  ;;  %7283 = vmatmul.mubr.msk.bf16.gmra.mrb[164].mxu1 %vm583_vm3, %v7908_v36  ;;  %v7910_v36 = vld [vmem:[%s8114_s21 + $0x314] sm:$0xff]  }
 0x15f   : > { %7054 = vmatprep.mubr.msk.bf16.mxu0 %vm8065_vm2, %v10599_v44  ;;  %7286 = vmatprep.mubr.msk.bf16.mxu1 %vm8065_vm2, %v10599_v44 }
 0x161   : > { %v8636_v2 = vpop.f32.mrb[60].mxu0  ;;  %v8638_v13 = vpop.f32.mrb[60].mxu1 }
 0x162   : > { %10604 = vst [vmem:[#allocation14_spill] sm:$0xff] %v8636_v2  ;;  %10605 = vst [vmem:[#allocation15_spill] sm:$0xff] %v8638_v13  ;;  %v6948_v1 = vpop.f32.mrb[61].mxu0  ;;  %v7180_v50 = vpop.f32.mrb[61].mxu1 }
 0x163   : > { %v8643_v8 = vpop.f32.mrb[62].mxu0  ;;  %v8646_v14 = vpop.f32.mrb[62].mxu1 }
 0x164   : > { %10606 = vst [vmem:[#allocation16_spill] sm:$0xff] %v8643_v8  ;;  %10607 = vst [vmem:[#allocation17_spill] sm:$0xff] %v8646_v14  ;;  %v6949_v32 = vpop.f32.mrb[63].mxu0  ;;  %v7181_v26 = vpop.f32.mrb[63].mxu1 }
 0x165   : > { %v7911_v32 = vld [vmem:[%s8114_s21 + $0x158] sm:$0xff]  }
 0x166   : > { %7055 = vmatmul.mubr.msk.bf16.gmra.mrb[168].mxu0 %vm583_vm3, %v7909_v56  ;;  %7287 = vmatmul.mubr.msk.bf16.gmra.mrb[168].mxu1 %vm583_vm3, %v7910_v36  ;;  %v7912_v36 = vld [vmem:[%s8114_s21 + $0x31c] sm:$0xff]  }
 0x167   : > { %7058 = vmatprep.mubr.msk.bf16.mxu0 %vm8065_vm2, %v10599_v44  ;;  %7290 = vmatprep.mubr.msk.bf16.mxu1 %vm8065_vm2, %v10599_v44 }
 0x169   : > { %v8656_v50 = vpop.f32.mrb[64].mxu0  ;;  %v8658_v1 = vpop.f32.mrb[64].mxu1 }
 0x16a   : > { %10608 = vst [vmem:[#allocation18_spill] sm:$0xff] %v8656_v50  ;;  %10609 = vst [vmem:[#allocation19_spill] sm:$0xff] %v8658_v1  ;;  %v6952_v38 = vpop.f32.mrb[65].mxu0  ;;  %v7184_v20 = vpop.f32.mrb[65].mxu1 }
 0x16b   : > { %v8663_v56 = vpop.f32.mrb[66].mxu0  ;;  %v8666_v14 = vpop.f32.mrb[66].mxu1 }
 0x16c   : > { %10610 = vst [vmem:[#allocation20_spill] sm:$0xff] %v8663_v56  ;;  %10611 = vst [vmem:[#allocation21_spill] sm:$0xff] %v8666_v14  ;;  %v6953_v8 = vpop.f32.mrb[67].mxu0  ;;  %v7185_v2 = vpop.f32.mrb[67].mxu1 }
 0x16d   : > { %v7913_v8 = vld [vmem:[%s8114_s21 + $0x160] sm:$0xff]  }
 0x16e   : > { %7059 = vmatmul.mubr.msk.bf16.gmra.mrb[172].mxu0 %vm583_vm3, %v7911_v32  ;;  %7291 = vmatmul.mubr.msk.bf16.gmra.mrb[172].mxu1 %vm583_vm3, %v7912_v36  ;;  %v7914_v36 = vld [vmem:[%s8114_s21 + $0x324] sm:$0xff]  }
 0x16f   : > { %7062 = vmatprep.mubr.msk.bf16.mxu0 %vm8065_vm2, %v10599_v44  ;;  %7294 = vmatprep.mubr.msk.bf16.mxu1 %vm8065_vm2, %v10599_v44 }
 0x171   : > { %v8676_v20 = vpop.f32.mrb[68].mxu0  ;;  %v8678_v38 = vpop.f32.mrb[68].mxu1 }
 0x172   : > { %10612 = vst [vmem:[#allocation22_spill] sm:$0xff] %v8676_v20  ;;  %10613 = vst [vmem:[#allocation23_spill] sm:$0xff] %v8678_v38  ;;  %v6956_v26 = vpop.f32.mrb[69].mxu0  ;;  %v7188_v13 = vpop.f32.mrb[69].mxu1 }
 0x173   : > { %v8683_v32 = vpop.f32.mrb[70].mxu0  ;;  %v8686_v14 = vpop.f32.mrb[70].mxu1 }
 0x174   : > { %10614 = vst [vmem:[#allocation24_spill] sm:$0xff] %v8683_v32  ;;  %10615 = vst [vmem:[#allocation25_spill] sm:$0xff] %v8686_v14  ;;  %v6957_v56 = vpop.f32.mrb[71].mxu0  ;;  %v7189_v50 = vpop.f32.mrb[71].mxu1 }
 0x175   : > { %v7915_v56 = vld [vmem:[%s8114_s21 + $0x168] sm:$0xff]  }
 0x176   : > { %7063 = vmatmul.mubr.msk.bf16.gmra.mrb[176].mxu0 %vm583_vm3, %v7913_v8  ;;  %7295 = vmatmul.mubr.msk.bf16.gmra.mrb[176].mxu1 %vm583_vm3, %v7914_v36  ;;  %v7916_v36 = vld [vmem:[%s8114_s21 + $0x32c] sm:$0xff]  }
 0x177   : > { %7066 = vmatprep.mubr.msk.bf16.mxu0 %vm8065_vm2, %v10599_v44  ;;  %7298 = vmatprep.mubr.msk.bf16.mxu1 %vm8065_vm2, %v10599_v44 }
 0x179   : > { %v8696_v13 = vpop.f32.mrb[72].mxu0  ;;  %v8698_v26 = vpop.f32.mrb[72].mxu1 }
 0x17a   : > { %10616 = vst [vmem:[#allocation26_spill] sm:$0xff] %v8696_v13  ;;  %10617 = vst [vmem:[#allocation27_spill] sm:$0xff] %v8698_v26  ;;  %v6960_v2 = vpop.f32.mrb[73].mxu0  ;;  %v7192_v1 = vpop.f32.mrb[73].mxu1 }
 0x17b   : > { %v8703_v8 = vpop.f32.mrb[74].mxu0  ;;  %v8706_v14 = vpop.f32.mrb[74].mxu1 }
 0x17c   : > { %10618 = vst [vmem:[#allocation28_spill] sm:$0xff] %v8703_v8  ;;  %10619 = vst [vmem:[#allocation29_spill] sm:$0xff] %v8706_v14  ;;  %v6961_v32 = vpop.f32.mrb[75].mxu0  ;;  %v7193_v20 = vpop.f32.mrb[75].mxu1 }
 0x17d   : > { %v7917_v32 = vld [vmem:[%s8114_s21 + $0x170] sm:$0xff]  }
 0x17e   : > { %7067 = vmatmul.mubr.msk.bf16.gmra.mrb[180].mxu0 %vm583_vm3, %v7915_v56  ;;  %7299 = vmatmul.mubr.msk.bf16.gmra.mrb[180].mxu1 %vm583_vm3, %v7916_v36  ;;  %v7918_v36 = vld [vmem:[%s8114_s21 + $0x334] sm:$0xff]  }
 0x17f   : > { %7070 = vmatprep.mubr.msk.bf16.mxu0 %vm8065_vm2, %v10599_v44  ;;  %7302 = vmatprep.mubr.msk.bf16.mxu1 %vm8065_vm2, %v10599_v44 }
 0x181   : > { %v8716_v1 = vpop.f32.mrb[76].mxu0  ;;  %v8718_v2 = vpop.f32.mrb[76].mxu1 }
 0x182   : > { %10620 = vst [vmem:[#allocation30_spill] sm:$0xff] %v8716_v1  ;;  %10621 = vst [vmem:[#allocation31_spill] sm:$0xff] %v8718_v2  ;;  %v6964_v50 = vpop.f32.mrb[77].mxu0  ;;  %v7196_v38 = vpop.f32.mrb[77].mxu1 }
 0x183   : > { %v8723_v56 = vpop.f32.mrb[78].mxu0  ;;  %v8726_v14 = vpop.f32.mrb[78].mxu1 }
 0x184   : > { %10622 = vst [vmem:[#allocation32_spill] sm:$0xff] %v8723_v56  ;;  %10623 = vst [vmem:[#allocation33_spill] sm:$0xff] %v8726_v14  ;;  %v6965_v8 = vpop.f32.mrb[79].mxu0  ;;  %v7197_v13 = vpop.f32.mrb[79].mxu1 }
 0x185   : > { %v7919_v8 = vld [vmem:[%s8114_s21 + $0x178] sm:$0xff]  }
 0x186   : > { %7071 = vmatmul.mubr.msk.bf16.gmra.mrb[184].mxu0 %vm583_vm3, %v7917_v32  ;;  %7303 = vmatmul.mubr.msk.bf16.gmra.mrb[184].mxu1 %vm583_vm3, %v7918_v36  ;;  %v7920_v36 = vld [vmem:[%s8114_s21 + $0x33c] sm:$0xff]  }
 0x187   : > { %7074 = vmatprep.mubr.msk.bf16.mxu0 %vm8065_vm2, %v10599_v44  ;;  %7306 = vmatprep.mubr.msk.bf16.mxu1 %vm8065_vm2, %v10599_v44 }
 0x189   : > { %v8736_v38 = vpop.f32.mrb[80].mxu0  ;;  %v8738_v50 = vpop.f32.mrb[80].mxu1 }
 0x18a   : > { %10624 = vst [vmem:[#allocation34_spill] sm:$0xff] %v8736_v38  ;;  %10625 = vst [vmem:[#allocation35_spill] sm:$0xff] %v8738_v50  ;;  %v6968_v20 = vpop.f32.mrb[81].mxu0  ;;  %v7200_v26 = vpop.f32.mrb[81].mxu1 }
 0x18b   : > { %v8743_v32 = vpop.f32.mrb[82].mxu0  ;;  %v8746_v14 = vpop.f32.mrb[82].mxu1 }
 0x18c   : > { %10626 = vst [vmem:[#allocation36_spill] sm:$0xff] %v8743_v32  ;;  %10627 = vst [vmem:[#allocation37_spill] sm:$0xff] %v8746_v14  ;;  %v6969_v56 = vpop.f32.mrb[83].mxu0  ;;  %v7201_v1 = vpop.f32.mrb[83].mxu1 }
 0x18d   : > { %v7921_v56 = vld [vmem:[%s8114_s21 + $0x180] sm:$0xff]  }
 0x18e   : > { %7075 = vmatmul.mubr.msk.bf16.gmra.mrb[188].mxu0 %vm583_vm3, %v7919_v8  ;;  %7307 = vmatmul.mubr.msk.bf16.gmra.mrb[188].mxu1 %vm583_vm3, %v7920_v36  ;;  %v7922_v36 = vld [vmem:[%s8114_s21 + $0x344] sm:$0xff]  }
 0x18f   : > { %7078 = vmatprep.mubr.msk.bf16.mxu0 %vm8065_vm2, %v10599_v44  ;;  %7310 = vmatprep.mubr.msk.bf16.mxu1 %vm8065_vm2, %v10599_v44 }
 0x191   : > { %v8756_v26 = vpop.f32.mrb[84].mxu0  ;;  %v8758_v20 = vpop.f32.mrb[84].mxu1 }
 0x192   : > { %10628 = vst [vmem:[#allocation38_spill] sm:$0xff] %v8756_v26  ;;  %10629 = vst [vmem:[#allocation39_spill] sm:$0xff] %v8758_v20  ;;  %v6972_v13 = vpop.f32.mrb[85].mxu0  ;;  %v7204_v2 = vpop.f32.mrb[85].mxu1 }
 0x193   : > { %v8763_v8 = vpop.f32.mrb[86].mxu0  ;;  %v8766_v14 = vpop.f32.mrb[86].mxu1 }
 0x194   : > { %10630 = vst [vmem:[#allocation40_spill] sm:$0xff] %v8763_v8  ;;  %10631 = vst [vmem:[#allocation41_spill] sm:$0xff] %v8766_v14  ;;  %v6973_v32 = vpop.f32.mrb[87].mxu0  ;;  %v7205_v38 = vpop.f32.mrb[87].mxu1 }
 0x195   : > { %v7923_v32 = vld [vmem:[%s8114_s21 + $0x188] sm:$0xff]  }
 0x196   : > { %7079 = vmatmul.mubr.msk.bf16.gmra.mrb[192].mxu0 %vm583_vm3, %v7921_v56  ;;  %7311 = vmatmul.mubr.msk.bf16.gmra.mrb[192].mxu1 %vm583_vm3, %v7922_v36  ;;  %v7924_v36 = vld [vmem:[%s8114_s21 + $0x34c] sm:$0xff]  }
 0x197   : > { %7082 = vmatprep.mubr.msk.bf16.mxu0 %vm8065_vm2, %v10599_v44  ;;  %7314 = vmatprep.mubr.msk.bf16.mxu1 %vm8065_vm2, %v10599_v44 }
 0x199   : > { %v8776_v2 = vpop.f32.mrb[88].mxu0  ;;  %v8778_v13 = vpop.f32.mrb[88].mxu1 }
 0x19a   : > { %10632 = vst [vmem:[#allocation42_spill] sm:$0xff] %v8776_v2  ;;  %10633 = vst [vmem:[#allocation43_spill] sm:$0xff] %v8778_v13  ;;  %v6976_v1 = vpop.f32.mrb[89].mxu0  ;;  %v7208_v50 = vpop.f32.mrb[89].mxu1 }
 0x19b   : > { %v8783_v56 = vpop.f32.mrb[90].mxu0  ;;  %v8786_v14 = vpop.f32.mrb[90].mxu1 }
 0x19c   : > { %10634 = vst [vmem:[#allocation44_spill] sm:$0xff] %v8783_v56  ;;  %10635 = vst [vmem:[#allocation45_spill] sm:$0xff] %v8786_v14  ;;  %v6977_v8 = vpop.f32.mrb[91].mxu0  ;;  %v7209_v26 = vpop.f32.mrb[91].mxu1 }
 0x19d   : > { %v7925_v8 = vld [vmem:[%s8114_s21 + $0x190] sm:$0xff]  }
 0x19e   : > { %7083 = vmatmul.mubr.msk.bf16.gmra.mrb[196].mxu0 %vm583_vm3, %v7923_v32  ;;  %7315 = vmatmul.mubr.msk.bf16.gmra.mrb[196].mxu1 %vm583_vm3, %v7924_v36  ;;  %v7926_v36 = vld [vmem:[%s8114_s21 + $0x354] sm:$0xff]  }
 0x19f   : > { %7086 = vmatprep.mubr.msk.bf16.mxu0 %vm8065_vm2, %v10599_v44  ;;  %7318 = vmatprep.mubr.msk.bf16.mxu1 %vm8065_vm2, %v10599_v44 }
 0x1a1   : > { %v8796_v50 = vpop.f32.mrb[92].mxu0  ;;  %v8798_v1 = vpop.f32.mrb[92].mxu1 }
 0x1a2   : > { %10636 = vst [vmem:[#allocation46_spill] sm:$0xff] %v8796_v50  ;;  %10637 = vst [vmem:[#allocation47_spill] sm:$0xff] %v8798_v1  ;;  %v6980_v38 = vpop.f32.mrb[93].mxu0  ;;  %v7212_v20 = vpop.f32.mrb[93].mxu1 }
 0x1a3   : > { %v8803_v32 = vpop.f32.mrb[94].mxu0  ;;  %v8806_v14 = vpop.f32.mrb[94].mxu1 }
 0x1a4   : > { %10638 = vst [vmem:[#allocation48_spill] sm:$0xff] %v8803_v32  ;;  %10639 = vst [vmem:[#allocation49_spill] sm:$0xff] %v8806_v14  ;;  %v6981_v56 = vpop.f32.mrb[95].mxu0  ;;  %v7213_v2 = vpop.f32.mrb[95].mxu1 }
 0x1a5   : > { %v7927_v56 = vld [vmem:[%s8114_s21 + $0x198] sm:$0xff]  }
 0x1a6   : > { %7087 = vmatmul.mubr.msk.bf16.gmra.mrb[200].mxu0 %vm583_vm3, %v7925_v8  ;;  %7319 = vmatmul.mubr.msk.bf16.gmra.mrb[200].mxu1 %vm583_vm3, %v7926_v36  ;;  %v7928_v36 = vld [vmem:[%s8114_s21 + $0x35c] sm:$0xff]  }
 0x1a7   : > { %7090 = vmatprep.mubr.msk.bf16.mxu0 %vm8065_vm2, %v10599_v44  ;;  %7322 = vmatprep.mubr.msk.bf16.mxu1 %vm8065_vm2, %v10599_v44 }
 0x1a9   : > { %v8816_v20 = vpop.f32.mrb[96].mxu0  ;;  %v8818_v38 = vpop.f32.mrb[96].mxu1 }
 0x1aa   : > { %10640 = vst [vmem:[#allocation50_spill] sm:$0xff] %v8816_v20  ;;  %10641 = vst [vmem:[#allocation51_spill] sm:$0xff] %v8818_v38  ;;  %v6984_v26 = vpop.f32.mrb[97].mxu0  ;;  %v7216_v13 = vpop.f32.mrb[97].mxu1 }
 0x1ab   : > { %v8823_v8 = vpop.f32.mrb[98].mxu0  ;;  %v8826_v14 = vpop.f32.mrb[98].mxu1 }
 0x1ac   : > { %10642 = vst [vmem:[#allocation52_spill] sm:$0xff] %v8823_v8  ;;  %10643 = vst [vmem:[#allocation53_spill] sm:$0xff] %v8826_v14  ;;  %v6985_v32 = vpop.f32.mrb[99].mxu0  ;;  %v7217_v50 = vpop.f32.mrb[99].mxu1 }
 0x1ad   : > { %v7929_v32 = vld [vmem:[%s8114_s21 + $0x1a0] sm:$0xff]  }
 0x1ae   : > { %7091 = vmatmul.mubr.msk.bf16.gmra.mrb[204].mxu0 %vm583_vm3, %v7927_v56  ;;  %7323 = vmatmul.mubr.msk.bf16.gmra.mrb[204].mxu1 %vm583_vm3, %v7928_v36  ;;  %v7930_v36 = vld [vmem:[%s8114_s21 + $0x364] sm:$0xff]  }
 0x1af   : > { %7094 = vmatprep.mubr.msk.bf16.mxu0 %vm8065_vm2, %v10599_v44  ;;  %7326 = vmatprep.mubr.msk.bf16.mxu1 %vm8065_vm2, %v10599_v44 }
 0x1b1   : > { %v8836_v13 = vpop.f32.mrb[100].mxu0  ;;  %v8838_v26 = vpop.f32.mrb[100].mxu1 }
 0x1b2   : > { %10644 = vst [vmem:[#allocation54_spill] sm:$0xff] %v8836_v13  ;;  %10645 = vst [vmem:[#allocation55_spill] sm:$0xff] %v8838_v26  ;;  %v6988_v2 = vpop.f32.mrb[101].mxu0  ;;  %v7220_v1 = vpop.f32.mrb[101].mxu1 }
 0x1b3   : > { %v8843_v56 = vpop.f32.mrb[102].mxu0  ;;  %v8846_v14 = vpop.f32.mrb[102].mxu1 }
 0x1b4   : > { %10646 = vst [vmem:[#allocation56_spill] sm:$0xff] %v8843_v56  ;;  %10647 = vst [vmem:[#allocation57_spill] sm:$0xff] %v8846_v14  ;;  %v6989_v8 = vpop.f32.mrb[103].mxu0  ;;  %v7221_v20 = vpop.f32.mrb[103].mxu1 }
 0x1b5   : > { %v7931_v8 = vld [vmem:[%s8114_s21 + $0x1a8] sm:$0xff]  }
 0x1b6   : > { %7095 = vmatmul.mubr.msk.bf16.gmra.mrb[208].mxu0 %vm583_vm3, %v7929_v32  ;;  %7327 = vmatmul.mubr.msk.bf16.gmra.mrb[208].mxu1 %vm583_vm3, %v7930_v36  ;;  %v7932_v36 = vld [vmem:[%s8114_s21 + $0x36c] sm:$0xff]  }
 0x1b7   : > { %7098 = vmatprep.mubr.msk.bf16.mxu0 %vm8065_vm2, %v10599_v44  ;;  %7330 = vmatprep.mubr.msk.bf16.mxu1 %vm8065_vm2, %v10599_v44 }
 0x1b9   : > { %v8856_v1 = vpop.f32.mrb[104].mxu0  ;;  %v8858_v2 = vpop.f32.mrb[104].mxu1 }
 0x1ba   : > { %10648 = vst [vmem:[#allocation58_spill] sm:$0xff] %v8856_v1  ;;  %10649 = vst [vmem:[#allocation59_spill] sm:$0xff] %v8858_v2  ;;  %v6992_v50 = vpop.f32.mrb[105].mxu0  ;;  %v7224_v38 = vpop.f32.mrb[105].mxu1 }
 0x1bb   : > { %v8863_v32 = vpop.f32.mrb[106].mxu0  ;;  %v8866_v14 = vpop.f32.mrb[106].mxu1 }
 0x1bc   : > { %10650 = vst [vmem:[#allocation60_spill] sm:$0xff] %v8863_v32  ;;  %10651 = vst [vmem:[#allocation61_spill] sm:$0xff] %v8866_v14  ;;  %v6993_v56 = vpop.f32.mrb[107].mxu0  ;;  %v7225_v13 = vpop.f32.mrb[107].mxu1 }
 0x1bd   : > { %v7933_v56 = vld [vmem:[%s8114_s21 + $0x1b0] sm:$0xff]  }
 0x1be   : > { %7099 = vmatmul.mubr.msk.bf16.gmra.mrb[212].mxu0 %vm583_vm3, %v7931_v8  ;;  %7331 = vmatmul.mubr.msk.bf16.gmra.mrb[212].mxu1 %vm583_vm3, %v7932_v36  ;;  %v7934_v36 = vld [vmem:[%s8114_s21 + $0x374] sm:$0xff]  }
 0x1bf   : > { %7102 = vmatprep.mubr.msk.bf16.mxu0 %vm8065_vm2, %v10599_v44  ;;  %7334 = vmatprep.mubr.msk.bf16.mxu1 %vm8065_vm2, %v10599_v44 }
 0x1c1   : > { %v8876_v38 = vpop.f32.mrb[108].mxu0  ;;  %v8878_v50 = vpop.f32.mrb[108].mxu1 }
 0x1c2   : > { %10652 = vst [vmem:[#allocation62_spill] sm:$0xff] %v8876_v38  ;;  %10653 = vst [vmem:[#allocation63_spill] sm:$0xff] %v8878_v50  ;;  %v6996_v20 = vpop.f32.mrb[109].mxu0  ;;  %v7228_v26 = vpop.f32.mrb[109].mxu1 }
 0x1c3   : > { %v8883_v8 = vpop.f32.mrb[110].mxu0  ;;  %v8886_v14 = vpop.f32.mrb[110].mxu1 }
 0x1c4   : > { %10654 = vst [vmem:[#allocation64_spill] sm:$0xff] %v8883_v8  ;;  %10655 = vst [vmem:[#allocation65_spill] sm:$0xff] %v8886_v14  ;;  %v6997_v32 = vpop.f32.mrb[111].mxu0  ;;  %v7229_v1 = vpop.f32.mrb[111].mxu1 }
 0x1c5   : > { %v7935_v32 = vld [vmem:[%s8114_s21 + $0x1b8] sm:$0xff]  }
 0x1c6   : > { %7103 = vmatmul.mubr.msk.bf16.gmra.mrb[216].mxu0 %vm583_vm3, %v7933_v56  ;;  %7335 = vmatmul.mubr.msk.bf16.gmra.mrb[216].mxu1 %vm583_vm3, %v7934_v36  ;;  %v7936_v36 = vld [vmem:[%s8114_s21 + $0x37c] sm:$0xff]  }
 0x1c7   : > { %7106 = vmatprep.mubr.msk.bf16.mxu0 %vm8065_vm2, %v10599_v44  ;;  %7338 = vmatprep.mubr.msk.bf16.mxu1 %vm8065_vm2, %v10599_v44 }
 0x1c9   : > { %v8896_v26 = vpop.f32.mrb[112].mxu0  ;;  %v8898_v20 = vpop.f32.mrb[112].mxu1 }
 0x1ca   : > { %10656 = vst [vmem:[#allocation66_spill] sm:$0xff] %v8896_v26  ;;  %10657 = vst [vmem:[#allocation67_spill] sm:$0xff] %v8898_v20  ;;  %v7000_v13 = vpop.f32.mrb[113].mxu0  ;;  %v7232_v2 = vpop.f32.mrb[113].mxu1 }
 0x1cb   : > { %v8903_v56 = vpop.f32.mrb[114].mxu0  ;;  %v8906_v14 = vpop.f32.mrb[114].mxu1 }
 0x1cc   : > { %10658 = vst [vmem:[#allocation68_spill] sm:$0xff] %v8903_v56  ;;  %10659 = vst [vmem:[#allocation69_spill] sm:$0xff] %v8906_v14  ;;  %v7001_v8 = vpop.f32.mrb[115].mxu0  ;;  %v7233_v38 = vpop.f32.mrb[115].mxu1 }
 0x1cd   : > { %v7937_v8 = vld [vmem:[%s8114_s21 + $0x1c0] ss:$0 sps:$4 sm:$0x33]  }
 0x1ce   : > { %7107 = vmatmul.mubr.msk.bf16.gmra.mrb[220].mxu0 %vm583_vm3, %v7935_v32  ;;  %7339 = vmatmul.mubr.msk.bf16.gmra.mrb[220].mxu1 %vm583_vm3, %v7936_v36  ;;  %v7938_v36 = vld [vmem:[%s8114_s21 + $0x384] ss:$0 sps:$4 sm:$0x33]  }
 0x1cf   : > { %7110 = vmatprep.mubr.msk.bf16.mxu0 %vm8065_vm2, %v10599_v44  ;;  %7342 = vmatprep.mubr.msk.bf16.mxu1 %vm8065_vm2, %v10599_v44 }
 0x1d1   : > { %v8916_v2 = vpop.f32.mrb[116].mxu0  ;;  %v8918_v13 = vpop.f32.mrb[116].mxu1 }
 0x1d2   : > { %10660 = vst [vmem:[#allocation70_spill] sm:$0xff] %v8916_v2  ;;  %10661 = vst [vmem:[#allocation71_spill] sm:$0xff] %v8918_v13  ;;  %v7004_v1 = vpop.f32.mrb[117].mxu0  ;;  %v7236_v50 = vpop.f32.mrb[117].mxu1 }
 0x1d3   : > { %v8923_v32 = vpop.f32.mrb[118].mxu0  ;;  %v8926_v14 = vpop.f32.mrb[118].mxu1 }
 0x1d4   : > { %10662 = vst [vmem:[#allocation72_spill] sm:$0xff] %v8923_v32  ;;  %10663 = vst [vmem:[#allocation73_spill] sm:$0xff] %v8926_v14  ;;  %v7005_v56 = vpop.f32.mrb[119].mxu0  ;;  %v7237_v26 = vpop.f32.mrb[119].mxu1 }
 0x1d5   : > { %v7939_v56 = vld [vmem:[%s8114_s21 + $0x388] sm:$0xff]  }
 0x1d6   : > { %7111 = vmatmul.mubr.msk.bf16.gmra.mrb[224].mxu0 %vm583_vm3, %v7937_v8  ;;  %7343 = vmatmul.mubr.msk.bf16.gmra.mrb[224].mxu1 %vm583_vm3, %v7938_v36  ;;  %v7940_v36 = vld [vmem:[%s8114_s21 + $0x54c] sm:$0xff]  }
 0x1d7   : > { %7350 = vmatprep.mubr.msk.bf16.mxu0 %vm8065_vm2, %v10599_v44  ;;  %7582 = vmatprep.mubr.msk.bf16.mxu1 %vm8065_vm2, %v10599_v44 }
 0x1d9   : > { %v8936_v50 = vpop.f32.mrb[120].mxu0  ;;  %v8938_v1 = vpop.f32.mrb[120].mxu1 }
 0x1da   : > { %10664 = vst [vmem:[#allocation74_spill] sm:$0xff] %v8936_v50  ;;  %10665 = vst [vmem:[#allocation75_spill] sm:$0xff] %v8938_v1  ;;  %v7008_v38 = vpop.f32.mrb[121].mxu0  ;;  %v7240_v20 = vpop.f32.mrb[121].mxu1 }
 0x1db   : > { %v8943_v8 = vpop.f32.mrb[122].mxu0  ;;  %v8946_v14 = vpop.f32.mrb[122].mxu1 }
 0x1dc   : > { %10666 = vst [vmem:[#allocation76_spill] sm:$0xff] %v8943_v8  ;;  %10667 = vst [vmem:[#allocation77_spill] sm:$0xff] %v8946_v14  ;;  %v7009_v32 = vpop.f32.mrb[123].mxu0  ;;  %v7241_v2 = vpop.f32.mrb[123].mxu1 }
 0x1dd   : > { %v7941_v32 = vld [vmem:[%s8114_s21 + $0x390] sm:$0xff]  }
 0x1de   : > { %7351 = vmatmul.mubr.msk.bf16.vlgmr.msra.gmra.mrb[228].mxu0 %vm583_vm3, %v7939_v56  ;;  %7583 = vmatmul.mubr.msk.bf16.vlgmr.msra.gmra.mrb[228].mxu1 %vm583_vm3, %v7940_v36  ;;  %v7942_v36 = vld [vmem:[%s8114_s21 + $0x554] sm:$0xff]  }
 0x1df   : > { %7354 = vmatprep.mubr.msk.bf16.mxu0 %vm8065_vm2, %v10599_v44  ;;  %7586 = vmatprep.mubr.msk.bf16.mxu1 %vm8065_vm2, %v10599_v44 }
 0x1e1   : > { %v8956_v20 = vpop.f32.mrb[124].mxu0  ;;  %v8958_v38 = vpop.f32.mrb[124].mxu1 }
 0x1e2   : > { %10668 = vst [vmem:[#allocation78_spill] sm:$0xff] %v8956_v20  ;;  %10669 = vst [vmem:[#allocation79_spill] sm:$0xff] %v8958_v38  ;;  %v7012_v26 = vpop.f32.mrb[125].mxu0  ;;  %v7244_v13 = vpop.f32.mrb[125].mxu1 }
 0x1e3   : > { %v8963_v56 = vpop.f32.mrb[126].mxu0  ;;  %v8966_v14 = vpop.f32.mrb[126].mxu1 }
 0x1e4   : > { %10670 = vst [vmem:[#allocation80_spill] sm:$0xff] %v8963_v56  ;;  %10671 = vst [vmem:[#allocation81_spill] sm:$0xff] %v8966_v14  ;;  %v7013_v8 = vpop.f32.mrb[127].mxu0  ;;  %v7245_v50 = vpop.f32.mrb[127].mxu1 }
 0x1e5   : > { %v7943_v8 = vld [vmem:[%s8114_s21 + $0x398] sm:$0xff]  }
 0x1e6   : > { %7355 = vmatmul.mubr.msk.bf16.gmra.mrb[232].mxu0 %vm583_vm3, %v7941_v32  ;;  %7587 = vmatmul.mubr.msk.bf16.gmra.mrb[232].mxu1 %vm583_vm3, %v7942_v36  ;;  %v7944_v36 = vld [vmem:[%s8114_s21 + $0x55c] sm:$0xff]  }
 0x1e7   : > { %7358 = vmatprep.mubr.msk.bf16.mxu0 %vm8065_vm2, %v10599_v44  ;;  %7590 = vmatprep.mubr.msk.bf16.mxu1 %vm8065_vm2, %v10599_v44 }
 0x1e9   : > { %v8976_v13 = vpop.f32.mrb[128].mxu0  ;;  %v8978_v26 = vpop.f32.mrb[128].mxu1 }
 0x1ea   : > { %10672 = vst [vmem:[#allocation82_spill] sm:$0xff] %v8976_v13  ;;  %10673 = vst [vmem:[#allocation83_spill] sm:$0xff] %v8978_v26  ;;  %v7016_v2 = vpop.f32.mrb[129].mxu0  ;;  %v7248_v1 = vpop.f32.mrb[129].mxu1 }
 0x1eb   : > { %v8983_v32 = vpop.f32.mrb[130].mxu0  ;;  %v8986_v14 = vpop.f32.mrb[130].mxu1 }
 0x1ec   : > { %10674 = vst [vmem:[#allocation84_spill] sm:$0xff] %v8983_v32  ;;  %10675 = vst [vmem:[#allocation85_spill] sm:$0xff] %v8986_v14  ;;  %v7017_v56 = vpop.f32.mrb[131].mxu0  ;;  %v7249_v20 = vpop.f32.mrb[131].mxu1 }
 0x1ed   : > { %v7945_v56 = vld [vmem:[%s8114_s21 + $0x3a0] sm:$0xff]  }
 0x1ee   : > { %7359 = vmatmul.mubr.msk.bf16.gmra.mrb[236].mxu0 %vm583_vm3, %v7943_v8  ;;  %7591 = vmatmul.mubr.msk.bf16.gmra.mrb[236].mxu1 %vm583_vm3, %v7944_v36  ;;  %v7946_v36 = vld [vmem:[%s8114_s21 + $0x564] sm:$0xff]  }
 0x1ef   : > { %7362 = vmatprep.mubr.msk.bf16.mxu0 %vm8065_vm2, %v10599_v44  ;;  %7594 = vmatprep.mubr.msk.bf16.mxu1 %vm8065_vm2, %v10599_v44 }
 0x1f1   : > { %v8996_v1 = vpop.f32.mrb[132].mxu0  ;;  %v8998_v2 = vpop.f32.mrb[132].mxu1 }
 0x1f2   : > { %10676 = vst [vmem:[#allocation86_spill] sm:$0xff] %v8996_v1  ;;  %10677 = vst [vmem:[#allocation87_spill] sm:$0xff] %v8998_v2  ;;  %v7020_v50 = vpop.f32.mrb[133].mxu0  ;;  %v7252_v38 = vpop.f32.mrb[133].mxu1 }
 0x1f3   : > { %v9003_v8 = vpop.f32.mrb[134].mxu0  ;;  %v9006_v14 = vpop.f32.mrb[134].mxu1 }
 0x1f4   : > { %10678 = vst [vmem:[#allocation88_spill] sm:$0xff] %v9003_v8  ;;  %10679 = vst [vmem:[#allocation89_spill] sm:$0xff] %v9006_v14  ;;  %v7021_v32 = vpop.f32.mrb[135].mxu0  ;;  %v7253_v13 = vpop.f32.mrb[135].mxu1 }
 0x1f5   : > { %v7947_v32 = vld [vmem:[%s8114_s21 + $0x3a8] sm:$0xff]  }
 0x1f6   : > { %7363 = vmatmul.mubr.msk.bf16.gmra.mrb[240].mxu0 %vm583_vm3, %v7945_v56  ;;  %7595 = vmatmul.mubr.msk.bf16.gmra.mrb[240].mxu1 %vm583_vm3, %v7946_v36  ;;  %v7948_v36 = vld [vmem:[%s8114_s21 + $0x56c] sm:$0xff]  }
 0x1f7   : > { %7366 = vmatprep.mubr.msk.bf16.mxu0 %vm8065_vm2, %v10599_v44  ;;  %7598 = vmatprep.mubr.msk.bf16.mxu1 %vm8065_vm2, %v10599_v44 }
 0x1f9   : > { %v9016_v38 = vpop.f32.mrb[136].mxu0  ;;  %v9018_v50 = vpop.f32.mrb[136].mxu1 }
 0x1fa   : > { %10680 = vst [vmem:[#allocation90_spill] sm:$0xff] %v9016_v38  ;;  %10681 = vst [vmem:[#allocation91_spill] sm:$0xff] %v9018_v50  ;;  %v7024_v20 = vpop.f32.mrb[137].mxu0  ;;  %v7256_v26 = vpop.f32.mrb[137].mxu1 }
 0x1fb   : > { %v9023_v56 = vpop.f32.mrb[138].mxu0  ;;  %v9026_v14 = vpop.f32.mrb[138].mxu1 }
 0x1fc   : > { %10682 = vst [vmem:[#allocation92_spill] sm:$0xff] %v9023_v56  ;;  %10683 = vst [vmem:[#allocation93_spill] sm:$0xff] %v9026_v14  ;;  %v7025_v8 = vpop.f32.mrb[139].mxu0  ;;  %v7257_v1 = vpop.f32.mrb[139].mxu1 }
 0x1fd   : > { %v7949_v8 = vld [vmem:[%s8114_s21 + $0x3b0] sm:$0xff]  }
 0x1fe   : > { %7367 = vmatmul.mubr.msk.bf16.gmra.mrb[244].mxu0 %vm583_vm3, %v7947_v32  ;;  %7599 = vmatmul.mubr.msk.bf16.gmra.mrb[244].mxu1 %vm583_vm3, %v7948_v36  ;;  %v7950_v36 = vld [vmem:[%s8114_s21 + $0x574] sm:$0xff]  }
 0x1ff   : > { %7370 = vmatprep.mubr.msk.bf16.mxu0 %vm8065_vm2, %v10599_v44  ;;  %7602 = vmatprep.mubr.msk.bf16.mxu1 %vm8065_vm2, %v10599_v44 }
 0x201   : > { %v9036_v26 = vpop.f32.mrb[140].mxu0  ;;  %v9038_v20 = vpop.f32.mrb[140].mxu1 }
 0x202   : > { %10684 = vst [vmem:[#allocation94_spill] sm:$0xff] %v9036_v26  ;;  %10685 = vst [vmem:[#allocation95_spill] sm:$0xff] %v9038_v20  ;;  %v7028_v13 = vpop.f32.mrb[141].mxu0  ;;  %v7260_v2 = vpop.f32.mrb[141].mxu1 }
 0x203   : > { %v9043_v32 = vpop.f32.mrb[142].mxu0  ;;  %v9046_v14 = vpop.f32.mrb[142].mxu1 }
 0x204   : > { %10686 = vst [vmem:[#allocation96_spill] sm:$0xff] %v9043_v32  ;;  %10687 = vst [vmem:[#allocation97_spill] sm:$0xff] %v9046_v14  ;;  %v7029_v56 = vpop.f32.mrb[143].mxu0  ;;  %v7261_v38 = vpop.f32.mrb[143].mxu1 }
 0x205   : > { %v7951_v56 = vld [vmem:[%s8114_s21 + $0x3b8] sm:$0xff]  }
 0x206   : > { %7371 = vmatmul.mubr.msk.bf16.gmra.mrb[248].mxu0 %vm583_vm3, %v7949_v8  ;;  %7603 = vmatmul.mubr.msk.bf16.gmra.mrb[248].mxu1 %vm583_vm3, %v7950_v36  ;;  %v7952_v36 = vld [vmem:[%s8114_s21 + $0x57c] sm:$0xff]  }
 0x207   : > { %7374 = vmatprep.mubr.msk.bf16.mxu0 %vm8065_vm2, %v10599_v44  ;;  %7606 = vmatprep.mubr.msk.bf16.mxu1 %vm8065_vm2, %v10599_v44 }
 0x209   : > { %v9056_v2 = vpop.f32.mrb[144].mxu0  ;;  %v9058_v13 = vpop.f32.mrb[144].mxu1 }
 0x20a   : > { %10688 = vst [vmem:[#allocation98_spill] sm:$0xff] %v9056_v2  ;;  %10689 = vst [vmem:[#allocation99_spill] sm:$0xff] %v9058_v13  ;;  %v7032_v1 = vpop.f32.mrb[145].mxu0  ;;  %v7264_v50 = vpop.f32.mrb[145].mxu1 }
 0x20b   : > { %v9063_v8 = vpop.f32.mrb[146].mxu0  ;;  %v9066_v14 = vpop.f32.mrb[146].mxu1 }
 0x20c   : > { %10690 = vst [vmem:[#allocation100_spill] sm:$0xff] %v9063_v8  ;;  %10691 = vst [vmem:[#allocation101_spill] sm:$0xff] %v9066_v14  ;;  %v7033_v32 = vpop.f32.mrb[147].mxu0  ;;  %v7265_v26 = vpop.f32.mrb[147].mxu1 }
 0x20d   : > { %v7953_v32 = vld [vmem:[%s8114_s21 + $0x3c0] sm:$0xff]  }
 0x20e   : > { %7375 = vmatmul.mubr.msk.bf16.gmra.mrb[252].mxu0 %vm583_vm3, %v7951_v56  ;;  %7607 = vmatmul.mubr.msk.bf16.gmra.mrb[252].mxu1 %vm583_vm3, %v7952_v36  ;;  %v7954_v36 = vld [vmem:[%s8114_s21 + $0x584] sm:$0xff]  }
 0x20f   : > { %7378 = vmatprep.mubr.msk.bf16.mxu0 %vm8065_vm2, %v10599_v44  ;;  %7610 = vmatprep.mubr.msk.bf16.mxu1 %vm8065_vm2, %v10599_v44 }
 0x211   : > { %v9076_v50 = vpop.f32.mrb[148].mxu0  ;;  %v9078_v1 = vpop.f32.mrb[148].mxu1 }
 0x212   : > { %10692 = vst [vmem:[#allocation102_spill] sm:$0xff] %v9076_v50  ;;  %10693 = vst [vmem:[#allocation103_spill] sm:$0xff] %v9078_v1  ;;  %v7036_v38 = vpop.f32.mrb[149].mxu0  ;;  %v7268_v20 = vpop.f32.mrb[149].mxu1 }
 0x213   : > { %v9083_v56 = vpop.f32.mrb[150].mxu0  ;;  %v9086_v14 = vpop.f32.mrb[150].mxu1 }
 0x214   : > { %10694 = vst [vmem:[#allocation104_spill] sm:$0xff] %v9083_v56  ;;  %10695 = vst [vmem:[#allocation105_spill] sm:$0xff] %v9086_v14  ;;  %v7037_v8 = vpop.f32.mrb[151].mxu0  ;;  %v7269_v2 = vpop.f32.mrb[151].mxu1 }
 0x215   : > { %v7955_v8 = vld [vmem:[%s8114_s21 + $0x3c8] sm:$0xff]  }
 0x216   : > { %7379 = vmatmul.mubr.msk.bf16.gmra.mrb[0].mxu0 %vm583_vm3, %v7953_v32  ;;  %7611 = vmatmul.mubr.msk.bf16.gmra.mrb[0].mxu1 %vm583_vm3, %v7954_v36  ;;  %v7956_v36 = vld [vmem:[%s8114_s21 + $0x58c] sm:$0xff]  }
 0x217   : > { %7382 = vmatprep.mubr.msk.bf16.mxu0 %vm8065_vm2, %v10599_v44  ;;  %7614 = vmatprep.mubr.msk.bf16.mxu1 %vm8065_vm2, %v10599_v44 }
 0x219   : > { %v9096_v20 = vpop.f32.mrb[152].mxu0  ;;  %v9098_v38 = vpop.f32.mrb[152].mxu1 }
 0x21a   : > { %10696 = vst [vmem:[#allocation106_spill] sm:$0xff] %v9096_v20  ;;  %10697 = vst [vmem:[#allocation107_spill] sm:$0xff] %v9098_v38  ;;  %v7040_v26 = vpop.f32.mrb[153].mxu0  ;;  %v7272_v13 = vpop.f32.mrb[153].mxu1 }
 0x21b   : > { %v9103_v32 = vpop.f32.mrb[154].mxu0  ;;  %v9106_v14 = vpop.f32.mrb[154].mxu1 }
 0x21c   : > { %10698 = vst [vmem:[#allocation108_spill] sm:$0xff] %v9103_v32  ;;  %10699 = vst [vmem:[#allocation109_spill] sm:$0xff] %v9106_v14  ;;  %v7041_v56 = vpop.f32.mrb[155].mxu0  ;;  %v7273_v50 = vpop.f32.mrb[155].mxu1 }
 0x21d   : > { %v7957_v56 = vld [vmem:[%s8114_s21 + $0x3d0] sm:$0xff]  }
 0x21e   : > { %7383 = vmatmul.mubr.msk.bf16.gmra.mrb[4].mxu0 %vm583_vm3, %v7955_v8  ;;  %7615 = vmatmul.mubr.msk.bf16.gmra.mrb[4].mxu1 %vm583_vm3, %v7956_v36  ;;  %v7958_v36 = vld [vmem:[%s8114_s21 + $0x594] sm:$0xff]  }
 0x21f   : > { %7386 = vmatprep.mubr.msk.bf16.mxu0 %vm8065_vm2, %v10599_v44  ;;  %7618 = vmatprep.mubr.msk.bf16.mxu1 %vm8065_vm2, %v10599_v44 }
 0x221   : > { %v9116_v13 = vpop.f32.mrb[156].mxu0  ;;  %v9118_v26 = vpop.f32.mrb[156].mxu1 }
 0x222   : > { %10700 = vst [vmem:[#allocation110_spill] sm:$0xff] %v9116_v13  ;;  %10701 = vst [vmem:[#allocation111_spill] sm:$0xff] %v9118_v26  ;;  %v7044_v2 = vpop.f32.mrb[157].mxu0  ;;  %v7276_v1 = vpop.f32.mrb[157].mxu1 }
 0x223   : > { %v9123_v8 = vpop.f32.mrb[158].mxu0  ;;  %v9126_v14 = vpop.f32.mrb[158].mxu1 }
 0x224   : > { %10702 = vst [vmem:[#allocation112_spill] sm:$0xff] %v9123_v8  ;;  %10703 = vst [vmem:[#allocation113_spill] sm:$0xff] %v9126_v14  ;;  %v7045_v32 = vpop.f32.mrb[159].mxu0  ;;  %v7277_v20 = vpop.f32.mrb[159].mxu1 }
 0x225   : > { %v7959_v32 = vld [vmem:[%s8114_s21 + $0x3d8] sm:$0xff]  }
 0x226   : > { %7387 = vmatmul.mubr.msk.bf16.gmra.mrb[8].mxu0 %vm583_vm3, %v7957_v56  ;;  %7619 = vmatmul.mubr.msk.bf16.gmra.mrb[8].mxu1 %vm583_vm3, %v7958_v36  ;;  %v7960_v36 = vld [vmem:[%s8114_s21 + $0x59c] sm:$0xff]  }
 0x227   : > { %7390 = vmatprep.mubr.msk.bf16.mxu0 %vm8065_vm2, %v10599_v44  ;;  %7622 = vmatprep.mubr.msk.bf16.mxu1 %vm8065_vm2, %v10599_v44 }
 0x229   : > { %v9136_v1 = vpop.f32.mrb[160].mxu0  ;;  %v9138_v2 = vpop.f32.mrb[160].mxu1 }
 0x22a   : > { %10704 = vst [vmem:[#allocation114_spill] sm:$0xff] %v9136_v1  ;;  %10705 = vst [vmem:[#allocation115_spill] sm:$0xff] %v9138_v2  ;;  %v7048_v50 = vpop.f32.mrb[161].mxu0  ;;  %v7280_v38 = vpop.f32.mrb[161].mxu1 }
 0x22b   : > { %v9143_v56 = vpop.f32.mrb[162].mxu0  ;;  %v9146_v14 = vpop.f32.mrb[162].mxu1 }
 0x22c   : > { %10706 = vst [vmem:[#allocation116_spill] sm:$0xff] %v9143_v56  ;;  %10707 = vst [vmem:[#allocation117_spill] sm:$0xff] %v9146_v14  ;;  %v7049_v8 = vpop.f32.mrb[163].mxu0  ;;  %v7281_v13 = vpop.f32.mrb[163].mxu1 }
 0x22d   : > { %v7961_v8 = vld [vmem:[%s8114_s21 + $0x3e0] sm:$0xff]  }
 0x22e   : > { %7391 = vmatmul.mubr.msk.bf16.gmra.mrb[12].mxu0 %vm583_vm3, %v7959_v32  ;;  %7623 = vmatmul.mubr.msk.bf16.gmra.mrb[12].mxu1 %vm583_vm3, %v7960_v36  ;;  %v7962_v36 = vld [vmem:[%s8114_s21 + $0x5a4] sm:$0xff]  }
 0x22f   : > { %7394 = vmatprep.mubr.msk.bf16.mxu0 %vm8065_vm2, %v10599_v44  ;;  %7626 = vmatprep.mubr.msk.bf16.mxu1 %vm8065_vm2, %v10599_v44 }
 0x231   : > { %v9156_v38 = vpop.f32.mrb[164].mxu0  ;;  %v9158_v50 = vpop.f32.mrb[164].mxu1 }
 0x232   : > { %10708 = vst [vmem:[#allocation118_spill] sm:$0xff] %v9156_v38  ;;  %10709 = vst [vmem:[#allocation119_spill] sm:$0xff] %v9158_v50  ;;  %v7052_v20 = vpop.f32.mrb[165].mxu0  ;;  %v7284_v26 = vpop.f32.mrb[165].mxu1 }
 0x233   : > { %v9163_v32 = vpop.f32.mrb[166].mxu0  ;;  %v9166_v14 = vpop.f32.mrb[166].mxu1 }
 0x234   : > { %10710 = vst [vmem:[#allocation120_spill] sm:$0xff] %v9163_v32  ;;  %10711 = vst [vmem:[#allocation121_spill] sm:$0xff] %v9166_v14  ;;  %v7053_v56 = vpop.f32.mrb[167].mxu0  ;;  %v7285_v1 = vpop.f32.mrb[167].mxu1 }
 0x235   : > { %v7963_v56 = vld [vmem:[%s8114_s21 + $0x3e8] sm:$0xff]  }
 0x236   : > { %7395 = vmatmul.mubr.msk.bf16.gmra.mrb[16].mxu0 %vm583_vm3, %v7961_v8  ;;  %7627 = vmatmul.mubr.msk.bf16.gmra.mrb[16].mxu1 %vm583_vm3, %v7962_v36  ;;  %v7964_v36 = vld [vmem:[%s8114_s21 + $0x5ac] sm:$0xff]  }
 0x237   : > { %7398 = vmatprep.mubr.msk.bf16.mxu0 %vm8065_vm2, %v10599_v44  ;;  %7630 = vmatprep.mubr.msk.bf16.mxu1 %vm8065_vm2, %v10599_v44 }
 0x239   : > { %v9176_v26 = vpop.f32.mrb[168].mxu0  ;;  %v9178_v20 = vpop.f32.mrb[168].mxu1 }
 0x23a   : > { %10712 = vst [vmem:[#allocation122_spill] sm:$0xff] %v9176_v26  ;;  %10713 = vst [vmem:[#allocation123_spill] sm:$0xff] %v9178_v20  ;;  %v7056_v13 = vpop.f32.mrb[169].mxu0  ;;  %v7288_v2 = vpop.f32.mrb[169].mxu1 }
 0x23b   : > { %v9183_v8 = vpop.f32.mrb[170].mxu0  ;;  %v9186_v14 = vpop.f32.mrb[170].mxu1 }
 0x23c   : > { %10714 = vst [vmem:[#allocation124_spill] sm:$0xff] %v9183_v8  ;;  %10715 = vst [vmem:[#allocation125_spill] sm:$0xff] %v9186_v14  ;;  %v7057_v32 = vpop.f32.mrb[171].mxu0  ;;  %v7289_v38 = vpop.f32.mrb[171].mxu1 }
 0x23d   : > { %v7965_v32 = vld [vmem:[%s8114_s21 + $0x3f0] sm:$0xff]  }
 0x23e   : > { %7399 = vmatmul.mubr.msk.bf16.gmra.mrb[20].mxu0 %vm583_vm3, %v7963_v56  ;;  %7631 = vmatmul.mubr.msk.bf16.gmra.mrb[20].mxu1 %vm583_vm3, %v7964_v36  ;;  %v7966_v36 = vld [vmem:[%s8114_s21 + $0x5b4] sm:$0xff]  }
 0x23f   : > { %7402 = vmatprep.mubr.msk.bf16.mxu0 %vm8065_vm2, %v10599_v44  ;;  %7634 = vmatprep.mubr.msk.bf16.mxu1 %vm8065_vm2, %v10599_v44 }
 0x241   : > { %v9196_v2 = vpop.f32.mrb[172].mxu0  ;;  %v9198_v13 = vpop.f32.mrb[172].mxu1 }
 0x242   : > { %10716 = vst [vmem:[#allocation126_spill] sm:$0xff] %v9196_v2  ;;  %10717 = vst [vmem:[#allocation127_spill] sm:$0xff] %v9198_v13  ;;  %v7060_v1 = vpop.f32.mrb[173].mxu0  ;;  %v7292_v50 = vpop.f32.mrb[173].mxu1 }
 0x243   : > { %v9203_v56 = vpop.f32.mrb[174].mxu0  ;;  %v9206_v14 = vpop.f32.mrb[174].mxu1 }
 0x244   : > { %10718 = vst [vmem:[#allocation128_spill] sm:$0xff] %v9203_v56  ;;  %10719 = vst [vmem:[#allocation129_spill] sm:$0xff] %v9206_v14  ;;  %v7061_v8 = vpop.f32.mrb[175].mxu0  ;;  %v7293_v26 = vpop.f32.mrb[175].mxu1 }
 0x245   : > { %v7967_v8 = vld [vmem:[%s8114_s21 + $0x3f8] sm:$0xff]  }
 0x246   : > { %7403 = vmatmul.mubr.msk.bf16.gmra.mrb[24].mxu0 %vm583_vm3, %v7965_v32  ;;  %7635 = vmatmul.mubr.msk.bf16.gmra.mrb[24].mxu1 %vm583_vm3, %v7966_v36  ;;  %v7968_v36 = vld [vmem:[%s8114_s21 + $0x5bc] sm:$0xff]  }
 0x247   : > { %7406 = vmatprep.mubr.msk.bf16.mxu0 %vm8065_vm2, %v10599_v44  ;;  %7638 = vmatprep.mubr.msk.bf16.mxu1 %vm8065_vm2, %v10599_v44 }
 0x249   : > { %v9216_v50 = vpop.f32.mrb[176].mxu0  ;;  %v9218_v1 = vpop.f32.mrb[176].mxu1 }
 0x24a   : > { %10720 = vst [vmem:[#allocation130_spill] sm:$0xff] %v9216_v50  ;;  %10721 = vst [vmem:[#allocation131_spill] sm:$0xff] %v9218_v1  ;;  %v7064_v38 = vpop.f32.mrb[177].mxu0  ;;  %v7296_v20 = vpop.f32.mrb[177].mxu1 }
 0x24b   : > { %v9223_v32 = vpop.f32.mrb[178].mxu0  ;;  %v9226_v14 = vpop.f32.mrb[178].mxu1 }
 0x24c   : > { %10722 = vst [vmem:[#allocation132_spill] sm:$0xff] %v9223_v32  ;;  %10723 = vst [vmem:[#allocation133_spill] sm:$0xff] %v9226_v14  ;;  %v7065_v56 = vpop.f32.mrb[179].mxu0  ;;  %v7297_v2 = vpop.f32.mrb[179].mxu1 }
 0x24d   : > { %v7969_v56 = vld [vmem:[%s8114_s21 + $0x400] sm:$0xff]  }
 0x24e   : > { %7407 = vmatmul.mubr.msk.bf16.gmra.mrb[28].mxu0 %vm583_vm3, %v7967_v8  ;;  %7639 = vmatmul.mubr.msk.bf16.gmra.mrb[28].mxu1 %vm583_vm3, %v7968_v36  ;;  %v7970_v36 = vld [vmem:[%s8114_s21 + $0x5c4] sm:$0xff]  }
 0x24f   : > { %7410 = vmatprep.mubr.msk.bf16.mxu0 %vm8065_vm2, %v10599_v44  ;;  %7642 = vmatprep.mubr.msk.bf16.mxu1 %vm8065_vm2, %v10599_v44 }
 0x251   : > { %v9236_v20 = vpop.f32.mrb[180].mxu0  ;;  %v9238_v38 = vpop.f32.mrb[180].mxu1 }
 0x252   : > { %10724 = vst [vmem:[#allocation134_spill] sm:$0xff] %v9236_v20  ;;  %10725 = vst [vmem:[#allocation135_spill] sm:$0xff] %v9238_v38  ;;  %v7068_v26 = vpop.f32.mrb[181].mxu0  ;;  %v7300_v13 = vpop.f32.mrb[181].mxu1 }
 0x253   : > { %v9243_v8 = vpop.f32.mrb[182].mxu0  ;;  %v9246_v14 = vpop.f32.mrb[182].mxu1 }
 0x254   : > { %10726 = vst [vmem:[#allocation136_spill] sm:$0xff] %v9243_v8  ;;  %10727 = vst [vmem:[#allocation137_spill] sm:$0xff] %v9246_v14  ;;  %v7069_v32 = vpop.f32.mrb[183].mxu0  ;;  %v7301_v50 = vpop.f32.mrb[183].mxu1 }
 0x255   : > { %v7971_v32 = vld [vmem:[%s8114_s21 + $0x408] sm:$0xff]  }
 0x256   : > { %7411 = vmatmul.mubr.msk.bf16.gmra.mrb[32].mxu0 %vm583_vm3, %v7969_v56  ;;  %7643 = vmatmul.mubr.msk.bf16.gmra.mrb[32].mxu1 %vm583_vm3, %v7970_v36  ;;  %v7972_v36 = vld [vmem:[%s8114_s21 + $0x5cc] sm:$0xff]  }
 0x257   : > { %7414 = vmatprep.mubr.msk.bf16.mxu0 %vm8065_vm2, %v10599_v44  ;;  %7646 = vmatprep.mubr.msk.bf16.mxu1 %vm8065_vm2, %v10599_v44 }
 0x259   : > { %v9256_v13 = vpop.f32.mrb[184].mxu0  ;;  %v9258_v26 = vpop.f32.mrb[184].mxu1 }
 0x25a   : > { %10728 = vst [vmem:[#allocation138_spill] sm:$0xff] %v9256_v13  ;;  %10729 = vst [vmem:[#allocation139_spill] sm:$0xff] %v9258_v26  ;;  %v7072_v2 = vpop.f32.mrb[185].mxu0  ;;  %v7304_v1 = vpop.f32.mrb[185].mxu1 }
 0x25b   : > { %v9263_v56 = vpop.f32.mrb[186].mxu0  ;;  %v9266_v14 = vpop.f32.mrb[186].mxu1 }
 0x25c   : > { %10730 = vst [vmem:[#allocation140_spill] sm:$0xff] %v9263_v56  ;;  %10731 = vst [vmem:[#allocation141_spill] sm:$0xff] %v9266_v14  ;;  %v7073_v8 = vpop.f32.mrb[187].mxu0  ;;  %v7305_v20 = vpop.f32.mrb[187].mxu1 }
 0x25d   : > { %v7973_v8 = vld [vmem:[%s8114_s21 + $0x410] sm:$0xff]  }
 0x25e   : > { %7415 = vmatmul.mubr.msk.bf16.gmra.mrb[36].mxu0 %vm583_vm3, %v7971_v32  ;;  %7647 = vmatmul.mubr.msk.bf16.gmra.mrb[36].mxu1 %vm583_vm3, %v7972_v36  ;;  %v7974_v36 = vld [vmem:[%s8114_s21 + $0x5d4] sm:$0xff]  }
 0x25f   : > { %7418 = vmatprep.mubr.msk.bf16.mxu0 %vm8065_vm2, %v10599_v44  ;;  %7650 = vmatprep.mubr.msk.bf16.mxu1 %vm8065_vm2, %v10599_v44 }
 0x261   : > { %v9276_v1 = vpop.f32.mrb[188].mxu0  ;;  %v9278_v2 = vpop.f32.mrb[188].mxu1 }
 0x262   : > { %10732 = vst [vmem:[#allocation142_spill] sm:$0xff] %v9276_v1  ;;  %10733 = vst [vmem:[#allocation143_spill] sm:$0xff] %v9278_v2  ;;  %v7076_v50 = vpop.f32.mrb[189].mxu0  ;;  %v7308_v38 = vpop.f32.mrb[189].mxu1 }
 0x263   : > { %v9283_v32 = vpop.f32.mrb[190].mxu0  ;;  %v9286_v14 = vpop.f32.mrb[190].mxu1 }
 0x264   : > { %10734 = vst [vmem:[#allocation144_spill] sm:$0xff] %v9283_v32  ;;  %10735 = vst [vmem:[#allocation145_spill] sm:$0xff] %v9286_v14  ;;  %v7077_v56 = vpop.f32.mrb[191].mxu0  ;;  %v7309_v13 = vpop.f32.mrb[191].mxu1 }
 0x265   : > { %v7975_v56 = vld [vmem:[%s8114_s21 + $0x418] sm:$0xff]  }
 0x266   : > { %7419 = vmatmul.mubr.msk.bf16.gmra.mrb[40].mxu0 %vm583_vm3, %v7973_v8  ;;  %7651 = vmatmul.mubr.msk.bf16.gmra.mrb[40].mxu1 %vm583_vm3, %v7974_v36  ;;  %v7976_v36 = vld [vmem:[%s8114_s21 + $0x5dc] sm:$0xff]  }
 0x267   : > { %7422 = vmatprep.mubr.msk.bf16.mxu0 %vm8065_vm2, %v10599_v44  ;;  %7654 = vmatprep.mubr.msk.bf16.mxu1 %vm8065_vm2, %v10599_v44 }
 0x269   : > { %v9296_v38 = vpop.f32.mrb[192].mxu0  ;;  %v9298_v50 = vpop.f32.mrb[192].mxu1 }
 0x26a   : > { %10736 = vst [vmem:[#allocation146_spill] sm:$0xff] %v9296_v38  ;;  %10737 = vst [vmem:[#allocation147_spill] sm:$0xff] %v9298_v50  ;;  %v7080_v20 = vpop.f32.mrb[193].mxu0  ;;  %v7312_v26 = vpop.f32.mrb[193].mxu1 }
 0x26b   : > { %v9303_v8 = vpop.f32.mrb[194].mxu0  ;;  %v9306_v14 = vpop.f32.mrb[194].mxu1 }
 0x26c   : > { %10738 = vst [vmem:[#allocation148_spill] sm:$0xff] %v9303_v8  ;;  %10739 = vst [vmem:[#allocation149_spill] sm:$0xff] %v9306_v14  ;;  %v7081_v32 = vpop.f32.mrb[195].mxu0  ;;  %v7313_v1 = vpop.f32.mrb[195].mxu1 }
 0x26d   : > { %v7977_v32 = vld [vmem:[%s8114_s21 + $0x420] sm:$0xff]  }
 0x26e   : > { %7423 = vmatmul.mubr.msk.bf16.gmra.mrb[44].mxu0 %vm583_vm3, %v7975_v56  ;;  %7655 = vmatmul.mubr.msk.bf16.gmra.mrb[44].mxu1 %vm583_vm3, %v7976_v36  ;;  %v7978_v36 = vld [vmem:[%s8114_s21 + $0x5e4] sm:$0xff]  }
 0x26f   : > { %7426 = vmatprep.mubr.msk.bf16.mxu0 %vm8065_vm2, %v10599_v44  ;;  %7658 = vmatprep.mubr.msk.bf16.mxu1 %vm8065_vm2, %v10599_v44 }
 0x271   : > { %v9316_v26 = vpop.f32.mrb[196].mxu0  ;;  %v9318_v20 = vpop.f32.mrb[196].mxu1 }
 0x272   : > { %10740 = vst [vmem:[#allocation150_spill] sm:$0xff] %v9316_v26  ;;  %10741 = vst [vmem:[#allocation151_spill] sm:$0xff] %v9318_v20  ;;  %v7084_v13 = vpop.f32.mrb[197].mxu0  ;;  %v7316_v2 = vpop.f32.mrb[197].mxu1 }
 0x273   : > { %v9323_v56 = vpop.f32.mrb[198].mxu0  ;;  %v9326_v14 = vpop.f32.mrb[198].mxu1 }
 0x274   : > { %10742 = vst [vmem:[#allocation152_spill] sm:$0xff] %v9323_v56  ;;  %10743 = vst [vmem:[#allocation153_spill] sm:$0xff] %v9326_v14  ;;  %v7085_v8 = vpop.f32.mrb[199].mxu0  ;;  %v7317_v38 = vpop.f32.mrb[199].mxu1 }
 0x275   : > { %v7979_v8 = vld [vmem:[%s8114_s21 + $0x428] sm:$0xff]  }
 0x276   : > { %7427 = vmatmul.mubr.msk.bf16.gmra.mrb[48].mxu0 %vm583_vm3, %v7977_v32  ;;  %7659 = vmatmul.mubr.msk.bf16.gmra.mrb[48].mxu1 %vm583_vm3, %v7978_v36  ;;  %v7980_v36 = vld [vmem:[%s8114_s21 + $0x5ec] sm:$0xff]  }
 0x277   : > { %7430 = vmatprep.mubr.msk.bf16.mxu0 %vm8065_vm2, %v10599_v44  ;;  %7662 = vmatprep.mubr.msk.bf16.mxu1 %vm8065_vm2, %v10599_v44 }
 0x279   : > { %v9336_v2 = vpop.f32.mrb[200].mxu0  ;;  %v9338_v13 = vpop.f32.mrb[200].mxu1 }
 0x27a   : > { %10744 = vst [vmem:[#allocation154_spill] sm:$0xff] %v9336_v2  ;;  %10745 = vst [vmem:[#allocation155_spill] sm:$0xff] %v9338_v13  ;;  %v7088_v1 = vpop.f32.mrb[201].mxu0  ;;  %v7320_v50 = vpop.f32.mrb[201].mxu1 }
 0x27b   : > { %v9343_v32 = vpop.f32.mrb[202].mxu0  ;;  %v9346_v14 = vpop.f32.mrb[202].mxu1 }
 0x27c   : > { %10746 = vst [vmem:[#allocation156_spill] sm:$0xff] %v9343_v32  ;;  %10747 = vst [vmem:[#allocation157_spill] sm:$0xff] %v9346_v14  ;;  %v7089_v56 = vpop.f32.mrb[203].mxu0  ;;  %v7321_v26 = vpop.f32.mrb[203].mxu1 }
 0x27d   : > { %v7981_v56 = vld [vmem:[%s8114_s21 + $0x430] sm:$0xff]  }
 0x27e   : > { %7431 = vmatmul.mubr.msk.bf16.gmra.mrb[52].mxu0 %vm583_vm3, %v7979_v8  ;;  %7663 = vmatmul.mubr.msk.bf16.gmra.mrb[52].mxu1 %vm583_vm3, %v7980_v36  ;;  %v7982_v36 = vld [vmem:[%s8114_s21 + $0x5f4] sm:$0xff]  }
 0x27f   : > { %7434 = vmatprep.mubr.msk.bf16.mxu0 %vm8065_vm2, %v10599_v44  ;;  %7666 = vmatprep.mubr.msk.bf16.mxu1 %vm8065_vm2, %v10599_v44 }
 0x281   : > { %v9356_v50 = vpop.f32.mrb[204].mxu0  ;;  %v9358_v1 = vpop.f32.mrb[204].mxu1 }
 0x282   : > { %10748 = vst [vmem:[#allocation158_spill] sm:$0xff] %v9356_v50  ;;  %10749 = vst [vmem:[#allocation159_spill] sm:$0xff] %v9358_v1  ;;  %v7092_v38 = vpop.f32.mrb[205].mxu0  ;;  %v7324_v20 = vpop.f32.mrb[205].mxu1 }
 0x283   : > { %v9363_v8 = vpop.f32.mrb[206].mxu0  ;;  %v9366_v14 = vpop.f32.mrb[206].mxu1 }
 0x284   : > { %10750 = vst [vmem:[#allocation160_spill] sm:$0xff] %v9363_v8  ;;  %10751 = vst [vmem:[#allocation161_spill] sm:$0xff] %v9366_v14  ;;  %v7093_v32 = vpop.f32.mrb[207].mxu0  ;;  %v7325_v2 = vpop.f32.mrb[207].mxu1 }
 0x285   : > { %v7983_v32 = vld [vmem:[%s8114_s21 + $0x438] sm:$0xff]  }
 0x286   : > { %7435 = vmatmul.mubr.msk.bf16.gmra.mrb[56].mxu0 %vm583_vm3, %v7981_v56  ;;  %7667 = vmatmul.mubr.msk.bf16.gmra.mrb[56].mxu1 %vm583_vm3, %v7982_v36  ;;  %v7984_v36 = vld [vmem:[%s8114_s21 + $0x5fc] sm:$0xff]  }
 0x287   : > { %7438 = vmatprep.mubr.msk.bf16.mxu0 %vm8065_vm2, %v10599_v44  ;;  %7670 = vmatprep.mubr.msk.bf16.mxu1 %vm8065_vm2, %v10599_v44 }
 0x289   : > { %v9376_v20 = vpop.f32.mrb[208].mxu0  ;;  %v9378_v38 = vpop.f32.mrb[208].mxu1 }
 0x28a   : > { %10752 = vst [vmem:[#allocation162_spill] sm:$0xff] %v9376_v20  ;;  %10753 = vst [vmem:[#allocation163_spill] sm:$0xff] %v9378_v38  ;;  %v7096_v26 = vpop.f32.mrb[209].mxu0  ;;  %v7328_v13 = vpop.f32.mrb[209].mxu1 }
 0x28b   : > { %v9383_v56 = vpop.f32.mrb[210].mxu0  ;;  %v9386_v14 = vpop.f32.mrb[210].mxu1 }
 0x28c   : > { %10754 = vst [vmem:[#allocation164_spill] sm:$0xff] %v9383_v56  ;;  %10755 = vst [vmem:[#allocation165_spill] sm:$0xff] %v9386_v14  ;;  %v7097_v8 = vpop.f32.mrb[211].mxu0  ;;  %v7329_v50 = vpop.f32.mrb[211].mxu1 }
 0x28d   : > { %v7985_v8 = vld [vmem:[%s8114_s21 + $0x440] sm:$0xff]  }
 0x28e   : > { %7439 = vmatmul.mubr.msk.bf16.gmra.mrb[60].mxu0 %vm583_vm3, %v7983_v32  ;;  %7671 = vmatmul.mubr.msk.bf16.gmra.mrb[60].mxu1 %vm583_vm3, %v7984_v36  ;;  %v7986_v36 = vld [vmem:[%s8114_s21 + $0x604] sm:$0xff]  }
 0x28f   : > { %7442 = vmatprep.mubr.msk.bf16.mxu0 %vm8065_vm2, %v10599_v44  ;;  %7674 = vmatprep.mubr.msk.bf16.mxu1 %vm8065_vm2, %v10599_v44 }
 0x291   : > { %v9396_v13 = vpop.f32.mrb[212].mxu0  ;;  %v9398_v26 = vpop.f32.mrb[212].mxu1 }
 0x292   : > { %10756 = vst [vmem:[#allocation166_spill] sm:$0xff] %v9396_v13  ;;  %10757 = vst [vmem:[#allocation167_spill] sm:$0xff] %v9398_v26  ;;  %v7100_v2 = vpop.f32.mrb[213].mxu0  ;;  %v7332_v1 = vpop.f32.mrb[213].mxu1 }
 0x293   : > { %v9403_v32 = vpop.f32.mrb[214].mxu0  ;;  %v9406_v14 = vpop.f32.mrb[214].mxu1 }
 0x294   : > { %10758 = vst [vmem:[#allocation168_spill] sm:$0xff] %v9403_v32  ;;  %10759 = vst [vmem:[#allocation169_spill] sm:$0xff] %v9406_v14  ;;  %v7101_v56 = vpop.f32.mrb[215].mxu0  ;;  %v7333_v20 = vpop.f32.mrb[215].mxu1 }
 0x295   : > { %v7987_v56 = vld [vmem:[%s8114_s21 + $0x448] sm:$0xff]  }
 0x296   : > { %7443 = vmatmul.mubr.msk.bf16.gmra.mrb[64].mxu0 %vm583_vm3, %v7985_v8  ;;  %7675 = vmatmul.mubr.msk.bf16.gmra.mrb[64].mxu1 %vm583_vm3, %v7986_v36  ;;  %v7988_v36 = vld [vmem:[%s8114_s21 + $0x60c] sm:$0xff]  }
 0x297   : > { %7446 = vmatprep.mubr.msk.bf16.mxu0 %vm8065_vm2, %v10599_v44  ;;  %7678 = vmatprep.mubr.msk.bf16.mxu1 %vm8065_vm2, %v10599_v44 }
 0x299   : > { %v9416_v1 = vpop.f32.mrb[216].mxu0  ;;  %v9418_v2 = vpop.f32.mrb[216].mxu1 }
 0x29a   : > { %10760 = vst [vmem:[#allocation170_spill] sm:$0xff] %v9416_v1  ;;  %10761 = vst [vmem:[#allocation171_spill] sm:$0xff] %v9418_v2  ;;  %v7104_v50 = vpop.f32.mrb[217].mxu0  ;;  %v7336_v38 = vpop.f32.mrb[217].mxu1 }
 0x29b   : > { %v9423_v8 = vpop.f32.mrb[218].mxu0  ;;  %v9426_v14 = vpop.f32.mrb[218].mxu1 }
 0x29c   : > { %10762 = vst [vmem:[#allocation172_spill] sm:$0xff] %v9423_v8  ;;  %10763 = vst [vmem:[#allocation173_spill] sm:$0xff] %v9426_v14  ;;  %v7105_v32 = vpop.f32.mrb[219].mxu0  ;;  %v7337_v13 = vpop.f32.mrb[219].mxu1 }
 0x29d   : > { %v7989_v32 = vld [vmem:[%s8114_s21 + $0x450] sm:$0xff]  }
 0x29e   : > { %7447 = vmatmul.mubr.msk.bf16.gmra.mrb[68].mxu0 %vm583_vm3, %v7987_v56  ;;  %7679 = vmatmul.mubr.msk.bf16.gmra.mrb[68].mxu1 %vm583_vm3, %v7988_v36  ;;  %v7990_v36 = vld [vmem:[%s8114_s21 + $0x614] sm:$0xff]  }
 0x29f   : > { %7450 = vmatprep.mubr.msk.bf16.mxu0 %vm8065_vm2, %v10599_v44  ;;  %7682 = vmatprep.mubr.msk.bf16.mxu1 %vm8065_vm2, %v10599_v44 }
 0x2a1   : > { %v9436_v38 = vpop.f32.mrb[220].mxu0  ;;  %v9438_v50 = vpop.f32.mrb[220].mxu1 }
 0x2a2   : > { %10764 = vst [vmem:[#allocation174_spill] sm:$0xff] %v9436_v38  ;;  %10765 = vst [vmem:[#allocation175_spill] sm:$0xff] %v9438_v50  ;;  %v7108_v20 = vpop.f32.mrb[221].mxu0  ;;  %v7340_v26 = vpop.f32.mrb[221].mxu1  ;;  %v10770_v38 = vmax.f32 %v8336_v61, %v8338_v62 }
 0x2a3   : > { %v9443_v56 = vpop.f32.mrb[222].mxu0  ;;  %v9446_v14 = vpop.f32.mrb[222].mxu1 }
 0x2a4   : > { %10766 = vst [vmem:[#allocation176_spill] sm:$0xff] %v9443_v56  ;;  %10767 = vst [vmem:[#allocation177_spill] sm:$0xff] %v9446_v14  ;;  %v7109_v8 = vpop.f32.mrb[223].mxu0  ;;  %v7341_v1 = vpop.f32.mrb[223].mxu1 }
 0x2a5   : > { %v7991_v8 = vld [vmem:[%s8114_s21 + $0x458] sm:$0xff]  }
 0x2a6   : > { %7451 = vmatmul.mubr.msk.bf16.gmra.mrb[72].mxu0 %vm583_vm3, %v7989_v32  ;;  %7683 = vmatmul.mubr.msk.bf16.gmra.mrb[72].mxu1 %vm583_vm3, %v7990_v36  ;;  %v7992_v36 = vld [vmem:[%s8114_s21 + $0x61c] sm:$0xff]  }
 0x2a7   : > { %7454 = vmatprep.mubr.msk.bf16.mxu0 %vm8065_vm2, %v10599_v44  ;;  %7686 = vmatprep.mubr.msk.bf16.mxu1 %vm8065_vm2, %v10599_v44 }
 0x2a9   : > { %v9456_v26 = vpop.f32.mrb[224].mxu0  ;;  %v9458_v20 = vpop.f32.mrb[224].mxu1 }
 0x2aa   : > { %10768 = vst [vmem:[#allocation178_spill] sm:$0xff] %v9456_v26  ;;  %10769 = vst [vmem:[#allocation179_spill] sm:$0xff] %v9458_v20  ;;  %v7112_v13 = vpop.f32.mrb[225].mxu0  ;;  %v7344_v2 = vpop.f32.mrb[225].mxu1 }
 0x2ab   : > { %v1247_v32 = vpop.f32.mrb[226].mxu0  ;;  %v2303_v14 = vpop.f32.mrb[226].mxu1 }
 0x2ac   : > { %v7113_v56 = vpop.f32.mrb[227].mxu0  ;;  %v7345_v50 = vpop.f32.mrb[227].mxu1  ;;  %v7993_v32 = vld [vmem:[%s8114_s21 + $0x460] sm:$0xff]  }
 0x2ad   : > { %v7994_v56 = vld [vmem:[%s8114_s21 + $0x624] sm:$0xff]   ;;  %v9475_v50 = vld [vmem:[%s10409_s2] ss:$0 sm:$0xff] }
 0x2ae   : > { %7455 = vmatmul.mubr.msk.bf16.gmra.mrb[76].mxu0 %vm583_vm3, %v7991_v8  ;;  %7687 = vmatmul.mubr.msk.bf16.gmra.mrb[76].mxu1 %vm583_vm3, %v7992_v36 }
 0x2af   : > { %7458 = vmatprep.mubr.msk.bf16.mxu0 %vm8065_vm2, %v10599_v44  ;;  %7690 = vmatprep.mubr.msk.bf16.mxu1 %vm8065_vm2, %v10599_v44 }
 0x2b1   : > { %v2908_v13 = vpop.f32.mrb[228].mxu0  ;;  %v3964_v1 = vpop.f32.mrb[228].mxu1 }
 0x2b2   : > { %v7352_v2 = vpop.f32.mrb[229].mxu0  ;;  %v4531_v20 = vmax.f32 %v2908_v13, %v3964_v1  ;;  %v7584_v26 = vpop.f32.mrb[229].mxu1  ;;  %v10771_v1 = vmax.f32 %v8343_v4, %v8346_v6 }
 0x2b3   : > { %v2911_v14 = vpop.f32.mrb[230].mxu0  ;;  %v3967_v8 = vpop.f32.mrb[230].mxu1 }
 0x2b4   : > { %v7353_v36 = vpop.f32.mrb[231].mxu0  ;;  %v4644_v37 = vmax.f32 %v10770_v38, %v4531_v20  ;;  %v4532_v63 = vmax.f32 %v2911_v14, %v3967_v8  ;;  %v7585_v25 = vpop.f32.mrb[231].mxu1  ;;  %v7996_v14 = vld [vmem:[%s8114_s21 + $0x62c] sm:$0xff]  }
 0x2b6   : > { %7459 = vmatmul.mubr.msk.bf16.gmra.mrb[80].mxu0 %vm583_vm3, %v7993_v32  ;;  %v4764_v26 = vadd.f32 %v9475_v50, %v4644_v37  ;;  %v4645_v13 = vmax.f32 %v10771_v1, %v4532_v63  ;;  %7691 = vmatmul.mubr.msk.bf16.gmra.mrb[80].mxu1 %vm583_vm3, %v7994_v56  ;;  %v7995_v63 = vld [vmem:[%s8114_s21 + $0x468] sm:$0xff]  }
 0x2b7   : > { %7462 = vmatprep.mubr.msk.bf16.mxu0 %vm8065_vm2, %v10599_v44  ;;  %7694 = vmatprep.mubr.msk.bf16.mxu1 %vm8065_vm2, %v10599_v44 }
 0x2b8   : > { %v4877_v61 = vmax.f32 %v4764_v26, 0.0  ;;  %v4765_v62 = vadd.f32 %v9475_v50, %v4645_v13  ;;  %v10772_v26 = vmax.f32 %v8356_v10, %v8358_v11 }
 0x2b9   : > { %v2916_v25 = vpop.f32.mrb[232].mxu0  ;;  %v3972_v4 = vpop.f32.mrb[232].mxu1 }
 0x2ba   : > { %v7356_v6 = vpop.f32.mrb[233].mxu0  ;;  %v6533_v37 = vpack.c.bf16 %v4877_v61, %v4877_v61  ;;  %v4878_v38 = vmax.f32 %v4765_v62, 0.0  ;;  %v4533_v20 = vmax.f32 %v2916_v25, %v3972_v4  ;;  %v7588_v2 = vpop.f32.mrb[233].mxu1  ;;  %v10773_v62 = vmax.f32 %v8363_v16, %v8366_v18 }
 0x2bb   : > { %v2919_v32 = vpop.f32.mrb[234].mxu0  ;;  %v3975_v56 = vpop.f32.mrb[234].mxu1 }
 0x2bc   : > { %v7357_v8 = vpop.f32.mrb[235].mxu0  ;;  %5444 = vst.msk [vmem:[%s9495_s27] sm:$0xf] %vm5443_vm4, %v6533_v37  ;;  %v6534_v36 = vpack.c.bf16 %v4878_v38, %v4878_v38  ;;  %v4646_v1 = vmax.f32 %v10772_v26, %v4533_v20  ;;  %v4534_v13 = vmax.f32 %v2919_v32, %v3975_v56  ;;  %v7589_v6 = vpop.f32.mrb[235].mxu1  ;;  %v7997_v38 = vld [vmem:[%s8114_s21 + $0x470] sm:$0xff]   ;;  %v10774_v26 = vmax.f32 %v8376_v22, %v8378_v23 }
 0x2be   : > { %7463 = vmatmul.mubr.msk.bf16.gmra.mrb[84].mxu0 %vm583_vm3, %v7995_v63  ;;  %5445 = vst.msk [vmem:[%s9495_s27 + $0x4] sm:$0xf] %vm5443_vm4, %v6534_v36  ;;  %v4766_v61 = vadd.f32 %v9475_v50, %v4646_v1  ;;  %v4647_v25 = vmax.f32 %v10773_v62, %v4534_v13  ;;  %7695 = vmatmul.mubr.msk.bf16.gmra.mrb[84].mxu1 %vm583_vm3, %v7996_v14  ;;  %v7998_v14 = vld [vmem:[%s8114_s21 + $0x634] sm:$0xff]  }
 0x2bf   : > { %7466 = vmatprep.mubr.msk.bf16.mxu0 %vm8065_vm2, %v10599_v44  ;;  %7698 = vmatprep.mubr.msk.bf16.mxu1 %vm8065_vm2, %v10599_v44  ;;  %v10775_v62 = vmax.f32 %v8383_v28, %v8386_v30 }
 0x2c0   : > { %v4879_v10 = vmax.f32 %v4766_v61, 0.0  ;;  %v4767_v11 = vadd.f32 %v9475_v50, %v4647_v25 }
 0x2c1   : > { %v2924_v4 = vpop.f32.mrb[236].mxu0  ;;  %v3980_v63 = vpop.f32.mrb[236].mxu1 }
 0x2c2   : > { %v7360_v37 = vpop.f32.mrb[237].mxu0  ;;  %v6535_v16 = vpack.c.bf16 %v4879_v10, %v4879_v10  ;;  %v4880_v18 = vmax.f32 %v4767_v11, 0.0  ;;  %v4535_v20 = vmax.f32 %v2924_v4, %v3980_v63  ;;  %v7592_v2 = vpop.f32.mrb[237].mxu1  ;;  %v7999_v63 = vld [vmem:[%s8114_s21 + $0x478] sm:$0xff]  }
 0x2c3   : > { %v2927_v32 = vpop.f32.mrb[238].mxu0  ;;  %v3983_v56 = vpop.f32.mrb[238].mxu1 }
 0x2c4   : > { %v7361_v8 = vpop.f32.mrb[239].mxu0  ;;  %5446 = vst.msk [vmem:[%s9495_s27 + $0x8] sm:$0xf] %vm5443_vm4, %v6535_v16  ;;  %v6536_v36 = vpack.c.bf16 %v4880_v18, %v4880_v18  ;;  %v4648_v1 = vmax.f32 %v10774_v26, %v4535_v20  ;;  %v4536_v13 = vmax.f32 %v2927_v32, %v3983_v56  ;;  %v7593_v6 = vpop.f32.mrb[239].mxu1  ;;  %v8000_v18 = vld [vmem:[%s8114_s21 + $0x63c] sm:$0xff]  }
 0x2c6   : > { %7467 = vmatmul.mubr.msk.bf16.gmra.mrb[88].mxu0 %vm583_vm3, %v7997_v38  ;;  %5447 = vst.msk [vmem:[%s9495_s27 + $0xc] sm:$0xf] %vm5443_vm4, %v6536_v36  ;;  %v4768_v61 = vadd.f32 %v9475_v50, %v4648_v1  ;;  %v4649_v25 = vmax.f32 %v10775_v62, %v4536_v13  ;;  %7699 = vmatmul.mubr.msk.bf16.gmra.mrb[88].mxu1 %vm583_vm3, %v7998_v14 }
 0x2c7   : > { %7470 = vmatprep.mubr.msk.bf16.mxu0 %vm8065_vm2, %v10599_v44  ;;  %7702 = vmatprep.mubr.msk.bf16.mxu1 %vm8065_vm2, %v10599_v44  ;;  %v10776_v14 = vmax.f32 %v8396_v34, %v8398_v35  ;;  %v10777_v1 = vmax.f32 %v8403_v40, %v8406_v42 }
 0x2c8   : > { %v4881_v22 = vmax.f32 %v4768_v61, 0.0  ;;  %v4769_v23 = vadd.f32 %v9475_v50, %v4649_v25  ;;  %v8001_v25 = vld [vmem:[%s8114_s21 + $0x480] sm:$0xff]  }
 0x2c9   : > { %v2932_v10 = vpop.f32.mrb[240].mxu0  ;;  %v3988_v11 = vpop.f32.mrb[240].mxu1 }
 0x2ca   : > { %v7364_v4 = vpop.f32.mrb[241].mxu0  ;;  %v6537_v28 = vpack.c.bf16 %v4881_v22, %v4881_v22  ;;  %v4882_v30 = vmax.f32 %v4769_v23, 0.0  ;;  %v4537_v37 = vmax.f32 %v2932_v10, %v3988_v11  ;;  %v7596_v38 = vpop.f32.mrb[241].mxu1  ;;  %v8002_v11 = vld [vmem:[%s8114_s21 + $0x644] sm:$0xff]  }
 0x2cb   : > { %v2935_v16 = vpop.f32.mrb[242].mxu0  ;;  %v3991_v20 = vpop.f32.mrb[242].mxu1 }
 0x2cc   : > { %v7365_v2 = vpop.f32.mrb[243].mxu0  ;;  %5448 = vst.msk [vmem:[%s9495_s27 + $0x10] sm:$0xf] %vm5443_vm4, %v6537_v28  ;;  %v6538_v32 = vpack.c.bf16 %v4882_v30, %v4882_v30  ;;  %v4650_v56 = vmax.f32 %v10776_v14, %v4537_v37  ;;  %v4538_v8 = vmax.f32 %v2935_v16, %v3991_v20  ;;  %v7597_v36 = vpop.f32.mrb[243].mxu1  ;;  %v10778_v30 = vmax.f32 %v8416_v46, %v8418_v47 }
 0x2cd   : > { %v10779_v20 = vmax.f32 %v8423_v52, %v8426_v54 }
 0x2ce   : > { %7471 = vmatmul.mubr.msk.bf16.gmra.mrb[92].mxu0 %vm583_vm3, %v7999_v63  ;;  %5449 = vst.msk [vmem:[%s9495_s27 + $0x14] sm:$0xf] %vm5443_vm4, %v6538_v32  ;;  %v4770_v26 = vadd.f32 %v9475_v50, %v4650_v56  ;;  %v4651_v13 = vmax.f32 %v10777_v1, %v4538_v8  ;;  %7703 = vmatmul.mubr.msk.bf16.gmra.mrb[92].mxu1 %vm583_vm3, %v8000_v18  ;;  %v8003_v8 = vld [vmem:[%s8114_s21 + $0x488] sm:$0xff]  }
 0x2cf   : > { %7474 = vmatprep.mubr.msk.bf16.mxu0 %vm8065_vm2, %v10599_v44  ;;  %7706 = vmatprep.mubr.msk.bf16.mxu1 %vm8065_vm2, %v10599_v44 }
 0x2d0   : > { %v4883_v34 = vmax.f32 %v4770_v26, 0.0  ;;  %v4771_v35 = vadd.f32 %v9475_v50, %v4651_v13  ;;  %v8004_v13 = vld [vmem:[%s8114_s21 + $0x64c] sm:$0xff]  }
 0x2d1   : > { %v2940_v6 = vpop.f32.mrb[244].mxu0  ;;  %v3996_v61 = vpop.f32.mrb[244].mxu1 }
 0x2d2   : > { %v7368_v62 = vpop.f32.mrb[245].mxu0  ;;  %v6539_v40 = vpack.c.bf16 %v4883_v34, %v4883_v34  ;;  %v4884_v42 = vmax.f32 %v4771_v35, 0.0  ;;  %v4539_v22 = vmax.f32 %v2940_v6, %v3996_v61  ;;  %v7600_v23 = vpop.f32.mrb[245].mxu1  ;;  %v10780_v61 = vmax.f32 %v8436_v58, %v8438_v59 }
 0x2d3   : > { %v2943_v10 = vpop.f32.mrb[246].mxu0  ;;  %v3999_v4 = vpop.f32.mrb[246].mxu1 }
 0x2d4   : > { %v7369_v63 = vpop.f32.mrb[247].mxu0  ;;  %5450 = vst.msk [vmem:[%s9495_s27 + $0x18] sm:$0xf] %vm5443_vm4, %v6539_v40  ;;  %v6540_v28 = vpack.c.bf16 %v4884_v42, %v4884_v42  ;;  %v4652_v37 = vmax.f32 %v10778_v30, %v4539_v22  ;;  %v4540_v38 = vmax.f32 %v2943_v10, %v3999_v4  ;;  %v7601_v16 = vpop.f32.mrb[247].mxu1  ;;  %v10781_v22 = vmax.f32 %v8443_v5, %v8446_v9 }
 0x2d5   : > { %v8005_v63 = vld [vmem:[%s8114_s21 + $0x490] sm:$0xff]  }
 0x2d6   : > { %7475 = vmatmul.mubr.msk.bf16.gmra.mrb[96].mxu0 %vm583_vm3, %v8001_v25  ;;  %5451 = vst.msk [vmem:[%s9495_s27 + $0x1c] sm:$0xf] %vm5443_vm4, %v6540_v28  ;;  %v4772_v18 = vadd.f32 %v9475_v50, %v4652_v37  ;;  %v4653_v2 = vmax.f32 %v10779_v20, %v4540_v38  ;;  %7707 = vmatmul.mubr.msk.bf16.gmra.mrb[96].mxu1 %vm583_vm3, %v8002_v11  ;;  %v8006_v38 = vld [vmem:[%s8114_s21 + $0x654] sm:$0xff]  }
 0x2d7   : > { %7478 = vmatprep.mubr.msk.bf16.mxu0 %vm8065_vm2, %v10599_v44  ;;  %7710 = vmatprep.mubr.msk.bf16.mxu1 %vm8065_vm2, %v10599_v44 }
 0x2d8   : > { %v4885_v46 = vmax.f32 %v4772_v18, 0.0  ;;  %v4773_v47 = vadd.f32 %v9475_v50, %v4653_v2  ;;  %v10782_v2 = vmax.f32 %v8456_v17, %v8458_v19 }
 0x2d9   : > { %v2948_v32 = vpop.f32.mrb[248].mxu0  ;;  %v4004_v14 = vpop.f32.mrb[248].mxu1 }
 0x2da   : > { %v7372_v56 = vpop.f32.mrb[249].mxu0  ;;  %v6541_v52 = vpack.c.bf16 %v4885_v46, %v4885_v46  ;;  %v4886_v54 = vmax.f32 %v4773_v47, 0.0  ;;  %v4541_v36 = vmax.f32 %v2948_v32, %v4004_v14  ;;  %v7604_v26 = vpop.f32.mrb[249].mxu1 }
 0x2db   : > { %v2951_v1 = vpop.f32.mrb[250].mxu0  ;;  %v4007_v34 = vpop.f32.mrb[250].mxu1  ;;  %v10783_v56 = vmax.f32 %v8463_v29, %v8466_v33  ;;  %v8007_v26 = vld [vmem:[%s8114_s21 + $0x498] sm:$0xff]  }
 0x2dc   : > { %v7373_v35 = vpop.f32.mrb[251].mxu0  ;;  %5452 = vst.msk [vmem:[%s9495_s27 + $0x20] sm:$0xf] %vm5443_vm4, %v6541_v52  ;;  %v6542_v6 = vpack.c.bf16 %v4886_v54, %v4886_v54  ;;  %v4654_v62 = vmax.f32 %v10780_v61, %v4541_v36  ;;  %v4542_v25 = vmax.f32 %v2951_v1, %v4007_v34  ;;  %v7605_v40 = vpop.f32.mrb[251].mxu1 }
 0x2dd   : > { %v8008_v35 = vld [vmem:[%s8114_s21 + $0x65c] sm:$0xff]  }
 0x2de   : > { %7479 = vmatmul.mubr.msk.bf16.gmra.mrb[100].mxu0 %vm583_vm3, %v8003_v8  ;;  %5453 = vst.msk [vmem:[%s9495_s27 + $0x24] sm:$0xf] %vm5443_vm4, %v6542_v6  ;;  %v4774_v42 = vadd.f32 %v9475_v50, %v4654_v62  ;;  %v4655_v23 = vmax.f32 %v10781_v22, %v4542_v25  ;;  %7711 = vmatmul.mubr.msk.bf16.gmra.mrb[100].mxu1 %vm583_vm3, %v8004_v13 }
 0x2df   : > { %7482 = vmatprep.mubr.msk.bf16.mxu0 %vm8065_vm2, %v10599_v44  ;;  %7714 = vmatprep.mubr.msk.bf16.mxu1 %vm8065_vm2, %v10599_v44  ;;  %v10784_v25 = vmax.f32 %v8476_v41, %v8478_v43 }
 0x2e0   : > { %v4887_v58 = vmax.f32 %v4774_v42, 0.0  ;;  %v4775_v59 = vadd.f32 %v9475_v50, %v4655_v23 }
 0x2e1   : > { %v2956_v10 = vpop.f32.mrb[252].mxu0  ;;  %v4012_v11 = vpop.f32.mrb[252].mxu1 }
 0x2e2   : > { %v7376_v4 = vpop.f32.mrb[253].mxu0  ;;  %v6543_v5 = vpack.c.bf16 %v4887_v58, %v4887_v58  ;;  %v4888_v9 = vmax.f32 %v4775_v59, 0.0  ;;  %v4543_v28 = vmax.f32 %v2956_v10, %v4012_v11  ;;  %v7608_v30 = vpop.f32.mrb[253].mxu1  ;;  %v10785_v58 = vmax.f32 %v8483_v53, %v8486_v57 }
 0x2e3   : > { %v2959_v37 = vpop.f32.mrb[254].mxu0  ;;  %v4015_v16 = vpop.f32.mrb[254].mxu1  ;;  %v8010_v30 = vld [vmem:[%s8114_s21 + $0x664] sm:$0xff]  }
 0x2e4   : > { %v7377_v18 = vpop.f32.mrb[255].mxu0  ;;  %5454 = vst.msk [vmem:[%s9495_s27 + $0x28] sm:$0xf] %vm5443_vm4, %v6543_v5  ;;  %v6544_v20 = vpack.c.bf16 %v4888_v9, %v4888_v9  ;;  %v4656_v46 = vmax.f32 %v10782_v2, %v4543_v28  ;;  %v4544_v47 = vmax.f32 %v2959_v37, %v4015_v16  ;;  %v7609_v32 = vpop.f32.mrb[255].mxu1 }
 0x2e5   : > { %v10786_v18 = vmax.f32 %v8496_v7, %v8498_v12  ;;  %v10787_v32 = vmax.f32 %v8503_v31, %v8506_v39 }
 0x2e6   : > { %7483 = vmatmul.mubr.msk.bf16.gmra.mrb[104].mxu0 %vm583_vm3, %v8005_v63  ;;  %5455 = vst.msk [vmem:[%s9495_s27 + $0x2c] sm:$0xf] %vm5443_vm4, %v6544_v20  ;;  %v4776_v14 = vadd.f32 %v9475_v50, %v4656_v46  ;;  %v4657_v8 = vmax.f32 %v10783_v56, %v4544_v47  ;;  %7715 = vmatmul.mubr.msk.bf16.gmra.mrb[104].mxu1 %vm583_vm3, %v8006_v38  ;;  %v8009_v63 = vld [vmem:[%s8114_s21 + $0x4a0] sm:$0xff]  }
 0x2e7   : > { %7486 = vmatprep.mubr.msk.bf16.mxu0 %vm8065_vm2, %v10599_v44  ;;  %7718 = vmatprep.mubr.msk.bf16.mxu1 %vm8065_vm2, %v10599_v44 }
 0x2e8   : > { %v4889_v17 = vmax.f32 %v4776_v14, 0.0  ;;  %v4777_v19 = vadd.f32 %v9475_v50, %v4657_v8 }
 0x2e9   : > { %v2964_v52 = vpop.f32.mrb[0].mxu0  ;;  %v4020_v54 = vpop.f32.mrb[0].mxu1 }
 0x2ea   : > { %v7380_v36 = vpop.f32.mrb[1].mxu0  ;;  %v6545_v29 = vpack.c.bf16 %v4889_v17, %v4889_v17  ;;  %v4890_v33 = vmax.f32 %v4777_v19, 0.0  ;;  %v4545_v1 = vmax.f32 %v2964_v52, %v4020_v54  ;;  %v7612_v13 = vpop.f32.mrb[1].mxu1  ;;  %v8011_v19 = vld [vmem:[%s8114_s21 + $0x4a8] sm:$0xff]  }
 0x2eb   : > { %v2967_v34 = vpop.f32.mrb[2].mxu0  ;;  %v4023_v6 = vpop.f32.mrb[2].mxu1  ;;  %v10788_v13 = vmax.f32 %v8516_v55, %v8518_v60 }
 0x2ec   : > { %v7381_v61 = vpop.f32.mrb[3].mxu0  ;;  %5456 = vst.msk [vmem:[%s9495_s27 + $0x30] sm:$0xf] %vm5443_vm4, %v6545_v29  ;;  %v6546_v62 = vpack.c.bf16 %v4890_v33, %v4890_v33  ;;  %v4658_v40 = vmax.f32 %v10784_v25, %v4545_v1  ;;  %v4546_v42 = vmax.f32 %v2967_v34, %v4023_v6  ;;  %v7613_v22 = vpop.f32.mrb[3].mxu1 }
 0x2ee   : > { %7487 = vmatmul.mubr.msk.bf16.gmra.mrb[108].mxu0 %vm583_vm3, %v8007_v26  ;;  %5457 = vst.msk [vmem:[%s9495_s27 + $0x34] sm:$0xf] %vm5443_vm4, %v6546_v62  ;;  %v4778_v23 = vadd.f32 %v9475_v50, %v4658_v40  ;;  %v4659_v59 = vmax.f32 %v10785_v58, %v4546_v42  ;;  %7719 = vmatmul.mubr.msk.bf16.gmra.mrb[108].mxu1 %vm583_vm3, %v8008_v35  ;;  %v8012_v26 = vld [vmem:[%s8114_s21 + $0x66c] sm:$0xff]  }
 0x2ef   : > { %7490 = vmatprep.mubr.msk.bf16.mxu0 %vm8065_vm2, %v10599_v44  ;;  %7722 = vmatprep.mubr.msk.bf16.mxu1 %vm8065_vm2, %v10599_v44  ;;  %v10789_v62 = vmax.f32 %v8523_v21, %v8526_v51 }
 0x2f0   : > { %v4891_v41 = vmax.f32 %v4778_v23, 0.0  ;;  %v4779_v43 = vadd.f32 %v9475_v50, %v4659_v59  ;;  %v8013_v23 = vld [vmem:[%s8114_s21 + $0x4b0] sm:$0xff]  }
 0x2f1   : > { %v2972_v10 = vpop.f32.mrb[4].mxu0  ;;  %v4028_v11 = vpop.f32.mrb[4].mxu1 }
 0x2f2   : > { %v7384_v4 = vpop.f32.mrb[5].mxu0  ;;  %v6547_v53 = vpack.c.bf16 %v4891_v41, %v4891_v41  ;;  %v4892_v57 = vmax.f32 %v4779_v43, 0.0  ;;  %v4547_v5 = vmax.f32 %v2972_v10, %v4028_v11  ;;  %v7616_v9 = vpop.f32.mrb[5].mxu1  ;;  %v8014_v43 = vld [vmem:[%s8114_s21 + $0x674] sm:$0xff]  }
 0x2f3   : > { %v2975_v28 = vpop.f32.mrb[6].mxu0  ;;  %v4031_v37 = vpop.f32.mrb[6].mxu1 }
 0x2f4   : > { %v7385_v38 = vpop.f32.mrb[7].mxu0  ;;  %5458 = vst.msk [vmem:[%s9495_s27 + $0x38] sm:$0xf] %vm5443_vm4, %v6547_v53  ;;  %v6548_v16 = vpack.c.bf16 %v4892_v57, %v4892_v57  ;;  %v4660_v20 = vmax.f32 %v10786_v18, %v4547_v5  ;;  %v4548_v2 = vmax.f32 %v2975_v28, %v4031_v37  ;;  %v7617_v46 = vpop.f32.mrb[7].mxu1  ;;  %v10791_v28 = vmax.f32 %v8543_v15, %v8546_v49  ;;  %v8015_v18 = vld [vmem:[%s8114_s21 + $0x4b8] sm:$0xff]  }
 0x2f6   : > { %7491 = vmatmul.mubr.msk.bf16.gmra.mrb[112].mxu0 %vm583_vm3, %v8009_v63  ;;  %5459 = vst.msk [vmem:[%s9495_s27 + $0x3c] sm:$0xf] %vm5443_vm4, %v6548_v16  ;;  %v4780_v47 = vadd.f32 %v9475_v50, %v4660_v20  ;;  %v4661_v14 = vmax.f32 %v10787_v32, %v4548_v2  ;;  %7723 = vmatmul.mubr.msk.bf16.gmra.mrb[112].mxu1 %vm583_vm3, %v8010_v30 }
 0x2f7   : > { %7494 = vmatprep.mubr.msk.bf16.mxu0 %vm8065_vm2, %v10599_v44  ;;  %7726 = vmatprep.mubr.msk.bf16.mxu1 %vm8065_vm2, %v10599_v44  ;;  %v10790_v63 = vmax.f32 %v8536_v3, %v8538_v45 }
 0x2f8   : > { %v4893_v7 = vmax.f32 %v4780_v47, 0.0  ;;  %v4781_v12 = vadd.f32 %v9475_v50, %v4661_v14  ;;  %v8016_v47 = vld [vmem:[%s8114_s21 + $0x67c] sm:$0xff]  }
 0x2f9   : > { %v2980_v56 = vpop.f32.mrb[8].mxu0  ;;  %v4036_v8 = vpop.f32.mrb[8].mxu1 }
 0x2fa   : > { %v7388_v17 = vpop.f32.mrb[9].mxu0  ;;  %v6549_v31 = vpack.c.bf16 %v4893_v7, %v4893_v7  ;;  %v4894_v39 = vmax.f32 %v4781_v12, 0.0  ;;  %v4549_v52 = vmax.f32 %v2980_v56, %v4036_v8  ;;  %v7620_v54 = vpop.f32.mrb[9].mxu1  ;;  %v10792_v12 = vmax.f32 %v8556_v24, %v8558_v27 }
 0x2fb   : > { %v2983_v36 = vpop.f32.mrb[10].mxu0  ;;  %v4039_v29 = vpop.f32.mrb[10].mxu1 }
 0x2fc   : > { %v7389_v33 = vpop.f32.mrb[11].mxu0  ;;  %5460 = vst.msk [vmem:[%s9495_s27 + $0x40] sm:$0xf] %vm5443_vm4, %v6549_v31  ;;  %v6550_v1 = vpack.c.bf16 %v4894_v39, %v4894_v39  ;;  %v4662_v34 = vmax.f32 %v10788_v13, %v4549_v52  ;;  %v4550_v35 = vmax.f32 %v2983_v36, %v4039_v29  ;;  %v7621_v6 = vpop.f32.mrb[11].mxu1  ;;  %v10793_v31 = vmax.f32 %v8563_v48, %v8566_v0  ;;  %v8018_v13 = vld [vmem:[%s8114_s21 + $0x684] sm:$0xff]  }
 0x2fe   : > { %7495 = vmatmul.mubr.msk.bf16.gmra.mrb[116].mxu0 %vm583_vm3, %v8011_v19  ;;  %5461 = vst.msk [vmem:[%s9495_s27 + $0x44] sm:$0xf] %vm5443_vm4, %v6550_v1  ;;  %v4782_v61 = vadd.f32 %v9475_v50, %v4662_v34  ;;  %v4663_v25 = vmax.f32 %v10789_v62, %v4550_v35  ;;  %7727 = vmatmul.mubr.msk.bf16.gmra.mrb[116].mxu1 %vm583_vm3, %v8012_v26  ;;  %v8017_v26 = vld [vmem:[%s8114_s21 + $0x4c0] sm:$0xff]   ;;  %v10795_v62 = vld [vmem:[#allocation3_spill] sm:$0xff] }
 0x2ff   : > { %7498 = vmatprep.mubr.msk.bf16.mxu0 %vm8065_vm2, %v10599_v44  ;;  %7730 = vmatprep.mubr.msk.bf16.mxu1 %vm8065_vm2, %v10599_v44 }
 0x300   : > { %v4895_v55 = vmax.f32 %v4782_v61, 0.0  ;;  %v4783_v60 = vadd.f32 %v9475_v50, %v4663_v25  ;;  %v10794_v61 = vld [vmem:[#allocation2_spill] sm:$0xff] }
 0x301   : > { %v2988_v40 = vpop.f32.mrb[12].mxu0  ;;  %v4044_v42 = vpop.f32.mrb[12].mxu1  ;;  %v10796_v25 = vmax.f32 %v10794_v61, %v10795_v62 }
 0x302   : > { %v7392_v22 = vpop.f32.mrb[13].mxu0  ;;  %v6551_v21 = vpack.c.bf16 %v4895_v55, %v4895_v55  ;;  %v4896_v51 = vmax.f32 %v4783_v60, 0.0  ;;  %v4551_v58 = vmax.f32 %v2988_v40, %v4044_v42  ;;  %v7624_v59 = vpop.f32.mrb[13].mxu1 }
 0x303   : > { %v2991_v41 = vpop.f32.mrb[14].mxu0  ;;  %v4047_v10 = vpop.f32.mrb[14].mxu1  ;;  %v10797_v22 = vld [vmem:[#allocation4_spill] sm:$0xff] }
 0x304   : > { %v7393_v11 = vpop.f32.mrb[15].mxu0  ;;  %5462 = vst.msk [vmem:[%s9495_s27 + $0x48] sm:$0xf] %vm5443_vm4, %v6551_v21  ;;  %v6552_v4 = vpack.c.bf16 %v4896_v51, %v4896_v51  ;;  %v4664_v53 = vmax.f32 %v10790_v63, %v4551_v58  ;;  %v4552_v57 = vmax.f32 %v2991_v41, %v4047_v10  ;;  %v7625_v5 = vpop.f32.mrb[15].mxu1 }
 0x305   : > { %v8019_v11 = vld [vmem:[%s8114_s21 + $0x4c8] sm:$0xff]  }
 0x306   : > { %7499 = vmatmul.mubr.msk.bf16.gmra.mrb[120].mxu0 %vm583_vm3, %v8013_v23  ;;  %5463 = vst.msk [vmem:[%s9495_s27 + $0x4c] sm:$0xf] %vm5443_vm4, %v6552_v4  ;;  %v4784_v9 = vadd.f32 %v9475_v50, %v4664_v53  ;;  %v4665_v30 = vmax.f32 %v10791_v28, %v4552_v57  ;;  %7731 = vmatmul.mubr.msk.bf16.gmra.mrb[120].mxu1 %vm583_vm3, %v8014_v43  ;;  %v10798_v23 = vld [vmem:[#allocation5_spill] sm:$0xff] }
 0x307   : > { %7502 = vmatprep.mubr.msk.bf16.mxu0 %vm8065_vm2, %v10599_v44  ;;  %7734 = vmatprep.mubr.msk.bf16.mxu1 %vm8065_vm2, %v10599_v44  ;;  %v10799_v21 = vmax.f32 %v10797_v22, %v10798_v23 }
 0x308   : > { %v4897_v3 = vmax.f32 %v4784_v9, 0.0  ;;  %v4785_v45 = vadd.f32 %v9475_v50, %v4665_v30  ;;  %v8020_v9 = vld [vmem:[%s8114_s21 + $0x68c] sm:$0xff]  }
 0x309   : > { %v2996_v37 = vpop.f32.mrb[16].mxu0  ;;  %v4052_v38 = vpop.f32.mrb[16].mxu1 }
 0x30a   : > { %v7396_v16 = vpop.f32.mrb[17].mxu0  ;;  %v6553_v49 = vpack.c.bf16 %v4897_v3, %v4897_v3  ;;  %v4898_v15 = vmax.f32 %v4785_v45, 0.0  ;;  %v4553_v20 = vmax.f32 %v2996_v37, %v4052_v38  ;;  %v7628_v2 = vpop.f32.mrb[17].mxu1  ;;  %v10800_v45 = vld [vmem:[#allocation6_spill] sm:$0xff]  ;;  %v10801_v37 = vld [vmem:[#allocation7_spill] sm:$0xff] }
 0x30b   : > { %v2999_v46 = vpop.f32.mrb[18].mxu0  ;;  %v4055_v32 = vpop.f32.mrb[18].mxu1  ;;  %v10802_v38 = vmax.f32 %v10800_v45, %v10801_v37  ;;  %v10804_v2 = vld [vmem:[#allocation9_spill] sm:$0xff] }
 0x30c   : > { %v7397_v14 = vpop.f32.mrb[19].mxu0  ;;  %5464 = vst.msk [vmem:[%s9495_s27 + $0x50] sm:$0xf] %vm5443_vm4, %v6553_v49  ;;  %v6554_v7 = vpack.c.bf16 %v4898_v15, %v4898_v15  ;;  %v4666_v56 = vmax.f32 %v10792_v12, %v4553_v20  ;;  %v4554_v8 = vmax.f32 %v2999_v46, %v4055_v32  ;;  %v7629_v17 = vpop.f32.mrb[19].mxu1  ;;  %v10803_v20 = vld [vmem:[#allocation8_spill] sm:$0xff] }
 0x30d   : > { %v10805_v46 = vmax.f32 %v10803_v20, %v10804_v2 }
 0x30e   : > { %7503 = vmatmul.mubr.msk.bf16.gmra.mrb[124].mxu0 %vm583_vm3, %v8015_v18  ;;  %5465 = vst.msk [vmem:[%s9495_s27 + $0x54] sm:$0xf] %vm5443_vm4, %v6554_v7  ;;  %v4786_v19 = vadd.f32 %v9475_v50, %v4666_v56  ;;  %v4667_v39 = vmax.f32 %v10793_v31, %v4554_v8  ;;  %7735 = vmatmul.mubr.msk.bf16.gmra.mrb[124].mxu1 %vm583_vm3, %v8016_v47  ;;  %v8021_v8 = vld [vmem:[%s8114_s21 + $0x4d0] sm:$0xff]  }
 0x30f   : > { %7506 = vmatprep.mubr.msk.bf16.mxu0 %vm8065_vm2, %v10599_v44  ;;  %7738 = vmatprep.mubr.msk.bf16.mxu1 %vm8065_vm2, %v10599_v44 }
 0x310   : > { %v4899_v24 = vmax.f32 %v4786_v19, 0.0  ;;  %v4787_v27 = vadd.f32 %v9475_v50, %v4667_v39 }
 0x311   : > { %v3004_v52 = vpop.f32.mrb[20].mxu0  ;;  %v4060_v54 = vpop.f32.mrb[20].mxu1 }
 0x312   : > { %v7400_v36 = vpop.f32.mrb[21].mxu0  ;;  %v6555_v0 = vpack.c.bf16 %v4899_v24, %v4899_v24  ;;  %v4900_v48 = vmax.f32 %v4787_v27, 0.0  ;;  %v4555_v29 = vmax.f32 %v3004_v52, %v4060_v54  ;;  %v7632_v33 = vpop.f32.mrb[21].mxu1  ;;  %v8022_v27 = vld [vmem:[%s8114_s21 + $0x694] sm:$0xff]  }
 0x313   : > { %v3007_v1 = vpop.f32.mrb[22].mxu0  ;;  %v4063_v34 = vpop.f32.mrb[22].mxu1 }
 0x314   : > { %v7401_v35 = vpop.f32.mrb[23].mxu0  ;;  %5466 = vst.msk [vmem:[%s9495_s27 + $0x58] sm:$0xf] %vm5443_vm4, %v6555_v0  ;;  %v6556_v6 = vpack.c.bf16 %v4900_v48, %v4900_v48  ;;  %v4668_v55 = vmax.f32 %v10796_v25, %v4555_v29  ;;  %v4556_v60 = vmax.f32 %v3007_v1, %v4063_v34  ;;  %v7633_v40 = vpop.f32.mrb[23].mxu1  ;;  %v10807_v0 = vld [vmem:[#allocation11_spill] sm:$0xff]  ;;  %v10809_v34 = vld [vmem:[#allocation12_spill] sm:$0xff] }
 0x315   : > { %v10810_v35 = vld [vmem:[#allocation13_spill] sm:$0xff] }
 0x316   : > { %7507 = vmatmul.mubr.msk.bf16.gmra.mrb[128].mxu0 %vm583_vm3, %v8017_v26  ;;  %5467 = vst.msk [vmem:[%s9495_s27 + $0x5c] sm:$0xf] %vm5443_vm4, %v6556_v6  ;;  %v4788_v42 = vadd.f32 %v9475_v50, %v4668_v55  ;;  %v4669_v51 = vmax.f32 %v10799_v21, %v4556_v60  ;;  %7739 = vmatmul.mubr.msk.bf16.gmra.mrb[128].mxu1 %vm583_vm3, %v8018_v13  ;;  %v10806_v26 = vld [vmem:[#allocation10_spill] sm:$0xff] }
 0x317   : > { %7510 = vmatprep.mubr.msk.bf16.mxu0 %vm8065_vm2, %v10599_v44  ;;  %7742 = vmatprep.mubr.msk.bf16.mxu1 %vm8065_vm2, %v10599_v44  ;;  %v10808_v48 = vmax.f32 %v10806_v26, %v10807_v0  ;;  %v10811_v6 = vmax.f32 %v10809_v34, %v10810_v35 }
 0x318   : > { %v4901_v58 = vmax.f32 %v4788_v42, 0.0  ;;  %v4789_v59 = vadd.f32 %v9475_v50, %v4669_v51  ;;  %v8023_v42 = vld [vmem:[%s8114_s21 + $0x4d8] sm:$0xff]  }
 0x319   : > { %v3012_v41 = vpop.f32.mrb[24].mxu0  ;;  %v4068_v43 = vpop.f32.mrb[24].mxu1 }
 0x31a   : > { %v7404_v10 = vpop.f32.mrb[25].mxu0  ;;  %v6557_v4 = vpack.c.bf16 %v4901_v58, %v4901_v58  ;;  %v4902_v63 = vmax.f32 %v4789_v59, 0.0  ;;  %v4557_v53 = vmax.f32 %v3012_v41, %v4068_v43  ;;  %v7636_v57 = vpop.f32.mrb[25].mxu1  ;;  %v8024_v59 = vld [vmem:[%s8114_s21 + $0x69c] sm:$0xff]  }
 0x31b   : > { %v3015_v5 = vpop.f32.mrb[26].mxu0  ;;  %v4071_v28 = vpop.f32.mrb[26].mxu1 }
 0x31c   : > { %v7405_v30 = vpop.f32.mrb[27].mxu0  ;;  %5468 = vst.msk [vmem:[%s9495_s27 + $0x60] sm:$0xf] %vm5443_vm4, %v6557_v4  ;;  %v6558_v3 = vpack.c.bf16 %v4902_v63, %v4902_v63  ;;  %v4670_v16 = vmax.f32 %v10802_v38, %v4557_v53  ;;  %v4558_v18 = vmax.f32 %v3015_v5, %v4071_v28  ;;  %v7637_v49 = vpop.f32.mrb[27].mxu1  ;;  %v10813_v4 = vld [vmem:[#allocation15_spill] sm:$0xff]  ;;  %v10815_v28 = vld [vmem:[#allocation16_spill] sm:$0xff] }
 0x31d   : > { %v10816_v30 = vld [vmem:[#allocation17_spill] sm:$0xff] }
 0x31e   : > { %7511 = vmatmul.mubr.msk.bf16.gmra.mrb[132].mxu0 %vm583_vm3, %v8019_v11  ;;  %5469 = vst.msk [vmem:[%s9495_s27 + $0x64] sm:$0xf] %vm5443_vm4, %v6558_v3  ;;  %v4790_v15 = vadd.f32 %v9475_v50, %v4670_v16  ;;  %v4671_v47 = vmax.f32 %v10805_v46, %v4558_v18  ;;  %7743 = vmatmul.mubr.msk.bf16.gmra.mrb[132].mxu1 %vm583_vm3, %v8020_v9  ;;  %v10812_v11 = vld [vmem:[#allocation14_spill] sm:$0xff] }
 0x31f   : > { %7514 = vmatprep.mubr.msk.bf16.mxu0 %vm8065_vm2, %v10599_v44  ;;  %7746 = vmatprep.mubr.msk.bf16.mxu1 %vm8065_vm2, %v10599_v44  ;;  %v10814_v63 = vmax.f32 %v10812_v11, %v10813_v4  ;;  %v10817_v3 = vmax.f32 %v10815_v28, %v10816_v30 }
 0x320   : > { %v4903_v32 = vmax.f32 %v4790_v15, 0.0  ;;  %v4791_v14 = vadd.f32 %v9475_v50, %v4671_v47  ;;  %v8025_v15 = vld [vmem:[%s8114_s21 + $0x4e0] sm:$0xff]  }
 0x321   : > { %v3020_v7 = vpop.f32.mrb[28].mxu0  ;;  %v4076_v12 = vpop.f32.mrb[28].mxu1 }
 0x322   : > { %v7408_v56 = vpop.f32.mrb[29].mxu0  ;;  %v6559_v17 = vpack.c.bf16 %v4903_v32, %v4903_v32  ;;  %v4904_v19 = vmax.f32 %v4791_v14, 0.0  ;;  %v4559_v31 = vmax.f32 %v3020_v7, %v4076_v12  ;;  %v7640_v39 = vpop.f32.mrb[29].mxu1  ;;  %v8026_v14 = vld [vmem:[%s8114_s21 + $0x6a4] sm:$0xff]  }
 0x323   : > { %v3023_v24 = vpop.f32.mrb[30].mxu0  ;;  %v4079_v52 = vpop.f32.mrb[30].mxu1 }
 0x324   : > { %v7409_v54 = vpop.f32.mrb[31].mxu0  ;;  %5470 = vst.msk [vmem:[%s9495_s27 + $0x68] sm:$0xf] %vm5443_vm4, %v6559_v17  ;;  %v6560_v36 = vpack.c.bf16 %v4904_v19, %v4904_v19  ;;  %v4672_v29 = vmax.f32 %v10808_v48, %v4559_v31  ;;  %v4560_v33 = vmax.f32 %v3023_v24, %v4079_v52  ;;  %v7641_v1 = vpop.f32.mrb[31].mxu1  ;;  %v10819_v17 = vld [vmem:[#allocation19_spill] sm:$0xff]  ;;  %v10821_v52 = vld [vmem:[#allocation20_spill] sm:$0xff] }
 0x325   : > { %v10822_v54 = vld [vmem:[#allocation21_spill] sm:$0xff] }
 0x326   : > { %7515 = vmatmul.mubr.msk.bf16.gmra.mrb[136].mxu0 %vm583_vm3, %v8021_v8  ;;  %5471 = vst.msk [vmem:[%s9495_s27 + $0x6c] sm:$0xf] %vm5443_vm4, %v6560_v36  ;;  %v4792_v13 = vadd.f32 %v9475_v50, %v4672_v29  ;;  %v4673_v61 = vmax.f32 %v10811_v6, %v4560_v33  ;;  %7747 = vmatmul.mubr.msk.bf16.gmra.mrb[136].mxu1 %vm583_vm3, %v8022_v27  ;;  %v10818_v8 = vld [vmem:[#allocation18_spill] sm:$0xff] }
 0x327   : > { %7518 = vmatprep.mubr.msk.bf16.mxu0 %vm8065_vm2, %v10599_v44  ;;  %7750 = vmatprep.mubr.msk.bf16.mxu1 %vm8065_vm2, %v10599_v44  ;;  %v10820_v19 = vmax.f32 %v10818_v8, %v10819_v17  ;;  %v10823_v36 = vmax.f32 %v10821_v52, %v10822_v54 }
 0x328   : > { %v4905_v62 = vmax.f32 %v4792_v13, 0.0  ;;  %v4793_v25 = vadd.f32 %v9475_v50, %v4673_v61  ;;  %v8027_v13 = vld [vmem:[%s8114_s21 + $0x4e8] sm:$0xff]  }
 0x329   : > { %v3028_v55 = vpop.f32.mrb[32].mxu0  ;;  %v4084_v60 = vpop.f32.mrb[32].mxu1 }
 0x32a   : > { %v7412_v40 = vpop.f32.mrb[33].mxu0  ;;  %v6561_v22 = vpack.c.bf16 %v4905_v62, %v4905_v62  ;;  %v4906_v23 = vmax.f32 %v4793_v25, 0.0  ;;  %v4561_v21 = vmax.f32 %v3028_v55, %v4084_v60  ;;  %v7644_v51 = vpop.f32.mrb[33].mxu1  ;;  %v8028_v25 = vld [vmem:[%s8114_s21 + $0x6ac] sm:$0xff]  }
 0x32b   : > { %v3031_v58 = vpop.f32.mrb[34].mxu0  ;;  %v4087_v41 = vpop.f32.mrb[34].mxu1 }
 0x32c   : > { %v7413_v43 = vpop.f32.mrb[35].mxu0  ;;  %5472 = vst.msk [vmem:[%s9495_s27 + $0x70] sm:$0xf] %vm5443_vm4, %v6561_v22  ;;  %v6562_v10 = vpack.c.bf16 %v4906_v23, %v4906_v23  ;;  %v4674_v53 = vmax.f32 %v10814_v63, %v4561_v21  ;;  %v4562_v57 = vmax.f32 %v3031_v58, %v4087_v41  ;;  %v7645_v5 = vpop.f32.mrb[35].mxu1  ;;  %v10825_v22 = vld [vmem:[#allocation23_spill] sm:$0xff]  ;;  %v10827_v41 = vld [vmem:[#allocation24_spill] sm:$0xff] }
 0x32d   : > { %v10828_v43 = vld [vmem:[#allocation25_spill] sm:$0xff] }
 0x32e   : > { %7519 = vmatmul.mubr.msk.bf16.gmra.mrb[140].mxu0 %vm583_vm3, %v8023_v42  ;;  %5473 = vst.msk [vmem:[%s9495_s27 + $0x74] sm:$0xf] %vm5443_vm4, %v6562_v10  ;;  %v4794_v9 = vadd.f32 %v9475_v50, %v4674_v53  ;;  %v4675_v45 = vmax.f32 %v10817_v3, %v4562_v57  ;;  %7751 = vmatmul.mubr.msk.bf16.gmra.mrb[140].mxu1 %vm583_vm3, %v8024_v59  ;;  %v10824_v42 = vld [vmem:[#allocation22_spill] sm:$0xff] }
 0x32f   : > { %7522 = vmatprep.mubr.msk.bf16.mxu0 %vm8065_vm2, %v10599_v44  ;;  %7754 = vmatprep.mubr.msk.bf16.mxu1 %vm8065_vm2, %v10599_v44  ;;  %v10826_v23 = vmax.f32 %v10824_v42, %v10825_v22  ;;  %v10829_v10 = vmax.f32 %v10827_v41, %v10828_v43 }
 0x330   : > { %v4907_v37 = vmax.f32 %v4794_v9, 0.0  ;;  %v4795_v38 = vadd.f32 %v9475_v50, %v4675_v45  ;;  %v8029_v9 = vld [vmem:[%s8114_s21 + $0x4f0] sm:$0xff]  }
 0x331   : > { %v3036_v16 = vpop.f32.mrb[36].mxu0  ;;  %v4092_v18 = vpop.f32.mrb[36].mxu1 }
 0x332   : > { %v7416_v49 = vpop.f32.mrb[37].mxu0  ;;  %v6563_v20 = vpack.c.bf16 %v4907_v37, %v4907_v37  ;;  %v4908_v2 = vmax.f32 %v4795_v38, 0.0  ;;  %v4563_v46 = vmax.f32 %v3036_v16, %v4092_v18  ;;  %v7648_v47 = vpop.f32.mrb[37].mxu1  ;;  %v8030_v38 = vld [vmem:[%s8114_s21 + $0x6b4] sm:$0xff]  }
 0x333   : > { %v3039_v32 = vpop.f32.mrb[38].mxu0  ;;  %v4095_v7 = vpop.f32.mrb[38].mxu1 }
 0x334   : > { %v7417_v12 = vpop.f32.mrb[39].mxu0  ;;  %5474 = vst.msk [vmem:[%s9495_s27 + $0x78] sm:$0xf] %vm5443_vm4, %v6563_v20  ;;  %v6564_v56 = vpack.c.bf16 %v4908_v2, %v4908_v2  ;;  %v4676_v31 = vmax.f32 %v10820_v19, %v4563_v46  ;;  %v4564_v39 = vmax.f32 %v3039_v32, %v4095_v7  ;;  %v7649_v24 = vpop.f32.mrb[39].mxu1  ;;  %v10831_v20 = vld [vmem:[#allocation27_spill] sm:$0xff]  ;;  %v10833_v7 = vld [vmem:[#allocation28_spill] sm:$0xff] }
 0x335   : > { %v10834_v12 = vld [vmem:[#allocation29_spill] sm:$0xff] }
 0x336   : > { %7523 = vmatmul.mubr.msk.bf16.gmra.mrb[144].mxu0 %vm583_vm3, %v8025_v15  ;;  %5475 = vst.msk [vmem:[%s9495_s27 + $0x7c] sm:$0xf] %vm5443_vm4, %v6564_v56  ;;  %v4796_v27 = vadd.f32 %v9475_v50, %v4676_v31  ;;  %v4677_v26 = vmax.f32 %v10823_v36, %v4564_v39  ;;  %7755 = vmatmul.mubr.msk.bf16.gmra.mrb[144].mxu1 %vm583_vm3, %v8026_v14  ;;  %v10830_v15 = vld [vmem:[#allocation26_spill] sm:$0xff] }
 0x337   : > { %7526 = vmatprep.mubr.msk.bf16.mxu0 %vm8065_vm2, %v10599_v44  ;;  %7758 = vmatprep.mubr.msk.bf16.mxu1 %vm8065_vm2, %v10599_v44  ;;  %v10832_v2 = vmax.f32 %v10830_v15, %v10831_v20  ;;  %v10835_v56 = vmax.f32 %v10833_v7, %v10834_v12 }
 0x338   : > { %v4909_v0 = vmax.f32 %v4796_v27, 0.0  ;;  %v4797_v48 = vadd.f32 %v9475_v50, %v4677_v26  ;;  %v8031_v27 = vld [vmem:[%s8114_s21 + $0x4f8] sm:$0xff]  }
 0x339   : > { %v3044_v29 = vpop.f32.mrb[40].mxu0  ;;  %v4100_v33 = vpop.f32.mrb[40].mxu1 }
 0x33a   : > { %v7420_v1 = vpop.f32.mrb[41].mxu0  ;;  %v6565_v34 = vpack.c.bf16 %v4909_v0, %v4909_v0  ;;  %v4910_v35 = vmax.f32 %v4797_v48, 0.0  ;;  %v4565_v6 = vmax.f32 %v3044_v29, %v4100_v33  ;;  %v7652_v61 = vpop.f32.mrb[41].mxu1  ;;  %v8032_v48 = vld [vmem:[%s8114_s21 + $0x6bc] sm:$0xff]  }
 0x33b   : > { %v3047_v62 = vpop.f32.mrb[42].mxu0  ;;  %v4103_v55 = vpop.f32.mrb[42].mxu1 }
 0x33c   : > { %v7421_v60 = vpop.f32.mrb[43].mxu0  ;;  %5476 = vst.msk [vmem:[%s9495_s27 + $0x80] sm:$0xf] %vm5443_vm4, %v6565_v34  ;;  %v6566_v40 = vpack.c.bf16 %v4910_v35, %v4910_v35  ;;  %v4678_v21 = vmax.f32 %v10826_v23, %v4565_v6  ;;  %v4566_v51 = vmax.f32 %v3047_v62, %v4103_v55  ;;  %v7653_v58 = vpop.f32.mrb[43].mxu1  ;;  %v10837_v34 = vld [vmem:[#allocation31_spill] sm:$0xff]  ;;  %v10839_v55 = vld [vmem:[#allocation32_spill] sm:$0xff] }
 0x33d   : > { %v10840_v60 = vld [vmem:[#allocation33_spill] sm:$0xff] }
 0x33e   : > { %7527 = vmatmul.mubr.msk.bf16.gmra.mrb[148].mxu0 %vm583_vm3, %v8027_v13  ;;  %5477 = vst.msk [vmem:[%s9495_s27 + $0x84] sm:$0xf] %vm5443_vm4, %v6566_v40  ;;  %v4798_v59 = vadd.f32 %v9475_v50, %v4678_v21  ;;  %v4679_v11 = vmax.f32 %v10829_v10, %v4566_v51  ;;  %7759 = vmatmul.mubr.msk.bf16.gmra.mrb[148].mxu1 %vm583_vm3, %v8028_v25  ;;  %v10836_v13 = vld [vmem:[#allocation30_spill] sm:$0xff] }
 0x33f   : > { %7530 = vmatprep.mubr.msk.bf16.mxu0 %vm8065_vm2, %v10599_v44  ;;  %7762 = vmatprep.mubr.msk.bf16.mxu1 %vm8065_vm2, %v10599_v44  ;;  %v10838_v35 = vmax.f32 %v10836_v13, %v10837_v34  ;;  %v10841_v40 = vmax.f32 %v10839_v55, %v10840_v60 }
 0x340   : > { %v4911_v4 = vmax.f32 %v4798_v59, 0.0  ;;  %v4799_v63 = vadd.f32 %v9475_v50, %v4679_v11  ;;  %v8033_v59 = vld [vmem:[%s8114_s21 + $0x500] sm:$0xff]  }
 0x341   : > { %v3052_v53 = vpop.f32.mrb[44].mxu0  ;;  %v4108_v57 = vpop.f32.mrb[44].mxu1 }
 0x342   : > { %v7424_v5 = vpop.f32.mrb[45].mxu0  ;;  %v6567_v28 = vpack.c.bf16 %v4911_v4, %v4911_v4  ;;  %v4912_v30 = vmax.f32 %v4799_v63, 0.0  ;;  %v4567_v3 = vmax.f32 %v3052_v53, %v4108_v57  ;;  %v7656_v45 = vpop.f32.mrb[45].mxu1  ;;  %v8034_v63 = vld [vmem:[%s8114_s21 + $0x6c4] sm:$0xff]  }
 0x343   : > { %v3055_v37 = vpop.f32.mrb[46].mxu0  ;;  %v4111_v16 = vpop.f32.mrb[46].mxu1 }
 0x344   : > { %v7425_v18 = vpop.f32.mrb[47].mxu0  ;;  %5478 = vst.msk [vmem:[%s9495_s27 + $0x88] sm:$0xf] %vm5443_vm4, %v6567_v28  ;;  %v6568_v49 = vpack.c.bf16 %v4912_v30, %v4912_v30  ;;  %v4680_v46 = vmax.f32 %v10832_v2, %v4567_v3  ;;  %v4568_v47 = vmax.f32 %v3055_v37, %v4111_v16  ;;  %v7657_v32 = vpop.f32.mrb[47].mxu1  ;;  %v10843_v28 = vld [vmem:[#allocation35_spill] sm:$0xff]  ;;  %v10845_v16 = vld [vmem:[#allocation36_spill] sm:$0xff] }
 0x345   : > { %v9890_v37 = vld [vmem:[%s10409_s2] ss:$0 sm:$0xff]  ;;  %v10846_v18 = vld [vmem:[#allocation37_spill] sm:$0xff] }
 0x346   : > { %7531 = vmatmul.mubr.msk.bf16.gmra.mrb[152].mxu0 %vm583_vm3, %v8029_v9  ;;  %5479 = vst.msk [vmem:[%s9495_s27 + $0x8c] sm:$0xf] %vm5443_vm4, %v6568_v49  ;;  %v4800_v14 = vadd.f32 %v9475_v50, %v4680_v46  ;;  %v4681_v8 = vmax.f32 %v10835_v56, %v4568_v47  ;;  %7763 = vmatmul.mubr.msk.bf16.gmra.mrb[152].mxu1 %vm583_vm3, %v8030_v38  ;;  %v10842_v9 = vld [vmem:[#allocation34_spill] sm:$0xff] }
 0x347   : > { %7534 = vmatprep.mubr.msk.bf16.mxu0 %vm8065_vm2, %v10599_v44  ;;  %7766 = vmatprep.mubr.msk.bf16.mxu1 %vm8065_vm2, %v10599_v44  ;;  %v10844_v30 = vmax.f32 %v10842_v9, %v10843_v28  ;;  %v10847_v49 = vmax.f32 %v10845_v16, %v10846_v18 }
 0x348   : > { %v4913_v17 = vmax.f32 %v4800_v14, 0.0  ;;  %v4801_v19 = vadd.f32 %v9475_v50, %v4681_v8  ;;  %v8035_v14 = vld [vmem:[%s8114_s21 + $0x508] sm:$0xff]  }
 0x349   : > { %v3060_v31 = vpop.f32.mrb[48].mxu0  ;;  %v4116_v39 = vpop.f32.mrb[48].mxu1 }
 0x34a   : > { %v7428_v24 = vpop.f32.mrb[49].mxu0  ;;  %v6569_v52 = vpack.c.bf16 %v4913_v17, %v4913_v17  ;;  %v4914_v54 = vmax.f32 %v4801_v19, 0.0  ;;  %v4569_v36 = vmax.f32 %v3060_v31, %v4116_v39  ;;  %v7660_v26 = vpop.f32.mrb[49].mxu1  ;;  %v8036_v19 = vld [vmem:[%s8114_s21 + $0x6cc] sm:$0xff]  }
 0x34b   : > { %v3063_v0 = vpop.f32.mrb[50].mxu0  ;;  %v4119_v29 = vpop.f32.mrb[50].mxu1 }
 0x34c   : > { %v7429_v33 = vpop.f32.mrb[51].mxu0  ;;  %5480 = vst.msk [vmem:[%s9495_s27 + $0x90] sm:$0xf] %vm5443_vm4, %v6569_v52  ;;  %v6570_v1 = vpack.c.bf16 %v4914_v54, %v4914_v54  ;;  %v4682_v6 = vmax.f32 %v10838_v35, %v4569_v36  ;;  %v4570_v61 = vmax.f32 %v3063_v0, %v4119_v29  ;;  %v7661_v62 = vpop.f32.mrb[51].mxu1  ;;  %v10849_v52 = vld [vmem:[#allocation39_spill] sm:$0xff]  ;;  %v10851_v29 = vld [vmem:[#allocation40_spill] sm:$0xff] }
 0x34d   : > { %v10852_v33 = vld [vmem:[#allocation41_spill] sm:$0xff] }
 0x34e   : > { %7535 = vmatmul.mubr.msk.bf16.gmra.mrb[156].mxu0 %vm583_vm3, %v8031_v27  ;;  %5481 = vst.msk [vmem:[%s9495_s27 + $0x94] sm:$0xf] %vm5443_vm4, %v6570_v1  ;;  %v4802_v25 = vadd.f32 %v9475_v50, %v4682_v6  ;;  %v4683_v42 = vmax.f32 %v10841_v40, %v4570_v61  ;;  %7767 = vmatmul.mubr.msk.bf16.gmra.mrb[156].mxu1 %vm583_vm3, %v8032_v48  ;;  %v10848_v27 = vld [vmem:[#allocation38_spill] sm:$0xff] }
 0x34f   : > { %7538 = vmatprep.mubr.msk.bf16.mxu0 %vm8065_vm2, %v10599_v44  ;;  %7770 = vmatprep.mubr.msk.bf16.mxu1 %vm8065_vm2, %v10599_v44  ;;  %v10850_v54 = vmax.f32 %v10848_v27, %v10849_v52  ;;  %v10853_v1 = vmax.f32 %v10851_v29, %v10852_v33 }
 0x350   : > { %v4915_v22 = vmax.f32 %v4802_v25, 0.0  ;;  %v4803_v23 = vadd.f32 %v9475_v50, %v4683_v42  ;;  %v8037_v25 = vld [vmem:[%s8114_s21 + $0x510] sm:$0xff]  }
 0x351   : > { %v3068_v21 = vpop.f32.mrb[52].mxu0  ;;  %v4124_v51 = vpop.f32.mrb[52].mxu1 }
 0x352   : > { %v7432_v58 = vpop.f32.mrb[53].mxu0  ;;  %v6571_v41 = vpack.c.bf16 %v4915_v22, %v4915_v22  ;;  %v4916_v43 = vmax.f32 %v4803_v23, 0.0  ;;  %v4571_v10 = vmax.f32 %v3068_v21, %v4124_v51  ;;  %v7664_v11 = vpop.f32.mrb[53].mxu1  ;;  %v8038_v23 = vld [vmem:[%s8114_s21 + $0x6d4] sm:$0xff]  }
 0x353   : > { %v3071_v4 = vpop.f32.mrb[54].mxu0  ;;  %v4127_v53 = vpop.f32.mrb[54].mxu1 }
 0x354   : > { %v7433_v57 = vpop.f32.mrb[55].mxu0  ;;  %5482 = vst.msk [vmem:[%s9495_s27 + $0x98] sm:$0xf] %vm5443_vm4, %v6571_v41  ;;  %v6572_v5 = vpack.c.bf16 %v4916_v43, %v4916_v43  ;;  %v4684_v50 = vmax.f32 %v10844_v30, %v4571_v10  ;;  %v4572_v3 = vmax.f32 %v3071_v4, %v4127_v53  ;;  %v7665_v45 = vpop.f32.mrb[55].mxu1  ;;  %v10855_v41 = vld [vmem:[#allocation43_spill] sm:$0xff]  ;;  %v10857_v53 = vld [vmem:[#allocation44_spill] sm:$0xff] }
 0x355   : > { %v10858_v57 = vld [vmem:[#allocation45_spill] sm:$0xff] }
 0x356   : > { %7539 = vmatmul.mubr.msk.bf16.gmra.mrb[160].mxu0 %vm583_vm3, %v8033_v59  ;;  %5483 = vst.msk [vmem:[%s9495_s27 + $0x9c] sm:$0xf] %vm5443_vm4, %v6572_v5  ;;  %v4804_v38 = vadd.f32 %v9890_v37, %v4684_v50  ;;  %v4685_v15 = vmax.f32 %v10847_v49, %v4572_v3  ;;  %7771 = vmatmul.mubr.msk.bf16.gmra.mrb[160].mxu1 %vm583_vm3, %v8034_v63  ;;  %v10854_v59 = vld [vmem:[#allocation42_spill] sm:$0xff] }
 0x357   : > { %7542 = vmatprep.mubr.msk.bf16.mxu0 %vm8065_vm2, %v10599_v44  ;;  %7774 = vmatprep.mubr.msk.bf16.mxu1 %vm8065_vm2, %v10599_v44  ;;  %v10856_v43 = vmax.f32 %v10854_v59, %v10855_v41  ;;  %v10859_v5 = vmax.f32 %v10857_v53, %v10858_v57 }
 0x358   : > { %v4917_v20 = vmax.f32 %v4804_v38, 0.0  ;;  %v4805_v2 = vadd.f32 %v9890_v37, %v4685_v15  ;;  %v8039_v38 = vld [vmem:[%s8114_s21 + $0x518] sm:$0xff]  }
 0x359   : > { %v3076_v46 = vpop.f32.mrb[56].mxu0  ;;  %v4132_v47 = vpop.f32.mrb[56].mxu1 }
 0x35a   : > { %v7436_v32 = vpop.f32.mrb[57].mxu0  ;;  %v6573_v7 = vpack.c.bf16 %v4917_v20, %v4917_v20  ;;  %v4918_v12 = vmax.f32 %v4805_v2, 0.0  ;;  %v4573_v56 = vmax.f32 %v3076_v46, %v4132_v47  ;;  %v7668_v8 = vpop.f32.mrb[57].mxu1  ;;  %v8040_v2 = vld [vmem:[%s8114_s21 + $0x6dc] sm:$0xff]  }
 0x35b   : > { %v3079_v17 = vpop.f32.mrb[58].mxu0  ;;  %v4135_v31 = vpop.f32.mrb[58].mxu1 }
 0x35c   : > { %v7437_v39 = vpop.f32.mrb[59].mxu0  ;;  %5484 = vst.msk [vmem:[%s9495_s27 + $0xa0] sm:$0xf] %vm5443_vm4, %v6573_v7  ;;  %v6574_v24 = vpack.c.bf16 %v4918_v12, %v4918_v12  ;;  %v4686_v36 = vmax.f32 %v10850_v54, %v4573_v56  ;;  %v4574_v26 = vmax.f32 %v3079_v17, %v4135_v31  ;;  %v7669_v0 = vpop.f32.mrb[59].mxu1  ;;  %v10861_v7 = vld [vmem:[#allocation47_spill] sm:$0xff]  ;;  %v10863_v31 = vld [vmem:[#allocation48_spill] sm:$0xff] }
 0x35d   : > { %v10864_v39 = vld [vmem:[#allocation49_spill] sm:$0xff] }
 0x35e   : > { %7543 = vmatmul.mubr.msk.bf16.gmra.mrb[164].mxu0 %vm583_vm3, %v8035_v14  ;;  %5485 = vst.msk [vmem:[%s9495_s27 + $0xa4] sm:$0xf] %vm5443_vm4, %v6574_v24  ;;  %v4806_v48 = vadd.f32 %v9890_v37, %v4686_v36  ;;  %v4687_v13 = vmax.f32 %v10853_v1, %v4574_v26  ;;  %7775 = vmatmul.mubr.msk.bf16.gmra.mrb[164].mxu1 %vm583_vm3, %v8036_v19  ;;  %v10860_v14 = vld [vmem:[#allocation46_spill] sm:$0xff] }
 0x35f   : > { %7546 = vmatprep.mubr.msk.bf16.mxu0 %vm8065_vm2, %v10599_v44  ;;  %7778 = vmatprep.mubr.msk.bf16.mxu1 %vm8065_vm2, %v10599_v44  ;;  %v10862_v12 = vmax.f32 %v10860_v14, %v10861_v7  ;;  %v10865_v24 = vmax.f32 %v10863_v31, %v10864_v39 }
 0x360   : > { %v4919_v34 = vmax.f32 %v4806_v48, 0.0  ;;  %v4807_v35 = vadd.f32 %v9890_v37, %v4687_v13  ;;  %v8041_v48 = vld [vmem:[%s8114_s21 + $0x520] sm:$0xff]  }
 0x361   : > { %v3084_v6 = vpop.f32.mrb[60].mxu0  ;;  %v4140_v61 = vpop.f32.mrb[60].mxu1 }
 0x362   : > { %v7440_v62 = vpop.f32.mrb[61].mxu0  ;;  %v6575_v55 = vpack.c.bf16 %v4919_v34, %v4919_v34  ;;  %v4920_v60 = vmax.f32 %v4807_v35, 0.0  ;;  %v4575_v40 = vmax.f32 %v3084_v6, %v4140_v61  ;;  %v7672_v42 = vpop.f32.mrb[61].mxu1  ;;  %v8042_v35 = vld [vmem:[%s8114_s21 + $0x6e4] sm:$0xff]  }
 0x363   : > { %v3087_v22 = vpop.f32.mrb[62].mxu0  ;;  %v4143_v21 = vpop.f32.mrb[62].mxu1 }
 0x364   : > { %v7441_v51 = vpop.f32.mrb[63].mxu0  ;;  %5486 = vst.msk [vmem:[%s9495_s27 + $0xa8] sm:$0xf] %vm5443_vm4, %v6575_v55  ;;  %v6576_v58 = vpack.c.bf16 %v4920_v60, %v4920_v60  ;;  %v4688_v10 = vmax.f32 %v10856_v43, %v4575_v40  ;;  %v4576_v11 = vmax.f32 %v3087_v22, %v4143_v21  ;;  %v7673_v4 = vpop.f32.mrb[63].mxu1  ;;  %v10867_v55 = vld [vmem:[#allocation51_spill] sm:$0xff]  ;;  %v10869_v21 = vld [vmem:[#allocation52_spill] sm:$0xff] }
 0x365   : > { %v10870_v51 = vld [vmem:[#allocation53_spill] sm:$0xff] }
 0x366   : > { %7547 = vmatmul.mubr.msk.bf16.gmra.mrb[168].mxu0 %vm583_vm3, %v8037_v25  ;;  %5487 = vst.msk [vmem:[%s9495_s27 + $0xac] sm:$0xf] %vm5443_vm4, %v6576_v58  ;;  %v4808_v63 = vadd.f32 %v9890_v37, %v4688_v10  ;;  %v4689_v9 = vmax.f32 %v10859_v5, %v4576_v11  ;;  %7779 = vmatmul.mubr.msk.bf16.gmra.mrb[168].mxu1 %vm583_vm3, %v8038_v23  ;;  %v10866_v25 = vld [vmem:[#allocation50_spill] sm:$0xff] }
 0x367   : > { %7550 = vmatprep.mubr.msk.bf16.mxu0 %vm8065_vm2, %v10599_v44  ;;  %7782 = vmatprep.mubr.msk.bf16.mxu1 %vm8065_vm2, %v10599_v44  ;;  %v10868_v60 = vmax.f32 %v10866_v25, %v10867_v55  ;;  %v10871_v58 = vmax.f32 %v10869_v21, %v10870_v51 }
 0x368   : > { %v4921_v28 = vmax.f32 %v4808_v63, 0.0  ;;  %v4809_v30 = vadd.f32 %v9890_v37, %v4689_v9  ;;  %v8043_v63 = vld [vmem:[%s8114_s21 + $0x528] sm:$0xff]  }
 0x369   : > { %v3092_v50 = vpop.f32.mrb[64].mxu0  ;;  %v4148_v3 = vpop.f32.mrb[64].mxu1 }
 0x36a   : > { %v7444_v45 = vpop.f32.mrb[65].mxu0  ;;  %v6577_v16 = vpack.c.bf16 %v4921_v28, %v4921_v28  ;;  %v4922_v18 = vmax.f32 %v4809_v30, 0.0  ;;  %v4577_v49 = vmax.f32 %v3092_v50, %v4148_v3  ;;  %v7676_v15 = vpop.f32.mrb[65].mxu1  ;;  %v8044_v30 = vld [vmem:[%s8114_s21 + $0x6ec] sm:$0xff]  }
 0x36b   : > { %v3095_v20 = vpop.f32.mrb[66].mxu0  ;;  %v4151_v46 = vpop.f32.mrb[66].mxu1 }
 0x36c   : > { %v7445_v47 = vpop.f32.mrb[67].mxu0  ;;  %5488 = vst.msk [vmem:[%s9495_s27 + $0xb0] sm:$0xf] %vm5443_vm4, %v6577_v16  ;;  %v6578_v32 = vpack.c.bf16 %v4922_v18, %v4922_v18  ;;  %v4690_v56 = vmax.f32 %v10862_v12, %v4577_v49  ;;  %v4578_v8 = vmax.f32 %v3095_v20, %v4151_v46  ;;  %v7677_v17 = vpop.f32.mrb[67].mxu1  ;;  %v10873_v16 = vld [vmem:[#allocation55_spill] sm:$0xff]  ;;  %v10875_v46 = vld [vmem:[#allocation56_spill] sm:$0xff] }
 0x36d   : > { %v10876_v47 = vld [vmem:[#allocation57_spill] sm:$0xff] }
 0x36e   : > { %7551 = vmatmul.mubr.msk.bf16.gmra.mrb[172].mxu0 %vm583_vm3, %v8039_v38  ;;  %5489 = vst.msk [vmem:[%s9495_s27 + $0xb4] sm:$0xf] %vm5443_vm4, %v6578_v32  ;;  %v4810_v19 = vadd.f32 %v9890_v37, %v4690_v56  ;;  %v4691_v27 = vmax.f32 %v10865_v24, %v4578_v8  ;;  %7783 = vmatmul.mubr.msk.bf16.gmra.mrb[172].mxu1 %vm583_vm3, %v8040_v2  ;;  %v10872_v38 = vld [vmem:[#allocation54_spill] sm:$0xff] }
 0x36f   : > { %7554 = vmatprep.mubr.msk.bf16.mxu0 %vm8065_vm2, %v10599_v44  ;;  %7786 = vmatprep.mubr.msk.bf16.mxu1 %vm8065_vm2, %v10599_v44  ;;  %v10874_v18 = vmax.f32 %v10872_v38, %v10873_v16  ;;  %v10877_v32 = vmax.f32 %v10875_v46, %v10876_v47 }
 0x370   : > { %v4923_v52 = vmax.f32 %v4810_v19, 0.0  ;;  %v4811_v54 = vadd.f32 %v9890_v37, %v4691_v27  ;;  %v8045_v19 = vld [vmem:[%s8114_s21 + $0x530] sm:$0xff]  }
 0x371   : > { %v3100_v36 = vpop.f32.mrb[68].mxu0  ;;  %v4156_v26 = vpop.f32.mrb[68].mxu1 }
 0x372   : > { %v7448_v0 = vpop.f32.mrb[69].mxu0  ;;  %v6579_v29 = vpack.c.bf16 %v4923_v52, %v4923_v52  ;;  %v4924_v33 = vmax.f32 %v4811_v54, 0.0  ;;  %v4579_v1 = vmax.f32 %v3100_v36, %v4156_v26  ;;  %v7680_v13 = vpop.f32.mrb[69].mxu1  ;;  %v8046_v54 = vld [vmem:[%s8114_s21 + $0x6f4] sm:$0xff]  }
 0x373   : > { %v3103_v34 = vpop.f32.mrb[70].mxu0  ;;  %v4159_v6 = vpop.f32.mrb[70].mxu1 }
 0x374   : > { %v7449_v61 = vpop.f32.mrb[71].mxu0  ;;  %5490 = vst.msk [vmem:[%s9495_s27 + $0xb8] sm:$0xf] %vm5443_vm4, %v6579_v29  ;;  %v6580_v62 = vpack.c.bf16 %v4924_v33, %v4924_v33  ;;  %v4692_v40 = vmax.f32 %v10868_v60, %v4579_v1  ;;  %v4580_v42 = vmax.f32 %v3103_v34, %v4159_v6  ;;  %v7681_v22 = vpop.f32.mrb[71].mxu1  ;;  %v10879_v29 = vld [vmem:[#allocation59_spill] sm:$0xff]  ;;  %v10881_v6 = vld [vmem:[#allocation60_spill] sm:$0xff] }
 0x375   : > { %v10882_v61 = vld [vmem:[#allocation61_spill] sm:$0xff] }
 0x376   : > { %7555 = vmatmul.mubr.msk.bf16.gmra.mrb[176].mxu0 %vm583_vm3, %v8041_v48  ;;  %5491 = vst.msk [vmem:[%s9495_s27 + $0xbc] sm:$0xf] %vm5443_vm4, %v6580_v62  ;;  %v4812_v23 = vadd.f32 %v9890_v37, %v4692_v40  ;;  %v4693_v59 = vmax.f32 %v10871_v58, %v4580_v42  ;;  %7787 = vmatmul.mubr.msk.bf16.gmra.mrb[176].mxu1 %vm583_vm3, %v8042_v35  ;;  %v10878_v48 = vld [vmem:[#allocation58_spill] sm:$0xff] }
 0x377   : > { %7558 = vmatprep.mubr.msk.bf16.mxu0 %vm8065_vm2, %v10599_v44  ;;  %7790 = vmatprep.mubr.msk.bf16.mxu1 %vm8065_vm2, %v10599_v44  ;;  %v10880_v33 = vmax.f32 %v10878_v48, %v10879_v29  ;;  %v10883_v62 = vmax.f32 %v10881_v6, %v10882_v61 }
 0x378   : > { %v4925_v41 = vmax.f32 %v4812_v23, 0.0  ;;  %v4813_v43 = vadd.f32 %v9890_v37, %v4693_v59  ;;  %v8047_v23 = vld [vmem:[%s8114_s21 + $0x538] sm:$0xff]  }
 0x379   : > { %v3108_v10 = vpop.f32.mrb[72].mxu0  ;;  %v4164_v11 = vpop.f32.mrb[72].mxu1 }
 0x37a   : > { %v7452_v4 = vpop.f32.mrb[73].mxu0  ;;  %v6581_v53 = vpack.c.bf16 %v4925_v41, %v4925_v41  ;;  %v4926_v57 = vmax.f32 %v4813_v43, 0.0  ;;  %v4581_v5 = vmax.f32 %v3108_v10, %v4164_v11  ;;  %v7684_v9 = vpop.f32.mrb[73].mxu1  ;;  %v8048_v43 = vld [vmem:[%s8114_s21 + $0x6fc] sm:$0xff]  }
 0x37b   : > { %v3111_v28 = vpop.f32.mrb[74].mxu0  ;;  %v4167_v50 = vpop.f32.mrb[74].mxu1 }
 0x37c   : > { %v7453_v3 = vpop.f32.mrb[75].mxu0  ;;  %5492 = vst.msk [vmem:[%s9495_s27 + $0xc0] sm:$0xf] %vm5443_vm4, %v6581_v53  ;;  %v6582_v45 = vpack.c.bf16 %v4926_v57, %v4926_v57  ;;  %v4694_v49 = vmax.f32 %v10874_v18, %v4581_v5  ;;  %v4582_v15 = vmax.f32 %v3111_v28, %v4167_v50  ;;  %v7685_v20 = vpop.f32.mrb[75].mxu1  ;;  %v10885_v53 = vld [vmem:[#allocation63_spill] sm:$0xff]  ;;  %v10887_v50 = vld [vmem:[#allocation64_spill] sm:$0xff] }
 0x37d   : > { %v10888_v3 = vld [vmem:[#allocation65_spill] sm:$0xff] }
 0x37e   : > { %7559 = vmatmul.mubr.msk.bf16.gmra.mrb[180].mxu0 %vm583_vm3, %v8043_v63  ;;  %5493 = vst.msk [vmem:[%s9495_s27 + $0xc4] sm:$0xf] %vm5443_vm4, %v6582_v45  ;;  %v4814_v2 = vadd.f32 %v9890_v37, %v4694_v49  ;;  %v4695_v14 = vmax.f32 %v10877_v32, %v4582_v15  ;;  %7791 = vmatmul.mubr.msk.bf16.gmra.mrb[180].mxu1 %vm583_vm3, %v8044_v30  ;;  %v10884_v63 = vld [vmem:[#allocation62_spill] sm:$0xff] }
 0x37f   : > { %7562 = vmatprep.mubr.msk.bf16.mxu0 %vm8065_vm2, %v10599_v44  ;;  %7794 = vmatprep.mubr.msk.bf16.mxu1 %vm8065_vm2, %v10599_v44  ;;  %v10886_v57 = vmax.f32 %v10884_v63, %v10885_v53  ;;  %v10889_v45 = vmax.f32 %v10887_v50, %v10888_v3 }
 0x380   : > { %v4927_v7 = vmax.f32 %v4814_v2, 0.0  ;;  %v4815_v12 = vadd.f32 %v9890_v37, %v4695_v14  ;;  %v8049_v2 = vld [vmem:[%s8114_s21 + $0x540] sm:$0xff]  }
 0x381   : > { %v3116_v56 = vpop.f32.mrb[76].mxu0  ;;  %v4172_v8 = vpop.f32.mrb[76].mxu1 }
 0x382   : > { %v7456_v17 = vpop.f32.mrb[77].mxu0  ;;  %v6583_v31 = vpack.c.bf16 %v4927_v7, %v4927_v7  ;;  %v4928_v39 = vmax.f32 %v4815_v12, 0.0  ;;  %v4583_v24 = vmax.f32 %v3116_v56, %v4172_v8  ;;  %v7688_v27 = vpop.f32.mrb[77].mxu1  ;;  %v8050_v12 = vld [vmem:[%s8114_s21 + $0x704] sm:$0xff]  }
 0x383   : > { %v3119_v52 = vpop.f32.mrb[78].mxu0  ;;  %v4175_v36 = vpop.f32.mrb[78].mxu1 }
 0x384   : > { %v7457_v26 = vpop.f32.mrb[79].mxu0  ;;  %5494 = vst.msk [vmem:[%s9495_s27 + $0xc8] sm:$0xf] %vm5443_vm4, %v6583_v31  ;;  %v6584_v0 = vpack.c.bf16 %v4928_v39, %v4928_v39  ;;  %v4696_v1 = vmax.f32 %v10880_v33, %v4583_v24  ;;  %v4584_v13 = vmax.f32 %v3119_v52, %v4175_v36  ;;  %v7689_v34 = vpop.f32.mrb[79].mxu1  ;;  %v10891_v31 = vld [vmem:[#allocation67_spill] sm:$0xff]  ;;  %v10893_v36 = vld [vmem:[#allocation68_spill] sm:$0xff] }
 0x385   : > { %v10894_v26 = vld [vmem:[#allocation69_spill] sm:$0xff] }
 0x386   : > { %7563 = vmatmul.mubr.msk.bf16.gmra.mrb[184].mxu0 %vm583_vm3, %v8045_v19  ;;  %5495 = vst.msk [vmem:[%s9495_s27 + $0xcc] sm:$0xf] %vm5443_vm4, %v6584_v0  ;;  %v4816_v35 = vadd.f32 %v9890_v37, %v4696_v1  ;;  %v4697_v25 = vmax.f32 %v10883_v62, %v4584_v13  ;;  %7795 = vmatmul.mubr.msk.bf16.gmra.mrb[184].mxu1 %vm583_vm3, %v8046_v54  ;;  %v10890_v19 = vld [vmem:[#allocation66_spill] sm:$0xff] }
 0x387   : > { %7566 = vmatprep.mubr.msk.bf16.mxu0 %vm8065_vm2, %v10599_v44  ;;  %7798 = vmatprep.mubr.msk.bf16.mxu1 %vm8065_vm2, %v10599_v44  ;;  %v10892_v39 = vmax.f32 %v10890_v19, %v10891_v31  ;;  %v10895_v0 = vmax.f32 %v10893_v36, %v10894_v26 }
 0x388   : > { %v4929_v55 = vmax.f32 %v4816_v35, 0.0  ;;  %v4817_v60 = vadd.f32 %v9890_v37, %v4697_v25  ;;  %v8051_v35 = vld [vmem:[%s8114_s21 + $0x548] ss:$0 sps:$4 sm:$0x33]  }
 0x389   : > { %v3124_v40 = vpop.f32.mrb[80].mxu0  ;;  %v4180_v42 = vpop.f32.mrb[80].mxu1 }
 0x38a   : > { %v7460_v22 = vpop.f32.mrb[81].mxu0  ;;  %v6585_v21 = vpack.c.bf16 %v4929_v55, %v4929_v55  ;;  %v4930_v51 = vmax.f32 %v4817_v60, 0.0  ;;  %v4585_v58 = vmax.f32 %v3124_v40, %v4180_v42  ;;  %v7692_v59 = vpop.f32.mrb[81].mxu1  ;;  %v8052_v60 = vld [vmem:[%s8114_s21 + $0x70c] ss:$0 sps:$4 sm:$0x33]  }
 0x38b   : > { %v3127_v41 = vpop.f32.mrb[82].mxu0  ;;  %v4183_v10 = vpop.f32.mrb[82].mxu1 }
 0x38c   : > { %v7461_v11 = vpop.f32.mrb[83].mxu0  ;;  %5496 = vst.msk [vmem:[%s9495_s27 + $0xd0] sm:$0xf] %vm5443_vm4, %v6585_v21  ;;  %v6586_v4 = vpack.c.bf16 %v4930_v51, %v4930_v51  ;;  %v4698_v5 = vmax.f32 %v10886_v57, %v4585_v58  ;;  %v4586_v9 = vmax.f32 %v3127_v41, %v4183_v10  ;;  %v7693_v28 = vpop.f32.mrb[83].mxu1  ;;  %v10900_v10 = vld [vmem:[#allocation73_spill] sm:$0xff] }
 0x38e   : > { %7567 = vmatmul.mubr.msk.bf16.gmra.mrb[188].mxu0 %vm583_vm3, %v8047_v23  ;;  %5497 = vst.msk [vmem:[%s9495_s27 + $0xd4] sm:$0xf] %vm5443_vm4, %v6586_v4  ;;  %v4818_v30 = vadd.f32 %v9890_v37, %v4698_v5  ;;  %v4699_v38 = vmax.f32 %v10889_v45, %v4586_v9  ;;  %7799 = vmatmul.mubr.msk.bf16.gmra.mrb[188].mxu1 %vm583_vm3, %v8048_v43  ;;  %v10897_v23 = vld [vmem:[#allocation71_spill] sm:$0xff]  ;;  %v10899_v43 = vld [vmem:[#allocation72_spill] sm:$0xff] }
 0x38f   : > { %7570 = vmatprep.mubr.msk.bf16.mxu0 %vm8065_vm2, %v10599_v44  ;;  %7802 = vmatprep.mubr.msk.bf16.mxu1 %vm8065_vm2, %v10599_v44  ;;  %v10901_v11 = vmax.f32 %v10899_v43, %v10900_v10 }
 0x390   : > { %v4931_v16 = vmax.f32 %v4818_v30, 0.0  ;;  %v4819_v18 = vadd.f32 %v9890_v37, %v4699_v38 }
 0x391   : > { %v3132_v49 = vpop.f32.mrb[84].mxu0  ;;  %v4188_v15 = vpop.f32.mrb[84].mxu1 }
 0x392   : > { %v7464_v20 = vpop.f32.mrb[85].mxu0  ;;  %v6587_v46 = vpack.c.bf16 %v4931_v16, %v4931_v16  ;;  %v4932_v47 = vmax.f32 %v4819_v18, 0.0  ;;  %v4587_v32 = vmax.f32 %v3132_v49, %v4188_v15  ;;  %v7696_v14 = vpop.f32.mrb[85].mxu1  ;;  %v10902_v49 = vld [vmem:[#allocation74_spill] sm:$0xff]  ;;  %v10903_v15 = vld [vmem:[#allocation75_spill] sm:$0xff] }
 0x393   : > { %v3135_v7 = vpop.f32.mrb[86].mxu0  ;;  %v4191_v56 = vpop.f32.mrb[86].mxu1  ;;  %v10904_v20 = vmax.f32 %v10902_v49, %v10903_v15  ;;  %v10905_v14 = vld [vmem:[#allocation76_spill] sm:$0xff] }
 0x394   : > { %v7465_v8 = vpop.f32.mrb[87].mxu0  ;;  %5498 = vst.msk [vmem:[%s9495_s27 + $0xd8] sm:$0xf] %vm5443_vm4, %v6587_v46  ;;  %v6588_v17 = vpack.c.bf16 %v4932_v47, %v4932_v47  ;;  %v4700_v24 = vmax.f32 %v10892_v39, %v4587_v32  ;;  %v4588_v27 = vmax.f32 %v3135_v7, %v4191_v56  ;;  %v7697_v52 = vpop.f32.mrb[87].mxu1  ;;  %v10906_v7 = vld [vmem:[#allocation77_spill] sm:$0xff] }
 0x396   : > { %7571 = vmatmul.mubr.msk.bf16.gmra.mrb[192].mxu0 %vm583_vm3, %v8049_v2  ;;  %5499 = vst.msk [vmem:[%s9495_s27 + $0xdc] sm:$0xf] %vm5443_vm4, %v6588_v17  ;;  %v4820_v54 = vadd.f32 %v9890_v37, %v4700_v24  ;;  %v4701_v48 = vmax.f32 %v10895_v0, %v4588_v27  ;;  %7803 = vmatmul.mubr.msk.bf16.gmra.mrb[192].mxu1 %vm583_vm3, %v8050_v12 }
 0x397   : > { %7574 = vmatprep.mubr.msk.bf16.mxu0 %vm8065_vm2, %v10599_v44  ;;  %7806 = vmatprep.mubr.msk.bf16.mxu1 %vm8065_vm2, %v10599_v44  ;;  %v10896_v44 = vld [vmem:[#allocation70_spill] sm:$0xff]  ;;  %v10907_v12 = vmax.f32 %v10905_v14, %v10906_v7 }
 0x398   : > { %v4933_v29 = vmax.f32 %v4820_v54, 0.0  ;;  %v4821_v33 = vadd.f32 %v9890_v37, %v4701_v48  ;;  %v10898_v21 = vmax.f32 %v10896_v44, %v10897_v23 }
 0x399   : > { %v3140_v1 = vpop.f32.mrb[88].mxu0  ;;  %v4196_v13 = vpop.f32.mrb[88].mxu1 }
 0x39a   : > { %v7468_v34 = vpop.f32.mrb[89].mxu0  ;;  %v6589_v6 = vpack.c.bf16 %v4933_v29, %v4933_v29  ;;  %v4934_v61 = vmax.f32 %v4821_v33, 0.0  ;;  %v4589_v62 = vmax.f32 %v3140_v1, %v4196_v13  ;;  %v7700_v25 = vpop.f32.mrb[89].mxu1  ;;  %v10908_v29 = vld [vmem:[#allocation78_spill] sm:$0xff]  ;;  %v10909_v33 = vld [vmem:[#allocation79_spill] sm:$0xff] }
 0x39b   : > { %v3143_v55 = vpop.f32.mrb[90].mxu0  ;;  %v4199_v40 = vpop.f32.mrb[90].mxu1  ;;  %v10910_v1 = vmax.f32 %v10908_v29, %v10909_v33 }
 0x39c   : > { %v7469_v42 = vpop.f32.mrb[91].mxu0  ;;  %5500 = vst.msk [vmem:[%s9495_s27 + $0xe0] sm:$0xf] %vm5443_vm4, %v6589_v6  ;;  %v6590_v22 = vpack.c.bf16 %v4934_v61, %v4934_v61  ;;  %v4702_v51 = vmax.f32 %v10898_v21, %v4589_v62  ;;  %v4590_v58 = vmax.f32 %v3143_v55, %v4199_v40  ;;  %v7701_v59 = vpop.f32.mrb[91].mxu1  ;;  %v10911_v61 = vld [vmem:[#allocation80_spill] sm:$0xff]  ;;  %v10912_v62 = vld [vmem:[#allocation81_spill] sm:$0xff] }
 0x39d   : > { %v10913_v25 = vmax.f32 %v10911_v61, %v10912_v62 }
 0x39e   : > { %7575 = vmatmul.mubr.msk.bf16.gmra.mrb[196].mxu0 %vm583_vm3, %v8051_v35  ;;  %5501 = vst.msk [vmem:[%s9495_s27 + $0xe4] sm:$0xf] %vm5443_vm4, %v6590_v22  ;;  %v4822_v41 = vadd.f32 %v9890_v37, %v4702_v51  ;;  %v4703_v4 = vmax.f32 %v10901_v11, %v4590_v58  ;;  %7807 = vmatmul.mubr.msk.bf16.gmra.mrb[196].mxu1 %vm583_vm3, %v8052_v60  ;;  %v10914_v11 = vld [vmem:[#allocation82_spill] sm:$0xff] }
 0x3a0   : > { %v4935_v63 = vmax.f32 %v4822_v41, 0.0  ;;  %v4823_v53 = vadd.f32 %v9890_v37, %v4703_v4  ;;  %v10915_v4 = vld [vmem:[#allocation83_spill] sm:$0xff] }
 0x3a1   : > { %v3148_v57 = vpop.f32.mrb[92].mxu0  ;;  %v4204_v5 = vpop.f32.mrb[92].mxu1 }
 0x3a2   : > { %v7472_v9 = vpop.f32.mrb[93].mxu0  ;;  %v6591_v28 = vpack.c.bf16 %v4935_v63, %v4935_v63  ;;  %v4936_v30 = vmax.f32 %v4823_v53, 0.0  ;;  %v4591_v50 = vmax.f32 %v3148_v57, %v4204_v5  ;;  %v7704_v3 = vpop.f32.mrb[93].mxu1  ;;  %v10916_v63 = vmax.f32 %v10914_v11, %v10915_v4 }
 0x3a3   : > { %v3151_v45 = vpop.f32.mrb[94].mxu0  ;;  %v4207_v38 = vpop.f32.mrb[94].mxu1 }
 0x3a4   : > { %v7473_v16 = vpop.f32.mrb[95].mxu0  ;;  %5502 = vst.msk [vmem:[%s9495_s27 + $0xe8] sm:$0xf] %vm5443_vm4, %v6591_v28  ;;  %v6592_v18 = vpack.c.bf16 %v4936_v30, %v4936_v30  ;;  %v4704_v2 = vmax.f32 %v10904_v20, %v4591_v50  ;;  %v4592_v46 = vmax.f32 %v3151_v45, %v4207_v38  ;;  %v7705_v47 = vpop.f32.mrb[95].mxu1  ;;  %v10917_v28 = vld [vmem:[#allocation84_spill] sm:$0xff]  ;;  %v10918_v30 = vld [vmem:[#allocation85_spill] sm:$0xff] }
 0x3a5   : > { %v10919_v50 = vmax.f32 %v10917_v28, %v10918_v30 }
 0x3a6   : > { %5503 = vst.msk [vmem:[%s9495_s27 + $0xec] sm:$0xf] %vm5443_vm4, %v6592_v18  ;;  %v4824_v32 = vadd.f32 %v9890_v37, %v4704_v2  ;;  %v4705_v56 = vmax.f32 %v10907_v12, %v4592_v46  ;;  %v10920_v12 = vld [vmem:[#allocation86_spill] sm:$0xff] }
 0x3a8   : > { %v4937_v8 = vmax.f32 %v4824_v32, 0.0  ;;  %v4825_v17 = vadd.f32 %v9890_v37, %v4705_v56  ;;  %v10921_v56 = vld [vmem:[#allocation87_spill] sm:$0xff] }
 0x3a9   : > { %v3156_v19 = vpop.f32.mrb[96].mxu0  ;;  %v4212_v31 = vpop.f32.mrb[96].mxu1 }
 0x3aa   : > { %v7476_v39 = vpop.f32.mrb[97].mxu0  ;;  %v6593_v24 = vpack.c.bf16 %v4937_v8, %v4937_v8  ;;  %v4938_v27 = vmax.f32 %v4825_v17, 0.0  ;;  %v4593_v52 = vmax.f32 %v3156_v19, %v4212_v31  ;;  %v7708_v54 = vpop.f32.mrb[97].mxu1  ;;  %v10922_v8 = vmax.f32 %v10920_v12, %v10921_v56 }
 0x3ab   : > { %v3159_v36 = vpop.f32.mrb[98].mxu0  ;;  %v4215_v26 = vpop.f32.mrb[98].mxu1 }
 0x3ac   : > { %v7477_v0 = vpop.f32.mrb[99].mxu0  ;;  %5504 = vst.msk [vmem:[%s9495_s27 + $0xf0] sm:$0xf] %vm5443_vm4, %v6593_v24  ;;  %v6594_v48 = vpack.c.bf16 %v4938_v27, %v4938_v27  ;;  %v4706_v13 = vmax.f32 %v10910_v1, %v4593_v52  ;;  %v4594_v34 = vmax.f32 %v3159_v36, %v4215_v26  ;;  %v7709_v35 = vpop.f32.mrb[99].mxu1  ;;  %v10923_v24 = vld [vmem:[#allocation88_spill] sm:$0xff]  ;;  %v10924_v27 = vld [vmem:[#allocation89_spill] sm:$0xff] }
 0x3ad   : > { %v10925_v52 = vmax.f32 %v10923_v24, %v10924_v27 }
 0x3ae   : > { %5505 = vst.msk [vmem:[%s9495_s27 + $0xf4] sm:$0xf] %vm5443_vm4, %v6594_v48  ;;  %v4826_v6 = vadd.f32 %v9890_v37, %v4706_v13  ;;  %v4707_v55 = vmax.f32 %v10913_v25, %v4594_v34  ;;  %v10926_v25 = vld [vmem:[#allocation90_spill] sm:$0xff] }
 0x3b0   : > { %v4939_v60 = vmax.f32 %v4826_v6, 0.0  ;;  %v4827_v40 = vadd.f32 %v9890_v37, %v4707_v55  ;;  %v10927_v55 = vld [vmem:[#allocation91_spill] sm:$0xff] }
 0x3b1   : > { %v3164_v42 = vpop.f32.mrb[100].mxu0  ;;  %v4220_v22 = vpop.f32.mrb[100].mxu1 }
 0x3b2   : > { %v7480_v44 = vpop.f32.mrb[101].mxu0  ;;  %v6595_v23 = vpack.c.bf16 %v4939_v60, %v4939_v60  ;;  %v4940_v21 = vmax.f32 %v4827_v40, 0.0  ;;  %v4595_v51 = vmax.f32 %v3164_v42, %v4220_v22  ;;  %v7712_v58 = vpop.f32.mrb[101].mxu1  ;;  %v10928_v60 = vmax.f32 %v10926_v25, %v10927_v55 }
 0x3b3   : > { %v3167_v59 = vpop.f32.mrb[102].mxu0  ;;  %v4223_v41 = vpop.f32.mrb[102].mxu1 }
 0x3b4   : > { %v7481_v43 = vpop.f32.mrb[103].mxu0  ;;  %5506 = vst.msk [vmem:[%s9495_s27 + $0xf8] sm:$0xf] %vm5443_vm4, %v6595_v23  ;;  %v6596_v10 = vpack.c.bf16 %v4940_v21, %v4940_v21  ;;  %v4708_v53 = vmax.f32 %v10916_v63, %v4595_v51  ;;  %v4596_v57 = vmax.f32 %v3167_v59, %v4223_v41  ;;  %v7713_v5 = vpop.f32.mrb[103].mxu1  ;;  %v10929_v23 = vld [vmem:[#allocation92_spill] sm:$0xff]  ;;  %v10930_v21 = vld [vmem:[#allocation93_spill] sm:$0xff] }
 0x3b5   : > { %v10931_v51 = vmax.f32 %v10929_v23, %v10930_v21 }
 0x3b6   : > { %5507 = vst.msk [vmem:[%s9495_s27 + $0xfc] sm:$0xf] %vm5443_vm4, %v6596_v10  ;;  %v4828_v9 = vadd.f32 %v9890_v37, %v4708_v53  ;;  %v4709_v3 = vmax.f32 %v10919_v50, %v4596_v57  ;;  %v10932_v50 = vld [vmem:[#allocation94_spill] sm:$0xff] }
 0x3b8   : > { %v4941_v45 = vmax.f32 %v4828_v9, 0.0  ;;  %v4829_v38 = vadd.f32 %v9890_v37, %v4709_v3  ;;  %v10933_v3 = vld [vmem:[#allocation95_spill] sm:$0xff] }
 0x3b9   : > { %v3172_v16 = vpop.f32.mrb[104].mxu0  ;;  %v4228_v18 = vpop.f32.mrb[104].mxu1 }
 0x3ba   : > { %v7484_v49 = vpop.f32.mrb[105].mxu0  ;;  %v6597_v15 = vpack.c.bf16 %v4941_v45, %v4941_v45  ;;  %v4942_v20 = vmax.f32 %v4829_v38, 0.0  ;;  %v4597_v2 = vmax.f32 %v3172_v16, %v4228_v18  ;;  %v7716_v46 = vpop.f32.mrb[105].mxu1  ;;  %v10934_v45 = vmax.f32 %v10932_v50, %v10933_v3 }
 0x3bb   : > { %v3175_v47 = vpop.f32.mrb[106].mxu0  ;;  %v4231_v32 = vpop.f32.mrb[106].mxu1 }
 0x3bc   : > { %v7485_v14 = vpop.f32.mrb[107].mxu0  ;;  %5508 = vst.msk [vmem:[%s9495_s27 + $0x100] sm:$0xf] %vm5443_vm4, %v6597_v15  ;;  %v6598_v7 = vpack.c.bf16 %v4942_v20, %v4942_v20  ;;  %v4710_v17 = vmax.f32 %v10922_v8, %v4597_v2  ;;  %v4598_v19 = vmax.f32 %v3175_v47, %v4231_v32  ;;  %v7717_v31 = vpop.f32.mrb[107].mxu1  ;;  %v10935_v15 = vld [vmem:[#allocation96_spill] sm:$0xff]  ;;  %v10936_v20 = vld [vmem:[#allocation97_spill] sm:$0xff] }
 0x3bd   : > { %v10937_v2 = vmax.f32 %v10935_v15, %v10936_v20 }
 0x3be   : > { %5509 = vst.msk [vmem:[%s9495_s27 + $0x104] sm:$0xf] %vm5443_vm4, %v6598_v7  ;;  %v4830_v39 = vadd.f32 %v9890_v37, %v4710_v17  ;;  %v4711_v54 = vmax.f32 %v10925_v52, %v4598_v19  ;;  %v10938_v52 = vld [vmem:[#allocation98_spill] sm:$0xff] }
 0x3c0   : > { %v4943_v36 = vmax.f32 %v4830_v39, 0.0  ;;  %v4831_v26 = vadd.f32 %v9890_v37, %v4711_v54  ;;  %v10939_v54 = vld [vmem:[#allocation99_spill] sm:$0xff] }
 0x3c1   : > { %v3180_v0 = vpop.f32.mrb[108].mxu0  ;;  %v4236_v48 = vpop.f32.mrb[108].mxu1 }
 0x3c2   : > { %v7488_v29 = vpop.f32.mrb[109].mxu0  ;;  %v6599_v33 = vpack.c.bf16 %v4943_v36, %v4943_v36  ;;  %v4944_v1 = vmax.f32 %v4831_v26, 0.0  ;;  %v4599_v13 = vmax.f32 %v3180_v0, %v4236_v48  ;;  %v7720_v34 = vpop.f32.mrb[109].mxu1  ;;  %v10940_v36 = vmax.f32 %v10938_v52, %v10939_v54 }
 0x3c3   : > { %v3183_v35 = vpop.f32.mrb[110].mxu0  ;;  %v4239_v6 = vpop.f32.mrb[110].mxu1 }
 0x3c4   : > { %v7489_v61 = vpop.f32.mrb[111].mxu0  ;;  %5510 = vst.msk [vmem:[%s9495_s27 + $0x108] sm:$0xf] %vm5443_vm4, %v6599_v33  ;;  %v6600_v62 = vpack.c.bf16 %v4944_v1, %v4944_v1  ;;  %v4712_v40 = vmax.f32 %v10928_v60, %v4599_v13  ;;  %v4600_v42 = vmax.f32 %v3183_v35, %v4239_v6  ;;  %v7721_v22 = vpop.f32.mrb[111].mxu1  ;;  %v10941_v33 = vld [vmem:[#allocation100_spill] sm:$0xff]  ;;  %v10942_v1 = vld [vmem:[#allocation101_spill] sm:$0xff] }
 0x3c5   : > { %v10943_v13 = vmax.f32 %v10941_v33, %v10942_v1 }
 0x3c6   : > { %5511 = vst.msk [vmem:[%s9495_s27 + $0x10c] sm:$0xf] %vm5443_vm4, %v6600_v62  ;;  %v4832_v44 = vadd.f32 %v9890_v37, %v4712_v40  ;;  %v4713_v58 = vmax.f32 %v10931_v51, %v4600_v42  ;;  %v10944_v51 = vld [vmem:[#allocation102_spill] sm:$0xff] }
 0x3c8   : > { %v4945_v59 = vmax.f32 %v4832_v44, 0.0  ;;  %v4833_v41 = vadd.f32 %v9890_v37, %v4713_v58  ;;  %v10945_v58 = vld [vmem:[#allocation103_spill] sm:$0xff] }
 0x3c9   : > { %v3188_v43 = vpop.f32.mrb[112].mxu0  ;;  %v4244_v10 = vpop.f32.mrb[112].mxu1 }
 0x3ca   : > { %v7492_v11 = vpop.f32.mrb[113].mxu0  ;;  %v6601_v4 = vpack.c.bf16 %v4945_v59, %v4945_v59  ;;  %v4946_v63 = vmax.f32 %v4833_v41, 0.0  ;;  %v4601_v53 = vmax.f32 %v3188_v43, %v4244_v10  ;;  %v7724_v57 = vpop.f32.mrb[113].mxu1  ;;  %v10946_v59 = vmax.f32 %v10944_v51, %v10945_v58 }
 0x3cb   : > { %v3191_v5 = vpop.f32.mrb[114].mxu0  ;;  %v4247_v9 = vpop.f32.mrb[114].mxu1 }
 0x3cc   : > { %v7493_v28 = vpop.f32.mrb[115].mxu0  ;;  %5512 = vst.msk [vmem:[%s9495_s27 + $0x110] sm:$0xf] %vm5443_vm4, %v6601_v4  ;;  %v6602_v30 = vpack.c.bf16 %v4946_v63, %v4946_v63  ;;  %v4714_v38 = vmax.f32 %v10934_v45, %v4601_v53  ;;  %v4602_v16 = vmax.f32 %v3191_v5, %v4247_v9  ;;  %v7725_v18 = vpop.f32.mrb[115].mxu1  ;;  %v10947_v4 = vld [vmem:[#allocation104_spill] sm:$0xff]  ;;  %v10948_v63 = vld [vmem:[#allocation105_spill] sm:$0xff] }
 0x3cd   : > { %v10949_v53 = vmax.f32 %v10947_v4, %v10948_v63 }
 0x3ce   : > { %5513 = vst.msk [vmem:[%s9495_s27 + $0x114] sm:$0xf] %vm5443_vm4, %v6602_v30  ;;  %v4834_v49 = vadd.f32 %v9890_v37, %v4714_v38  ;;  %v4715_v46 = vmax.f32 %v10937_v2, %v4602_v16  ;;  %v10950_v2 = vld [vmem:[#allocation106_spill] sm:$0xff] }
 0x3d0   : > { %v4947_v47 = vmax.f32 %v4834_v49, 0.0  ;;  %v4835_v32 = vadd.f32 %v9890_v37, %v4715_v46  ;;  %v10951_v46 = vld [vmem:[#allocation107_spill] sm:$0xff] }
 0x3d1   : > { %v3196_v14 = vpop.f32.mrb[116].mxu0  ;;  %v4252_v7 = vpop.f32.mrb[116].mxu1 }
 0x3d2   : > { %v7496_v12 = vpop.f32.mrb[117].mxu0  ;;  %v6603_v56 = vpack.c.bf16 %v4947_v47, %v4947_v47  ;;  %v4948_v8 = vmax.f32 %v4835_v32, 0.0  ;;  %v4603_v17 = vmax.f32 %v3196_v14, %v4252_v7  ;;  %v7728_v19 = vpop.f32.mrb[117].mxu1  ;;  %v10952_v47 = vmax.f32 %v10950_v2, %v10951_v46 }
 0x3d3   : > { %v3199_v31 = vpop.f32.mrb[118].mxu0  ;;  %v4255_v39 = vpop.f32.mrb[118].mxu1 }
 0x3d4   : > { %v7497_v24 = vpop.f32.mrb[119].mxu0  ;;  %5514 = vst.msk [vmem:[%s9495_s27 + $0x118] sm:$0xf] %vm5443_vm4, %v6603_v56  ;;  %v6604_v27 = vpack.c.bf16 %v4948_v8, %v4948_v8  ;;  %v4716_v26 = vmax.f32 %v10940_v36, %v4603_v17  ;;  %v4604_v0 = vmax.f32 %v3199_v31, %v4255_v39  ;;  %v7729_v48 = vpop.f32.mrb[119].mxu1  ;;  %v10953_v56 = vld [vmem:[#allocation108_spill] sm:$0xff]  ;;  %v10954_v8 = vld [vmem:[#allocation109_spill] sm:$0xff] }
 0x3d5   : > { %v10955_v17 = vmax.f32 %v10953_v56, %v10954_v8 }
 0x3d6   : > { %5515 = vst.msk [vmem:[%s9495_s27 + $0x11c] sm:$0xf] %vm5443_vm4, %v6604_v27  ;;  %v4836_v29 = vadd.f32 %v9890_v37, %v4716_v26  ;;  %v4717_v34 = vmax.f32 %v10943_v13, %v4604_v0  ;;  %v10956_v13 = vld [vmem:[#allocation110_spill] sm:$0xff] }
 0x3d8   : > { %v4949_v35 = vmax.f32 %v4836_v29, 0.0  ;;  %v4837_v6 = vadd.f32 %v9890_v37, %v4717_v34  ;;  %v10957_v34 = vld [vmem:[#allocation111_spill] sm:$0xff] }
 0x3d9   : > { %v3204_v61 = vpop.f32.mrb[120].mxu0  ;;  %v4260_v62 = vpop.f32.mrb[120].mxu1 }
 0x3da   : > { %v7500_v25 = vpop.f32.mrb[121].mxu0  ;;  %v6605_v55 = vpack.c.bf16 %v4949_v35, %v4949_v35  ;;  %v4950_v60 = vmax.f32 %v4837_v6, 0.0  ;;  %v4605_v40 = vmax.f32 %v3204_v61, %v4260_v62  ;;  %v7732_v42 = vpop.f32.mrb[121].mxu1  ;;  %v10958_v35 = vmax.f32 %v10956_v13, %v10957_v34 }
 0x3db   : > { %v3207_v22 = vpop.f32.mrb[122].mxu0  ;;  %v4263_v44 = vpop.f32.mrb[122].mxu1 }
 0x3dc   : > { %v7501_v23 = vpop.f32.mrb[123].mxu0  ;;  %5516 = vst.msk [vmem:[%s9495_s27 + $0x120] sm:$0xf] %vm5443_vm4, %v6605_v55  ;;  %v6606_v21 = vpack.c.bf16 %v4950_v60, %v4950_v60  ;;  %v4718_v41 = vmax.f32 %v10946_v59, %v4605_v40  ;;  %v4606_v43 = vmax.f32 %v3207_v22, %v4263_v44  ;;  %v7733_v10 = vpop.f32.mrb[123].mxu1  ;;  %v10959_v55 = vld [vmem:[#allocation112_spill] sm:$0xff]  ;;  %v10960_v60 = vld [vmem:[#allocation113_spill] sm:$0xff] }
 0x3dd   : > { %v10961_v40 = vmax.f32 %v10959_v55, %v10960_v60 }
 0x3de   : > { %5517 = vst.msk [vmem:[%s9495_s27 + $0x124] sm:$0xf] %vm5443_vm4, %v6606_v21  ;;  %v4838_v11 = vadd.f32 %v9890_v37, %v4718_v41  ;;  %v4719_v57 = vmax.f32 %v10949_v53, %v4606_v43  ;;  %v10962_v53 = vld [vmem:[#allocation114_spill] sm:$0xff] }
 0x3e0   : > { %v4951_v5 = vmax.f32 %v4838_v11, 0.0  ;;  %v4839_v9 = vadd.f32 %v9890_v37, %v4719_v57  ;;  %v10963_v57 = vld [vmem:[#allocation115_spill] sm:$0xff] }
 0x3e1   : > { %v3212_v28 = vpop.f32.mrb[124].mxu0  ;;  %v4268_v30 = vpop.f32.mrb[124].mxu1 }
 0x3e2   : > { %v7504_v50 = vpop.f32.mrb[125].mxu0  ;;  %v6607_v3 = vpack.c.bf16 %v4951_v5, %v4951_v5  ;;  %v4952_v45 = vmax.f32 %v4839_v9, 0.0  ;;  %v4607_v38 = vmax.f32 %v3212_v28, %v4268_v30  ;;  %v7736_v16 = vpop.f32.mrb[125].mxu1  ;;  %v10964_v5 = vmax.f32 %v10962_v53, %v10963_v57 }
 0x3e3   : > { %v3215_v18 = vpop.f32.mrb[126].mxu0  ;;  %v4271_v49 = vpop.f32.mrb[126].mxu1 }
 0x3e4   : > { %v7505_v15 = vpop.f32.mrb[127].mxu0  ;;  %5518 = vst.msk [vmem:[%s9495_s27 + $0x128] sm:$0xf] %vm5443_vm4, %v6607_v3  ;;  %v6608_v20 = vpack.c.bf16 %v4952_v45, %v4952_v45  ;;  %v4720_v32 = vmax.f32 %v10952_v47, %v4607_v38  ;;  %v4608_v14 = vmax.f32 %v3215_v18, %v4271_v49  ;;  %v7737_v7 = vpop.f32.mrb[127].mxu1  ;;  %v10965_v3 = vld [vmem:[#allocation116_spill] sm:$0xff]  ;;  %v10966_v45 = vld [vmem:[#allocation117_spill] sm:$0xff] }
 0x3e5   : > { %v10967_v38 = vmax.f32 %v10965_v3, %v10966_v45 }
 0x3e6   : > { %5519 = vst.msk [vmem:[%s9495_s27 + $0x12c] sm:$0xf] %vm5443_vm4, %v6608_v20  ;;  %v4840_v12 = vadd.f32 %v9890_v37, %v4720_v32  ;;  %v4721_v19 = vmax.f32 %v10955_v17, %v4608_v14  ;;  %v10968_v17 = vld [vmem:[#allocation118_spill] sm:$0xff] }
 0x3e8   : > { %v4953_v31 = vmax.f32 %v4840_v12, 0.0  ;;  %v4841_v39 = vadd.f32 %v9890_v37, %v4721_v19  ;;  %v10969_v19 = vld [vmem:[#allocation119_spill] sm:$0xff] }
 0x3e9   : > { %v3220_v24 = vpop.f32.mrb[128].mxu0  ;;  %v4276_v27 = vpop.f32.mrb[128].mxu1 }
 0x3ea   : > { %v7508_v52 = vpop.f32.mrb[129].mxu0  ;;  %v6609_v54 = vpack.c.bf16 %v4953_v31, %v4953_v31  ;;  %v4954_v36 = vmax.f32 %v4841_v39, 0.0  ;;  %v4609_v26 = vmax.f32 %v3220_v24, %v4276_v27  ;;  %v7740_v0 = vpop.f32.mrb[129].mxu1  ;;  %v10970_v31 = vmax.f32 %v10968_v17, %v10969_v19 }
 0x3eb   : > { %v3223_v48 = vpop.f32.mrb[130].mxu0  ;;  %v4279_v29 = vpop.f32.mrb[130].mxu1 }
 0x3ec   : > { %v7509_v33 = vpop.f32.mrb[131].mxu0  ;;  %5520 = vst.msk [vmem:[%s9495_s27 + $0x130] sm:$0xf] %vm5443_vm4, %v6609_v54  ;;  %v6610_v1 = vpack.c.bf16 %v4954_v36, %v4954_v36  ;;  %v4722_v6 = vmax.f32 %v10958_v35, %v4609_v26  ;;  %v4610_v61 = vmax.f32 %v3223_v48, %v4279_v29  ;;  %v7741_v62 = vpop.f32.mrb[131].mxu1  ;;  %v10971_v54 = vld [vmem:[#allocation120_spill] sm:$0xff]  ;;  %v10972_v36 = vld [vmem:[#allocation121_spill] sm:$0xff] }
 0x3ed   : > { %v10973_v26 = vmax.f32 %v10971_v54, %v10972_v36 }
 0x3ee   : > { %5521 = vst.msk [vmem:[%s9495_s27 + $0x134] sm:$0xf] %vm5443_vm4, %v6610_v1  ;;  %v4842_v25 = vadd.f32 %v9890_v37, %v4722_v6  ;;  %v4723_v42 = vmax.f32 %v10961_v40, %v4610_v61  ;;  %v10974_v40 = vld [vmem:[#allocation122_spill] sm:$0xff] }
 0x3f0   : > { %v4955_v22 = vmax.f32 %v4842_v25, 0.0  ;;  %v4843_v44 = vadd.f32 %v9890_v37, %v4723_v42  ;;  %v10975_v42 = vld [vmem:[#allocation123_spill] sm:$0xff] }
 0x3f1   : > { %v3228_v23 = vpop.f32.mrb[132].mxu0  ;;  %v4284_v21 = vpop.f32.mrb[132].mxu1 }
 0x3f2   : > { %v7512_v51 = vpop.f32.mrb[133].mxu0  ;;  %v6611_v58 = vpack.c.bf16 %v4955_v22, %v4955_v22  ;;  %v4956_v59 = vmax.f32 %v4843_v44, 0.0  ;;  %v4611_v41 = vmax.f32 %v3228_v23, %v4284_v21  ;;  %v7744_v43 = vpop.f32.mrb[133].mxu1  ;;  %v10976_v22 = vmax.f32 %v10974_v40, %v10975_v42 }
 0x3f3   : > { %v3231_v10 = vpop.f32.mrb[134].mxu0  ;;  %v4287_v11 = vpop.f32.mrb[134].mxu1 }
 0x3f4   : > { %v7513_v4 = vpop.f32.mrb[135].mxu0  ;;  %5522 = vst.msk [vmem:[%s9495_s27 + $0x138] sm:$0xf] %vm5443_vm4, %v6611_v58  ;;  %v6612_v63 = vpack.c.bf16 %v4956_v59, %v4956_v59  ;;  %v4724_v9 = vmax.f32 %v10964_v5, %v4611_v41  ;;  %v4612_v28 = vmax.f32 %v3231_v10, %v4287_v11  ;;  %v7745_v30 = vpop.f32.mrb[135].mxu1  ;;  %v10977_v58 = vld [vmem:[#allocation124_spill] sm:$0xff]  ;;  %v10978_v59 = vld [vmem:[#allocation125_spill] sm:$0xff] }
 0x3f5   : > { %v10979_v41 = vmax.f32 %v10977_v58, %v10978_v59 }
 0x3f6   : > { %5523 = vst.msk [vmem:[%s9495_s27 + $0x13c] sm:$0xf] %vm5443_vm4, %v6612_v63  ;;  %v4844_v50 = vadd.f32 %v9890_v37, %v4724_v9  ;;  %v4725_v16 = vmax.f32 %v10967_v38, %v4612_v28  ;;  %v10980_v38 = vld [vmem:[#allocation126_spill] sm:$0xff] }
 0x3f8   : > { %v4957_v18 = vmax.f32 %v4844_v50, 0.0  ;;  %v4845_v49 = vadd.f32 %v9890_v37, %v4725_v16  ;;  %v10981_v16 = vld [vmem:[#allocation127_spill] sm:$0xff] }
 0x3f9   : > { %v3236_v15 = vpop.f32.mrb[136].mxu0  ;;  %v4292_v20 = vpop.f32.mrb[136].mxu1 }
 0x3fa   : > { %v7516_v2 = vpop.f32.mrb[137].mxu0  ;;  %v6613_v46 = vpack.c.bf16 %v4957_v18, %v4957_v18  ;;  %v4958_v47 = vmax.f32 %v4845_v49, 0.0  ;;  %v4613_v32 = vmax.f32 %v3236_v15, %v4292_v20  ;;  %v7748_v14 = vpop.f32.mrb[137].mxu1  ;;  %v10982_v18 = vmax.f32 %v10980_v38, %v10981_v16  ;;  %v10244_v20 = vld [vmem:[%s10409_s2] ss:$0 sm:$0xff] }
 0x3fb   : > { %v3239_v7 = vpop.f32.mrb[138].mxu0  ;;  %v4295_v12 = vpop.f32.mrb[138].mxu1 }
 0x3fc   : > { %v7517_v56 = vpop.f32.mrb[139].mxu0  ;;  %5524 = vst.msk [vmem:[%s9495_s27 + $0x140] sm:$0xf] %vm5443_vm4, %v6613_v46  ;;  %v6614_v8 = vpack.c.bf16 %v4958_v47, %v4958_v47  ;;  %v4726_v39 = vmax.f32 %v10970_v31, %v4613_v32  ;;  %v4614_v24 = vmax.f32 %v3239_v7, %v4295_v12  ;;  %v7749_v27 = vpop.f32.mrb[139].mxu1  ;;  %v10983_v46 = vld [vmem:[#allocation128_spill] sm:$0xff]  ;;  %v10984_v47 = vld [vmem:[#allocation129_spill] sm:$0xff] }
 0x3fd   : > { %v10985_v32 = vmax.f32 %v10983_v46, %v10984_v47 }
 0x3fe   : > { %5525 = vst.msk [vmem:[%s9495_s27 + $0x144] sm:$0xf] %vm5443_vm4, %v6614_v8  ;;  %v4846_v52 = vadd.f32 %v9890_v37, %v4726_v39  ;;  %v4727_v0 = vmax.f32 %v10973_v26, %v4614_v24  ;;  %v10986_v26 = vld [vmem:[#allocation130_spill] sm:$0xff] }
 0x400   : > { %v4959_v48 = vmax.f32 %v4846_v52, 0.0  ;;  %v4847_v29 = vadd.f32 %v9890_v37, %v4727_v0  ;;  %v10987_v0 = vld [vmem:[#allocation131_spill] sm:$0xff] }
 0x401   : > { %v3244_v33 = vpop.f32.mrb[140].mxu0  ;;  %v4300_v1 = vpop.f32.mrb[140].mxu1 }
 0x402   : > { %v7520_v13 = vpop.f32.mrb[141].mxu0  ;;  %v6615_v34 = vpack.c.bf16 %v4959_v48, %v4959_v48  ;;  %v4960_v35 = vmax.f32 %v4847_v29, 0.0  ;;  %v4615_v6 = vmax.f32 %v3244_v33, %v4300_v1  ;;  %v7752_v61 = vpop.f32.mrb[141].mxu1  ;;  %v10988_v48 = vmax.f32 %v10986_v26, %v10987_v0 }
 0x403   : > { %v3247_v62 = vpop.f32.mrb[142].mxu0  ;;  %v4303_v25 = vpop.f32.mrb[142].mxu1 }
 0x404   : > { %v7521_v55 = vpop.f32.mrb[143].mxu0  ;;  %5526 = vst.msk [vmem:[%s9495_s27 + $0x148] sm:$0xf] %vm5443_vm4, %v6615_v34  ;;  %v6616_v60 = vpack.c.bf16 %v4960_v35, %v4960_v35  ;;  %v4728_v44 = vmax.f32 %v10976_v22, %v4615_v6  ;;  %v4616_v23 = vmax.f32 %v3247_v62, %v4303_v25  ;;  %v7753_v21 = vpop.f32.mrb[143].mxu1  ;;  %v10989_v34 = vld [vmem:[#allocation132_spill] sm:$0xff]  ;;  %v10990_v35 = vld [vmem:[#allocation133_spill] sm:$0xff] }
 0x405   : > { %v10991_v6 = vmax.f32 %v10989_v34, %v10990_v35 }
 0x406   : > { %5527 = vst.msk [vmem:[%s9495_s27 + $0x14c] sm:$0xf] %vm5443_vm4, %v6616_v60  ;;  %v4848_v51 = vadd.f32 %v9890_v37, %v4728_v44  ;;  %v4729_v43 = vmax.f32 %v10979_v41, %v4616_v23  ;;  %v10992_v41 = vld [vmem:[#allocation134_spill] sm:$0xff] }
 0x408   : > { %v4961_v10 = vmax.f32 %v4848_v51, 0.0  ;;  %v4849_v11 = vadd.f32 %v9890_v37, %v4729_v43  ;;  %v10993_v43 = vld [vmem:[#allocation135_spill] sm:$0xff] }
 0x409   : > { %v3252_v4 = vpop.f32.mrb[144].mxu0  ;;  %v4308_v63 = vpop.f32.mrb[144].mxu1 }
 0x40a   : > { %v7524_v53 = vpop.f32.mrb[145].mxu0  ;;  %v6617_v57 = vpack.c.bf16 %v4961_v10, %v4961_v10  ;;  %v4962_v5 = vmax.f32 %v4849_v11, 0.0  ;;  %v4617_v9 = vmax.f32 %v3252_v4, %v4308_v63  ;;  %v7756_v28 = vpop.f32.mrb[145].mxu1  ;;  %v10994_v10 = vmax.f32 %v10992_v41, %v10993_v43 }
 0x40b   : > { %v3255_v30 = vpop.f32.mrb[146].mxu0  ;;  %v4311_v50 = vpop.f32.mrb[146].mxu1 }
 0x40c   : > { %v7525_v3 = vpop.f32.mrb[147].mxu0  ;;  %5528 = vst.msk [vmem:[%s9495_s27 + $0x150] sm:$0xf] %vm5443_vm4, %v6617_v57  ;;  %v6618_v45 = vpack.c.bf16 %v4962_v5, %v4962_v5  ;;  %v4730_v49 = vmax.f32 %v10982_v18, %v4617_v9  ;;  %v4618_v15 = vmax.f32 %v3255_v30, %v4311_v50  ;;  %v7757_v37 = vpop.f32.mrb[147].mxu1  ;;  %v10995_v57 = vld [vmem:[#allocation136_spill] sm:$0xff]  ;;  %v10996_v5 = vld [vmem:[#allocation137_spill] sm:$0xff] }
 0x40d   : > { %v10997_v9 = vmax.f32 %v10995_v57, %v10996_v5 }
 0x40e   : > { %5529 = vst.msk [vmem:[%s9495_s27 + $0x154] sm:$0xf] %vm5443_vm4, %v6618_v45  ;;  %v4850_v2 = vadd.f32 %v10244_v20, %v4730_v49  ;;  %v4731_v14 = vmax.f32 %v10985_v32, %v4618_v15  ;;  %v10998_v32 = vld [vmem:[#allocation138_spill] sm:$0xff] }
 0x410   : > { %v4963_v7 = vmax.f32 %v4850_v2, 0.0  ;;  %v4851_v12 = vadd.f32 %v10244_v20, %v4731_v14  ;;  %v10999_v14 = vld [vmem:[#allocation139_spill] sm:$0xff] }
 0x411   : > { %v3260_v56 = vpop.f32.mrb[148].mxu0  ;;  %v4316_v8 = vpop.f32.mrb[148].mxu1 }
 0x412   : > { %v7528_v17 = vpop.f32.mrb[149].mxu0  ;;  %v6619_v19 = vpack.c.bf16 %v4963_v7, %v4963_v7  ;;  %v4964_v31 = vmax.f32 %v4851_v12, 0.0  ;;  %v4619_v39 = vmax.f32 %v3260_v56, %v4316_v8  ;;  %v7760_v24 = vpop.f32.mrb[149].mxu1  ;;  %v11000_v7 = vmax.f32 %v10998_v32, %v10999_v14 }
 0x413   : > { %v3263_v27 = vpop.f32.mrb[150].mxu0  ;;  %v4319_v52 = vpop.f32.mrb[150].mxu1 }
 0x414   : > { %v7529_v54 = vpop.f32.mrb[151].mxu0  ;;  %5530 = vst.msk [vmem:[%s9495_s27 + $0x158] sm:$0xf] %vm5443_vm4, %v6619_v19  ;;  %v6620_v36 = vpack.c.bf16 %v4964_v31, %v4964_v31  ;;  %v4732_v29 = vmax.f32 %v10988_v48, %v4619_v39  ;;  %v4620_v33 = vmax.f32 %v3263_v27, %v4319_v52  ;;  %v7761_v1 = vpop.f32.mrb[151].mxu1  ;;  %v11001_v19 = vld [vmem:[#allocation140_spill] sm:$0xff]  ;;  %v11002_v31 = vld [vmem:[#allocation141_spill] sm:$0xff] }
 0x415   : > { %v11003_v39 = vmax.f32 %v11001_v19, %v11002_v31 }
 0x416   : > { %5531 = vst.msk [vmem:[%s9495_s27 + $0x15c] sm:$0xf] %vm5443_vm4, %v6620_v36  ;;  %v4852_v13 = vadd.f32 %v10244_v20, %v4732_v29  ;;  %v4733_v61 = vmax.f32 %v10991_v6, %v4620_v33  ;;  %v11004_v6 = vld [vmem:[#allocation142_spill] sm:$0xff] }
 0x418   : > { %v4965_v62 = vmax.f32 %v4852_v13, 0.0  ;;  %v4853_v25 = vadd.f32 %v10244_v20, %v4733_v61  ;;  %v11005_v61 = vld [vmem:[#allocation143_spill] sm:$0xff] }
 0x419   : > { %v3268_v55 = vpop.f32.mrb[152].mxu0  ;;  %v4324_v60 = vpop.f32.mrb[152].mxu1 }
 0x41a   : > { %v7532_v40 = vpop.f32.mrb[153].mxu0  ;;  %v6621_v42 = vpack.c.bf16 %v4965_v62, %v4965_v62  ;;  %v4966_v22 = vmax.f32 %v4853_v25, 0.0  ;;  %v4621_v44 = vmax.f32 %v3268_v55, %v4324_v60  ;;  %v7764_v23 = vpop.f32.mrb[153].mxu1  ;;  %v11006_v62 = vmax.f32 %v11004_v6, %v11005_v61 }
 0x41b   : > { %v3271_v21 = vpop.f32.mrb[154].mxu0  ;;  %v4327_v51 = vpop.f32.mrb[154].mxu1 }
 0x41c   : > { %v7533_v58 = vpop.f32.mrb[155].mxu0  ;;  %5532 = vst.msk [vmem:[%s9495_s27 + $0x160] sm:$0xf] %vm5443_vm4, %v6621_v42  ;;  %v6622_v59 = vpack.c.bf16 %v4966_v22, %v4966_v22  ;;  %v4734_v11 = vmax.f32 %v10994_v10, %v4621_v44  ;;  %v4622_v4 = vmax.f32 %v3271_v21, %v4327_v51  ;;  %v7765_v63 = vpop.f32.mrb[155].mxu1  ;;  %v11007_v42 = vld [vmem:[#allocation144_spill] sm:$0xff]  ;;  %v11008_v22 = vld [vmem:[#allocation145_spill] sm:$0xff] }
 0x41d   : > { %v11009_v44 = vmax.f32 %v11007_v42, %v11008_v22 }
 0x41e   : > { %5533 = vst.msk [vmem:[%s9495_s27 + $0x164] sm:$0xf] %vm5443_vm4, %v6622_v59  ;;  %v4854_v53 = vadd.f32 %v10244_v20, %v4734_v11  ;;  %v4735_v28 = vmax.f32 %v10997_v9, %v4622_v4  ;;  %v11010_v9 = vld [vmem:[#allocation146_spill] sm:$0xff] }
 0x420   : > { %v4967_v30 = vmax.f32 %v4854_v53, 0.0  ;;  %v4855_v50 = vadd.f32 %v10244_v20, %v4735_v28  ;;  %v11011_v28 = vld [vmem:[#allocation147_spill] sm:$0xff] }
 0x421   : > { %v3276_v3 = vpop.f32.mrb[156].mxu0  ;;  %v4332_v45 = vpop.f32.mrb[156].mxu1 }
 0x422   : > { %v7536_v38 = vpop.f32.mrb[157].mxu0  ;;  %v6623_v16 = vpack.c.bf16 %v4967_v30, %v4967_v30  ;;  %v4968_v18 = vmax.f32 %v4855_v50, 0.0  ;;  %v4623_v49 = vmax.f32 %v3276_v3, %v4332_v45  ;;  %v7768_v15 = vpop.f32.mrb[157].mxu1  ;;  %v11012_v30 = vmax.f32 %v11010_v9, %v11011_v28 }
 0x423   : > { %v3279_v37 = vpop.f32.mrb[158].mxu0  ;;  %v4335_v2 = vpop.f32.mrb[158].mxu1 }
 0x424   : > { %v7537_v46 = vpop.f32.mrb[159].mxu0  ;;  %5534 = vst.msk [vmem:[%s9495_s27 + $0x168] sm:$0xf] %vm5443_vm4, %v6623_v16  ;;  %v6624_v47 = vpack.c.bf16 %v4968_v18, %v4968_v18  ;;  %v4736_v12 = vmax.f32 %v11000_v7, %v4623_v49  ;;  %v4624_v56 = vmax.f32 %v3279_v37, %v4335_v2  ;;  %v7769_v8 = vpop.f32.mrb[159].mxu1  ;;  %v11013_v16 = vld [vmem:[#allocation148_spill] sm:$0xff]  ;;  %v11014_v18 = vld [vmem:[#allocation149_spill] sm:$0xff] }
 0x425   : > { %v11015_v49 = vmax.f32 %v11013_v16, %v11014_v18 }
 0x426   : > { %5535 = vst.msk [vmem:[%s9495_s27 + $0x16c] sm:$0xf] %vm5443_vm4, %v6624_v47  ;;  %v4856_v17 = vadd.f32 %v10244_v20, %v4736_v12  ;;  %v4737_v24 = vmax.f32 %v11003_v39, %v4624_v56  ;;  %v11016_v39 = vld [vmem:[#allocation150_spill] sm:$0xff] }
 0x428   : > { %v4969_v27 = vmax.f32 %v4856_v17, 0.0  ;;  %v4857_v52 = vadd.f32 %v10244_v20, %v4737_v24  ;;  %v11017_v24 = vld [vmem:[#allocation151_spill] sm:$0xff] }
 0x429   : > { %v3284_v54 = vpop.f32.mrb[160].mxu0  ;;  %v4340_v36 = vpop.f32.mrb[160].mxu1 }
 0x42a   : > { %v7540_v26 = vpop.f32.mrb[161].mxu0  ;;  %v6625_v0 = vpack.c.bf16 %v4969_v27, %v4969_v27  ;;  %v4970_v48 = vmax.f32 %v4857_v52, 0.0  ;;  %v4625_v29 = vmax.f32 %v3284_v54, %v4340_v36  ;;  %v7772_v33 = vpop.f32.mrb[161].mxu1  ;;  %v11018_v27 = vmax.f32 %v11016_v39, %v11017_v24 }
 0x42b   : > { %v3287_v1 = vpop.f32.mrb[162].mxu0  ;;  %v4343_v13 = vpop.f32.mrb[162].mxu1 }
 0x42c   : > { %v7541_v34 = vpop.f32.mrb[163].mxu0  ;;  %5536 = vst.msk [vmem:[%s9495_s27 + $0x170] sm:$0xf] %vm5443_vm4, %v6625_v0  ;;  %v6626_v35 = vpack.c.bf16 %v4970_v48, %v4970_v48  ;;  %v4738_v25 = vmax.f32 %v11006_v62, %v4625_v29  ;;  %v4626_v55 = vmax.f32 %v3287_v1, %v4343_v13  ;;  %v7773_v60 = vpop.f32.mrb[163].mxu1  ;;  %v11019_v0 = vld [vmem:[#allocation152_spill] sm:$0xff]  ;;  %v11020_v48 = vld [vmem:[#allocation153_spill] sm:$0xff] }
 0x42d   : > { %v11021_v29 = vmax.f32 %v11019_v0, %v11020_v48 }
 0x42e   : > { %5537 = vst.msk [vmem:[%s9495_s27 + $0x174] sm:$0xf] %vm5443_vm4, %v6626_v35  ;;  %v4858_v40 = vadd.f32 %v10244_v20, %v4738_v25  ;;  %v4739_v23 = vmax.f32 %v11009_v44, %v4626_v55  ;;  %v11022_v44 = vld [vmem:[#allocation154_spill] sm:$0xff] }
 0x430   : > { %v4971_v21 = vmax.f32 %v4858_v40, 0.0  ;;  %v4859_v51 = vadd.f32 %v10244_v20, %v4739_v23  ;;  %v11023_v23 = vld [vmem:[#allocation155_spill] sm:$0xff] }
 0x431   : > { %v3292_v58 = vpop.f32.mrb[164].mxu0  ;;  %v4348_v59 = vpop.f32.mrb[164].mxu1 }
 0x432   : > { %v7544_v41 = vpop.f32.mrb[165].mxu0  ;;  %v6627_v43 = vpack.c.bf16 %v4971_v21, %v4971_v21  ;;  %v4972_v10 = vmax.f32 %v4859_v51, 0.0  ;;  %v4627_v11 = vmax.f32 %v3292_v58, %v4348_v59  ;;  %v7776_v4 = vpop.f32.mrb[165].mxu1  ;;  %v11024_v21 = vmax.f32 %v11022_v44, %v11023_v23 }
 0x433   : > { %v3295_v63 = vpop.f32.mrb[166].mxu0  ;;  %v4351_v53 = vpop.f32.mrb[166].mxu1 }
 0x434   : > { %v7545_v57 = vpop.f32.mrb[167].mxu0  ;;  %5538 = vst.msk [vmem:[%s9495_s27 + $0x178] sm:$0xf] %vm5443_vm4, %v6627_v43  ;;  %v6628_v5 = vpack.c.bf16 %v4972_v10, %v4972_v10  ;;  %v4740_v50 = vmax.f32 %v11012_v30, %v4627_v11  ;;  %v4628_v3 = vmax.f32 %v3295_v63, %v4351_v53  ;;  %v7777_v45 = vpop.f32.mrb[167].mxu1  ;;  %v11025_v43 = vld [vmem:[#allocation156_spill] sm:$0xff]  ;;  %v11026_v10 = vld [vmem:[#allocation157_spill] sm:$0xff] }
 0x435   : > { %v11027_v11 = vmax.f32 %v11025_v43, %v11026_v10 }
 0x436   : > { %5539 = vst.msk [vmem:[%s9495_s27 + $0x17c] sm:$0xf] %vm5443_vm4, %v6628_v5  ;;  %v4860_v38 = vadd.f32 %v10244_v20, %v4740_v50  ;;  %v4741_v15 = vmax.f32 %v11015_v49, %v4628_v3  ;;  %v11028_v49 = vld [vmem:[#allocation158_spill] sm:$0xff] }
 0x438   : > { %v4973_v37 = vmax.f32 %v4860_v38, 0.0  ;;  %v4861_v2 = vadd.f32 %v10244_v20, %v4741_v15  ;;  %v11029_v15 = vld [vmem:[#allocation159_spill] sm:$0xff] }
 0x439   : > { %v3300_v46 = vpop.f32.mrb[168].mxu0  ;;  %v4356_v47 = vpop.f32.mrb[168].mxu1 }
 0x43a   : > { %v7548_v32 = vpop.f32.mrb[169].mxu0  ;;  %v6629_v14 = vpack.c.bf16 %v4973_v37, %v4973_v37  ;;  %v4974_v7 = vmax.f32 %v4861_v2, 0.0  ;;  %v4629_v12 = vmax.f32 %v3300_v46, %v4356_v47  ;;  %v7780_v56 = vpop.f32.mrb[169].mxu1  ;;  %v11030_v37 = vmax.f32 %v11028_v49, %v11029_v15 }
 0x43b   : > { %v3303_v8 = vpop.f32.mrb[170].mxu0  ;;  %v4359_v17 = vpop.f32.mrb[170].mxu1 }
 0x43c   : > { %v7549_v19 = vpop.f32.mrb[171].mxu0  ;;  %5540 = vst.msk [vmem:[%s9495_s27 + $0x180] sm:$0xf] %vm5443_vm4, %v6629_v14  ;;  %v6630_v31 = vpack.c.bf16 %v4974_v7, %v4974_v7  ;;  %v4742_v52 = vmax.f32 %v11018_v27, %v4629_v12  ;;  %v4630_v54 = vmax.f32 %v3303_v8, %v4359_v17  ;;  %v7781_v36 = vpop.f32.mrb[171].mxu1  ;;  %v11031_v14 = vld [vmem:[#allocation160_spill] sm:$0xff]  ;;  %v11032_v7 = vld [vmem:[#allocation161_spill] sm:$0xff] }
 0x43d   : > { %v11033_v12 = vmax.f32 %v11031_v14, %v11032_v7 }
 0x43e   : > { %5541 = vst.msk [vmem:[%s9495_s27 + $0x184] sm:$0xf] %vm5443_vm4, %v6630_v31  ;;  %v4862_v26 = vadd.f32 %v10244_v20, %v4742_v52  ;;  %v4743_v33 = vmax.f32 %v11021_v29, %v4630_v54  ;;  %v11034_v29 = vld [vmem:[#allocation162_spill] sm:$0xff] }
 0x440   : > { %v4975_v1 = vmax.f32 %v4862_v26, 0.0  ;;  %v4863_v13 = vadd.f32 %v10244_v20, %v4743_v33  ;;  %v11035_v33 = vld [vmem:[#allocation163_spill] sm:$0xff] }
 0x441   : > { %v3308_v34 = vpop.f32.mrb[172].mxu0  ;;  %v4364_v35 = vpop.f32.mrb[172].mxu1 }
 0x442   : > { %v7552_v6 = vpop.f32.mrb[173].mxu0  ;;  %v6631_v61 = vpack.c.bf16 %v4975_v1, %v4975_v1  ;;  %v4976_v62 = vmax.f32 %v4863_v13, 0.0  ;;  %v4631_v25 = vmax.f32 %v3308_v34, %v4364_v35  ;;  %v7784_v55 = vpop.f32.mrb[173].mxu1  ;;  %v11036_v1 = vmax.f32 %v11034_v29, %v11035_v33 }
 0x443   : > { %v3311_v60 = vpop.f32.mrb[174].mxu0  ;;  %v4367_v40 = vpop.f32.mrb[174].mxu1 }
 0x444   : > { %v7553_v42 = vpop.f32.mrb[175].mxu0  ;;  %5542 = vst.msk [vmem:[%s9495_s27 + $0x188] sm:$0xf] %vm5443_vm4, %v6631_v61  ;;  %v6632_v22 = vpack.c.bf16 %v4976_v62, %v4976_v62  ;;  %v4744_v51 = vmax.f32 %v11024_v21, %v4631_v25  ;;  %v4632_v58 = vmax.f32 %v3311_v60, %v4367_v40  ;;  %v7785_v59 = vpop.f32.mrb[175].mxu1  ;;  %v11037_v61 = vld [vmem:[#allocation164_spill] sm:$0xff]  ;;  %v11038_v62 = vld [vmem:[#allocation165_spill] sm:$0xff] }
 0x445   : > { %v11039_v25 = vmax.f32 %v11037_v61, %v11038_v62 }
 0x446   : > { %5543 = vst.msk [vmem:[%s9495_s27 + $0x18c] sm:$0xf] %vm5443_vm4, %v6632_v22  ;;  %v4864_v41 = vadd.f32 %v10244_v20, %v4744_v51  ;;  %v4745_v4 = vmax.f32 %v11027_v11, %v4632_v58  ;;  %v11040_v11 = vld [vmem:[#allocation166_spill] sm:$0xff] }
 0x448   : > { %v4977_v63 = vmax.f32 %v4864_v41, 0.0  ;;  %v4865_v53 = vadd.f32 %v10244_v20, %v4745_v4  ;;  %v11041_v4 = vld [vmem:[#allocation167_spill] sm:$0xff] }
 0x449   : > { %v3316_v57 = vpop.f32.mrb[176].mxu0  ;;  %v4372_v5 = vpop.f32.mrb[176].mxu1 }
 0x44a   : > { %v7556_v9 = vpop.f32.mrb[177].mxu0  ;;  %v6633_v28 = vpack.c.bf16 %v4977_v63, %v4977_v63  ;;  %v4978_v30 = vmax.f32 %v4865_v53, 0.0  ;;  %v4633_v50 = vmax.f32 %v3316_v57, %v4372_v5  ;;  %v7788_v3 = vpop.f32.mrb[177].mxu1  ;;  %v11042_v63 = vmax.f32 %v11040_v11, %v11041_v4 }
 0x44b   : > { %v3319_v45 = vpop.f32.mrb[178].mxu0  ;;  %v4375_v38 = vpop.f32.mrb[178].mxu1 }
 0x44c   : > { %v7557_v16 = vpop.f32.mrb[179].mxu0  ;;  %5544 = vst.msk [vmem:[%s9495_s27 + $0x190] sm:$0xf] %vm5443_vm4, %v6633_v28  ;;  %v6634_v18 = vpack.c.bf16 %v4978_v30, %v4978_v30  ;;  %v4746_v2 = vmax.f32 %v11030_v37, %v4633_v50  ;;  %v4634_v46 = vmax.f32 %v3319_v45, %v4375_v38  ;;  %v7789_v47 = vpop.f32.mrb[179].mxu1  ;;  %v11043_v28 = vld [vmem:[#allocation168_spill] sm:$0xff]  ;;  %v11044_v30 = vld [vmem:[#allocation169_spill] sm:$0xff] }
 0x44d   : > { %v11045_v50 = vmax.f32 %v11043_v28, %v11044_v30 }
 0x44e   : > { %5545 = vst.msk [vmem:[%s9495_s27 + $0x194] sm:$0xf] %vm5443_vm4, %v6634_v18  ;;  %v4866_v32 = vadd.f32 %v10244_v20, %v4746_v2  ;;  %v4747_v56 = vmax.f32 %v11033_v12, %v4634_v46  ;;  %v11046_v12 = vld [vmem:[#allocation170_spill] sm:$0xff] }
 0x450   : > { %v4979_v8 = vmax.f32 %v4866_v32, 0.0  ;;  %v4867_v17 = vadd.f32 %v10244_v20, %v4747_v56  ;;  %v11047_v56 = vld [vmem:[#allocation171_spill] sm:$0xff] }
 0x451   : > { %v3324_v19 = vpop.f32.mrb[180].mxu0  ;;  %v4380_v31 = vpop.f32.mrb[180].mxu1 }
 0x452   : > { %v7560_v39 = vpop.f32.mrb[181].mxu0  ;;  %v6635_v24 = vpack.c.bf16 %v4979_v8, %v4979_v8  ;;  %v4980_v27 = vmax.f32 %v4867_v17, 0.0  ;;  %v4635_v52 = vmax.f32 %v3324_v19, %v4380_v31  ;;  %v7792_v54 = vpop.f32.mrb[181].mxu1  ;;  %v11048_v8 = vmax.f32 %v11046_v12, %v11047_v56 }
 0x453   : > { %v3327_v36 = vpop.f32.mrb[182].mxu0  ;;  %v4383_v26 = vpop.f32.mrb[182].mxu1 }
 0x454   : > { %v7561_v0 = vpop.f32.mrb[183].mxu0  ;;  %5546 = vst.msk [vmem:[%s9495_s27 + $0x198] sm:$0xf] %vm5443_vm4, %v6635_v24  ;;  %v6636_v48 = vpack.c.bf16 %v4980_v27, %v4980_v27  ;;  %v4748_v13 = vmax.f32 %v11036_v1, %v4635_v52  ;;  %v4636_v34 = vmax.f32 %v3327_v36, %v4383_v26  ;;  %v7793_v35 = vpop.f32.mrb[183].mxu1  ;;  %v11049_v24 = vld [vmem:[#allocation172_spill] sm:$0xff]  ;;  %v11050_v27 = vld [vmem:[#allocation173_spill] sm:$0xff] }
 0x455   : > { %v11051_v52 = vmax.f32 %v11049_v24, %v11050_v27 }
 0x456   : > { %5547 = vst.msk [vmem:[%s9495_s27 + $0x19c] sm:$0xf] %vm5443_vm4, %v6636_v48  ;;  %v4868_v6 = vadd.f32 %v10244_v20, %v4748_v13  ;;  %v4749_v55 = vmax.f32 %v11039_v25, %v4636_v34  ;;  %v11052_v25 = vld [vmem:[#allocation174_spill] sm:$0xff] }
 0x458   : > { %v4981_v60 = vmax.f32 %v4868_v6, 0.0  ;;  %v4869_v40 = vadd.f32 %v10244_v20, %v4749_v55  ;;  %v11053_v55 = vld [vmem:[#allocation175_spill] sm:$0xff] }
 0x459   : > { %v3332_v42 = vpop.f32.mrb[184].mxu0  ;;  %v4388_v22 = vpop.f32.mrb[184].mxu1 }
 0x45a   : > { %v7564_v44 = vpop.f32.mrb[185].mxu0  ;;  %v6637_v23 = vpack.c.bf16 %v4981_v60, %v4981_v60  ;;  %v4982_v21 = vmax.f32 %v4869_v40, 0.0  ;;  %v4637_v51 = vmax.f32 %v3332_v42, %v4388_v22  ;;  %v7796_v58 = vpop.f32.mrb[185].mxu1  ;;  %v11054_v60 = vmax.f32 %v11052_v25, %v11053_v55 }
 0x45b   : > { %v3335_v59 = vpop.f32.mrb[186].mxu0  ;;  %v4391_v41 = vpop.f32.mrb[186].mxu1 }
 0x45c   : > { %v7565_v43 = vpop.f32.mrb[187].mxu0  ;;  %5548 = vst.msk [vmem:[%s9495_s27 + $0x1a0] sm:$0xf] %vm5443_vm4, %v6637_v23  ;;  %v6638_v10 = vpack.c.bf16 %v4982_v21, %v4982_v21  ;;  %v4750_v53 = vmax.f32 %v11042_v63, %v4637_v51  ;;  %v4638_v57 = vmax.f32 %v3335_v59, %v4391_v41  ;;  %v7797_v5 = vpop.f32.mrb[187].mxu1  ;;  %v11055_v23 = vld [vmem:[#allocation176_spill] sm:$0xff]  ;;  %v11056_v21 = vld [vmem:[#allocation177_spill] sm:$0xff] }
 0x45d   : > { %v11057_v51 = vmax.f32 %v11055_v23, %v11056_v21 }
 0x45e   : > { %5549 = vst.msk [vmem:[%s9495_s27 + $0x1a4] sm:$0xf] %vm5443_vm4, %v6638_v10  ;;  %v4870_v9 = vadd.f32 %v10244_v20, %v4750_v53  ;;  %v4751_v3 = vmax.f32 %v11045_v50, %v4638_v57  ;;  %v11058_v50 = vld [vmem:[#allocation178_spill] sm:$0xff] }
 0x460   : > { %v4983_v45 = vmax.f32 %v4870_v9, 0.0  ;;  %v4871_v38 = vadd.f32 %v10244_v20, %v4751_v3  ;;  %v11059_v3 = vld [vmem:[#allocation179_spill] sm:$0xff] }
 0x461   : > { %v3340_v16 = vpop.f32.mrb[188].mxu0  ;;  %v4396_v18 = vpop.f32.mrb[188].mxu1 }
 0x462   : > { %v7568_v49 = vpop.f32.mrb[189].mxu0  ;;  %v6639_v15 = vpack.c.bf16 %v4983_v45, %v4983_v45  ;;  %v4984_v37 = vmax.f32 %v4871_v38, 0.0  ;;  %v4639_v2 = vmax.f32 %v3340_v16, %v4396_v18  ;;  %v7800_v46 = vpop.f32.mrb[189].mxu1  ;;  %v11060_v45 = vmax.f32 %v11058_v50, %v11059_v3 }
 0x463   : > { %v3343_v47 = vpop.f32.mrb[190].mxu0  ;;  %v4399_v32 = vpop.f32.mrb[190].mxu1 }
 0x464   : > { %v7569_v14 = vpop.f32.mrb[191].mxu0  ;;  %5550 = vst.msk [vmem:[%s9495_s27 + $0x1a8] sm:$0xf] %vm5443_vm4, %v6639_v15  ;;  %v6640_v7 = vpack.c.bf16 %v4984_v37, %v4984_v37  ;;  %v4752_v17 = vmax.f32 %v11048_v8, %v4639_v2  ;;  %v4640_v19 = vmax.f32 %v3343_v47, %v4399_v32  ;;  %v7801_v31 = vpop.f32.mrb[191].mxu1 }
 0x466   : > { %5551 = vst.msk [vmem:[%s9495_s27 + $0x1ac] sm:$0xf] %vm5443_vm4, %v6640_v7  ;;  %v4872_v39 = vadd.f32 %v10244_v20, %v4752_v17  ;;  %v4753_v54 = vmax.f32 %v11051_v52, %v4640_v19 }
 0x468   : > { %v4985_v36 = vmax.f32 %v4872_v39, 0.0  ;;  %v4873_v26 = vadd.f32 %v10244_v20, %v4753_v54 }
 0x469   : > { %v3348_v0 = vpop.f32.mrb[192].mxu0  ;;  %v4404_v48 = vpop.f32.mrb[192].mxu1 }
 0x46a   : > { %v7572_v29 = vpop.f32.mrb[193].mxu0  ;;  %v6641_v33 = vpack.c.bf16 %v4985_v36, %v4985_v36  ;;  %v4986_v1 = vmax.f32 %v4873_v26, 0.0  ;;  %v4641_v13 = vmax.f32 %v3348_v0, %v4404_v48  ;;  %v7804_v34 = vpop.f32.mrb[193].mxu1 }
 0x46b   : > { %v3351_v35 = vpop.f32.mrb[194].mxu0  ;;  %v4407_v6 = vpop.f32.mrb[194].mxu1 }
 0x46c   : > { %v7573_v61 = vpop.f32.mrb[195].mxu0  ;;  %5552 = vst.msk [vmem:[%s9495_s27 + $0x1b0] sm:$0xf] %vm5443_vm4, %v6641_v33  ;;  %v6642_v62 = vpack.c.bf16 %v4986_v1, %v4986_v1  ;;  %v4754_v40 = vmax.f32 %v11054_v60, %v4641_v13  ;;  %v4642_v42 = vmax.f32 %v3351_v35, %v4407_v6  ;;  %v7805_v22 = vpop.f32.mrb[195].mxu1 }
 0x46e   : > { %5553 = vst.msk [vmem:[%s9495_s27 + $0x1b4] sm:$0xf] %vm5443_vm4, %v6642_v62  ;;  %v4874_v44 = vadd.f32 %v10244_v20, %v4754_v40  ;;  %v4755_v58 = vmax.f32 %v11057_v51, %v4642_v42 }
 0x470   : > { %v4987_v59 = vmax.f32 %v4874_v44, 0.0  ;;  %v4875_v41 = vadd.f32 %v10244_v20, %v4755_v58 }
 0x471   : > { %v3356_v43 = vpop.f32.mrb[196].mxu0  ;;  %v4412_v10 = vpop.f32.mrb[196].mxu1 }
 0x472   : > { %v7576_v11 = vpop.f32.mrb[197].mxu0  ;;  %v6643_v4 = vpack.c.bf16 %v4987_v59, %v4987_v59  ;;  %v4988_v63 = vmax.f32 %v4875_v41, 0.0  ;;  %v4643_v53 = vmax.f32 %v3356_v43, %v4412_v10  ;;  %v7808_v57 = vpop.f32.mrb[197].mxu1 }
 0x473   : > { %v3359_v5 = vpop.f32.mrb[198].mxu0  ;;  %v4415_v9 = vpop.f32.mrb[198].mxu1 }
 0x474   : > { %v7577_v28 = vpop.f32.mrb[199].mxu0  ;;  %5554 = vst.msk [vmem:[%s9495_s27 + $0x1b8] sm:$0xf] %vm5443_vm4, %v6643_v4  ;;  %v6644_v30 = vpack.c.bf16 %v4988_v63, %v4988_v63  ;;  %v4756_v38 = vmax.f32 %v11060_v45, %v4643_v53  ;;  %v7809_v16 = vpop.f32.mrb[199].mxu1 }
 0x476   : > { %5555 = vst.msk [vmem:[%s9495_s27 + $0x1bc] sm:$0xf] %vm5443_vm4, %v6644_v30  ;;  %v4876_v18 = vadd.f32 %v10244_v20, %v4756_v38 }
 0x478   : > { %v4989_v49 = vmax.f32 %v4876_v18, 0.0 }
 0x47a   : > { %v6645_v15 = vpack.c.bf16 %v4989_v49, %v4989_v49 }
 0x47c   : > { %5557 = vst.msk [vmem:[%s9495_s27 + $0x1c0] sm:$0x3] %vm5556_vm5, %v6645_v15 }
 0x47d PF: > { %s13_s12 = sadd.s32 1, %s8061_s12  }
 0x47e   : > { %p10_p4 = scmp.ge.s32.totalorder %s13_s12, 4  }
 0x480   :  { %12 = sbr.rel (!%p10_p4) target bundleno = 1 (0x1), region = 65 }

// kernel: classifier_forward.5
= control target key start
LH: loop header
LB: loop body
LE: loop exit
PB: predicated region body
PF: predicated region fallthrough
CT: control target
= control target key end

     0   :  { %s4205_s12 = smov 0   ;;  %s5230_s0 = inlined_call_operand.vmem [shape: bf16[2,4,196,288], index: 0, kind: input, shape index: {}]   ;;  %s5231_s1 = inlined_call_operand.vmem [shape: bf16[288,64], index: 1, kind: input, shape index: {}]   ;;  %s5232_s2 = inlined_call_operand.vmem [shape: f32[1,64], index: 2, kind: input, shape index: {}]   ;;  %s5233_s3 = inlined_call_operand.vmem [shape: bf16[2,196,64], index: 3, kind: output, shape index: {}]  }
   0x1 LB: > { %s2839_s13 = sadd.s32 4294967295, %s4181_s12   ;;  %p2843_p0 = scmp.ge.s32.totalorder %s4181_s12, 1  ;;  %s4181_s12 = sphi %s4205_s12, %s13_s12  }
   0x2   : > { %p137_p1 = scmp.lt.s32.totalorder %s4181_s12, 3 }
   0x4   : > { %p138_p2 = pnand %p2843_p0, %p137_p1 }
   0x6   : > { %141 = sbr.rel (%p138_p2) target bundleno = 674 (0x2a2), region = 32 }
   0xd   : > { %v4216_v0 = vld [vmem:[%s5231_s1 + $0x40] sm:$0xff]   ;;  %v5234_v1 = vmov 0.0   ;;  %vm4184_vm0 = vmmov 0   ;;  %p161_p3 = scmp.lt.s32.totalorder %s2839_s13, 1  ;;  %v4236_v4 = vld [vmem:[%s5231_s1 + $0x48] sm:$0xff]   ;;  %v4257_v7 = vld [vmem:[%s5231_s1 + $0x50] sm:$0xff]  }
   0xe   : > { %3711 = vmatprep.subr.bf16.mxu1 %v5234_v1  ;;  %v4222_v2 = vld [vmem:[%s5231_s1 + $0x80] sm:$0xff]   ;;  %3275 = vmatprep.subr.bf16.mxu0 %v4216_v0  ;;  %v4243_v5 = vld [vmem:[%s5231_s1 + $0x88] sm:$0xff]   ;;  %v4263_v8 = vld [vmem:[%s5231_s1 + $0x10] sm:$0xff]   ;;  %vm556_vm1 = vcmask 261120   ;;  %vm2757_vm2 = vcmask 519168   ;;  %vm2782_vm3 = vcmask 517120  }
   0xf   : > { %v4228_v3 = vld [vmem:[%s5231_s1] sm:$0xff]   ;;  %3715 = vmatprep.mubr.msk.bf16.mxu1 %vm4184_vm0, %v5234_v1  ;;  %3712 = vmatpush3.bf16.msra.mxu1 %v4222_v2  ;;  %s5354_s13 = smov (!%p161_p3, %s2839_s13), 1  ;;  %v4251_v6 = vld [vmem:[%s5231_s1 + $0x8] sm:$0xff]   ;;  %v4274_v9 = vld [vmem:[%s5231_s1 + $0x58] sm:$0xff]  }
  0x10   : > { %3276 = vmatpush3.bf16.msra.mxu0 %v4228_v3  ;;  %3713 = vmatprep.subr.bf16.mxu1 %v5234_v1  ;;  %s3939_s26 = smul.u32 1200, %s5354_s13  ;;  %v4284_v11 = vld [vmem:[%s5231_s1 + $0x18] sm:$0xff]   ;;  %v4292_v12 = vld [vmem:[%s5231_s1 + $0x60] sm:$0xff]   ;;  %v4307_v15 = vld [vmem:[%s5231_s1 + $0x68] sm:$0xff]  }
  0x11   : > { %3277 = vmatprep.subr.bf16.mxu0 %v4236_v4  ;;  %v4301_v14 = vld [vmem:[%s5231_s1 + $0x20] sm:$0xff]   ;;  %v4316_v16 = vld [vmem:[%s5231_s1 + $0x28] sm:$0xff]   ;;  %v4324_v17 = vld [vmem:[%s5231_s1 + $0x70] sm:$0xff]   ;;  %s3940_s8 = smul.u32 100, %s5354_s13 }
  0x12   : > { %s4269_s6 = scalar_lea.vmem %s5230_s0, %s3939_s26  ;;  %v4334_v20 = vld [vmem:[%s5231_s1 + $0x30] sm:$0xff]   ;;  %v4340_v21 = vld [vmem:[%s5231_s1 + $0x78] sm:$0xff]  }
  0x13   : > { %3714 = vmatpush3.bf16.msra.mxu1 %v4243_v5  ;;  %v3957_v10 = vld [vmem:[%s4269_s6 + $0x8] ss:$12 sps:$4 sm:$0xff]   ;;  %v3962_v13 = vld [vmem:[%s4269_s6 + $0x20] ss:$12 sps:$4 sm:$0xff]   ;;  %v3974_v18 = vld [vmem:[%s4269_s6 + $0x4] ss:$12 sps:$4 sm:$0xff]   ;;  %s5011_s11 = scalar_lea.vmem %s5233_s3, %s3940_s8 }
  0x14   : > { %3278 = vmatpush3.bf16.msra.mxu0 %v4251_v6  ;;  %3384 = vmatprep.subr.bf16.mxu1 %v4216_v0  ;;  %v3967_v19 = vld [vmem:[%s4269_s6 + $0x38] ss:$12 sps:$4 sm:$0xff]   ;;  %v3972_v23 = vld [vmem:[%s4269_s6] ss:$12 sps:$4 sm:$0xff]   ;;  %v3975_v24 = vld [vmem:[%s4269_s6 + $0x50] ss:$12 sps:$4 sm:$0xff]  }
  0x15   : > { %3279 = vmatprep.subr.bf16.mxu0 %v4257_v7  ;;  %628 = vmatprep.mubr.bf16.mxu0 %v3974_v18  ;;  %v4349_v22 = vld [vmem:[%s5231_s1 + $0x38] sm:$0xff]   ;;  %v3978_v26 = vld [vmem:[%s4269_s6 + $0x68] ss:$12 sps:$4 sm:$0xff]   ;;  %v3982_v29 = vld [vmem:[%s4269_s6 + $0x80] ss:$12 sps:$4 sm:$0xff]  }
  0x16   : > { %3716 = vmatmul.mubr.msk.bf16.vlgmr.msra.gmra.mrb[0].mxu1 %vm556_vm1, %v3957_v10  ;;  %v3976_v25 = vld [vmem:[%s4269_s6 + $0x1c] ss:$12 sps:$4 sm:$0xff]   ;;  %v3979_v27 = vld [vmem:[%s4269_s6 + $0x18] ss:$12 sps:$4 sm:$0xff]   ;;  %v3980_v28 = vld [vmem:[%s4269_s6 + $0x34] ss:$12 sps:$4 sm:$0xff]  }
  0x17   : > { %3719 = vmatprep.mubr.msk.bf16.mxu1 %vm4184_vm0, %v5234_v1  ;;  %3385 = vmatpush3.bf16.msra.mxu1 %v4228_v3  ;;  %v3983_v30 = vld [vmem:[%s4269_s6 + $0x30] ss:$12 sps:$4 sm:$0xff]   ;;  %v3984_v31 = vld [vmem:[%s4269_s6 + $0x4c] ss:$12 sps:$4 sm:$0xff]   ;;  %v3987_v33 = vld [vmem:[%s4269_s6 + $0x48] ss:$12 sps:$4 sm:$0xff]  }
  0x18   : > { %3280 = vmatpush3.bf16.msra.mxu0 %v4263_v8  ;;  %3386 = vmatprep.subr.bf16.mxu1 %v4236_v4  ;;  %v3986_v32 = vld [vmem:[%s4269_s6 + $0x98] ss:$12 sps:$4 sm:$0xff]   ;;  %v3990_v35 = vld [vmem:[%s4269_s6 + $0xb0] ss:$12 sps:$4 sm:$0xff]   ;;  %v3991_v36 = vld [vmem:[%s4269_s6 + $0x60] ss:$12 sps:$4 sm:$0xff]  }
  0x19   : > { %3281 = vmatprep.subr.bf16.mxu0 %v4274_v9  ;;  %v3988_v34 = vld [vmem:[%s4269_s6 + $0x64] ss:$12 sps:$4 sm:$0xff]   ;;  %v3992_v37 = vld [vmem:[%s4269_s6 + $0x7c] ss:$12 sps:$4 sm:$0xff]   ;;  %v3996_v40 = vld [vmem:[%s4269_s6 + $0x94] ss:$12 sps:$4 sm:$0xff]  }
  0x1a   : > { %v3994_v38 = vld [vmem:[%s4269_s6 + $0xc8] ss:$12 sps:$4 sm:$0xff]   ;;  %v3995_v39 = vld [vmem:[%s4269_s6 + $0x78] ss:$12 sps:$4 sm:$0xff]   ;;  %v3998_v41 = vld [vmem:[%s4269_s6 + $0xe0] ss:$12 sps:$4 sm:$0xff]  }
  0x1b   : > { %3387 = vmatpush3.bf16.msra.mxu1 %v4251_v6  ;;  %v3999_v42 = vld [vmem:[%s4269_s6 + $0x90] ss:$12 sps:$4 sm:$0xff]   ;;  %v4000_v43 = vld [vmem:[%s4269_s6 + $0xac] ss:$12 sps:$4 sm:$0xff]   ;;  %v4003_v45 = vld [vmem:[%s4269_s6 + $0xa8] ss:$12 sps:$4 sm:$0xff]  }
  0x1c   : > { %3282 = vmatpush3.bf16.msra.mxu0 %v4284_v11  ;;  %3388 = vmatprep.subr.bf16.mxu1 %v4257_v7  ;;  %v4002_v44 = vld [vmem:[%s4269_s6 + $0xf8] ss:$12 sps:$4 sm:$0xff]   ;;  %v4006_v47 = vld [vmem:[%s4269_s6 + $0x110] ss:$12 sps:$4 sm:$0xff]   ;;  %v4007_v48 = vld [vmem:[%s4269_s6 + $0xc0] ss:$12 sps:$4 sm:$0xff]  }
  0x1d   : > { %3283 = vmatprep.subr.bf16.mxu0 %v4292_v12  ;;  %v4004_v46 = vld [vmem:[%s4269_s6 + $0xc4] ss:$12 sps:$4 sm:$0xff]   ;;  %v4008_v49 = vld [vmem:[%s4269_s6 + $0xdc] ss:$12 sps:$4 sm:$0xff]   ;;  %v4015_v53 = vld [vmem:[%s4269_s6 + $0xf4] ss:$12 sps:$4 sm:$0xff]  }
  0x1e   : > { %3720 = vmatmul.mubr.msk.bf16.gmra.mrb[4].mxu1 %vm556_vm1, %v3962_v13  ;;  %v4010_v50 = vld [vmem:[%s4269_s6 + $0x128] ss:$0 sps:$4 sm:$0x33]   ;;  %v4011_v51 = vld [vmem:[%s4269_s6 + $0xd8] ss:$12 sps:$4 sm:$0xff]  }
  0x1f   : > { %3723 = vmatprep.mubr.msk.bf16.mxu1 %vm4184_vm0, %v5234_v1  ;;  %3389 = vmatpush3.bf16.msra.mxu1 %v4263_v8  ;;  %v4014_v52 = vld [vmem:[%s4269_s6 + $0x130] ss:$12 sps:$4 sm:$0xff]   ;;  %v4012_v54 = vld [vmem:[%s4269_s6 + $0x12c] ss:$12 sps:$4 sm:$0xff]   ;;  %v4018_v56 = vld [vmem:[%s4269_s6 + $0x148] ss:$12 sps:$4 sm:$0xff]  }
  0x20   : > { %3284 = vmatpush3.bf16.msra.mxu0 %v4301_v14  ;;  %3390 = vmatprep.subr.bf16.mxu1 %v4274_v9  ;;  %v4017_v55 = vld [vmem:[%s4269_s6 + $0xf0] ss:$12 sps:$4 sm:$0xff]   ;;  %v4020_v57 = vld [vmem:[%s4269_s6 + $0x10c] ss:$12 sps:$4 sm:$0xff]   ;;  %v256_v58 = vld [vmem:[%s4269_s6 + $0x120] sm:$0x33] }
  0x21   : > { %3285 = vmatprep.subr.bf16.mxu0 %v4307_v15  ;;  %v4022_v59 = vld [vmem:[%s4269_s6 + $0x144] ss:$12 sps:$4 sm:$0xff]   ;;  %v4023_v60 = vld [vmem:[%s4269_s6 + $0x108] ss:$12 sps:$4 sm:$0xff]   ;;  %v4024_v61 = vld [vmem:[%s4269_s6 + $0x160] ss:$12 sps:$4 sm:$0xff]   ;;  %v2883_v62 = vcombine.high %v256_v58, %v256_v58  ;;  %v2882_v10 = vcombine.low %v256_v58, %v256_v58 }
  0x22   : > { %v4027_v63 = vld [vmem:[%s4269_s6 + $0x15c] ss:$12 sps:$4 sm:$0xff]   ;;  %v4029_v13 = vld [vmem:[%s4269_s6 + $0x178] ss:$12 sps:$4 sm:$0xff]   ;;  %v4031_v18 = vld [vmem:[%s4269_s6 + $0x174] ss:$12 sps:$4 sm:$0xff]  }
  0x23   : > { %3391 = vmatpush3.bf16.msra.mxu1 %v4284_v11 }
  0x24   : > { %3286 = vmatpush3.bf16.msra.mxu0 %v4316_v16  ;;  %3392 = vmatprep.subr.bf16.mxu1 %v4292_v12 }
  0x25   : > { %3287 = vmatprep.subr.bf16.mxu0 %v4324_v17 }
  0x26   : > { %3724 = vmatmul.mubr.msk.bf16.gmra.mrb[8].mxu1 %vm556_vm1, %v3967_v19  ;;  %v4032_v19 = vld [vmem:[%s4269_s6 + $0x134] ss:$12 sps:$4 sm:$0xff]  }
  0x27   : > { %3727 = vmatprep.mubr.msk.bf16.mxu1 %vm4184_vm0, %v5234_v1  ;;  %3393 = vmatpush3.bf16.msra.mxu1 %v4301_v14 }
  0x28   : > { %3288 = vmatpush3.bf16.msra.mxu0 %v4334_v20  ;;  %3394 = vmatprep.subr.bf16.mxu1 %v4307_v15 }
  0x29   : > { %3289 = vmatprep.subr.bf16.mxu0 %v4340_v21 }
  0x2b   : > { %3395 = vmatpush3.bf16.msra.mxu1 %v4316_v16 }
  0x2c   : > { %3290 = vmatpush3.bf16.msra.mxu0 %v4349_v22  ;;  %3396 = vmatprep.subr.bf16.mxu1 %v4324_v17 }
  0x2d   : > { %3767 = vmatprep.subr.bf16.mxu0 %v5234_v1 }
  0x2e   : > { %3728 = vmatmul.mubr.msk.bf16.gmra.mrb[12].mxu1 %vm556_vm1, %v3975_v24  ;;  %v4035_v24 = vld [vmem:[%s4269_s6 + $0x18c] ss:$12 sps:$4 sm:$0xff]  }
  0x2f   : > { %629 = vmatmul.mubr.bf16.vlgmr.msra.gmra.mrb[0].mxu0 %v3972_v23  ;;  %3731 = vmatprep.mubr.msk.bf16.mxu1 %vm4184_vm0, %v5234_v1  ;;  %v4033_v23 = vld [vmem:[%s4269_s6 + $0x190] ss:$12 sps:$4 sm:$0xff]  }
  0x30   : > { %3768 = vmatpush3.bf16.msra.mxu0 %v4222_v2  ;;  %636 = vmatprep.mubr.bf16.mxu0 %v3976_v25  ;;  %v4036_v25 = vld [vmem:[%s4269_s6 + $0x14c] ss:$12 sps:$4 sm:$0xff]  }
  0x31   : > { %3769 = vmatprep.subr.bf16.mxu0 %v5234_v1  ;;  %3397 = vmatpush3.bf16.msra.mxu1 %v4334_v20 }
  0x32   : > { %3398 = vmatprep.subr.bf16.mxu1 %v4340_v21 }
  0x34   : > { %3770 = vmatpush3.bf16.msra.mxu0 %v4243_v5 }
  0x35   : > { %3823 = vmatprep.subr.bf16.mxu0 %v5234_v1  ;;  %3399 = vmatpush3.bf16.msra.mxu1 %v4349_v22 }
  0x36   : > { %3732 = vmatmul.mubr.msk.bf16.gmra.mrb[16].mxu1 %vm556_vm1, %v3978_v26  ;;  %3493 = vmatprep.subr.bf16.mxu1 %v4216_v0  ;;  %v4037_v26 = vld [vmem:[%s4269_s6 + $0x1a8] ss:$12 sps:$4 sm:$0xff]  }
  0x37   : > { %637 = vmatmul.mubr.bf16.gmra.mrb[4].mxu0 %v3979_v27  ;;  %3735 = vmatprep.mubr.msk.bf16.mxu1 %vm4184_vm0, %v5234_v1  ;;  %v4041_v27 = vld [vmem:[%s4269_s6 + $0x1c0] ss:$12 sps:$4 sm:$0xff]  }
  0x38   : > { %644 = vmatprep.mubr.bf16.mxu0 %v3980_v28  ;;  %v4043_v28 = vld [vmem:[%s4269_s6 + $0x1bc] ss:$12 sps:$4 sm:$0xff]  }
  0x3e   : > { %3736 = vmatmul.mubr.msk.bf16.gmra.mrb[20].mxu1 %vm556_vm1, %v3982_v29  ;;  %v4044_v29 = vld [vmem:[%s4269_s6 + $0x17c] ss:$12 sps:$4 sm:$0xff]  }
  0x3f   : > { %645 = vmatmul.mubr.bf16.gmra.mrb[8].mxu0 %v3983_v30  ;;  %3739 = vmatprep.mubr.msk.bf16.mxu1 %vm4184_vm0, %v5234_v1  ;;  %v4045_v30 = vld [vmem:[%s4269_s6 + $0x1d8] ss:$12 sps:$4 sm:$0xff]  }
  0x40   : > { %652 = vmatprep.mubr.bf16.mxu0 %v3984_v31  ;;  %v4048_v31 = vld [vmem:[%s4269_s6 + $0x194] ss:$12 sps:$4 sm:$0xff]  }
  0x46   : > { %3740 = vmatmul.mubr.msk.bf16.gmra.mrb[24].mxu1 %vm556_vm1, %v3986_v32  ;;  %v4049_v32 = vld [vmem:[%s4269_s6 + $0x1f0] ss:$12 sps:$4 sm:$0xff]  }
  0x47   : > { %653 = vmatmul.mubr.bf16.gmra.mrb[12].mxu0 %v3987_v33  ;;  %3743 = vmatprep.mubr.msk.bf16.mxu1 %vm4184_vm0, %v5234_v1  ;;  %v4051_v33 = vld [vmem:[%s4269_s6 + $0x1ec] ss:$12 sps:$4 sm:$0xff]  }
  0x48   : > { %660 = vmatprep.mubr.bf16.mxu0 %v3988_v34  ;;  %v4052_v34 = vld [vmem:[%s4269_s6 + $0x1ac] ss:$12 sps:$4 sm:$0xff]  }
  0x4e   : > { %3744 = vmatmul.mubr.msk.bf16.gmra.mrb[28].mxu1 %vm556_vm1, %v3990_v35  ;;  %v4053_v35 = vld [vmem:[%s4269_s6 + $0x208] ss:$12 sps:$4 sm:$0xff]  }
  0x4f   : > { %661 = vmatmul.mubr.bf16.gmra.mrb[16].mxu0 %v3991_v36  ;;  %3747 = vmatprep.mubr.msk.bf16.mxu1 %vm4184_vm0, %v5234_v1  ;;  %v4055_v36 = vld [vmem:[%s4269_s6 + $0x204] ss:$12 sps:$4 sm:$0xff]  }
  0x50   : > { %668 = vmatprep.mubr.bf16.mxu0 %v3992_v37  ;;  %v4056_v37 = vld [vmem:[%s4269_s6 + $0x1c4] ss:$12 sps:$4 sm:$0xff]  }
  0x56   : > { %3748 = vmatmul.mubr.msk.bf16.gmra.mrb[32].mxu1 %vm556_vm1, %v3994_v38  ;;  %v4057_v38 = vld [vmem:[%s4269_s6 + $0x220] ss:$12 sps:$4 sm:$0xff]  }
  0x57   : > { %669 = vmatmul.mubr.bf16.gmra.mrb[20].mxu0 %v3995_v39  ;;  %3751 = vmatprep.mubr.msk.bf16.mxu1 %vm4184_vm0, %v5234_v1  ;;  %v4059_v39 = vld [vmem:[%s4269_s6 + $0x21c] ss:$12 sps:$4 sm:$0xff]  }
  0x58   : > { %676 = vmatprep.mubr.bf16.mxu0 %v3996_v40  ;;  %v4060_v40 = vld [vmem:[%s4269_s6 + $0x1dc] ss:$12 sps:$4 sm:$0xff]  }
  0x5e   : > { %3752 = vmatmul.mubr.msk.bf16.gmra.mrb[36].mxu1 %vm556_vm1, %v3998_v41  ;;  %v4061_v41 = vld [vmem:[%s4269_s6 + $0x238] ss:$12 sps:$4 sm:$0xff]  }
  0x5f   : > { %677 = vmatmul.mubr.bf16.gmra.mrb[24].mxu0 %v3999_v42  ;;  %3755 = vmatprep.mubr.msk.bf16.mxu1 %vm4184_vm0, %v5234_v1  ;;  %v2964_v42 = vld [vmem:[%s4269_s6 + $0x24c] sm:$0x33] }
  0x60   : > { %684 = vmatprep.mubr.bf16.mxu0 %v4000_v43  ;;  %v4063_v43 = vld [vmem:[%s4269_s6 + $0x234] ss:$12 sps:$4 sm:$0xff]  }
  0x66   : > { %3756 = vmatmul.mubr.msk.bf16.gmra.mrb[40].mxu1 %vm556_vm1, %v4002_v44  ;;  %v4064_v44 = vld [vmem:[%s4269_s6 + $0x1f4] ss:$12 sps:$4 sm:$0xff]  }
  0x67   : > { %685 = vmatmul.mubr.bf16.gmra.mrb[28].mxu0 %v4003_v45  ;;  %3759 = vmatprep.mubr.msk.bf16.mxu1 %vm4184_vm0, %v5234_v1  ;;  %v3003_v45 = vcombine.high %v2964_v42, %v2964_v42 }
  0x68   : > { %692 = vmatprep.mubr.bf16.mxu0 %v4004_v46  ;;  %v3002_v46 = vcombine.low %v2964_v42, %v2964_v42 }
  0x6e   : > { %3760 = vmatmul.mubr.msk.bf16.gmra.mrb[44].mxu1 %vm556_vm1, %v4006_v47  ;;  %v4067_v47 = vld [vmem:[%s4269_s6 + $0x20c] ss:$12 sps:$4 sm:$0xff]  }
  0x6f   : > { %693 = vmatmul.mubr.bf16.gmra.mrb[32].mxu0 %v4007_v48  ;;  %3763 = vmatprep.mubr.msk.bf16.mxu1 %vm4184_vm0, %v5234_v1  ;;  %v4070_v48 = vld [vmem:[%s4269_s6 + $0x25c] ss:$12 sps:$4 sm:$0xff]  }
  0x70   : > { %700 = vmatprep.mubr.bf16.mxu0 %v4008_v49  ;;  %v4068_v49 = vld [vmem:[%s4269_s6 + $0x258] ss:$12 sps:$4 sm:$0xff]  }
  0x76   : > { %3764 = vmatmul.mubr.msk.bf16.gmra.mrb[48].mxu1 %vm556_vm1, %v4010_v50  ;;  %v4071_v50 = vld [vmem:[%s4269_s6 + $0x224] ss:$12 sps:$4 sm:$0xff]  }
  0x77   : > { %701 = vmatmul.mubr.bf16.gmra.mrb[36].mxu0 %v4011_v51  ;;  %1180 = vmatprep.mubr.bf16.mxu1 %v4014_v52  ;;  %v4072_v51 = vld [vmem:[%s4269_s6 + $0x274] ss:$12 sps:$4 sm:$0xff]  }
  0x78   : > { %708 = vmatprep.mubr.bf16.mxu0 %v4015_v53  ;;  %v4074_v53 = vld [vmem:[%s4269_s6 + $0x270] ss:$12 sps:$4 sm:$0xff]  }
  0x7e   : > { %1181 = vmatmul.mubr.bf16.vlgmr.msra.gmra.mrb[52].mxu1 %v4012_v54  ;;  %v4075_v54 = vld [vmem:[%s4269_s6 + $0x23c] ss:$12 sps:$4 sm:$0xff]  }
  0x7f   : > { %709 = vmatmul.mubr.bf16.gmra.mrb[40].mxu0 %v4017_v55  ;;  %1188 = vmatprep.mubr.bf16.mxu1 %v4018_v56 }
  0x80   : > { %716 = vmatprep.mubr.bf16.mxu0 %v4020_v57  ;;  %3494 = vmatpush3.bf16.msra.mxu1 %v4228_v3  ;;  %v4076_v57 = vld [vmem:[%s4269_s6 + $0x28c] ss:$12 sps:$4 sm:$0xff]  }
  0x81   : > { %3495 = vmatprep.subr.bf16.mxu1 %v4236_v4 }
  0x84   : > { %3496 = vmatpush3.bf16.msra.mxu1 %v4251_v6 }
  0x85   : > { %3497 = vmatprep.subr.bf16.mxu1 %v4257_v7 }
  0x86   : > { %1189 = vmatmul.mubr.bf16.gmra.mrb[56].mxu1 %v4022_v59  ;;  %v4079_v59 = vld [vmem:[%s4269_s6 + $0x254] ss:$0 sps:$4 sm:$0x33]  }
  0x87   : > { %717 = vmatmul.mubr.bf16.gmra.mrb[44].mxu0 %v4023_v60  ;;  %1196 = vmatprep.mubr.bf16.mxu1 %v4024_v61 }
  0x88   : > { %724 = vmatprep.mubr.bf16.mxu0 %v2883_v62  ;;  %3498 = vmatpush3.bf16.msra.mxu1 %v4263_v8  ;;  %v4083_v62 = vld [vmem:[%s4269_s6 + $0x260] ss:$12 sps:$4 sm:$0xff]  }
  0x89   : > { %3499 = vmatprep.subr.bf16.mxu1 %v4274_v9 }
  0x8c   : > { %3500 = vmatpush3.bf16.msra.mxu1 %v4284_v11 }
  0x8d   : > { %3501 = vmatprep.subr.bf16.mxu1 %v4292_v12 }
  0x8e   : > { %1197 = vmatmul.mubr.bf16.gmra.mrb[60].mxu1 %v4027_v63 }
  0x8f   : > { %725 = vmatmul.mubr.bf16.gmra.mrb[48].mxu0 %v2882_v10  ;;  %1204 = vmatprep.mubr.bf16.mxu1 %v4029_v13  ;;  %v4086_v13 = vld [vmem:[%s4269_s6 + $0x2b8] ss:$12 sps:$4 sm:$0xff]  }
  0x90   : > { %3771 = vmatprep.mubr.msk.bf16.mxu0 %vm4184_vm0, %v5234_v1  ;;  %3502 = vmatpush3.bf16.msra.mxu1 %v4301_v14 }
  0x91   : > { %3503 = vmatprep.subr.bf16.mxu1 %v4307_v15 }
  0x94   : > { %3504 = vmatpush3.bf16.msra.mxu1 %v4316_v16 }
  0x95   : > { %3505 = vmatprep.subr.bf16.mxu1 %v4324_v17 }
  0x96   : > { %1205 = vmatmul.mubr.bf16.gmra.mrb[64].mxu1 %v4031_v18  ;;  %v4087_v18 = vld [vmem:[%s4269_s6 + $0x278] ss:$12 sps:$4 sm:$0xff]  }
  0x97   : > { %3772 = vmatmul.mubr.msk.bf16.vlgmr.msra.gmra.mrb[52].mxu0 %vm556_vm1, %v4032_v19  ;;  %1212 = vmatprep.mubr.bf16.mxu1 %v4033_v23 }
  0x98   : > { %3824 = vmatpush3.bf16.msra.mxu0 %v4222_v2  ;;  %3775 = vmatprep.mubr.msk.bf16.mxu0 %vm4184_vm0, %v5234_v1  ;;  %v4039_v2 = vld [vmem:[%s4269_s6 + $0x1a4] ss:$12 sps:$4 sm:$0xff]  }
  0x99   : > { %3825 = vmatprep.subr.bf16.mxu0 %v5234_v1  ;;  %3506 = vmatpush3.bf16.msra.mxu1 %v4334_v20 }
  0x9a   : > { %3507 = vmatprep.subr.bf16.mxu1 %v4340_v21 }
  0x9c   : > { %3826 = vmatpush3.bf16.msra.mxu0 %v4243_v5  ;;  %v4040_v5 = vld [vmem:[%s4269_s6 + $0x164] ss:$12 sps:$4 sm:$0xff]  }
  0x9d   : > { %3879 = vmatprep.subr.bf16.mxu0 %v5234_v1  ;;  %3508 = vmatpush3.bf16.msra.mxu1 %v4349_v22 }
  0x9e   : > { %1213 = vmatmul.mubr.bf16.gmra.mrb[68].mxu1 %v4035_v24  ;;  %3602 = vmatprep.subr.bf16.mxu1 %v4216_v0  ;;  %v4047_v0 = vld [vmem:[%s4269_s6 + $0x1d4] ss:$12 sps:$4 sm:$0xff]  }
  0x9f   : > { %3776 = vmatmul.mubr.msk.bf16.gmra.mrb[56].mxu0 %vm556_vm1, %v4036_v25  ;;  %1220 = vmatprep.mubr.bf16.mxu1 %v4037_v26  ;;  %v4088_v26 = vld [vmem:[%s4269_s6 + $0x2d4] ss:$12 sps:$4 sm:$0xff]  }
  0xa0   : > { %3779 = vmatprep.mubr.msk.bf16.mxu0 %vm4184_vm0, %v5234_v1 }
  0xa6   : > { %1221 = vmatmul.mubr.bf16.gmra.mrb[72].mxu1 %v4039_v2  ;;  %v4585_v2 = vld [vmem:[%s5231_s1 + $0x88] sm:$0xff]  }
  0xa7   : > { %3780 = vmatmul.mubr.msk.bf16.gmra.mrb[60].mxu0 %vm556_vm1, %v4040_v5  ;;  %1228 = vmatprep.mubr.bf16.mxu1 %v4041_v27 }
  0xa8   : > { %3783 = vmatprep.mubr.msk.bf16.mxu0 %vm4184_vm0, %v5234_v1 }
  0xae   : > { %1229 = vmatmul.mubr.bf16.gmra.mrb[76].mxu1 %v4043_v28 }
  0xaf   : > { %3784 = vmatmul.mubr.msk.bf16.gmra.mrb[64].mxu0 %vm556_vm1, %v4044_v29  ;;  %1236 = vmatprep.mubr.bf16.mxu1 %v4045_v30 }
  0xb0   : > { %3787 = vmatprep.mubr.msk.bf16.mxu0 %vm4184_vm0, %v5234_v1 }
  0xb6   : > { %1237 = vmatmul.mubr.bf16.gmra.mrb[80].mxu1 %v4047_v0 }
  0xb7   : > { %3788 = vmatmul.mubr.msk.bf16.gmra.mrb[68].mxu0 %vm556_vm1, %v4048_v31  ;;  %1244 = vmatprep.mubr.bf16.mxu1 %v4049_v32  ;;  %v4090_v31 = vld [vmem:[%s4269_s6 + $0x2d0] ss:$12 sps:$4 sm:$0xff]  }
  0xb8   : > { %3791 = vmatprep.mubr.msk.bf16.mxu0 %vm4184_vm0, %v5234_v1  ;;  %v4091_v32 = vld [vmem:[%s4269_s6 + $0x290] ss:$12 sps:$4 sm:$0xff]  }
  0xbe   : > { %1245 = vmatmul.mubr.bf16.gmra.mrb[84].mxu1 %v4051_v33 }
  0xbf   : > { %3792 = vmatmul.mubr.msk.bf16.gmra.mrb[72].mxu0 %vm556_vm1, %v4052_v34  ;;  %1252 = vmatprep.mubr.bf16.mxu1 %v4053_v35 }
  0xc0   : > { %3795 = vmatprep.mubr.msk.bf16.mxu0 %vm4184_vm0, %v5234_v1 }
  0xc6   : > { %1253 = vmatmul.mubr.bf16.gmra.mrb[88].mxu1 %v4055_v36  ;;  %v4092_v36 = vld [vmem:[%s4269_s6 + $0x2ec] ss:$12 sps:$4 sm:$0xff]  }
  0xc7   : > { %3796 = vmatmul.mubr.msk.bf16.gmra.mrb[76].mxu0 %vm556_vm1, %v4056_v37  ;;  %1260 = vmatprep.mubr.bf16.mxu1 %v4057_v38 }
  0xc8   : > { %3799 = vmatprep.mubr.msk.bf16.mxu0 %vm4184_vm0, %v5234_v1 }
  0xce   : > { %1261 = vmatmul.mubr.bf16.gmra.mrb[92].mxu1 %v4059_v39 }
  0xcf   : > { %3800 = vmatmul.mubr.msk.bf16.gmra.mrb[80].mxu0 %vm556_vm1, %v4060_v40  ;;  %1268 = vmatprep.mubr.bf16.mxu1 %v4061_v41 }
  0xd0   : > { %3803 = vmatprep.mubr.msk.bf16.mxu0 %vm4184_vm0, %v5234_v1 }
  0xd6   : > { %1269 = vmatmul.mubr.bf16.gmra.mrb[96].mxu1 %v4063_v43 }
  0xd7   : > { %3804 = vmatmul.mubr.msk.bf16.gmra.mrb[84].mxu0 %vm556_vm1, %v4064_v44  ;;  %1276 = vmatprep.mubr.bf16.mxu1 %v3003_v45  ;;  %v4094_v45 = vld [vmem:[%s4269_s6 + $0x2e8] ss:$12 sps:$4 sm:$0xff]  }
  0xd8   : > { %3807 = vmatprep.mubr.msk.bf16.mxu0 %vm4184_vm0, %v5234_v1 }
  0xde   : > { %1277 = vmatmul.mubr.bf16.gmra.mrb[100].mxu1 %v3002_v46  ;;  %v4095_v46 = vld [vmem:[%s4269_s6 + $0x2a8] ss:$12 sps:$4 sm:$0xff]  }
  0xdf   : > { %3808 = vmatmul.mubr.msk.bf16.gmra.mrb[88].mxu0 %vm556_vm1, %v4067_v47  ;;  %1732 = vmatprep.mubr.bf16.mxu1 %v4070_v48 }
  0xe0   : > { %3811 = vmatprep.mubr.msk.bf16.mxu0 %vm4184_vm0, %v5234_v1 }
  0xe6   : > { %1733 = vmatmul.mubr.bf16.vlgmr.msra.gmra.mrb[104].mxu1 %v4068_v49 }
  0xe7   : > { %3812 = vmatmul.mubr.msk.bf16.gmra.mrb[92].mxu0 %vm556_vm1, %v4071_v50  ;;  %1740 = vmatprep.mubr.bf16.mxu1 %v4072_v51  ;;  %v4096_v51 = vld [vmem:[%s4269_s6 + $0x304] ss:$12 sps:$4 sm:$0xff]  }
  0xe8   : > { %3815 = vmatprep.mubr.msk.bf16.mxu0 %vm4184_vm0, %v5234_v1  ;;  %3603 = vmatpush3.bf16.msra.mxu1 %v4228_v3 }
  0xe9   : > { %v4525_v52 = vpop.f32.mrb[0].mxu1  ;;  %3604 = vmatprep.subr.bf16.mxu1 %v4236_v4  ;;  %v4078_v4 = vld [vmem:[%s4269_s6 + $0x288] ss:$12 sps:$4 sm:$0xff]  }
  0xea   : > { %v3717_v55 = vpop.f32.mrb[1].mxu1 }
  0xeb   : > { %v4530_v56 = vpop.f32.mrb[2].mxu1 }
  0xec   : > { %v3718_v58 = vpop.f32.mrb[3].mxu1  ;;  %3605 = vmatpush3.bf16.msra.mxu1 %v4251_v6 }
  0xed   : > { %3606 = vmatprep.subr.bf16.mxu1 %v4257_v7  ;;  %v4080_v7 = vld [vmem:[%s4269_s6 + $0x2a4] ss:$12 sps:$4 sm:$0xff]  }
  0xee   : > { %1741 = vmatmul.mubr.bf16.gmra.mrb[108].mxu1 %v4074_v53 }
  0xef   : > { %3816 = vmatmul.mubr.msk.bf16.gmra.mrb[96].mxu0 %vm556_vm1, %v4075_v54  ;;  %1748 = vmatprep.mubr.bf16.mxu1 %v4076_v57 }
  0xf0   : > { %3819 = vmatprep.mubr.msk.bf16.mxu0 %vm4184_vm0, %v5234_v1  ;;  %3607 = vmatpush3.bf16.msra.mxu1 %v4263_v8 }
  0xf1   : > { %v4539_v3 = vpop.f32.mrb[4].mxu1  ;;  %3608 = vmatprep.subr.bf16.mxu1 %v4274_v9  ;;  %v4082_v9 = vld [vmem:[%s4269_s6 + $0x2a0] ss:$12 sps:$4 sm:$0xff]  }
  0xf2   : > { %v3721_v6 = vpop.f32.mrb[5].mxu1 }
  0xf3   : > { %v4544_v60 = vpop.f32.mrb[6].mxu1 }
  0xf4   : > { %v3722_v61 = vpop.f32.mrb[7].mxu1  ;;  %3609 = vmatpush3.bf16.msra.mxu1 %v4284_v11  ;;  %v4084_v11 = vld [vmem:[%s4269_s6 + $0x2bc] ss:$12 sps:$4 sm:$0xff]  }
  0xf5   : > { %3610 = vmatprep.subr.bf16.mxu1 %v4292_v12 }
  0xf6   : > { %1749 = vmatmul.mubr.bf16.gmra.mrb[112].mxu1 %v4078_v4  ;;  %v4098_v4 = vld [vmem:[%s4269_s6 + $0x300] ss:$12 sps:$4 sm:$0xff]  }
  0xf7   : > { %3820 = vmatmul.mubr.msk.bf16.gmra.mrb[100].mxu0 %vm556_vm1, %v4079_v59  ;;  %1756 = vmatprep.mubr.bf16.mxu1 %v4080_v7  ;;  %v4099_v59 = vld [vmem:[%s4269_s6 + $0x2c0] ss:$12 sps:$4 sm:$0xff]  }
  0xf8   : > { %3827 = vmatprep.mubr.msk.bf16.mxu0 %vm4184_vm0, %v5234_v1  ;;  %3611 = vmatpush3.bf16.msra.mxu1 %v4301_v14  ;;  %v4567_v14 = vld [vmem:[%s5231_s1 + $0x80] sm:$0xff]  }
  0xf9   : > { %v4553_v8 = vpop.f32.mrb[8].mxu1  ;;  %3612 = vmatprep.subr.bf16.mxu1 %v4307_v15 }
  0xfa   : > { %v3725_v63 = vpop.f32.mrb[9].mxu1 }
  0xfb   : > { %v4558_v10 = vpop.f32.mrb[10].mxu1 }
  0xfc   : > { %v3726_v12 = vpop.f32.mrb[11].mxu1  ;;  %3613 = vmatpush3.bf16.msra.mxu1 %v4316_v16 }
  0xfd   : > { %3614 = vmatprep.subr.bf16.mxu1 %v4324_v17 }
  0xfe   : > { %1757 = vmatmul.mubr.bf16.gmra.mrb[116].mxu1 %v4082_v9 }
  0xff   : > { %3828 = vmatmul.mubr.msk.bf16.vlgmr.msra.gmra.mrb[104].mxu0 %vm556_vm1, %v4083_v62  ;;  %1764 = vmatprep.mubr.bf16.mxu1 %v4084_v11 }
 0x100   : > { %3880 = vmatpush3.bf16.msra.mxu0 %v4567_v14  ;;  %3831 = vmatprep.mubr.msk.bf16.mxu0 %vm4184_vm0, %v5234_v1 }
 0x101   : > { %3881 = vmatprep.subr.bf16.mxu0 %v5234_v1  ;;  %v4573_v16 = vpop.f32.mrb[12].mxu1  ;;  %3615 = vmatpush3.bf16.msra.mxu1 %v4334_v20 }
 0x102   : > { %v3291_v15 = vpop.f32.mrb[0].mxu0  ;;  %v3729_v19 = vpop.f32.mrb[13].mxu1  ;;  %3616 = vmatprep.subr.bf16.mxu1 %v4340_v21 }
 0x103   : > { %v3292_v17 = vpop.f32.mrb[1].mxu0  ;;  %v4579_v25 = vpop.f32.mrb[14].mxu1 }
 0x104   : > { %v3293_v23 = vadd.f32 %v3292_v17, %v3291_v15  ;;  %v3294_v24 = vpop.f32.mrb[2].mxu0  ;;  %3882 = vmatpush3.bf16.msra.mxu0 %v4585_v2  ;;  %v3730_v5 = vpop.f32.mrb[15].mxu1 }
 0x105   : > { %v3295_v20 = vpop.f32.mrb[3].mxu0  ;;  %3617 = vmatpush3.bf16.msra.mxu1 %v4349_v22 }
 0x106   : > { %v4589_v27 = vadd.f32 %v3293_v23, %v4525_v52  ;;  %v3296_v21 = vadd.f32 %v3295_v20, %v3294_v24  ;;  %1765 = vmatmul.mubr.bf16.gmra.mrb[120].mxu1 %v4086_v13  ;;  %3935 = vmatprep.subr.bf16.mxu1 %v5234_v1  ;;  %v4102_v13 = vld [vmem:[%s4269_s6 + $0x318] ss:$12 sps:$4 sm:$0xff]  }
 0x107   : > { %3832 = vmatmul.mubr.msk.bf16.gmra.mrb[108].mxu0 %vm556_vm1, %v4087_v18  ;;  %1772 = vmatprep.mubr.bf16.mxu1 %v4088_v26  ;;  %v4103_v18 = vld [vmem:[%s4269_s6 + $0x2d8] ss:$12 sps:$4 sm:$0xff]   ;;  %v4104_v26 = vld [vmem:[%s4269_s6 + $0x334] ss:$12 sps:$4 sm:$0xff]  }
 0x108   : > { %v4594_v28 = vadd.f32 %v3296_v21, %v4530_v56  ;;  %3835 = vmatprep.mubr.msk.bf16.mxu0 %vm4184_vm0, %v5234_v1 }
 0x109   : > { %v4599_v30 = vpop.f32.mrb[16].mxu1 }
 0x10a   : > { %v3297_v29 = vpop.f32.mrb[4].mxu0  ;;  %v3733_v22 = vpop.f32.mrb[17].mxu1 }
 0x10b   : > { %v3298_v0 = vpop.f32.mrb[5].mxu0  ;;  %v4603_v35 = vpop.f32.mrb[18].mxu1  ;;  %v4106_v22 = vld [vmem:[%s4269_s6 + $0x330] ss:$12 sps:$4 sm:$0xff]  }
 0x10c   : > { %v3299_v33 = vadd.f32 %v3298_v0, %v3297_v29  ;;  %v3300_v34 = vpop.f32.mrb[6].mxu0  ;;  %v3734_v38 = vpop.f32.mrb[19].mxu1 }
 0x10d   : > { %v3301_v37 = vpop.f32.mrb[7].mxu0  ;;  %v4108_v38 = vld [vmem:[%s4269_s6 + $0x34c] ss:$12 sps:$4 sm:$0xff]  }
 0x10e   : > { %v4607_v39 = vadd.f32 %v3299_v33, %v4539_v3  ;;  %v3302_v40 = vadd.f32 %v3301_v37, %v3300_v34  ;;  %1773 = vmatmul.mubr.bf16.gmra.mrb[124].mxu1 %v4090_v31  ;;  %v4107_v33 = vld [vmem:[%s4269_s6 + $0x2f0] ss:$12 sps:$4 sm:$0xff]  }
 0x10f   : > { %3836 = vmatmul.mubr.msk.bf16.gmra.mrb[112].mxu0 %vm556_vm1, %v4091_v32  ;;  %1780 = vmatprep.mubr.bf16.mxu1 %v4092_v36 }
 0x110   : > { %v4611_v41 = vadd.f32 %v3302_v40, %v4544_v60  ;;  %3839 = vmatprep.mubr.msk.bf16.mxu0 %vm4184_vm0, %v5234_v1 }
 0x111   : > { %v4615_v43 = vpop.f32.mrb[20].mxu1 }
 0x112   : > { %v3303_v42 = vpop.f32.mrb[8].mxu0  ;;  %v3737_v47 = vpop.f32.mrb[21].mxu1 }
 0x113   : > { %v3304_v44 = vpop.f32.mrb[9].mxu0  ;;  %v4619_v50 = vpop.f32.mrb[22].mxu1 }
 0x114   : > { %v3305_v48 = vadd.f32 %v3304_v44, %v3303_v42  ;;  %v3306_v49 = vpop.f32.mrb[10].mxu0  ;;  %v3738_v53 = vpop.f32.mrb[23].mxu1 }
 0x115   : > { %v3307_v52 = vpop.f32.mrb[11].mxu0 }
 0x116   : > { %v4623_v54 = vadd.f32 %v3305_v48, %v4553_v8  ;;  %v3308_v55 = vadd.f32 %v3307_v52, %v3306_v49  ;;  %1781 = vmatmul.mubr.bf16.gmra.mrb[128].mxu1 %v4094_v45  ;;  %v4100_v8 = vld [vmem:[%s4269_s6 + $0x31c] ss:$12 sps:$4 sm:$0xff]  }
 0x117   : > { %3840 = vmatmul.mubr.msk.bf16.gmra.mrb[116].mxu0 %vm556_vm1, %v4095_v46  ;;  %1788 = vmatprep.mubr.bf16.mxu1 %v4096_v51  ;;  %v4110_v49 = vld [vmem:[%s4269_s6 + $0x348] ss:$12 sps:$4 sm:$0xff]  }
 0x118   : > { %v4627_v56 = vadd.f32 %v3308_v55, %v4558_v10  ;;  %3843 = vmatprep.mubr.msk.bf16.mxu0 %vm4184_vm0, %v5234_v1 }
 0x119   : > { %v4631_v58 = vpop.f32.mrb[24].mxu1 }
 0x11a   : > { %v3309_v57 = vpop.f32.mrb[12].mxu0  ;;  %v3741_v6 = vpop.f32.mrb[25].mxu1 }
 0x11b   : > { %v3310_v3 = vpop.f32.mrb[13].mxu0  ;;  %v4635_v61 = vpop.f32.mrb[26].mxu1 }
 0x11c   : > { %v3311_v60 = vadd.f32 %v3310_v3, %v3309_v57  ;;  %v3312_v7 = vpop.f32.mrb[14].mxu0  ;;  %v3742_v62 = vpop.f32.mrb[27].mxu1 }
 0x11d   : > { %v3313_v9 = vpop.f32.mrb[15].mxu0  ;;  %v4114_v62 = vld [vmem:[%s4269_s6 + $0x360] ss:$12 sps:$4 sm:$0xff]  }
 0x11e   : > { %v4639_v63 = vadd.f32 %v3311_v60, %v4573_v16  ;;  %v3314_v10 = vadd.f32 %v3313_v9, %v3312_v7  ;;  %1789 = vmatmul.mubr.bf16.gmra.mrb[132].mxu1 %v4098_v4  ;;  %v3066_v60 = vld [vmem:[%s4269_s6 + $0x378] sm:$0x33] }
 0x11f   : > { %3844 = vmatmul.mubr.msk.bf16.gmra.mrb[120].mxu0 %vm556_vm1, %v4099_v59  ;;  %1796 = vmatprep.mubr.bf16.mxu1 %v4100_v8 }
 0x120   : > { %v4643_v11 = vadd.f32 %v3314_v10, %v4579_v25  ;;  %3847 = vmatprep.mubr.msk.bf16.mxu0 %vm4184_vm0, %v5234_v1  ;;  %v4115_v10 = vld [vmem:[%s4269_s6 + $0x320] ss:$12 sps:$4 sm:$0xff]  }
 0x121   : > { %v4647_v15 = vpop.f32.mrb[28].mxu1 }
 0x122   : > { %v3315_v12 = vpop.f32.mrb[16].mxu0  ;;  %v3745_v16 = vpop.f32.mrb[29].mxu1 }
 0x123   : > { %v3316_v17 = vpop.f32.mrb[17].mxu0  ;;  %v4651_v24 = vpop.f32.mrb[30].mxu1 }
 0x124   : > { %v3317_v19 = vadd.f32 %v3316_v17, %v3315_v12  ;;  %v3318_v23 = vpop.f32.mrb[18].mxu0  ;;  %v3746_v20 = vpop.f32.mrb[31].mxu1 }
 0x125   : > { %v3319_v25 = vpop.f32.mrb[19].mxu0 }
 0x126   : > { %v4655_v5 = vadd.f32 %v3317_v19, %v4599_v30  ;;  %v3320_v21 = vadd.f32 %v3319_v25, %v3318_v23  ;;  %1797 = vmatmul.mubr.bf16.gmra.mrb[136].mxu1 %v4102_v13 }
 0x127   : > { %3848 = vmatmul.mubr.msk.bf16.gmra.mrb[124].mxu0 %vm556_vm1, %v4103_v18  ;;  %1804 = vmatprep.mubr.bf16.mxu1 %v4104_v26  ;;  %v3105_v18 = vcombine.high %v3066_v60, %v3066_v60 }
 0x128   : > { %v4659_v29 = vadd.f32 %v3320_v21, %v4603_v35  ;;  %3851 = vmatprep.mubr.msk.bf16.mxu0 %vm4184_vm0, %v5234_v1 }
 0x129   : > { %v4663_v31 = vpop.f32.mrb[32].mxu1 }
 0x12a   : > { %v3321_v0 = vpop.f32.mrb[20].mxu0  ;;  %v3749_v30 = vpop.f32.mrb[33].mxu1 }
 0x12b   : > { %v3322_v32 = vpop.f32.mrb[21].mxu0  ;;  %v4667_v37 = vpop.f32.mrb[34].mxu1 }
 0x12c   : > { %v3323_v34 = vadd.f32 %v3322_v32, %v3321_v0  ;;  %v3324_v36 = vpop.f32.mrb[22].mxu0  ;;  %v3750_v40 = vpop.f32.mrb[35].mxu1  ;;  %v3104_v0 = vcombine.low %v3066_v60, %v3066_v60  ;;  %v4118_v32 = vld [vmem:[%s4269_s6 + $0x338] ss:$12 sps:$4 sm:$0xff]  }
 0x12d   : > { %v3325_v35 = vpop.f32.mrb[23].mxu0 }
 0x12e   : > { %v4671_v42 = vadd.f32 %v3323_v34, %v4615_v43  ;;  %v3326_v44 = vadd.f32 %v3325_v35, %v3324_v36  ;;  %1805 = vmatmul.mubr.bf16.gmra.mrb[140].mxu1 %v4106_v22  ;;  %v4111_v43 = vld [vmem:[%s4269_s6 + $0x308] ss:$12 sps:$4 sm:$0xff]  }
 0x12f   : > { %3852 = vmatmul.mubr.msk.bf16.gmra.mrb[128].mxu0 %vm556_vm1, %v4107_v33  ;;  %1812 = vmatprep.mubr.bf16.mxu1 %v4108_v38  ;;  %v4121_v34 = vld [vmem:[%s4269_s6 + $0x388] ss:$12 sps:$4 sm:$0xff]  }
 0x130   : > { %v4675_v45 = vadd.f32 %v3326_v44, %v4619_v50  ;;  %3855 = vmatprep.mubr.msk.bf16.mxu0 %vm4184_vm0, %v5234_v1  ;;  %v4112_v50 = vld [vmem:[%s4269_s6 + $0x364] ss:$12 sps:$4 sm:$0xff]  }
 0x131   : > { %v4679_v47 = vpop.f32.mrb[36].mxu1 }
 0x132   : > { %v3327_v46 = vpop.f32.mrb[24].mxu0  ;;  %v3753_v51 = vpop.f32.mrb[37].mxu1 }
 0x133   : > { %v3328_v48 = vpop.f32.mrb[25].mxu0  ;;  %v4683_v55 = vpop.f32.mrb[38].mxu1 }
 0x134   : > { %v3329_v52 = vadd.f32 %v3328_v48, %v3327_v46  ;;  %v3330_v53 = vpop.f32.mrb[26].mxu0  ;;  %v3754_v3 = vpop.f32.mrb[39].mxu1 }
 0x135   : > { %v3331_v57 = vpop.f32.mrb[27].mxu0 }
 0x136   : > { %v4687_v4 = vadd.f32 %v3329_v52, %v4631_v58  ;;  %v3332_v59 = vadd.f32 %v3331_v57, %v3330_v53  ;;  %1813 = vmatmul.mubr.bf16.gmra.mrb[144].mxu1 %v4110_v49  ;;  %v4119_v49 = vld [vmem:[%s4269_s6 + $0x384] ss:$12 sps:$4 sm:$0xff]  }
 0x137   : > { %3856 = vmatmul.mubr.msk.bf16.gmra.mrb[132].mxu0 %vm556_vm1, %v4111_v43  ;;  %1820 = vmatprep.mubr.bf16.mxu1 %v4112_v50  ;;  %v4122_v43 = vld [vmem:[%s4269_s6 + $0x350] ss:$12 sps:$4 sm:$0xff]   ;;  %v4123_v50 = vld [vmem:[%s4269_s6 + $0x3a0] ss:$12 sps:$4 sm:$0xff]  }
 0x138   : > { %v4691_v6 = vadd.f32 %v3332_v59, %v4635_v61  ;;  %3859 = vmatprep.mubr.msk.bf16.mxu0 %vm4184_vm0, %v5234_v1 }
 0x139   : > { %v4696_v8 = vpop.f32.mrb[40].mxu1 }
 0x13a   : > { %5259 = vst [vmem:[#allocation2_spill] sm:$0xff] %v4691_v6  ;;  %v3333_v7 = vpop.f32.mrb[28].mxu0  ;;  %v3757_v58 = vpop.f32.mrb[41].mxu1 }
 0x13b   : > { %v3334_v9 = vpop.f32.mrb[29].mxu0  ;;  %v4700_v13 = vpop.f32.mrb[42].mxu1 }
 0x13c   : > { %v3335_v12 = vadd.f32 %v3334_v9, %v3333_v7  ;;  %v3336_v17 = vpop.f32.mrb[30].mxu0  ;;  %v3758_v16 = vpop.f32.mrb[43].mxu1 }
 0x13d   : > { %v3337_v61 = vpop.f32.mrb[31].mxu0 }
 0x13e   : > { %v4703_v19 = vadd.f32 %v3335_v12, %v4647_v15  ;;  %v3338_v23 = vadd.f32 %v3337_v61, %v3336_v17  ;;  %1821 = vmatmul.mubr.bf16.gmra.mrb[148].mxu1 %v4114_v62  ;;  %v4125_v62 = vld [vmem:[%s4269_s6 + $0x39c] ss:$12 sps:$4 sm:$0xff]   ;;  %v4127_v61 = vld [vmem:[%s4269_s6 + $0x3b8] ss:$12 sps:$4 sm:$0xff]  }
 0x13f   : > { %3860 = vmatmul.mubr.msk.bf16.gmra.mrb[136].mxu0 %vm556_vm1, %v4115_v10  ;;  %1828 = vmatprep.mubr.bf16.mxu1 %v3105_v18  ;;  %v4126_v10 = vld [vmem:[%s4269_s6 + $0x368] ss:$12 sps:$4 sm:$0xff]  }
 0x140   : > { %5260 = vst [vmem:[#allocation3_spill] sm:$0xff] %v4703_v19  ;;  %v4707_v26 = vadd.f32 %v3338_v23, %v4651_v24  ;;  %3863 = vmatprep.mubr.msk.bf16.mxu0 %vm4184_vm0, %v5234_v1 }
 0x141   : > { %v4711_v20 = vpop.f32.mrb[44].mxu1 }
 0x142   : > { %5261 = vst [vmem:[#allocation4_spill] sm:$0xff] %v4707_v26  ;;  %v3339_v25 = vpop.f32.mrb[32].mxu0  ;;  %v3761_v15 = vpop.f32.mrb[45].mxu1 }
 0x143   : > { %v3340_v21 = vpop.f32.mrb[33].mxu0  ;;  %v4714_v30 = vpop.f32.mrb[46].mxu1  ;;  %v4129_v15 = vld [vmem:[%s4269_s6 + $0x3b4] ss:$12 sps:$4 sm:$0xff]  }
 0x144   : > { %v3341_v22 = vadd.f32 %v3340_v21, %v3339_v25  ;;  %v3342_v33 = vpop.f32.mrb[34].mxu0  ;;  %v3762_v36 = vpop.f32.mrb[47].mxu1 }
 0x145   : > { %v3343_v24 = vpop.f32.mrb[35].mxu0 }
 0x146   : > { %v4718_v38 = vadd.f32 %v3341_v22, %v4663_v31  ;;  %v3344_v35 = vadd.f32 %v3343_v24, %v3342_v33  ;;  %1829 = vmatmul.mubr.bf16.gmra.mrb[152].mxu1 %v3104_v0  ;;  %v4130_v33 = vld [vmem:[%s4269_s6 + $0x380] ss:$0 sps:$4 sm:$0x33]  }
 0x147   : > { %3864 = vmatmul.mubr.msk.bf16.gmra.mrb[140].mxu0 %vm556_vm1, %v4118_v32  ;;  %2284 = vmatprep.mubr.bf16.mxu1 %v4121_v34 }
 0x148   : > { %5262 = vst [vmem:[#allocation5_spill] sm:$0xff] %v4718_v38  ;;  %v4722_v40 = vadd.f32 %v3344_v35, %v4667_v37  ;;  %3867 = vmatprep.mubr.msk.bf16.mxu0 %vm4184_vm0, %v5234_v1 }
 0x149   : > { %v4726_v46 = vpop.f32.mrb[48].mxu1 }
 0x14a   : > { %5263 = vst [vmem:[#allocation6_spill] sm:$0xff] %v4722_v40  ;;  %v3345_v44 = vpop.f32.mrb[36].mxu0  ;;  %v3765_v31 = vpop.f32.mrb[49].mxu1 }
 0x14b   : > { %v3346_v48 = vpop.f32.mrb[37].mxu0  ;;  %v865_v53 = vpop.f32.mrb[50].mxu1 }
 0x14c   : > { %v3347_v51 = vadd.f32 %v3346_v48, %v3345_v44  ;;  %v3348_v52 = vpop.f32.mrb[38].mxu0  ;;  %v3766_v37 = vpop.f32.mrb[51].mxu1  ;;  %v4131_v44 = vld [vmem:[%s4269_s6 + $0x3d0] ss:$12 sps:$4 sm:$0xff]  }
 0x14d   : > { %v3349_v57 = vpop.f32.mrb[39].mxu0  ;;  %v4134_v37 = vld [vmem:[%s4269_s6 + $0x38c] ss:$12 sps:$4 sm:$0xff]  }
 0x14e   : > { %v4732_v3 = vadd.f32 %v3347_v51, %v4679_v47  ;;  %v3350_v59 = vadd.f32 %v3349_v57, %v3348_v52  ;;  %2285 = vmatmul.mubr.bf16.vlgmr.msra.gmra.mrb[156].mxu1 %v4119_v49  ;;  %v4133_v57 = vld [vmem:[%s4269_s6 + $0x3cc] ss:$12 sps:$4 sm:$0xff]  }
 0x14f   : > { %3868 = vmatmul.mubr.msk.bf16.gmra.mrb[144].mxu0 %vm556_vm1, %v4122_v43  ;;  %2292 = vmatprep.mubr.bf16.mxu1 %v4123_v50 }
 0x150   : > { %5264 = vst [vmem:[#allocation7_spill] sm:$0xff] %v4732_v3  ;;  %v4736_v60 = vadd.f32 %v3350_v59, %v4683_v55  ;;  %3871 = vmatprep.mubr.msk.bf16.mxu0 %vm4184_vm0, %v5234_v1  ;;  %3937 = vmatpush3.bf16.msra.mxu1 %v4567_v14 }
 0x151   : > { %v3400_v9 = vpop.f32.mrb[52].mxu1  ;;  %3936 = vmatprep.subr.bf16.mxu1 %v5234_v1 }
 0x152   : > { %5265 = vst [vmem:[#allocation8_spill] sm:$0xff] %v4736_v60  ;;  %v3351_v7 = vpop.f32.mrb[40].mxu0  ;;  %v3401_v58 = vpop.f32.mrb[53].mxu1 }
 0x153   : > { %v3352_v47 = vpop.f32.mrb[41].mxu0  ;;  %v3402_v18 = vadd.f32 %v3401_v58, %v3400_v9  ;;  %v3403_v55 = vpop.f32.mrb[54].mxu1 }
 0x154   : > { %v3353_v12 = vadd.f32 %v3352_v47, %v3351_v7  ;;  %v3354_v17 = vpop.f32.mrb[42].mxu0  ;;  %v3404_v23 = vpop.f32.mrb[55].mxu1  ;;  %3938 = vmatpush3.bf16.msra.mxu1 %v4585_v2 }
 0x155   : > { %v3355_v16 = vpop.f32.mrb[43].mxu0  ;;  %v3405_v21 = vadd.f32 %v3404_v23, %v3403_v55  ;;  %v4137_v23 = vld [vmem:[%s4269_s6 + $0x3e4] ss:$12 sps:$4 sm:$0xff]  }
 0x156   : > { %v4747_v14 = vadd.f32 %v3353_v12, %v4696_v8  ;;  %v3356_v25 = vadd.f32 %v3355_v16, %v3354_v17  ;;  %2293 = vmatmul.mubr.bf16.gmra.mrb[160].mxu1 %v4125_v62  ;;  %v4135_v62 = vld [vmem:[%s4269_s6 + $0x3e8] ss:$12 sps:$4 sm:$0xff]  }
 0x157   : > { %3872 = vmatmul.mubr.msk.bf16.gmra.mrb[148].mxu0 %vm556_vm1, %v4126_v10  ;;  %2300 = vmatprep.mubr.bf16.mxu1 %v4127_v61 }
 0x158   : > { %5266 = vst [vmem:[#allocation9_spill] sm:$0xff] %v4747_v14  ;;  %v4751_v0 = vadd.f32 %v3356_v25, %v4700_v13  ;;  %3875 = vmatprep.mubr.msk.bf16.mxu0 %vm4184_vm0, %v5234_v1  ;;  %v4138_v25 = vld [vmem:[%s4269_s6 + $0x3a4] ss:$12 sps:$4 sm:$0xff]  }
 0x159   : > { %v3406_v22 = vpop.f32.mrb[56].mxu1 }
 0x15a   : > { %5267 = vst [vmem:[#allocation10_spill] sm:$0xff] %v4751_v0  ;;  %v3357_v32 = vpop.f32.mrb[44].mxu0  ;;  %v3407_v8 = vpop.f32.mrb[57].mxu1 }
 0x15b   : > { %v3358_v2 = vpop.f32.mrb[45].mxu0  ;;  %v3408_v36 = vadd.f32 %v3407_v8, %v3406_v22  ;;  %v3409_v35 = vpop.f32.mrb[58].mxu1 }
 0x15c   : > { %v3359_v34 = vadd.f32 %v3358_v2, %v3357_v32  ;;  %v3360_v24 = vpop.f32.mrb[46].mxu0  ;;  %v3410_v13 = vpop.f32.mrb[59].mxu1  ;;  %v4139_v2 = vld [vmem:[%s4269_s6 + $0x400] ss:$12 sps:$4 sm:$0xff]  }
 0x15d   : > { %v3361_v48 = vpop.f32.mrb[47].mxu0  ;;  %v3411_v31 = vadd.f32 %v3410_v13, %v3409_v35 }
 0x15e   : > { %v4759_v49 = vadd.f32 %v3359_v34, %v4711_v20  ;;  %v3362_v43 = vadd.f32 %v3361_v48, %v3360_v24  ;;  %2301 = vmatmul.mubr.bf16.gmra.mrb[164].mxu1 %v4129_v15 }
 0x15f   : > { %3876 = vmatmul.mubr.msk.bf16.gmra.mrb[152].mxu0 %vm556_vm1, %v4130_v33  ;;  %2308 = vmatprep.mubr.bf16.mxu1 %v4131_v44 }
 0x160   : > { %5268 = vst [vmem:[#allocation11_spill] sm:$0xff] %v4759_v49  ;;  %v4763_v51 = vadd.f32 %v3362_v43, %v4714_v30  ;;  %3883 = vmatprep.mubr.msk.bf16.mxu0 %vm4184_vm0, %v5234_v1  ;;  %v4141_v43 = vld [vmem:[%s4269_s6 + $0x3fc] ss:$12 sps:$4 sm:$0xff]  }
 0x161   : > { %v3412_v53 = vpop.f32.mrb[60].mxu1 }
 0x162   : > { %5269 = vst [vmem:[#allocation12_spill] sm:$0xff] %v4763_v51  ;;  %v3363_v52 = vpop.f32.mrb[48].mxu0  ;;  %v3413_v20 = vpop.f32.mrb[61].mxu1 }
 0x163   : > { %v3364_v50 = vpop.f32.mrb[49].mxu0  ;;  %v3414_v9 = vadd.f32 %v3413_v20, %v3412_v53  ;;  %v3415_v47 = vpop.f32.mrb[62].mxu1  ;;  %v4143_v20 = vld [vmem:[%s4269_s6 + $0x418] ss:$12 sps:$4 sm:$0xff]  }
 0x164   : > { %v3365_v59 = vadd.f32 %v3364_v50, %v3363_v52  ;;  %v3366_v7 = vpop.f32.mrb[50].mxu0  ;;  %v3416_v30 = vpop.f32.mrb[63].mxu1  ;;  %v4142_v52 = vld [vmem:[%s4269_s6 + $0x3bc] ss:$12 sps:$4 sm:$0xff]  }
 0x165   : > { %v3367_v10 = vpop.f32.mrb[51].mxu0  ;;  %v3417_v12 = vadd.f32 %v3416_v30, %v3415_v47 }
 0x166   : > { %v4771_v58 = vadd.f32 %v3365_v59, %v4726_v46  ;;  %2309 = vmatmul.mubr.bf16.gmra.mrb[168].mxu1 %v4133_v57 }
 0x167   : > { %3884 = vmatmul.mubr.msk.bf16.vlgmr.msra.gmra.mrb[156].mxu0 %vm556_vm1, %v4134_v37  ;;  %2316 = vmatprep.mubr.bf16.mxu1 %v4135_v62 }
 0x168   : > { %5270 = vst [vmem:[#allocation13_spill] sm:$0xff] %v4771_v58  ;;  %3887 = vmatprep.mubr.msk.bf16.mxu0 %vm4184_vm0, %v5234_v1 }
 0x169   : > { %v3418_v55 = vpop.f32.mrb[64].mxu1 }
 0x16a   : > { %v1318_v17 = vpop.f32.mrb[52].mxu0  ;;  %v3419_v32 = vpop.f32.mrb[65].mxu1 }
 0x16b   : > { %v4776_v61 = vadd.f32 %v3402_v18, %v1318_v17  ;;  %v3773_v16 = vpop.f32.mrb[53].mxu0  ;;  %v3420_v46 = vadd.f32 %v3419_v32, %v3418_v55  ;;  %v3421_v22 = vpop.f32.mrb[66].mxu1 }
 0x16c   : > { %v1321_v15 = vpop.f32.mrb[54].mxu0  ;;  %v3422_v24 = vpop.f32.mrb[67].mxu1  ;;  %v4145_v16 = vld [vmem:[%s4269_s6 + $0x414] ss:$12 sps:$4 sm:$0xff]  }
 0x16d   : > { %v4783_v8 = vadd.f32 %v3405_v21, %v1321_v15  ;;  %v3774_v34 = vpop.f32.mrb[55].mxu0  ;;  %v3423_v35 = vadd.f32 %v3422_v24, %v3421_v22 }
 0x16e   : > { %2317 = vmatmul.mubr.bf16.gmra.mrb[172].mxu1 %v4137_v23  ;;  %v4146_v23 = vld [vmem:[%s4269_s6 + $0x3d4] ss:$12 sps:$4 sm:$0xff]  }
 0x16f   : > { %3888 = vmatmul.mubr.msk.bf16.gmra.mrb[160].mxu0 %vm556_vm1, %v4138_v25  ;;  %2324 = vmatprep.mubr.bf16.mxu1 %v4139_v2  ;;  %v4147_v2 = vld [vmem:[%s4269_s6 + $0x430] ss:$12 sps:$4 sm:$0xff]  }
 0x170   : > { %3891 = vmatprep.mubr.msk.bf16.mxu0 %vm4184_vm0, %v5234_v1 }
 0x171   : > { %v3424_v48 = vpop.f32.mrb[68].mxu1 }
 0x172   : > { %v1326_v44 = vpop.f32.mrb[56].mxu0  ;;  %v3425_v53 = vpop.f32.mrb[69].mxu1 }
 0x173   : > { %v4790_v13 = vadd.f32 %v3408_v36, %v1326_v44  ;;  %v3777_v21 = vpop.f32.mrb[57].mxu0  ;;  %v3426_v57 = vadd.f32 %v3425_v53, %v3424_v48  ;;  %v3427_v37 = vpop.f32.mrb[70].mxu1 }
 0x174   : > { %v1329_v50 = vpop.f32.mrb[58].mxu0  ;;  %v3428_v62 = vpop.f32.mrb[71].mxu1 }
 0x175   : > { %v4797_v7 = vadd.f32 %v3411_v31, %v1329_v50  ;;  %v3778_v47 = vpop.f32.mrb[59].mxu0  ;;  %v3429_v10 = vadd.f32 %v3428_v62, %v3427_v37  ;;  %v4149_v50 = vld [vmem:[%s4269_s6 + $0x42c] ss:$12 sps:$4 sm:$0xff]  }
 0x176   : > { %2325 = vmatmul.mubr.bf16.gmra.mrb[176].mxu1 %v4141_v43  ;;  %v4150_v37 = vld [vmem:[%s4269_s6 + $0x3ec] ss:$12 sps:$4 sm:$0xff]  }
 0x177   : > { %3892 = vmatmul.mubr.msk.bf16.gmra.mrb[164].mxu0 %vm556_vm1, %v4142_v52  ;;  %2332 = vmatprep.mubr.bf16.mxu1 %v4143_v20 }
 0x178   : > { %3895 = vmatprep.mubr.msk.bf16.mxu0 %vm4184_vm0, %v5234_v1 }
 0x179   : > { %v3430_v17 = vpop.f32.mrb[72].mxu1 }
 0x17a   : > { %v1334_v30 = vpop.f32.mrb[60].mxu0  ;;  %v3431_v25 = vpop.f32.mrb[73].mxu1 }
 0x17b   : > { %v4804_v55 = vadd.f32 %v3414_v9, %v1334_v30  ;;  %v3781_v31 = vpop.f32.mrb[61].mxu0  ;;  %v3432_v15 = vadd.f32 %v3431_v25, %v3430_v17  ;;  %v3433_v22 = vpop.f32.mrb[74].mxu1  ;;  %v4151_v17 = vld [vmem:[%s4269_s6 + $0x448] ss:$12 sps:$4 sm:$0xff]  }
 0x17c   : > { %v1337_v32 = vpop.f32.mrb[62].mxu0  ;;  %v3434_v48 = vpop.f32.mrb[75].mxu1 }
 0x17d   : > { %v4811_v24 = vadd.f32 %v3417_v12, %v1337_v32  ;;  %v3782_v44 = vpop.f32.mrb[63].mxu0  ;;  %v3435_v21 = vadd.f32 %v3434_v48, %v3433_v22  ;;  %v4153_v48 = vld [vmem:[%s4269_s6 + $0x444] ss:$12 sps:$4 sm:$0xff]  }
 0x17e   : > { %2333 = vmatmul.mubr.bf16.gmra.mrb[180].mxu1 %v4145_v16 }
 0x17f   : > { %3896 = vmatmul.mubr.msk.bf16.gmra.mrb[168].mxu0 %vm556_vm1, %v4146_v23  ;;  %2340 = vmatprep.mubr.bf16.mxu1 %v4147_v2 }
 0x180   : > { %3899 = vmatprep.mubr.msk.bf16.mxu0 %vm4184_vm0, %v5234_v1 }
 0x181   : > { %v3436_v52 = vpop.f32.mrb[76].mxu1 }
 0x182   : > { %v1342_v43 = vpop.f32.mrb[64].mxu0  ;;  %v3437_v20 = vpop.f32.mrb[77].mxu1 }
 0x183   : > { %v4818_v53 = vadd.f32 %v3420_v46, %v1342_v43  ;;  %v3785_v12 = vpop.f32.mrb[65].mxu0  ;;  %v3438_v62 = vadd.f32 %v3437_v20, %v3436_v52  ;;  %v3439_v30 = vpop.f32.mrb[78].mxu1  ;;  %v4154_v43 = vld [vmem:[%s4269_s6 + $0x404] ss:$12 sps:$4 sm:$0xff]  }
 0x184   : > { %v1345_v47 = vpop.f32.mrb[66].mxu0  ;;  %v3440_v25 = vpop.f32.mrb[79].mxu1 }
 0x185   : > { %v4825_v16 = vadd.f32 %v3423_v35, %v1345_v47  ;;  %v3786_v23 = vpop.f32.mrb[67].mxu0  ;;  %v3441_v32 = vadd.f32 %v3440_v25, %v3439_v30  ;;  %v4155_v30 = vld [vmem:[%s4269_s6 + $0x460] ss:$12 sps:$4 sm:$0xff]  }
 0x186   : > { %2341 = vmatmul.mubr.bf16.gmra.mrb[184].mxu1 %v4149_v50 }
 0x187   : > { %3900 = vmatmul.mubr.msk.bf16.gmra.mrb[172].mxu0 %vm556_vm1, %v4150_v37  ;;  %2348 = vmatprep.mubr.bf16.mxu1 %v4151_v17 }
 0x188   : > { %3903 = vmatprep.mubr.msk.bf16.mxu0 %vm4184_vm0, %v5234_v1 }
 0x189   : > { %v3442_v2 = vpop.f32.mrb[80].mxu1 }
 0x18a   : > { %v1350_v22 = vpop.f32.mrb[68].mxu0  ;;  %v3443_v52 = vpop.f32.mrb[81].mxu1 }
 0x18b   : > { %v4832_v44 = vadd.f32 %v3426_v57, %v1350_v22  ;;  %v3789_v35 = vpop.f32.mrb[69].mxu0  ;;  %v3444_v20 = vadd.f32 %v3443_v52, %v3442_v2  ;;  %v3445_v47 = vpop.f32.mrb[82].mxu1  ;;  %v4157_v52 = vld [vmem:[%s4269_s6 + $0x45c] ss:$12 sps:$4 sm:$0xff]   ;;  %v4159_v57 = vld [vmem:[%s4269_s6 + $0x478] ss:$12 sps:$4 sm:$0xff]  }
 0x18c   : > { %v1353_v12 = vpop.f32.mrb[70].mxu0  ;;  %v3446_v23 = vpop.f32.mrb[83].mxu1 }
 0x18d   : > { %v4839_v37 = vadd.f32 %v3429_v10, %v1353_v12  ;;  %v3790_v17 = vpop.f32.mrb[71].mxu0  ;;  %v3447_v25 = vadd.f32 %v3446_v23, %v3445_v47  ;;  %v4158_v12 = vld [vmem:[%s4269_s6 + $0x41c] ss:$12 sps:$4 sm:$0xff]  }
 0x18e   : > { %2349 = vmatmul.mubr.bf16.gmra.mrb[188].mxu1 %v4153_v48 }
 0x18f   : > { %3904 = vmatmul.mubr.msk.bf16.gmra.mrb[176].mxu0 %vm556_vm1, %v4154_v43  ;;  %2356 = vmatprep.mubr.bf16.mxu1 %v4155_v30 }
 0x190   : > { %3907 = vmatprep.mubr.msk.bf16.mxu0 %vm4184_vm0, %v5234_v1 }
 0x191   : > { %v3448_v2 = vpop.f32.mrb[84].mxu1 }
 0x192   : > { %v1358_v22 = vpop.f32.mrb[72].mxu0  ;;  %v3449_v17 = vpop.f32.mrb[85].mxu1 }
 0x193   : > { %v4846_v35 = vadd.f32 %v3432_v15, %v1358_v22  ;;  %v3793_v10 = vpop.f32.mrb[73].mxu0  ;;  %v3450_v23 = vadd.f32 %v3449_v17, %v3448_v2  ;;  %v3451_v50 = vpop.f32.mrb[86].mxu1  ;;  %v4161_v17 = vld [vmem:[%s4269_s6 + $0x474] ss:$12 sps:$4 sm:$0xff]   ;;  %v4163_v15 = vld [vmem:[%s4269_s6 + $0x490] ss:$12 sps:$4 sm:$0xff]  }
 0x194   : > { %v1361_v47 = vpop.f32.mrb[74].mxu0  ;;  %v3452_v46 = vpop.f32.mrb[87].mxu1 }
 0x195   : > { %v4853_v43 = vadd.f32 %v3435_v21, %v1361_v47  ;;  %v3794_v30 = vpop.f32.mrb[75].mxu0  ;;  %v3453_v31 = vadd.f32 %v3452_v46, %v3451_v50  ;;  %v4162_v47 = vld [vmem:[%s4269_s6 + $0x434] ss:$12 sps:$4 sm:$0xff]  }
 0x196   : > { %2357 = vmatmul.mubr.bf16.gmra.mrb[192].mxu1 %v4157_v52 }
 0x197   : > { %3908 = vmatmul.mubr.msk.bf16.gmra.mrb[180].mxu0 %vm556_vm1, %v4158_v12  ;;  %2364 = vmatprep.mubr.bf16.mxu1 %v4159_v57 }
 0x198   : > { %3911 = vmatprep.mubr.msk.bf16.mxu0 %vm4184_vm0, %v5234_v1 }
 0x199   : > { %v3454_v2 = vpop.f32.mrb[88].mxu1 }
 0x19a   : > { %v1366_v22 = vpop.f32.mrb[76].mxu0  ;;  %v3455_v46 = vpop.f32.mrb[89].mxu1 }
 0x19b   : > { %v4860_v10 = vadd.f32 %v3438_v62, %v1366_v22  ;;  %v3797_v21 = vpop.f32.mrb[77].mxu0  ;;  %v3456_v30 = vadd.f32 %v3455_v46, %v3454_v2  ;;  %v3457_v48 = vpop.f32.mrb[90].mxu1  ;;  %v3168_v2 = vld [vmem:[%s4269_s6 + $0x4a4] sm:$0x33] }
 0x19c   : > { %v1369_v50 = vpop.f32.mrb[78].mxu0  ;;  %v3458_v9 = vpop.f32.mrb[91].mxu1  ;;  %v3207_v22 = vcombine.high %v3168_v2, %v3168_v2 }
 0x19d   : > { %v4867_v52 = vadd.f32 %v3441_v32, %v1369_v50  ;;  %v3798_v12 = vpop.f32.mrb[79].mxu0  ;;  %v3459_v62 = vadd.f32 %v3458_v9, %v3457_v48  ;;  %v4165_v50 = vld [vmem:[%s4269_s6 + $0x48c] ss:$12 sps:$4 sm:$0xff]  }
 0x19e   : > { %2365 = vmatmul.mubr.bf16.gmra.mrb[196].mxu1 %v4161_v17  ;;  %v4166_v12 = vld [vmem:[%s4269_s6 + $0x44c] ss:$12 sps:$4 sm:$0xff]  }
 0x19f   : > { %5271 = vst [vmem:[#allocation14_spill] sm:$0xff] %v4867_v52  ;;  %3912 = vmatmul.mubr.msk.bf16.gmra.mrb[184].mxu0 %vm556_vm1, %v4162_v47  ;;  %2372 = vmatprep.mubr.bf16.mxu1 %v4163_v15 }
 0x1a0   : > { %3915 = vmatprep.mubr.msk.bf16.mxu0 %vm4184_vm0, %v5234_v1 }
 0x1a1   : > { %v3460_v46 = vpop.f32.mrb[92].mxu1 }
 0x1a2   : > { %v1374_v21 = vpop.f32.mrb[80].mxu0  ;;  %v3461_v34 = vpop.f32.mrb[93].mxu1 }
 0x1a3   : > { %v4875_v57 = vadd.f32 %v3444_v20, %v1374_v21  ;;  %v3801_v32 = vpop.f32.mrb[81].mxu0  ;;  %v3462_v48 = vadd.f32 %v3461_v34, %v3460_v46  ;;  %v3463_v36 = vpop.f32.mrb[94].mxu1 }
 0x1a4   : > { %v1377_v9 = vpop.f32.mrb[82].mxu0  ;;  %v3464_v59 = vpop.f32.mrb[95].mxu1 }
 0x1a5   : > { %5272 = vst [vmem:[#allocation15_spill] sm:$0xff] %v4875_v57  ;;  %v4881_v17 = vadd.f32 %v3447_v25, %v1377_v9  ;;  %v3802_v47 = vpop.f32.mrb[83].mxu0  ;;  %v3465_v18 = vadd.f32 %v3464_v59, %v3463_v36  ;;  %v3206_v25 = vcombine.low %v3168_v2, %v3168_v2  ;;  %v4169_v9 = vld [vmem:[%s4269_s6 + $0x464] ss:$12 sps:$4 sm:$0xff]  }
 0x1a6   : > { %2373 = vmatmul.mubr.bf16.gmra.mrb[200].mxu1 %v4165_v50 }
 0x1a7   : > { %5273 = vst [vmem:[#allocation16_spill] sm:$0xff] %v4881_v17  ;;  %3916 = vmatmul.mubr.msk.bf16.gmra.mrb[188].mxu0 %vm556_vm1, %v4166_v12  ;;  %2380 = vmatprep.mubr.bf16.mxu1 %v3207_v22 }
 0x1a8   : > { %3919 = vmatprep.mubr.msk.bf16.mxu0 %vm4184_vm0, %v5234_v1 }
 0x1a9   : > { %v3466_v21 = vpop.f32.mrb[96].mxu1 }
 0x1aa   : > { %v1382_v34 = vpop.f32.mrb[84].mxu0  ;;  %v3467_v47 = vpop.f32.mrb[97].mxu1 }
 0x1ab   : > { %v4888_v46 = vadd.f32 %v3450_v23, %v1382_v34  ;;  %v3805_v32 = vpop.f32.mrb[85].mxu0  ;;  %v3468_v36 = vadd.f32 %v3467_v47, %v3466_v21  ;;  %v3469_v15 = vpop.f32.mrb[98].mxu1  ;;  %v4170_v34 = vld [vmem:[%s4269_s6 + $0x4ac] ss:$0 sps:$4 sm:$0x33]  }
 0x1ac   : > { %v1385_v59 = vpop.f32.mrb[86].mxu0  ;;  %v3470_v20 = vpop.f32.mrb[99].mxu1  ;;  %v4171_v47 = vld [vmem:[%s4269_s6 + $0x47c] ss:$12 sps:$4 sm:$0xff]  }
 0x1ad   : > { %5274 = vst [vmem:[#allocation17_spill] sm:$0xff] %v4888_v46  ;;  %v4893_v22 = vadd.f32 %v3453_v31, %v1385_v59  ;;  %v3806_v12 = vpop.f32.mrb[87].mxu0  ;;  %v3471_v33 = vadd.f32 %v3470_v20, %v3469_v15 }
 0x1ae   : > { %2381 = vmatmul.mubr.bf16.gmra.mrb[204].mxu1 %v3206_v25 }
 0x1af   : > { %5275 = vst [vmem:[#allocation18_spill] sm:$0xff] %v4893_v22  ;;  %3920 = vmatmul.mubr.msk.bf16.gmra.mrb[192].mxu0 %vm556_vm1, %v4169_v9  ;;  %3931 = vmatprep.mubr.msk.bf16.mxu1 %vm4184_vm0, %v5234_v1 }
 0x1b0   : > { %3923 = vmatprep.mubr.msk.bf16.mxu0 %vm4184_vm0, %v5234_v1 }
 0x1b1   : > { %v3472_v21 = vpop.f32.mrb[100].mxu1 }
 0x1b2   : > { %v1390_v2 = vpop.f32.mrb[88].mxu0  ;;  %v3473_v15 = vpop.f32.mrb[101].mxu1 }
 0x1b3   : > { %v4903_v31 = vadd.f32 %v3456_v30, %v1390_v2  ;;  %v3809_v32 = vpop.f32.mrb[89].mxu0  ;;  %v3474_v59 = vadd.f32 %v3473_v15, %v3472_v21  ;;  %v3475_v25 = vpop.f32.mrb[102].mxu1  ;;  %v5278_v30 = vmov 0.0  }
 0x1b4   : > { %v1393_v20 = vpop.f32.mrb[90].mxu0  ;;  %v3476_v50 = vpop.f32.mrb[103].mxu1  ;;  %v4172_v25 = vld [vmem:[%s4269_s6 + $0x494] ss:$12 sps:$4 sm:$0xff]  }
 0x1b5   : > { %5276 = vst [vmem:[#allocation19_spill] sm:$0xff] %v4903_v31  ;;  %v4908_v12 = vadd.f32 %v3459_v62, %v1393_v20  ;;  %v3810_v23 = vpop.f32.mrb[91].mxu0 }
 0x1b6   : > { %3932 = vmatmul.mubr.msk.bf16.vlgmr.msra.gmra.mrb[208].mxu1 %vm556_vm1, %v4170_v34 }
 0x1b7   : > { %5277 = vst [vmem:[#allocation20_spill] sm:$0xff] %v4908_v12  ;;  %3924 = vmatmul.mubr.msk.bf16.gmra.mrb[196].mxu0 %vm556_vm1, %v4171_v47 }
 0x1b8   : > { %3927 = vmatprep.mubr.msk.bf16.mxu0 %vm4184_vm0, %v5278_v30 }
 0x1b9   : > { %v3509_v21 = vpop.f32.mrb[104].mxu1 }
 0x1ba   : > { %v1398_v2 = vpop.f32.mrb[92].mxu0  ;;  %v3510_v62 = vpop.f32.mrb[105].mxu1 }
 0x1bb   : > { %v4916_v32 = vadd.f32 %v3462_v48, %v1398_v2  ;;  %v3813_v15 = vpop.f32.mrb[93].mxu0  ;;  %v3511_v23 = vadd.f32 %v3510_v62, %v3509_v21  ;;  %v3512_v50 = vpop.f32.mrb[106].mxu1 }
 0x1bc   : > { %v1401_v20 = vpop.f32.mrb[94].mxu0  ;;  %v3513_v47 = vpop.f32.mrb[107].mxu1 }
 0x1bd   : > { %5279 = vst [vmem:[#allocation21_spill] sm:$0xff] %v4916_v32  ;;  %v4921_v9 = vadd.f32 %v3465_v18, %v1401_v20  ;;  %v3814_v34 = vpop.f32.mrb[95].mxu0  ;;  %v3514_v12 = vadd.f32 %v3513_v47, %v3512_v50 }
 0x1bf   : > { %5280 = vst [vmem:[#allocation22_spill] sm:$0xff] %v4921_v9  ;;  %3928 = vmatmul.mubr.msk.bf16.gmra.mrb[200].mxu0 %vm556_vm1, %v4172_v25 }
 0x1c1   : > { %v3515_v2 = vpop.f32.mrb[108].mxu1 }
 0x1c2   : > { %v1406_v48 = vpop.f32.mrb[96].mxu0  ;;  %v3516_v21 = vpop.f32.mrb[109].mxu1 }
 0x1c3   : > { %v4926_v15 = vadd.f32 %v3468_v36, %v1406_v48  ;;  %v3817_v60 = vpop.f32.mrb[97].mxu0  ;;  %v3517_v31 = vadd.f32 %v3516_v21, %v3515_v2  ;;  %v3518_v3 = vpop.f32.mrb[110].mxu1 }
 0x1c4   : > { %v1409_v62 = vpop.f32.mrb[98].mxu0  ;;  %v3519_v34 = vpop.f32.mrb[111].mxu1 }
 0x1c5   : > { %5281 = vst [vmem:[#allocation23_spill] sm:$0xff] %v4926_v15  ;;  %v4930_v20 = vadd.f32 %v3471_v33, %v1409_v62  ;;  %v3818_v50 = vpop.f32.mrb[99].mxu0  ;;  %v3520_v47 = vadd.f32 %v3519_v34, %v3518_v3 }
 0x1c7   : > { %5282 = vst [vmem:[#allocation24_spill] sm:$0xff] %v4930_v20 }
 0x1c9   : > { %v3521_v1 = vpop.f32.mrb[112].mxu1 }
 0x1ca   : > { %v1414_v30 = vpop.f32.mrb[100].mxu0  ;;  %v3522_v48 = vpop.f32.mrb[113].mxu1 }
 0x1cb   : > { %v4934_v36 = vadd.f32 %v3474_v59, %v1414_v30  ;;  %v3821_v60 = vpop.f32.mrb[101].mxu0  ;;  %v3523_v2 = vadd.f32 %v3522_v48, %v3521_v1  ;;  %v3524_v21 = vpop.f32.mrb[114].mxu1 }
 0x1cc   : > { %v1417_v9 = vpop.f32.mrb[102].mxu0  ;;  %v3525_v62 = vpop.f32.mrb[115].mxu1 }
 0x1cd   : > { %5283 = vst [vmem:[#allocation25_spill] sm:$0xff] %v4934_v36  ;;  %v3822_v33 = vpop.f32.mrb[103].mxu0  ;;  %v3526_v50 = vadd.f32 %v3525_v62, %v3524_v21 }
 0x1d1   : > { %v3527_v3 = vpop.f32.mrb[116].mxu1 }
 0x1d2   : > { %v1870_v15 = vpop.f32.mrb[104].mxu0  ;;  %v3528_v20 = vpop.f32.mrb[117].mxu1 }
 0x1d3   : > { %v4938_v34 = vadd.f32 %v3511_v23, %v1870_v15  ;;  %v3829_v25 = vpop.f32.mrb[105].mxu0  ;;  %v3529_v59 = vadd.f32 %v3528_v20, %v3527_v3  ;;  %v3530_v30 = vpop.f32.mrb[118].mxu1 }
 0x1d4   : > { %v1873_v51 = vpop.f32.mrb[106].mxu0  ;;  %v3531_v1 = vpop.f32.mrb[119].mxu1 }
 0x1d5   : > { %v4940_v60 = vadd.f32 %v3514_v12, %v1873_v51  ;;  %v3830_v9 = vpop.f32.mrb[107].mxu0  ;;  %v3532_v48 = vadd.f32 %v3531_v1, %v3530_v30 }
 0x1d9   : > { %v3533_v0 = vpop.f32.mrb[120].mxu1 }
 0x1da   : > { %v1878_v49 = vpop.f32.mrb[108].mxu0  ;;  %v3534_v21 = vpop.f32.mrb[121].mxu1 }
 0x1db   : > { %v4942_v18 = vadd.f32 %v3517_v31, %v1878_v49  ;;  %v3833_v33 = vpop.f32.mrb[109].mxu0  ;;  %v3535_v32 = vadd.f32 %v3534_v21, %v3533_v0  ;;  %v3536_v23 = vpop.f32.mrb[122].mxu1 }
 0x1dc   : > { %v1881_v62 = vpop.f32.mrb[110].mxu0  ;;  %v3537_v14 = vpop.f32.mrb[123].mxu1 }
 0x1dd   : > { %v4944_v15 = vadd.f32 %v3520_v47, %v1881_v62  ;;  %v3834_v25 = vpop.f32.mrb[111].mxu0  ;;  %v3538_v20 = vadd.f32 %v3537_v14, %v3536_v23 }
 0x1e1   : > { %v3539_v51 = vpop.f32.mrb[124].mxu1 }
 0x1e2   : > { %v1886_v3 = vpop.f32.mrb[112].mxu0  ;;  %v3540_v30 = vpop.f32.mrb[125].mxu1 }
 0x1e3   : > { %v4946_v12 = vadd.f32 %v3523_v2, %v1886_v3  ;;  %v3837_v9 = vpop.f32.mrb[113].mxu0  ;;  %v3541_v36 = vadd.f32 %v3540_v30, %v3539_v51  ;;  %v3542_v49 = vpop.f32.mrb[126].mxu1 }
 0x1e4   : > { %v1889_v1 = vpop.f32.mrb[114].mxu0  ;;  %v3543_v58 = vpop.f32.mrb[127].mxu1 }
 0x1e5   : > { %v4948_v31 = vadd.f32 %v3526_v50, %v1889_v1  ;;  %v3838_v33 = vpop.f32.mrb[115].mxu0  ;;  %v3544_v0 = vadd.f32 %v3543_v58, %v3542_v49 }
 0x1e9   : > { %v3545_v47 = vpop.f32.mrb[128].mxu1 }
 0x1ea   : > { %v1894_v21 = vpop.f32.mrb[116].mxu0  ;;  %v3546_v14 = vpop.f32.mrb[129].mxu1 }
 0x1eb   : > { %v4950_v62 = vadd.f32 %v3529_v59, %v1894_v21  ;;  %v3841_v25 = vpop.f32.mrb[117].mxu0  ;;  %v3547_v22 = vadd.f32 %v3546_v14, %v3545_v47  ;;  %v3548_v2 = vpop.f32.mrb[130].mxu1 }
 0x1ec   : > { %v1897_v23 = vpop.f32.mrb[118].mxu0  ;;  %v3549_v40 = vpop.f32.mrb[131].mxu1 }
 0x1ed   : > { %v4952_v3 = vadd.f32 %v3532_v48, %v1897_v23  ;;  %v3842_v9 = vpop.f32.mrb[119].mxu0  ;;  %v3550_v51 = vadd.f32 %v3549_v40, %v3548_v2 }
 0x1f1   : > { %v3551_v50 = vpop.f32.mrb[132].mxu1 }
 0x1f2   : > { %v1902_v30 = vpop.f32.mrb[120].mxu0  ;;  %v3552_v58 = vpop.f32.mrb[133].mxu1 }
 0x1f3   : > { %v4954_v1 = vadd.f32 %v3535_v32, %v1902_v30  ;;  %v3845_v33 = vpop.f32.mrb[121].mxu0  ;;  %v3553_v46 = vadd.f32 %v3552_v58, %v3551_v50  ;;  %v3554_v59 = vpop.f32.mrb[134].mxu1 }
 0x1f4   : > { %v1905_v49 = vpop.f32.mrb[122].mxu0  ;;  %v3555_v38 = vpop.f32.mrb[135].mxu1 }
 0x1f5   : > { %v4956_v21 = vadd.f32 %v3538_v20, %v1905_v49  ;;  %v3846_v25 = vpop.f32.mrb[123].mxu0  ;;  %v3556_v47 = vadd.f32 %v3555_v38, %v3554_v59 }
 0x1f9   : > { %v3557_v48 = vpop.f32.mrb[136].mxu1 }
 0x1fa   : > { %v1910_v14 = vpop.f32.mrb[124].mxu0  ;;  %v3558_v40 = vpop.f32.mrb[137].mxu1 }
 0x1fb   : > { %v4958_v23 = vadd.f32 %v3541_v36, %v1910_v14  ;;  %v3849_v9 = vpop.f32.mrb[125].mxu0  ;;  %v3559_v17 = vadd.f32 %v3558_v40, %v3557_v48  ;;  %v3560_v32 = vpop.f32.mrb[138].mxu1 }
 0x1fc   : > { %v1913_v2 = vpop.f32.mrb[126].mxu0  ;;  %v3561_v26 = vpop.f32.mrb[139].mxu1 }
 0x1fd   : > { %v4960_v30 = vadd.f32 %v3544_v0, %v1913_v2  ;;  %v3850_v33 = vpop.f32.mrb[127].mxu0  ;;  %v3562_v50 = vadd.f32 %v3561_v26, %v3560_v32 }
 0x201   : > { %v3563_v20 = vpop.f32.mrb[140].mxu1 }
 0x202   : > { %v1918_v58 = vpop.f32.mrb[128].mxu0  ;;  %v3564_v38 = vpop.f32.mrb[141].mxu1 }
 0x203   : > { %v4962_v49 = vadd.f32 %v3547_v22, %v1918_v58  ;;  %v3853_v25 = vpop.f32.mrb[129].mxu0  ;;  %v3565_v57 = vadd.f32 %v3564_v38, %v3563_v20  ;;  %v3566_v36 = vpop.f32.mrb[142].mxu1 }
 0x204   : > { %v1921_v59 = vpop.f32.mrb[130].mxu0  ;;  %v3567_v19 = vpop.f32.mrb[143].mxu1 }
 0x205   : > { %v4964_v14 = vadd.f32 %v3550_v51, %v1921_v59  ;;  %v3854_v9 = vpop.f32.mrb[131].mxu0  ;;  %v3568_v48 = vadd.f32 %v3567_v19, %v3566_v36 }
 0x207   : > { %5284 = vst [vmem:[#allocation26_spill] sm:$0xff] %v4964_v14 }
 0x209   : > { %v3569_v0 = vpop.f32.mrb[144].mxu1 }
 0x20a   : > { %v1926_v40 = vpop.f32.mrb[132].mxu0  ;;  %v3570_v26 = vpop.f32.mrb[145].mxu1 }
 0x20b   : > { %v4966_v2 = vadd.f32 %v3553_v46, %v1926_v40  ;;  %v3857_v33 = vpop.f32.mrb[133].mxu0  ;;  %v3571_v52 = vadd.f32 %v3570_v26, %v3569_v0  ;;  %v3572_v22 = vpop.f32.mrb[146].mxu1 }
 0x20c   : > { %v1929_v32 = vpop.f32.mrb[134].mxu0  ;;  %v3573_v6 = vpop.f32.mrb[147].mxu1 }
 0x20d   : > { %5285 = vst [vmem:[#allocation27_spill] sm:$0xff] %v4966_v2  ;;  %v4968_v58 = vadd.f32 %v3556_v47, %v1929_v32  ;;  %v3858_v25 = vpop.f32.mrb[135].mxu0  ;;  %v3574_v20 = vadd.f32 %v3573_v6, %v3572_v22 }
 0x20f   : > { %5286 = vst [vmem:[#allocation28_spill] sm:$0xff] %v4968_v58 }
 0x211   : > { %v3575_v51 = vpop.f32.mrb[148].mxu1 }
 0x212   : > { %v1934_v38 = vpop.f32.mrb[136].mxu0  ;;  %v3576_v19 = vpop.f32.mrb[149].mxu1 }
 0x213   : > { %v4970_v59 = vadd.f32 %v3559_v17, %v1934_v38  ;;  %v3861_v9 = vpop.f32.mrb[137].mxu0  ;;  %v3577_v14 = vadd.f32 %v3576_v19, %v3575_v51  ;;  %v3578_v46 = vpop.f32.mrb[150].mxu1 }
 0x214   : > { %v1937_v36 = vpop.f32.mrb[138].mxu0  ;;  %v3579_v2 = vpop.f32.mrb[151].mxu1 }
 0x215   : > { %5287 = vst [vmem:[#allocation29_spill] sm:$0xff] %v4970_v59  ;;  %v4972_v40 = vadd.f32 %v3562_v50, %v1937_v36  ;;  %v3862_v33 = vpop.f32.mrb[139].mxu0  ;;  %v3580_v0 = vadd.f32 %v3579_v2, %v3578_v46 }
 0x217   : > { %5288 = vst [vmem:[#allocation30_spill] sm:$0xff] %v4972_v40 }
 0x219   : > { %v3581_v47 = vpop.f32.mrb[152].mxu1 }
 0x21a   : > { %v1942_v26 = vpop.f32.mrb[140].mxu0  ;;  %v3582_v6 = vpop.f32.mrb[153].mxu1 }
 0x21b   : > { %v4974_v32 = vadd.f32 %v3565_v57, %v1942_v26  ;;  %v3865_v25 = vpop.f32.mrb[141].mxu0  ;;  %v3583_v58 = vadd.f32 %v3582_v6, %v3581_v47  ;;  %v3584_v17 = vpop.f32.mrb[154].mxu1 }
 0x21c   : > { %v1945_v22 = vpop.f32.mrb[142].mxu0  ;;  %v3585_v59 = vpop.f32.mrb[155].mxu1 }
 0x21d   : > { %5289 = vst [vmem:[#allocation31_spill] sm:$0xff] %v4974_v32  ;;  %v4976_v38 = vadd.f32 %v3568_v48, %v1945_v22  ;;  %v3866_v9 = vpop.f32.mrb[143].mxu0 }
 0x21f   : > { %5290 = vst [vmem:[#allocation32_spill] sm:$0xff] %v4976_v38 }
 0x221   : > { %v3618_v19 = vpop.f32.mrb[156].mxu1 }
 0x222   : > { %v1950_v51 = vpop.f32.mrb[144].mxu0  ;;  %v3619_v33 = vpop.f32.mrb[157].mxu1 }
 0x223   : > { %v4978_v50 = vadd.f32 %v3571_v52, %v1950_v51  ;;  %v3869_v36 = vpop.f32.mrb[145].mxu0  ;;  %v3620_v46 = vadd.f32 %v3619_v33, %v3618_v19  ;;  %v3621_v40 = vpop.f32.mrb[158].mxu1 }
 0x224   : > { %v1953_v2 = vpop.f32.mrb[146].mxu0  ;;  %v3622_v25 = vpop.f32.mrb[159].mxu1 }
 0x225   : > { %5291 = vst [vmem:[#allocation33_spill] sm:$0xff] %v4978_v50  ;;  %v4980_v57 = vadd.f32 %v3574_v20, %v1953_v2  ;;  %v3870_v26 = vpop.f32.mrb[147].mxu0  ;;  %v3623_v32 = vadd.f32 %v3622_v25, %v3621_v40 }
 0x227   : > { %5292 = vst [vmem:[#allocation34_spill] sm:$0xff] %v4980_v57 }
 0x229   : > { %v3624_v6 = vpop.f32.mrb[160].mxu1 }
 0x22a   : > { %v1958_v47 = vpop.f32.mrb[148].mxu0  ;;  %v3625_v59 = vpop.f32.mrb[161].mxu1 }
 0x22b   : > { %v4982_v48 = vadd.f32 %v3577_v14, %v1958_v47  ;;  %v3873_v22 = vpop.f32.mrb[149].mxu0  ;;  %v3626_v9 = vadd.f32 %v3625_v59, %v3624_v6  ;;  %v3627_v52 = vpop.f32.mrb[162].mxu1 }
 0x22c   : > { %v1961_v17 = vpop.f32.mrb[150].mxu0  ;;  %v3628_v50 = vpop.f32.mrb[163].mxu1 }
 0x22d   : > { %5293 = vst [vmem:[#allocation35_spill] sm:$0xff] %v4982_v48  ;;  %v4984_v51 = vadd.f32 %v3580_v0, %v1961_v17  ;;  %v3874_v36 = vpop.f32.mrb[151].mxu0  ;;  %v3629_v19 = vadd.f32 %v3628_v50, %v3627_v52 }
 0x231   : > { %v3630_v20 = vpop.f32.mrb[164].mxu1 }
 0x232   : > { %v1966_v33 = vpop.f32.mrb[152].mxu0  ;;  %v3631_v40 = vpop.f32.mrb[165].mxu1 }
 0x233   : > { %v4986_v2 = vadd.f32 %v3583_v58, %v1966_v33  ;;  %v3877_v26 = vpop.f32.mrb[153].mxu0  ;;  %v3632_v57 = vadd.f32 %v3631_v40, %v3630_v20  ;;  %v3633_v14 = vpop.f32.mrb[166].mxu1  ;;  %v4994_v20 = vld [vmem:[%s5232_s2] ss:$0 sm:$0xff] }
 0x234   : > { %v1969_v25 = vpop.f32.mrb[154].mxu0  ;;  %v3634_v22 = vpop.f32.mrb[167].mxu1 }
 0x235   : > { %v3878_v47 = vpop.f32.mrb[155].mxu0  ;;  %v3635_v48 = vadd.f32 %v3634_v22, %v3633_v14 }
 0x239   : > { %v3636_v6 = vpop.f32.mrb[168].mxu1 }
 0x23a   : > { %v2422_v38 = vpop.f32.mrb[156].mxu0  ;;  %v3637_v17 = vpop.f32.mrb[169].mxu1 }
 0x23b   : > { %v2423_v0 = vadd.f32 %v3620_v46, %v2422_v38  ;;  %v3885_v59 = vpop.f32.mrb[157].mxu0  ;;  %v4988_v50 = vadd.f32 %v3637_v17, %v3636_v6  ;;  %v3639_v52 = vpop.f32.mrb[170].mxu1  ;;  %v5294_v38 = vmax.f32 %v4589_v27, %v4776_v61 }
 0x23c   : > { %v2425_v36 = vpop.f32.mrb[158].mxu0  ;;  %v3640_v25 = vpop.f32.mrb[171].mxu1 }
 0x23d   : > { %v2549_v58 = vmax.f32 %v4938_v34, %v2423_v0  ;;  %v2426_v33 = vadd.f32 %v3623_v32, %v2425_v36  ;;  %v3886_v26 = vpop.f32.mrb[159].mxu0  ;;  %v4996_v40 = vadd.f32 %v3640_v25, %v3639_v52  ;;  %v5295_v34 = vmax.f32 %v4594_v28, %v4783_v8 }
 0x23f   : > { %v2574_v46 = vmax.f32 %v5294_v38, %v2549_v58  ;;  %v2550_v14 = vmax.f32 %v4940_v60, %v2426_v33 }
 0x241   : > { %v2606_v47 = vadd.f32 %v4994_v20, %v2574_v46  ;;  %v2575_v32 = vmax.f32 %v5295_v34, %v2550_v14  ;;  %v3642_v6 = vpop.f32.mrb[172].mxu1  ;;  %v5296_v46 = vmax.f32 %v4607_v39, %v4790_v13 }
 0x242   : > { %v2430_v22 = vpop.f32.mrb[160].mxu0  ;;  %v3643_v52 = vpop.f32.mrb[173].mxu1 }
 0x243   : > { %v2631_v0 = vmax.f32 %v2606_v47, 0.0  ;;  %v2607_v59 = vadd.f32 %v4994_v20, %v2575_v32  ;;  %v2431_v17 = vadd.f32 %v3626_v9, %v2430_v22  ;;  %v3889_v36 = vpop.f32.mrb[161].mxu0  ;;  %v5013_v61 = vadd.f32 %v3643_v52, %v3642_v6  ;;  %v3645_v28 = vpop.f32.mrb[174].mxu1 }
 0x244   : > { %v2433_v27 = vpop.f32.mrb[162].mxu0  ;;  %v3646_v26 = vpop.f32.mrb[175].mxu1 }
 0x245   : > { %v3250_v8 = vpack.c.bf16 %v2631_v0, %v2631_v0  ;;  %v2632_v60 = vmax.f32 %v2607_v59, 0.0  ;;  %v2551_v58 = vmax.f32 %v4942_v18, %v2431_v17  ;;  %v2434_v33 = vadd.f32 %v3629_v19, %v2433_v27  ;;  %v3890_v9 = vpop.f32.mrb[163].mxu0 }
 0x246   : > { %v5016_v25 = vadd.f32 %v3646_v26, %v3645_v28  ;;  %v5297_v18 = vmax.f32 %v4611_v41, %v4797_v7 }
 0x247   : > { %2758 = vst.msk [vmem:[%s5011_s11] sm:$0xf] %vm2757_vm2, %v3250_v8  ;;  %v3251_v38 = vpack.c.bf16 %v2632_v60, %v2632_v60  ;;  %v2576_v14 = vmax.f32 %v5296_v46, %v2551_v58  ;;  %v2552_v47 = vmax.f32 %v4944_v15, %v2434_v33 }
 0x249   : > { %2759 = vst.msk [vmem:[%s5011_s11 + $0x4] sm:$0xf] %vm2757_vm2, %v3251_v38  ;;  %v2608_v34 = vadd.f32 %v4994_v20, %v2576_v14  ;;  %v2577_v19 = vmax.f32 %v5297_v18, %v2552_v47  ;;  %v3648_v22 = vpop.f32.mrb[176].mxu1 }
 0x24a   : > { %v2438_v32 = vpop.f32.mrb[164].mxu0  ;;  %v3649_v39 = vpop.f32.mrb[177].mxu1 }
 0x24b   : > { %v2633_v6 = vmax.f32 %v2608_v34, 0.0  ;;  %v2609_v0 = vadd.f32 %v4994_v20, %v2577_v19  ;;  %v2439_v59 = vadd.f32 %v3632_v57, %v2438_v32  ;;  %v3893_v17 = vpop.f32.mrb[165].mxu0  ;;  %v5031_v15 = vadd.f32 %v3649_v39, %v3648_v22  ;;  %v3651_v36 = vpop.f32.mrb[178].mxu1 }
 0x24c   : > { %v2441_v13 = vpop.f32.mrb[166].mxu0  ;;  %v3652_v8 = vpop.f32.mrb[179].mxu1  ;;  %v5298_v57 = vmax.f32 %v4623_v54, %v4804_v55  ;;  %v5300_v17 = vmax.f32 %v4639_v63, %v4818_v53 }
 0x24d   : > { %v3252_v52 = vpack.c.bf16 %v2633_v6, %v2633_v6  ;;  %v2634_v27 = vmax.f32 %v2609_v0, 0.0  ;;  %v2553_v28 = vmax.f32 %v4946_v12, %v2439_v59  ;;  %v2442_v41 = vadd.f32 %v3635_v48, %v2441_v13  ;;  %v3894_v7 = vpop.f32.mrb[167].mxu0 }
 0x24e   : > { %v5034_v60 = vadd.f32 %v3652_v8, %v3651_v36  ;;  %v5299_v12 = vmax.f32 %v4627_v56, %v4811_v24 }
 0x24f   : > { %2760 = vst.msk [vmem:[%s5011_s11 + $0x8] sm:$0xf] %vm2757_vm2, %v3252_v52  ;;  %v3253_v58 = vpack.c.bf16 %v2634_v27, %v2634_v27  ;;  %v2578_v33 = vmax.f32 %v5298_v57, %v2553_v28  ;;  %v2554_v9 = vmax.f32 %v4948_v31, %v2442_v41 }
 0x251   : > { %2761 = vst.msk [vmem:[%s5011_s11 + $0xc] sm:$0xf] %vm2757_vm2, %v3253_v58  ;;  %v2610_v26 = vadd.f32 %v4994_v20, %v2578_v33  ;;  %v2579_v48 = vmax.f32 %v5299_v12, %v2554_v9  ;;  %v3654_v46 = vpop.f32.mrb[180].mxu1 }
 0x252   : > { %v2446_v38 = vpop.f32.mrb[168].mxu0  ;;  %v3655_v55 = vpop.f32.mrb[181].mxu1 }
 0x253   : > { %v2635_v14 = vmax.f32 %v2610_v26, 0.0  ;;  %v2611_v47 = vadd.f32 %v4994_v20, %v2579_v48  ;;  %v2447_v34 = vadd.f32 %v4988_v50, %v2446_v38  ;;  %v3897_v54 = vpop.f32.mrb[169].mxu0  ;;  %v5050_v18 = vadd.f32 %v3655_v55, %v3654_v46  ;;  %v3657_v19 = vpop.f32.mrb[182].mxu1 }
 0x254   : > { %v2449_v31 = vpop.f32.mrb[170].mxu0  ;;  %v3658_v0 = vpop.f32.mrb[183].mxu1  ;;  %v5302_v48 = vmax.f32 %v4655_v5, %v4832_v44 }
 0x255   : > { %v3254_v32 = vpack.c.bf16 %v2635_v14, %v2635_v14  ;;  %v2636_v22 = vmax.f32 %v2611_v47, 0.0  ;;  %v2555_v56 = vmax.f32 %v4950_v62, %v2447_v34  ;;  %v2450_v24 = vadd.f32 %v4996_v40, %v2449_v31  ;;  %v3898_v6 = vpop.f32.mrb[171].mxu0 }
 0x256   : > { %v5054_v59 = vadd.f32 %v3658_v0, %v3657_v19  ;;  %v5301_v62 = vmax.f32 %v4643_v11, %v4825_v16 }
 0x257   : > { %2762 = vst.msk [vmem:[%s5011_s11 + $0x10] sm:$0xf] %vm2757_vm2, %v3254_v32  ;;  %v3255_v50 = vpack.c.bf16 %v2636_v22, %v2636_v22  ;;  %v2580_v39 = vmax.f32 %v5300_v17, %v2555_v56  ;;  %v2556_v13 = vmax.f32 %v4952_v3, %v2450_v24 }
 0x259   : > { %2763 = vst.msk [vmem:[%s5011_s11 + $0x14] sm:$0xf] %vm2757_vm2, %v3255_v50  ;;  %v2612_v36 = vadd.f32 %v4994_v20, %v2580_v39  ;;  %v2581_v40 = vmax.f32 %v5301_v62, %v2556_v13  ;;  %v3660_v27 = vpop.f32.mrb[184].mxu1  ;;  %v5304_v50 = vmax.f32 %v4671_v42, %v4846_v35 }
 0x25a   : > { %v2454_v52 = vpop.f32.mrb[172].mxu0  ;;  %v3661_v53 = vpop.f32.mrb[185].mxu1 }
 0x25b   : > { %v2637_v28 = vmax.f32 %v2612_v36, 0.0  ;;  %v2613_v41 = vadd.f32 %v4994_v20, %v2581_v40  ;;  %v2455_v7 = vadd.f32 %v5013_v61, %v2454_v52  ;;  %v3901_v63 = vpop.f32.mrb[173].mxu0  ;;  %v5070_v8 = vadd.f32 %v3661_v53, %v3660_v27  ;;  %v3663_v58 = vpop.f32.mrb[186].mxu1 }
 0x25c   : > { %v2457_v3 = vpop.f32.mrb[174].mxu0  ;;  %v3664_v26 = vpop.f32.mrb[187].mxu1 }
 0x25d   : > { %v3256_v57 = vpack.c.bf16 %v2637_v28, %v2637_v28  ;;  %v2638_v33 = vmax.f32 %v2613_v41, 0.0  ;;  %v2557_v11 = vmax.f32 %v4954_v1, %v2455_v7  ;;  %v2458_v16 = vadd.f32 %v5016_v25, %v2457_v3  ;;  %v3902_v9 = vpop.f32.mrb[175].mxu0 }
 0x25e   : > { %v5074_v12 = vadd.f32 %v3664_v26, %v3663_v58  ;;  %v5303_v1 = vmax.f32 %v4659_v29, %v4839_v37  ;;  %v5309_v26 = vld [vmem:[#allocation14_spill] sm:$0xff] }
 0x25f   : > { %2764 = vst.msk [vmem:[%s5011_s11 + $0x18] sm:$0xf] %vm2757_vm2, %v3256_v57  ;;  %v3257_v61 = vpack.c.bf16 %v2638_v33, %v2638_v33  ;;  %v2582_v38 = vmax.f32 %v5302_v48, %v2557_v11  ;;  %v2558_v46 = vmax.f32 %v4956_v21, %v2458_v16  ;;  %v5306_v57 = vmax.f32 %v4687_v4, %v4860_v10  ;;  %v5307_v11 = vld [vmem:[#allocation26_spill] sm:$0xff] }
 0x261   : > { %2765 = vst.msk [vmem:[%s5011_s11 + $0x1c] sm:$0xf] %vm2757_vm2, %v3257_v61  ;;  %v2614_v14 = vadd.f32 %v4994_v20, %v2582_v38  ;;  %v2583_v25 = vmax.f32 %v5303_v1, %v2558_v46  ;;  %v3666_v34 = vpop.f32.mrb[188].mxu1 }
 0x262   : > { %v2462_v47 = vpop.f32.mrb[176].mxu0  ;;  %v3667_v44 = vpop.f32.mrb[189].mxu1 }
 0x263   : > { %v2639_v54 = vmax.f32 %v2614_v14, 0.0  ;;  %v2615_v55 = vadd.f32 %v4994_v20, %v2583_v25  ;;  %v2463_v31 = vadd.f32 %v5031_v15, %v2462_v47  ;;  %v3905_v5 = vpop.f32.mrb[177].mxu0  ;;  %v5090_v19 = vadd.f32 %v3667_v44, %v3666_v34  ;;  %v3669_v32 = vpop.f32.mrb[190].mxu1 }
 0x264   : > { %v2465_v21 = vpop.f32.mrb[178].mxu0  ;;  %v3670_v6 = vpop.f32.mrb[191].mxu1 }
 0x265   : > { %v3258_v22 = vpack.c.bf16 %v2639_v54, %v2639_v54  ;;  %v2640_v56 = vmax.f32 %v2615_v55, 0.0  ;;  %v2559_v29 = vmax.f32 %v4958_v23, %v2463_v31  ;;  %v2466_v37 = vadd.f32 %v5034_v60, %v2465_v21  ;;  %v3906_v24 = vpop.f32.mrb[179].mxu0  ;;  %v5311_v31 = vld [vmem:[#allocation27_spill] sm:$0xff] }
 0x266   : > { %v5094_v0 = vadd.f32 %v3670_v6, %v3669_v32  ;;  %v5305_v23 = vmax.f32 %v4675_v45, %v4853_v43  ;;  %v5315_v6 = vld [vmem:[#allocation28_spill] sm:$0xff] }
 0x267   : > { %2766 = vst.msk [vmem:[%s5011_s11 + $0x20] sm:$0xf] %vm2757_vm2, %v3258_v22  ;;  %v3259_v15 = vpack.c.bf16 %v2640_v56, %v2640_v56  ;;  %v2584_v17 = vmax.f32 %v5304_v50, %v2559_v29  ;;  %v2560_v39 = vmax.f32 %v4960_v30, %v2466_v37  ;;  %v5312_v56 = vld [vmem:[#allocation3_spill] sm:$0xff] }
 0x268   : > { %v5313_v29 = vld [vmem:[#allocation15_spill] sm:$0xff] }
 0x269   : > { %2767 = vst.msk [vmem:[%s5011_s11 + $0x24] sm:$0xf] %vm2757_vm2, %v3259_v15  ;;  %v2616_v13 = vadd.f32 %v4994_v20, %v2584_v17  ;;  %v2585_v60 = vmax.f32 %v5305_v23, %v2560_v39  ;;  %v3672_v62 = vpop.f32.mrb[192].mxu1  ;;  %v5314_v37 = vmax.f32 %v5312_v56, %v5313_v29  ;;  %v5316_v17 = vld [vmem:[#allocation4_spill] sm:$0xff] }
 0x26a   : > { %v2470_v36 = vpop.f32.mrb[180].mxu0  ;;  %v3673_v35 = vpop.f32.mrb[193].mxu1  ;;  %v5317_v39 = vld [vmem:[#allocation16_spill] sm:$0xff] }
 0x26b   : > { %v2641_v40 = vmax.f32 %v2616_v13, 0.0  ;;  %v2617_v52 = vadd.f32 %v4994_v20, %v2585_v60  ;;  %v2471_v27 = vadd.f32 %v5050_v18, %v2470_v36  ;;  %v3909_v42 = vpop.f32.mrb[181].mxu0  ;;  %v5110_v28 = vadd.f32 %v3673_v35, %v3672_v62  ;;  %v3675_v41 = vpop.f32.mrb[194].mxu1 }
 0x26c   : > { %v2473_v30 = vpop.f32.mrb[182].mxu0  ;;  %v3676_v3 = vpop.f32.mrb[195].mxu1 }
 0x26d   : > { %v3260_v7 = vpack.c.bf16 %v2641_v40, %v2641_v40  ;;  %v2642_v63 = vmax.f32 %v2617_v52, 0.0  ;;  %v2561_v45 = vmax.f32 %v4962_v49, %v2471_v27  ;;  %v2474_v43 = vadd.f32 %v5054_v59, %v2473_v30  ;;  %v3910_v53 = vpop.f32.mrb[183].mxu0  ;;  %v5308_v49 = vld [vmem:[#allocation2_spill] sm:$0xff] }
 0x26e   : > { %v5114_v58 = vadd.f32 %v3676_v3, %v3675_v41  ;;  %v5310_v59 = vmax.f32 %v5308_v49, %v5309_v26 }
 0x26f   : > { %2768 = vst.msk [vmem:[%s5011_s11 + $0x28] sm:$0xf] %vm2757_vm2, %v3260_v7  ;;  %v3261_v18 = vpack.c.bf16 %v2642_v63, %v2642_v63  ;;  %v2586_v33 = vmax.f32 %v5306_v57, %v2561_v45  ;;  %v2562_v16 = vmax.f32 %v5307_v11, %v2474_v43  ;;  %v5319_v63 = vld [vmem:[#allocation29_spill] sm:$0xff] }
 0x270   : > { %v5320_v57 = vld [vmem:[#allocation5_spill] sm:$0xff] }
 0x271   : > { %2769 = vst.msk [vmem:[%s5011_s11 + $0x2c] sm:$0xf] %vm2757_vm2, %v3261_v18  ;;  %v2618_v9 = vadd.f32 %v4994_v20, %v2586_v33  ;;  %v2587_v61 = vmax.f32 %v5310_v59, %v2562_v16  ;;  %v3678_v38 = vpop.f32.mrb[196].mxu1  ;;  %v5321_v33 = vld [vmem:[#allocation17_spill] sm:$0xff]  ;;  %v5324_v59 = vld [vmem:[#allocation6_spill] sm:$0xff] }
 0x272   : > { %v2478_v48 = vpop.f32.mrb[184].mxu0  ;;  %v3679_v10 = vpop.f32.mrb[197].mxu1  ;;  %v5322_v11 = vmax.f32 %v5320_v57, %v5321_v33 }
 0x273   : > { %v2643_v46 = vmax.f32 %v2618_v9, 0.0  ;;  %v2619_v14 = vadd.f32 %v4994_v20, %v2587_v61  ;;  %v2479_v1 = vadd.f32 %v5070_v8, %v2478_v48  ;;  %v3913_v4 = vpop.f32.mrb[185].mxu0  ;;  %v5130_v47 = vadd.f32 %v3679_v10, %v3678_v38  ;;  %v3681_v34 = vpop.f32.mrb[198].mxu1  ;;  %v5323_v9 = vld [vmem:[#allocation30_spill] sm:$0xff] }
 0x274   : > { %v2481_v25 = vpop.f32.mrb[186].mxu0  ;;  %v3682_v32 = vpop.f32.mrb[199].mxu1  ;;  %v5325_v61 = vld [vmem:[#allocation18_spill] sm:$0xff] }
 0x275   : > { %v3262_v54 = vpack.c.bf16 %v2643_v46, %v2643_v46  ;;  %v2644_v55 = vmax.f32 %v2619_v14, 0.0  ;;  %v2563_v5 = vmax.f32 %v5311_v31, %v2479_v1  ;;  %v2482_v44 = vadd.f32 %v5074_v12, %v2481_v25  ;;  %v3914_v21 = vpop.f32.mrb[187].mxu0 }
 0x276   : > { %v5134_v22 = vadd.f32 %v3682_v32, %v3681_v34  ;;  %v5318_v12 = vmax.f32 %v5316_v17, %v5317_v39  ;;  %v5332_v39 = vld [vmem:[#allocation8_spill] sm:$0xff] }
 0x277   : > { %2770 = vst.msk [vmem:[%s5011_s11 + $0x30] sm:$0xf] %vm2757_vm2, %v3262_v54  ;;  %v3263_v8 = vpack.c.bf16 %v2644_v55, %v2644_v55  ;;  %v2588_v24 = vmax.f32 %v5314_v37, %v2563_v5  ;;  %v2564_v15 = vmax.f32 %v5315_v6, %v2482_v44  ;;  %v5327_v44 = vld [vmem:[#allocation31_spill] sm:$0xff] }
 0x278   : > { %v5328_v37 = vld [vmem:[#allocation7_spill] sm:$0xff] }
 0x279   : > { %2771 = vst.msk [vmem:[%s5011_s11 + $0x34] sm:$0xf] %vm2757_vm2, %v3263_v8  ;;  %v2620_v50 = vadd.f32 %v4994_v20, %v2588_v24  ;;  %v2589_v13 = vmax.f32 %v5318_v12, %v2564_v15  ;;  %v3684_v60 = vpop.f32.mrb[200].mxu1  ;;  %v5329_v24 = vld [vmem:[#allocation19_spill] sm:$0xff]  ;;  %v5331_v15 = vld [vmem:[#allocation32_spill] sm:$0xff] }
 0x27a   : > { %v2486_v23 = vpop.f32.mrb[188].mxu0  ;;  %v3685_v27 = vpop.f32.mrb[201].mxu1  ;;  %v5333_v12 = vld [vmem:[#allocation20_spill] sm:$0xff] }
 0x27b   : > { %v2645_v36 = vmax.f32 %v2620_v50, 0.0  ;;  %v2621_v62 = vadd.f32 %v4994_v20, %v2589_v13  ;;  %v2487_v40 = vadd.f32 %v5090_v19, %v2486_v23  ;;  %v3917_v52 = vpop.f32.mrb[189].mxu0  ;;  %v5150_v35 = vadd.f32 %v3685_v27, %v3684_v60  ;;  %v3687_v30 = vpop.f32.mrb[202].mxu1 }
 0x27c   : > { %v2489_v42 = vpop.f32.mrb[190].mxu0  ;;  %v3688_v3 = vpop.f32.mrb[203].mxu1  ;;  %v5334_v13 = vmax.f32 %v5332_v39, %v5333_v12  ;;  %v5351_v39 = vld [vmem:[#allocation24_spill] sm:$0xff] }
 0x27d   : > { %v3264_v41 = vpack.c.bf16 %v2645_v36, %v2645_v36  ;;  %v2646_v7 = vmax.f32 %v2621_v62, 0.0  ;;  %v2565_v45 = vmax.f32 %v5319_v63, %v2487_v40  ;;  %v2490_v43 = vadd.f32 %v5094_v0, %v2489_v42  ;;  %v3918_v53 = vpop.f32.mrb[191].mxu0 }
 0x27e   : > { %v5154_v18 = vadd.f32 %v3688_v3, %v3687_v30  ;;  %v5326_v0 = vmax.f32 %v5324_v59, %v5325_v61 }
 0x27f   : > { %2772 = vst.msk [vmem:[%s5011_s11 + $0x38] sm:$0xf] %vm2757_vm2, %v3264_v41  ;;  %v3265_v19 = vpack.c.bf16 %v2646_v7, %v2646_v7  ;;  %v2590_v16 = vmax.f32 %v5322_v11, %v2565_v45  ;;  %v2566_v49 = vmax.f32 %v5323_v9, %v2490_v43  ;;  %v5335_v43 = vld [vmem:[#allocation33_spill] sm:$0xff] }
 0x280   : > { %v5336_v11 = vld [vmem:[#allocation13_spill] sm:$0xff] }
 0x281   : > { %2773 = vst.msk [vmem:[%s5011_s11 + $0x3c] sm:$0xf] %vm2757_vm2, %v3265_v19  ;;  %v2622_v26 = vadd.f32 %v4994_v20, %v2590_v16  ;;  %v2591_v48 = vmax.f32 %v5326_v0, %v2566_v49  ;;  %v3690_v46 = vpop.f32.mrb[204].mxu1  ;;  %v5339_v49 = vld [vmem:[#allocation9_spill] sm:$0xff]  ;;  %v5342_v0 = vld [vmem:[#allocation34_spill] sm:$0xff] }
 0x282   : > { %v2494_v38 = vpop.f32.mrb[192].mxu0  ;;  %v3691_v25 = vpop.f32.mrb[205].mxu1 }
 0x283   : > { %v2647_v14 = vmax.f32 %v2622_v26, 0.0  ;;  %v2623_v1 = vadd.f32 %v4994_v20, %v2591_v48  ;;  %v2495_v4 = vadd.f32 %v5110_v28, %v2494_v38  ;;  %v3921_v10 = vpop.f32.mrb[193].mxu0  ;;  %v3692_v54 = vadd.f32 %v3691_v25, %v3690_v46  ;;  %v3693_v55 = vpop.f32.mrb[206].mxu1  ;;  %v5340_v26 = vld [vmem:[#allocation21_spill] sm:$0xff]  ;;  %v5344_v46 = vld [vmem:[#allocation22_spill] sm:$0xff] }
 0x284   : > { %v2497_v34 = vpop.f32.mrb[194].mxu0  ;;  %v3694_v56 = vpop.f32.mrb[207].mxu1  ;;  %v5330_v28 = vmax.f32 %v5328_v37, %v5329_v24  ;;  %v5341_v59 = vmax.f32 %v5339_v49, %v5340_v26  ;;  %v5348_v37 = vld [vmem:[#allocation23_spill] sm:$0xff] }
 0x285   : > { %v3266_v31 = vpack.c.bf16 %v2647_v14, %v2647_v14  ;;  %v2648_v5 = vmax.f32 %v2623_v1, 0.0  ;;  %v2567_v21 = vmax.f32 %v5327_v44, %v2495_v4  ;;  %v2498_v32 = vadd.f32 %v5114_v58, %v2497_v34  ;;  %v3922_v8 = vpop.f32.mrb[195].mxu0 }
 0x287   : > { %2774 = vst.msk [vmem:[%s5011_s11 + $0x40] sm:$0xf] %vm2757_vm2, %v3266_v31  ;;  %v3267_v29 = vpack.c.bf16 %v2648_v5, %v2648_v5  ;;  %v2592_v6 = vmax.f32 %v5330_v28, %v2567_v21  ;;  %v2568_v50 = vmax.f32 %v5331_v15, %v2498_v32  ;;  %v5346_v21 = vld [vmem:[#allocation35_spill] sm:$0xff] }
 0x289   : > { %2775 = vst.msk [vmem:[%s5011_s11 + $0x44] sm:$0xf] %vm2757_vm2, %v3267_v29  ;;  %v2624_v17 = vadd.f32 %v4994_v20, %v2592_v6  ;;  %v2593_v23 = vmax.f32 %v5334_v13, %v2568_v50  ;;  %v2518_v58 = vpop.f32.mrb[208].mxu1 }
 0x28a   : > { %v2502_v60 = vpop.f32.mrb[196].mxu0  ;;  %v2519_v40 = vadd.f32 %v3692_v54, %v2518_v58  ;;  %v3933_v42 = vpop.f32.mrb[209].mxu1 }
 0x28b   : > { %v2649_v36 = vmax.f32 %v2624_v17, 0.0  ;;  %v2625_v62 = vadd.f32 %v4994_v20, %v2593_v23  ;;  %v2503_v52 = vadd.f32 %v5130_v47, %v2502_v60  ;;  %v3925_v27 = vpop.f32.mrb[197].mxu0  ;;  %v2521_v41 = vpop.f32.mrb[210].mxu1  ;;  %v5337_v47 = vld [vmem:[#allocation25_spill] sm:$0xff]  ;;  %v5350_v17 = vld [vmem:[#allocation12_spill] sm:$0xff] }
 0x28c   : > { %v2505_v30 = vpop.f32.mrb[198].mxu0  ;;  %v2573_v45 = vmax.f32 %v4986_v2, %v2519_v40  ;;  %v3934_v19 = vpop.f32.mrb[211].mxu1  ;;  %v5338_v16 = vmax.f32 %v5336_v11, %v5337_v47  ;;  %v5352_v12 = vmax.f32 %v5350_v17, %v5351_v39 }
 0x28d   : > { %v3268_v7 = vpack.c.bf16 %v2649_v36, %v2649_v36  ;;  %v2650_v63 = vmax.f32 %v2625_v62, 0.0  ;;  %v2569_v53 = vmax.f32 %v5335_v43, %v2503_v52  ;;  %v3926_v3 = vpop.f32.mrb[199].mxu0  ;;  %v2506_v57 = vadd.f32 %v5134_v22, %v2505_v30  ;;  %v5343_v22 = vld [vmem:[#allocation10_spill] sm:$0xff] }
 0x28e   : > { %v2598_v9 = vmax.f32 %v5338_v16, %v2573_v45  ;;  %v5345_v14 = vmax.f32 %v5343_v22, %v5344_v46 }
 0x28f   : > { %2776 = vst.msk [vmem:[%s5011_s11 + $0x48] sm:$0xf] %vm2757_vm2, %v3268_v7  ;;  %v3269_v33 = vpack.c.bf16 %v2650_v63, %v2650_v63  ;;  %v2594_v61 = vmax.f32 %v5341_v59, %v2569_v53  ;;  %v2570_v48 = vmax.f32 %v5342_v0, %v2506_v57 }
 0x290   : > { %v2630_v2 = vadd.f32 %v4994_v20, %v2598_v9 }
 0x291   : > { %2777 = vst.msk [vmem:[%s5011_s11 + $0x4c] sm:$0xf] %vm2757_vm2, %v3269_v33  ;;  %v2626_v38 = vadd.f32 %v4994_v20, %v2594_v61  ;;  %v2595_v1 = vmax.f32 %v5345_v14, %v2570_v48 }
 0x292   : > { %v2510_v4 = vpop.f32.mrb[200].mxu0  ;;  %v2655_v10 = vmax.f32 %v2630_v2, 0.0 }
 0x293   : > { %v2651_v25 = vmax.f32 %v2626_v38, 0.0  ;;  %v2511_v34 = vadd.f32 %v5150_v35, %v2510_v4  ;;  %v3929_v54 = vpop.f32.mrb[201].mxu0  ;;  %v2627_v55 = vadd.f32 %v4994_v20, %v2595_v1  ;;  %v5347_v35 = vld [vmem:[#allocation11_spill] sm:$0xff] }
 0x294   : > { %v2513_v31 = vpop.f32.mrb[202].mxu0  ;;  %v3274_v5 = vpack.c.bf16 %v2655_v10, %v2655_v10  ;;  %v5349_v24 = vmax.f32 %v5347_v35, %v5348_v37 }
 0x295   : > { %v3270_v44 = vpack.c.bf16 %v2651_v25, %v2651_v25  ;;  %v2571_v32 = vmax.f32 %v5346_v21, %v2511_v34  ;;  %v2514_v8 = vadd.f32 %v5154_v18, %v2513_v31  ;;  %v3930_v56 = vpop.f32.mrb[203].mxu0  ;;  %v2652_v29 = vmax.f32 %v2627_v55, 0.0 }
 0x296   : > { %2783 = vst.msk [vmem:[%s5011_s11 + $0x60] sm:$0x3] %vm2782_vm3, %v3274_v5 }
 0x297   : > { %2778 = vst.msk [vmem:[%s5011_s11 + $0x50] sm:$0xf] %vm2757_vm2, %v3270_v44  ;;  %v2596_v28 = vmax.f32 %v5349_v24, %v2571_v32  ;;  %v2572_v6 = vmax.f32 %v4984_v51, %v2514_v8  ;;  %v3271_v15 = vpack.c.bf16 %v2652_v29, %v2652_v29 }
 0x299   : > { %v2628_v50 = vadd.f32 %v4994_v20, %v2596_v28  ;;  %v2597_v13 = vmax.f32 %v5352_v12, %v2572_v6  ;;  %2779 = vst.msk [vmem:[%s5011_s11 + $0x54] sm:$0xf] %vm2757_vm2, %v3271_v15 }
 0x29b   : > { %v2653_v18 = vmax.f32 %v2628_v50, 0.0  ;;  %v2629_v23 = vadd.f32 %v4994_v20, %v2597_v13 }
 0x29d   : > { %v3272_v58 = vpack.c.bf16 %v2653_v18, %v2653_v18  ;;  %v2654_v60 = vmax.f32 %v2629_v23, 0.0 }
 0x29f   : > { %2780 = vst.msk [vmem:[%s5011_s11 + $0x58] sm:$0xf] %vm2757_vm2, %v3272_v58  ;;  %v3273_v36 = vpack.c.bf16 %v2654_v60, %v2654_v60 }
 0x2a1   : > { %2781 = vst.msk [vmem:[%s5011_s11 + $0x5c] sm:$0xf] %vm2757_vm2, %v3273_v36 }
 0x2a2 PF: > { %s13_s12 = sadd.s32 1, %s4181_s12  }
 0x2a3   : > { %p10_p4 = scmp.ge.s32.totalorder %s13_s12, 4  }
 0x2a5   :  { %12 = sbr.rel (!%p10_p4) target bundleno = 1 (0x1), region = 65 }

// kernel: classifier_forward.6
= control target key start
LH: loop header
LB: loop body
LE: loop exit
PB: predicated region body
PF: predicated region fallthrough
CT: control target
= control target key end

     0   :  { %s1795_s12 = smov 0   ;;  %s2078_s0 = inlined_call_operand.vmem [shape: bf16[2,144,576], index: 0, kind: input, shape index: {}]   ;;  %s2079_s1 = inlined_call_operand.vmem [shape: bf16[576,128], index: 1, kind: input, shape index: {}]   ;;  %s2080_s2 = inlined_call_operand.vmem [shape: f32[1,128], index: 2, kind: input, shape index: {}]   ;;  %s2081_s3 = inlined_call_operand.vmem [shape: bf16[2,144,128], index: 3, kind: output, shape index: {}]  }
   0x1 LB: > { %s1252_s13 = sadd.s32 4294967295, %s1771_s12   ;;  %p1256_p0 = scmp.ge.s32.totalorder %s1771_s12, 1  ;;  %s1771_s12 = sphi %s1795_s12, %s13_s12  }
   0x2   : > { %p137_p1 = scmp.lt.s32.totalorder %s1771_s12, 3 }
   0x4   : > { %p138_p2 = pnand %p1256_p0, %p137_p1 }
   0x5   : > { %v1666_v0 = vld [vmem:[%s2079_s1 + $0x40] sm:$0xff] (!%p138_p2)   ;;  %v1668_v2 = vld [vmem:[%s2079_s1 + $0x48] sm:$0xff] (!%p138_p2)   ;;  %p161_p3 = scmp.lt.s32.totalorder (!%p138_p2), %s1252_s13, 1  ;;  %v1670_v4 = vld [vmem:[%s2079_s1 + $0x50] sm:$0xff] (!%p138_p2)   ;;  %v1773_v24 = vmov (!%p138_p2), 0.0   ;;  %vm1774_vm0 = vmmov (!%p138_p2), 0  }
   0x6   : > { %141 = sbr.rel (%p138_p2) target bundleno = 363 (0x16b), region = 32  ;;  %v1667_v1 = vld [vmem:[%s2079_s1] sm:$0xff] (!%p138_p2)   ;;  %1441 = vmatprep.subr.bf16.mxu0 (!%p138_p2), %v1666_v0  ;;  %1638 = vmatprep.subr.bf16.mxu1 (!%p138_p2), %v1666_v0  ;;  %v1669_v3 = vld [vmem:[%s2079_s1 + $0x8] sm:$0xff] (!%p138_p2)   ;;  %v1671_v5 = vld [vmem:[%s2079_s1 + $0x10] sm:$0xff] (!%p138_p2)   ;;  %vm746_vm1 = vcmask (!%p138_p2), 523264  }
   0x7   : > { %1442 = vmatpush3.bf16.msra.mxu0 (!%p138_p2), %v1667_v1  ;;  %1646 = vmatpush3.bf16.msra.mxu1 (!%p138_p2), %v1667_v1  ;;  %v1672_v6 = vld [vmem:[%s2079_s1 + $0x58] sm:$0xff] (!%p138_p2)   ;;  %v1674_v8 = vld [vmem:[%s2079_s1 + $0x60] sm:$0xff] (!%p138_p2)   ;;  %v1676_v10 = vld [vmem:[%s2079_s1 + $0x68] sm:$0xff] (!%p138_p2)  }
   0x8   : > { %1443 = vmatprep.subr.bf16.mxu0 (!%p138_p2), %v1668_v2  ;;  %1639 = vmatprep.subr.bf16.mxu1 (!%p138_p2), %v1668_v2  ;;  %v1673_v7 = vld [vmem:[%s2079_s1 + $0x18] sm:$0xff] (!%p138_p2)   ;;  %v1675_v9 = vld [vmem:[%s2079_s1 + $0x20] sm:$0xff] (!%p138_p2)   ;;  %v1677_v13 = vld [vmem:[%s2079_s1 + $0x28] sm:$0xff] (!%p138_p2)  }
   0x9   : > { %v1678_v14 = vld [vmem:[%s2079_s1 + $0x70] sm:$0xff] (!%p138_p2)   ;;  %v1680_v16 = vld [vmem:[%s2079_s1 + $0x78] sm:$0xff] (!%p138_p2)   ;;  %v1688_v20 = vld [vmem:[%s2079_s1 + $0xc0] sm:$0xff] (!%p138_p2)  }
   0xa   : > { %v1679_v15 = vld [vmem:[%s2079_s1 + $0x30] sm:$0xff] (!%p138_p2)   ;;  %v1681_v17 = vld [vmem:[%s2079_s1 + $0x38] sm:$0xff] (!%p138_p2)   ;;  %v1689_v21 = vld [vmem:[%s2079_s1 + $0x80] sm:$0xff] (!%p138_p2)  }
   0xb   : > { %1444 = vmatpush3.bf16.msra.mxu0 (!%p138_p2), %v1669_v3  ;;  %1647 = vmatpush3.bf16.msra.mxu1 (!%p138_p2), %v1669_v3  ;;  %v1690_v22 = vld [vmem:[%s2079_s1 + $0x100] sm:$0xff] (!%p138_p2)   ;;  %v1691_v23 = vld [vmem:[%s2079_s1 + $0xc8] sm:$0xff] (!%p138_p2)   ;;  %v1699_v31 = vld [vmem:[%s2079_s1 + $0xd0] sm:$0xff] (!%p138_p2)  }
   0xc   : > { %1445 = vmatprep.subr.bf16.mxu0 (!%p138_p2), %v1670_v4  ;;  %1640 = vmatprep.subr.bf16.mxu1 (!%p138_p2), %v1670_v4  ;;  %v1692_v27 = vld [vmem:[%s2079_s1 + $0x88] sm:$0xff] (!%p138_p2)   ;;  %v1700_v32 = vld [vmem:[%s2079_s1 + $0x90] sm:$0xff] (!%p138_p2)   ;;  %v1702_v33 = vld [vmem:[%s2079_s1 + $0xd8] sm:$0xff] (!%p138_p2)  }
   0xd   : > { %s2083_s13 = smov (!%p161_p3, %s1252_s13), 1  ;;  %v1701_v28 = vld [vmem:[%s2079_s1 + $0x108] sm:$0xff]   ;;  %v1714_v36 = vld [vmem:[%s2079_s1 + $0x110] sm:$0xff]   ;;  %v1703_v37 = vld [vmem:[%s2079_s1 + $0x98] sm:$0xff]  }
   0xe   : > { %s1654_s28 = smul.u32 360, %s2083_s13  ;;  %v1710_v39 = vld [vmem:[%s2079_s1 + $0xe0] sm:$0xff]   ;;  %v1712_v42 = vld [vmem:[%s2079_s1 + $0xe8] sm:$0xff]   ;;  %v1730_v45 = vld [vmem:[%s2079_s1 + $0x118] sm:$0xff]  }
   0xf   : > { %1446 = vmatpush3.bf16.msra.mxu0 %v1671_v5  ;;  %1648 = vmatpush3.bf16.msra.mxu1 %v1671_v5  ;;  %v1711_v41 = vld [vmem:[%s2079_s1 + $0xa0] sm:$0xff]   ;;  %v1713_v46 = vld [vmem:[%s2079_s1 + $0xa8] sm:$0xff]   ;;  %v1721_v49 = vld [vmem:[%s2079_s1 + $0xf0] sm:$0xff]   ;;  %s1655_s18 = smul.u32 72, %s2083_s13 }
  0x10   : > { %1447 = vmatprep.subr.bf16.mxu0 %v1672_v6  ;;  %1641 = vmatprep.subr.bf16.mxu1 %v1672_v6  ;;  %s1836_s8 = scalar_lea.vmem %s2078_s0, %s1654_s28  ;;  %v1722_v50 = vld [vmem:[%s2079_s1 + $0xb0] sm:$0xff]   ;;  %v1723_v51 = vld [vmem:[%s2079_s1 + $0xf8] sm:$0xff]  }
  0x11   : > { %v1684_v11 = vld [vmem:[%s1836_s8 + $0x4] ss:$20 sps:$4 sm:$0xff]   ;;  %v1687_v12 = vld [vmem:[%s1836_s8 + $0xcc] ss:$20 sps:$4 sm:$0xff]   ;;  %v1685_v19 = vld [vmem:[%s1836_s8 + $0xc8] ss:$20 sps:$4 sm:$0xff]   ;;  %s2038_s21 = scalar_lea.vmem %s2081_s3, %s1655_s18 }
  0x12   : > { %806 = vmatprep.mubr.bf16.mxu0 %v1684_v11  ;;  %846 = vmatprep.mubr.bf16.mxu1 %v1687_v12  ;;  %v1682_v18 = vld [vmem:[%s1836_s8] ss:$20 sps:$4 sm:$0xff]   ;;  %v1697_v29 = vld [vmem:[%s1836_s8 + $0x28] ss:$20 sps:$4 sm:$0xff]   ;;  %v1698_v30 = vld [vmem:[%s1836_s8 + $0xf0] ss:$20 sps:$4 sm:$0xff]  }
  0x13   : > { %1448 = vmatpush3.bf16.msra.mxu0 %v1673_v7  ;;  %1649 = vmatpush3.bf16.msra.mxu1 %v1673_v7  ;;  %v1693_v25 = vld [vmem:[%s1836_s8 + $0x2c] ss:$20 sps:$4 sm:$0xff]   ;;  %v1695_v26 = vld [vmem:[%s1836_s8 + $0xf4] ss:$20 sps:$4 sm:$0xff]   ;;  %v1706_v35 = vld [vmem:[%s1836_s8 + $0x11c] ss:$20 sps:$4 sm:$0xff]  }
  0x14   : > { %1449 = vmatprep.subr.bf16.mxu0 %v1674_v8  ;;  %1642 = vmatprep.subr.bf16.mxu1 %v1674_v8  ;;  %v1704_v34 = vld [vmem:[%s1836_s8 + $0x54] ss:$20 sps:$4 sm:$0xff]   ;;  %v1708_v38 = vld [vmem:[%s1836_s8 + $0x50] ss:$20 sps:$4 sm:$0xff]   ;;  %v1709_v40 = vld [vmem:[%s1836_s8 + $0x118] ss:$20 sps:$4 sm:$0xff]  }
  0x15   : > { %v1715_v43 = vld [vmem:[%s1836_s8 + $0x7c] ss:$20 sps:$4 sm:$0xff]   ;;  %v1717_v44 = vld [vmem:[%s1836_s8 + $0x144] ss:$20 sps:$4 sm:$0xff]   ;;  %v1720_v48 = vld [vmem:[%s1836_s8 + $0x140] ss:$20 sps:$4 sm:$0xff]  }
  0x16   : > { %v1719_v47 = vld [vmem:[%s1836_s8 + $0x78] ss:$20 sps:$4 sm:$0xff]   ;;  %v1727_v55 = vld [vmem:[%s1836_s8 + $0x8] ss:$20 sps:$4 sm:$0xff]   ;;  %v1731_v56 = vld [vmem:[%s1836_s8 + $0xa0] ss:$20 sps:$4 sm:$0xff]  }
  0x17   : > { %1450 = vmatpush3.bf16.msra.mxu0 %v1675_v9  ;;  %1650 = vmatpush3.bf16.msra.mxu1 %v1675_v9  ;;  %v1725_v52 = vld [vmem:[%s1836_s8 + $0xa4] ss:$20 sps:$4 sm:$0xff]   ;;  %v1729_v53 = vld [vmem:[%s1836_s8 + $0xc] ss:$20 sps:$4 sm:$0xff]   ;;  %v1732_v57 = vld [vmem:[%s1836_s8 + $0x34] ss:$20 sps:$4 sm:$0xff]  }
  0x18   : > { %1451 = vmatprep.subr.bf16.mxu0 %v1676_v10  ;;  %1643 = vmatprep.subr.bf16.mxu1 %v1676_v10  ;;  %v1724_v54 = vld [vmem:[%s2079_s1 + $0xb8] sm:$0xff]   ;;  %v1734_v58 = vld [vmem:[%s1836_s8 + $0x30] ss:$20 sps:$4 sm:$0xff]   ;;  %v1742_v0 = vld [vmem:[%s1836_s8 + $0x80] ss:$20 sps:$4 sm:$0xff]  }
  0x19   : > { %v1735_v59 = vld [vmem:[%s1836_s8 + $0x10] ss:$20 sps:$4 sm:$0xff]   ;;  %v1738_v61 = vld [vmem:[%s1836_s8 + $0x58] ss:$20 sps:$4 sm:$0xff]   ;;  %v1743_v1 = vld [vmem:[%s1836_s8 + $0x60] ss:$20 sps:$4 sm:$0xff]  }
  0x1a   : > { %v1736_v60 = vld [vmem:[%s1836_s8 + $0x5c] ss:$20 sps:$4 sm:$0xff]   ;;  %v1739_v62 = vld [vmem:[%s1836_s8 + $0x38] ss:$20 sps:$4 sm:$0xff]   ;;  %v1748_v5 = vld [vmem:[%s1836_s8 + $0xd4] ss:$20 sps:$4 sm:$0xff]  }
  0x1b   : > { %1452 = vmatpush3.bf16.msra.mxu0 %v1677_v13  ;;  %1651 = vmatpush3.bf16.msra.mxu1 %v1677_v13  ;;  %v1740_v63 = vld [vmem:[%s1836_s8 + $0x84] ss:$20 sps:$4 sm:$0xff]   ;;  %v1744_v2 = vld [vmem:[%s1836_s8 + $0xac] ss:$20 sps:$4 sm:$0xff]   ;;  %v1746_v3 = vld [vmem:[%s1836_s8 + $0xa8] ss:$20 sps:$4 sm:$0xff]  }
  0x1c   : > { %1453 = vmatprep.subr.bf16.mxu0 %v1678_v14  ;;  %1644 = vmatprep.subr.bf16.mxu1 %v1678_v14  ;;  %v1747_v4 = vld [vmem:[%s1836_s8 + $0x88] ss:$20 sps:$4 sm:$0xff]   ;;  %v1750_v6 = vld [vmem:[%s1836_s8 + $0xd0] ss:$20 sps:$4 sm:$0xff]   ;;  %v1754_v9 = vld [vmem:[%s1836_s8 + $0xf8] ss:$20 sps:$4 sm:$0xff]  }
  0x1d   : > { %v1751_v7 = vld [vmem:[%s1836_s8 + $0xb0] ss:$20 sps:$4 sm:$0xff]   ;;  %v1755_v10 = vld [vmem:[%s1836_s8 + $0xd8] ss:$20 sps:$4 sm:$0xff]   ;;  %v1758_v12 = vld [vmem:[%s1836_s8 + $0x120] ss:$20 sps:$4 sm:$0xff]  }
  0x1e   : > { %v1752_v8 = vld [vmem:[%s1836_s8 + $0xfc] ss:$20 sps:$4 sm:$0xff]   ;;  %v1756_v11 = vld [vmem:[%s1836_s8 + $0x124] ss:$20 sps:$4 sm:$0xff]   ;;  %v1759_v13 = vld [vmem:[%s1836_s8 + $0x100] ss:$20 sps:$4 sm:$0xff]  }
  0x1f   : > { %1454 = vmatpush3.bf16.msra.mxu0 %v1679_v15  ;;  %1652 = vmatpush3.bf16.msra.mxu1 %v1679_v15  ;;  %v1760_v14 = vld [vmem:[%s1836_s8 + $0x14c] ss:$20 sps:$4 sm:$0xff]   ;;  %v1762_v15 = vld [vmem:[%s1836_s8 + $0x148] ss:$20 sps:$4 sm:$0xff]  }
  0x20   : > { %1455 = vmatprep.subr.bf16.mxu0 %v1680_v16  ;;  %1645 = vmatprep.subr.bf16.mxu1 %v1680_v16  ;;  %v1763_v16 = vld [vmem:[%s1836_s8 + $0x128] ss:$20 sps:$4 sm:$0xff]  }
  0x23   : > { %1456 = vmatpush3.bf16.msra.mxu0 %v1681_v17  ;;  %1653 = vmatpush3.bf16.msra.mxu1 %v1681_v17  ;;  %v1764_v17 = vld [vmem:[%s1836_s8 + $0x150] ss:$20 sps:$4 sm:$0xff]  }
  0x24   : > { %1511 = vmatprep.subr.bf16.mxu1 %v1688_v20  ;;  %1594 = vmatprep.subr.bf16.mxu0 %v1773_v24 }
  0x26   : > { %807 = vmatmul.mubr.bf16.vlgmr.msra.gmra.mrb[0].mxu0 %v1682_v18  ;;  %847 = vmatmul.mubr.bf16.vlgmr.msra.gmra.mrb[0].mxu1 %v1685_v19 }
  0x27   : > { %1512 = vmatpush3.bf16.msra.mxu1 %v1689_v21  ;;  %1595 = vmatpush3.bf16.msra.mxu0 %v1690_v22 }
  0x28   : > { %1513 = vmatprep.subr.bf16.mxu1 %v1691_v23  ;;  %814 = vmatprep.mubr.bf16.mxu0 %v1693_v25 }
  0x29   : > { %854 = vmatprep.mubr.bf16.mxu1 %v1695_v26  ;;  %1596 = vmatprep.subr.bf16.mxu0 %v1773_v24 }
  0x2b   : > { %1514 = vmatpush3.bf16.msra.mxu1 %v1692_v27  ;;  %1597 = vmatpush3.bf16.msra.mxu0 %v1701_v28 }
  0x2c   : > { %1515 = vmatprep.subr.bf16.mxu1 %v1699_v31  ;;  %1598 = vmatprep.subr.bf16.mxu0 %v1773_v24 }
  0x2e   : > { %815 = vmatmul.mubr.bf16.gmra.mrb[4].mxu0 %v1697_v29  ;;  %855 = vmatmul.mubr.bf16.gmra.mrb[4].mxu1 %v1698_v30 }
  0x2f   : > { %1516 = vmatpush3.bf16.msra.mxu1 %v1700_v32  ;;  %822 = vmatprep.mubr.bf16.mxu0 %v1704_v34 }
  0x30   : > { %1517 = vmatprep.subr.bf16.mxu1 %v1702_v33  ;;  %862 = vmatprep.mubr.bf16.mxu1 %v1706_v35 }
  0x31   : > { %1599 = vmatpush3.bf16.msra.mxu0 %v1714_v36 }
  0x32   : > { %1600 = vmatprep.subr.bf16.mxu0 %v1773_v24 }
  0x33   : > { %1518 = vmatpush3.bf16.msra.mxu1 %v1703_v37 }
  0x34   : > { %1519 = vmatprep.subr.bf16.mxu1 %v1710_v39 }
  0x35   : > { %1601 = vmatpush3.bf16.msra.mxu0 %v1730_v45 }
  0x36   : > { %823 = vmatmul.mubr.bf16.gmra.mrb[8].mxu0 %v1708_v38  ;;  %863 = vmatmul.mubr.bf16.gmra.mrb[8].mxu1 %v1709_v40 }
  0x37   : > { %1520 = vmatpush3.bf16.msra.mxu1 %v1711_v41  ;;  %830 = vmatprep.mubr.bf16.mxu0 %v1715_v43 }
  0x38   : > { %1521 = vmatprep.subr.bf16.mxu1 %v1712_v42  ;;  %870 = vmatprep.mubr.bf16.mxu1 %v1717_v44 }
  0x3b   : > { %1522 = vmatpush3.bf16.msra.mxu1 %v1713_v46 }
  0x3c   : > { %1523 = vmatprep.subr.bf16.mxu1 %v1721_v49 }
  0x3e   : > { %831 = vmatmul.mubr.bf16.gmra.mrb[12].mxu0 %v1719_v47  ;;  %871 = vmatmul.mubr.bf16.gmra.mrb[12].mxu1 %v1720_v48 }
  0x3f   : > { %1524 = vmatpush3.bf16.msra.mxu1 %v1722_v50  ;;  %838 = vmatprep.mubr.bf16.mxu0 %v1725_v52 }
  0x40   : > { %1525 = vmatprep.subr.bf16.mxu1 %v1723_v51  ;;  %911 = vmatprep.mubr.bf16.mxu1 %v1729_v53 }
  0x43   : > { %1526 = vmatpush3.bf16.msra.mxu1 %v1724_v54 }
  0x46   : > { %839 = vmatmul.mubr.bf16.gmra.mrb[16].mxu0 %v1731_v56  ;;  %912 = vmatmul.mubr.bf16.vlgmr.msra.gmra.mrb[16].mxu1 %v1727_v55 }
  0x47   : > { %919 = vmatprep.mubr.bf16.mxu1 %v1732_v57  ;;  %1602 = vmatprep.mubr.msk.bf16.mxu0 %vm1774_vm0, %v1773_v24 }
  0x4e   : > { %920 = vmatmul.mubr.bf16.gmra.mrb[20].mxu1 %v1734_v58  ;;  %1603 = vmatmul.mubr.msk.bf16.vlgmr.msra.gmra.mrb[20].mxu0 %vm746_vm1, %v1735_v59 }
  0x4f   : > { %927 = vmatprep.mubr.bf16.mxu1 %v1736_v60  ;;  %1606 = vmatprep.mubr.msk.bf16.mxu0 %vm1774_vm0, %v1773_v24 }
  0x56   : > { %928 = vmatmul.mubr.bf16.gmra.mrb[24].mxu1 %v1738_v61  ;;  %1607 = vmatmul.mubr.msk.bf16.gmra.mrb[24].mxu0 %vm746_vm1, %v1739_v62  ;;  %v2016_v62 = vld [vmem:[%s2080_s2] ss:$0 sm:$0xff] }
  0x57   : > { %935 = vmatprep.mubr.bf16.mxu1 %v1740_v63  ;;  %1610 = vmatprep.mubr.msk.bf16.mxu0 %vm1774_vm0, %v1773_v24 }
  0x5e   : > { %936 = vmatmul.mubr.bf16.gmra.mrb[28].mxu1 %v1742_v0  ;;  %1611 = vmatmul.mubr.msk.bf16.gmra.mrb[28].mxu0 %vm746_vm1, %v1743_v1 }
  0x5f   : > { %943 = vmatprep.mubr.bf16.mxu1 %v1744_v2  ;;  %1614 = vmatprep.mubr.msk.bf16.mxu0 %vm1774_vm0, %v1773_v24 }
  0x66   : > { %944 = vmatmul.mubr.bf16.gmra.mrb[32].mxu1 %v1746_v3  ;;  %1615 = vmatmul.mubr.msk.bf16.gmra.mrb[32].mxu0 %vm746_vm1, %v1747_v4 }
  0x67   : > { %951 = vmatprep.mubr.bf16.mxu1 %v1748_v5  ;;  %1618 = vmatprep.mubr.msk.bf16.mxu0 %vm1774_vm0, %v1773_v24 }
  0x6e   : > { %952 = vmatmul.mubr.bf16.gmra.mrb[36].mxu1 %v1750_v6  ;;  %1619 = vmatmul.mubr.msk.bf16.gmra.mrb[36].mxu0 %vm746_vm1, %v1751_v7 }
  0x6f   : > { %959 = vmatprep.mubr.bf16.mxu1 %v1752_v8  ;;  %1622 = vmatprep.mubr.msk.bf16.mxu0 %vm1774_vm0, %v1773_v24 }
  0x76   : > { %960 = vmatmul.mubr.bf16.gmra.mrb[40].mxu1 %v1754_v9  ;;  %1623 = vmatmul.mubr.msk.bf16.gmra.mrb[40].mxu0 %vm746_vm1, %v1755_v10 }
  0x77   : > { %967 = vmatprep.mubr.bf16.mxu1 %v1756_v11  ;;  %1626 = vmatprep.mubr.msk.bf16.mxu0 %vm1774_vm0, %v1773_v24 }
  0x7e   : > { %968 = vmatmul.mubr.bf16.gmra.mrb[44].mxu1 %v1758_v12  ;;  %1627 = vmatmul.mubr.msk.bf16.gmra.mrb[44].mxu0 %vm746_vm1, %v1759_v13 }
  0x7f   : > { %975 = vmatprep.mubr.bf16.mxu1 %v1760_v14  ;;  %1630 = vmatprep.mubr.msk.bf16.mxu0 %vm1774_vm0, %v1773_v24 }
  0x86   : > { %976 = vmatmul.mubr.bf16.gmra.mrb[48].mxu1 %v1762_v15  ;;  %1631 = vmatmul.mubr.msk.bf16.gmra.mrb[48].mxu0 %vm746_vm1, %v1763_v16 }
  0x87   : > { %1634 = vmatprep.mubr.msk.bf16.mxu0 %vm1774_vm0, %v1773_v24 }
  0x8e   : > { %1635 = vmatmul.mubr.msk.bf16.gmra.mrb[52].mxu0 %vm746_vm1, %v1764_v17 }
  0xf9   : > { %v1457_v18 = vpop.f32.mrb[0].mxu0  ;;  %v1487_v19 = vpop.f32.mrb[0].mxu1 }
  0xfa   : > { %v1458_v20 = vpop.f32.mrb[1].mxu0  ;;  %v1488_v21 = vpop.f32.mrb[1].mxu1 }
  0xfb   : > { %v1459_v22 = vadd.f32 %v1458_v20, %v1457_v18  ;;  %v1460_v23 = vpop.f32.mrb[2].mxu0  ;;  %v1995_v25 = vadd.f32 %v1488_v21, %v1487_v19  ;;  %v1490_v26 = vpop.f32.mrb[2].mxu1 }
  0xfc   : > { %v1461_v27 = vpop.f32.mrb[3].mxu0  ;;  %v1491_v28 = vpop.f32.mrb[3].mxu1 }
  0xfd   : > { %v1462_v29 = vadd.f32 %v1461_v27, %v1460_v23  ;;  %v1997_v30 = vadd.f32 %v1491_v28, %v1490_v26  ;;  %v809_v9 = vadd.f32 %v1459_v22, %v2016_v62 }
  0xff   : > { %v812_v16 = vadd.f32 %v1462_v29, %v2016_v62 }
 0x101   : > { %v1463_v31 = vpop.f32.mrb[4].mxu0  ;;  %v1493_v32 = vpop.f32.mrb[4].mxu1 }
 0x102   : > { %v1464_v24 = vpop.f32.mrb[5].mxu0  ;;  %v1494_v33 = vpop.f32.mrb[5].mxu1 }
 0x103   : > { %v1465_v34 = vadd.f32 %v1464_v24, %v1463_v31  ;;  %v1466_v35 = vpop.f32.mrb[6].mxu0  ;;  %v1999_v36 = vadd.f32 %v1494_v33, %v1493_v32  ;;  %v1496_v37 = vpop.f32.mrb[6].mxu1 }
 0x104   : > { %v1467_v38 = vpop.f32.mrb[7].mxu0  ;;  %v1497_v39 = vpop.f32.mrb[7].mxu1 }
 0x105   : > { %v1468_v40 = vadd.f32 %v1467_v38, %v1466_v35  ;;  %v2001_v41 = vadd.f32 %v1497_v39, %v1496_v37  ;;  %v817_v28 = vadd.f32 %v1465_v34, %v2016_v62 }
 0x107   : > { %v820_v29 = vadd.f32 %v1468_v40, %v2016_v62 }
 0x109   : > { %v1469_v42 = vpop.f32.mrb[8].mxu0  ;;  %v1499_v43 = vpop.f32.mrb[8].mxu1 }
 0x10a   : > { %v1470_v44 = vpop.f32.mrb[9].mxu0  ;;  %v1500_v45 = vpop.f32.mrb[9].mxu1 }
 0x10b   : > { %v2003_v46 = vadd.f32 %v1470_v44, %v1469_v42  ;;  %v1472_v47 = vpop.f32.mrb[10].mxu0  ;;  %v2005_v48 = vadd.f32 %v1500_v45, %v1499_v43  ;;  %v1502_v49 = vpop.f32.mrb[10].mxu1 }
 0x10c   : > { %v1473_v50 = vpop.f32.mrb[11].mxu0  ;;  %v1503_v51 = vpop.f32.mrb[11].mxu1 }
 0x10d   : > { %v2007_v52 = vadd.f32 %v1473_v50, %v1472_v47  ;;  %v2009_v53 = vadd.f32 %v1503_v51, %v1502_v49  ;;  %v825_v40 = vadd.f32 %v2003_v46, %v2016_v62 }
 0x111   : > { %v1475_v54 = vpop.f32.mrb[12].mxu0  ;;  %v1505_v55 = vpop.f32.mrb[12].mxu1 }
 0x112   : > { %v1476_v56 = vpop.f32.mrb[13].mxu0  ;;  %v1506_v57 = vpop.f32.mrb[13].mxu1 }
 0x113   : > { %v2011_v58 = vadd.f32 %v1476_v56, %v1475_v54  ;;  %v1478_v59 = vpop.f32.mrb[14].mxu0  ;;  %v1507_v60 = vadd.f32 %v1506_v57, %v1505_v55  ;;  %v1508_v61 = vpop.f32.mrb[14].mxu1 }
 0x114   : > { %v1479_v63 = vpop.f32.mrb[15].mxu0  ;;  %v1509_v0 = vpop.f32.mrb[15].mxu1 }
 0x115   : > { %v2019_v1 = vadd.f32 %v1507_v60, %v2016_v62  ;;  %v2021_v2 = vadd.f32 %v1479_v63, %v1478_v59  ;;  %v1510_v3 = vadd.f32 %v1509_v0, %v1508_v61  ;;  %v828_v61 = vadd.f32 %v2007_v52, %v2016_v62 }
 0x117   : > { %v2024_v4 = vadd.f32 %v1510_v3, %v2016_v62 }
 0x119   : > { %v1481_v5 = vpop.f32.mrb[16].mxu0  ;;  %v1527_v6 = vpop.f32.mrb[16].mxu1 }
 0x11a   : > { %v1482_v7 = vpop.f32.mrb[17].mxu0  ;;  %v1528_v8 = vpop.f32.mrb[17].mxu1 }
 0x11b   : > { %v2027_v10 = vadd.f32 %v1482_v7, %v1481_v5  ;;  %v1529_v11 = vadd.f32 %v1528_v8, %v1527_v6  ;;  %v1484_v12 = vpop.f32.mrb[18].mxu0  ;;  %v1530_v13 = vpop.f32.mrb[18].mxu1 }
 0x11c   : > { %v1485_v14 = vpop.f32.mrb[19].mxu0  ;;  %v1531_v15 = vpop.f32.mrb[19].mxu1 }
 0x11d   : > { %v2030_v17 = vadd.f32 %v1485_v14, %v1484_v12  ;;  %v1532_v18 = vadd.f32 %v1531_v15, %v1530_v13  ;;  %v914_v19 = vadd.f32 %v1529_v11, %v809_v9  ;;  %v833_v13 = vadd.f32 %v2011_v58, %v2016_v62 }
 0x11f   : > { %v917_v20 = vadd.f32 %v1532_v18, %v812_v16 }
 0x121   : > { %v1533_v21 = vpop.f32.mrb[20].mxu1  ;;  %v1018_v23 = vpop.f32.mrb[20].mxu0 }
 0x122   : > { %v1019_v26 = vadd.f32 %v1018_v23, %v914_v19  ;;  %v1534_v27 = vpop.f32.mrb[21].mxu1  ;;  %v1604_v22 = vpop.f32.mrb[21].mxu0 }
 0x123   : > { %v1535_v31 = vadd.f32 %v1534_v27, %v1533_v21  ;;  %v1536_v32 = vpop.f32.mrb[22].mxu1  ;;  %v1021_v24 = vpop.f32.mrb[22].mxu0 }
 0x124   : > { %v1022_v33 = vadd.f32 %v1021_v24, %v917_v20  ;;  %v1537_v35 = vpop.f32.mrb[23].mxu1  ;;  %v1605_v37 = vpop.f32.mrb[23].mxu0  ;;  %v1089_v42 = vmax.f32 %v1019_v26, 0.0  ;;  %v836_v20 = vadd.f32 %v2021_v2, %v2016_v62 }
 0x125   : > { %v1538_v38 = vadd.f32 %v1537_v35, %v1536_v32  ;;  %v922_v39 = vadd.f32 %v1535_v31, %v817_v28  ;;  %v841_v35 = vadd.f32 %v2027_v10, %v2016_v62 }
 0x126   : > { %v1090_v43 = vmax.f32 %v1022_v33, 0.0 }
 0x127   : > { %v925_v34 = vadd.f32 %v1538_v38, %v820_v29 }
 0x128   : > { %v1391_v44 = vpack.c.bf16 %v1090_v43, %v1089_v42  ;;  %v844_v43 = vadd.f32 %v2030_v17, %v2016_v62 }
 0x129   : > { %v1539_v45 = vpop.f32.mrb[24].mxu1  ;;  %v1026_v47 = vpop.f32.mrb[24].mxu0 }
 0x12a   : > { %1392 = vst [vmem:[%s2038_s21] sm:$0xff] %v1391_v44   ;;  %v1027_v49 = vadd.f32 %v1026_v47, %v922_v39  ;;  %v1540_v50 = vpop.f32.mrb[25].mxu1  ;;  %v1608_v51 = vpop.f32.mrb[25].mxu0 }
 0x12b   : > { %v1541_v54 = vadd.f32 %v1540_v50, %v1539_v45  ;;  %v1542_v55 = vpop.f32.mrb[26].mxu1  ;;  %v1029_v56 = vpop.f32.mrb[26].mxu0 }
 0x12c   : > { %v1030_v57 = vadd.f32 %v1029_v56, %v925_v34  ;;  %v1543_v59 = vpop.f32.mrb[27].mxu1  ;;  %v1609_v60 = vpop.f32.mrb[27].mxu0  ;;  %v1091_v3 = vmax.f32 %v1027_v49, 0.0  ;;  %v849_v56 = vadd.f32 %v1995_v25, %v2016_v62 }
 0x12d   : > { %v1544_v63 = vadd.f32 %v1543_v59, %v1542_v55  ;;  %v930_v0 = vadd.f32 %v1541_v54, %v825_v40 }
 0x12e   : > { %v1092_v5 = vmax.f32 %v1030_v57, 0.0 }
 0x12f   : > { %v933_v6 = vadd.f32 %v1544_v63, %v828_v61 }
 0x130   : > { %v1396_v7 = vpack.c.bf16 %v1092_v5, %v1091_v3 }
 0x131   : > { %v1545_v8 = vpop.f32.mrb[28].mxu1  ;;  %v1034_v9 = vpop.f32.mrb[28].mxu0 }
 0x132   : > { %1433 = vst [vmem:[%s2038_s21 + $0x8] sm:$0xff] %v1396_v7   ;;  %v1035_v46 = vadd.f32 %v1034_v9, %v930_v0  ;;  %v1546_v11 = vpop.f32.mrb[29].mxu1  ;;  %v1612_v12 = vpop.f32.mrb[29].mxu0  ;;  %v852_v0 = vadd.f32 %v1997_v30, %v2016_v62 }
 0x133   : > { %v1547_v14 = vadd.f32 %v1546_v11, %v1545_v8  ;;  %v1548_v15 = vpop.f32.mrb[30].mxu1  ;;  %v1037_v16 = vpop.f32.mrb[30].mxu0 }
 0x134   : > { %v1038_v52 = vadd.f32 %v1037_v16, %v933_v6  ;;  %v1549_v18 = vpop.f32.mrb[31].mxu1  ;;  %v1613_v19 = vpop.f32.mrb[31].mxu0  ;;  %v1093_v26 = vmax.f32 %v1035_v46, 0.0 }
 0x135   : > { %v1550_v21 = vadd.f32 %v1549_v18, %v1548_v15  ;;  %v938_v23 = vadd.f32 %v1547_v14, %v833_v13  ;;  %v857_v14 = vadd.f32 %v1999_v36, %v2016_v62 }
 0x136   : > { %v1094_v27 = vmax.f32 %v1038_v52, 0.0 }
 0x137   : > { %v941_v22 = vadd.f32 %v1550_v21, %v836_v20  ;;  %v860_v20 = vadd.f32 %v2001_v41, %v2016_v62 }
 0x138   : > { %v1401_v28 = vpack.c.bf16 %v1094_v27, %v1093_v26 }
 0x139   : > { %v1551_v31 = vpop.f32.mrb[32].mxu1  ;;  %v1042_v32 = vpop.f32.mrb[32].mxu0 }
 0x13a   : > { %1434 = vst [vmem:[%s2038_s21 + $0x10] sm:$0xff] %v1401_v28   ;;  %v1043_v58 = vadd.f32 %v1042_v32, %v938_v23  ;;  %v1552_v24 = vpop.f32.mrb[33].mxu1  ;;  %v1616_v33 = vpop.f32.mrb[33].mxu0 }
 0x13b   : > { %v1553_v37 = vadd.f32 %v1552_v24, %v1551_v31  ;;  %v1554_v29 = vpop.f32.mrb[34].mxu1  ;;  %v1045_v38 = vpop.f32.mrb[34].mxu0  ;;  %v865_v33 = vadd.f32 %v2005_v48, %v2016_v62 }
 0x13c   : > { %v1046_v2 = vadd.f32 %v1045_v38, %v941_v22  ;;  %v1555_v39 = vpop.f32.mrb[35].mxu1  ;;  %v1617_v42 = vpop.f32.mrb[35].mxu0  ;;  %v1095_v45 = vmax.f32 %v1043_v58, 0.0 }
 0x13d   : > { %v1556_v34 = vadd.f32 %v1555_v39, %v1554_v29  ;;  %v946_v44 = vadd.f32 %v1553_v37, %v841_v35  ;;  %v868_v39 = vadd.f32 %v2009_v53, %v2016_v62 }
 0x13e   : > { %v1096_v47 = vmax.f32 %v1046_v2, 0.0 }
 0x13f   : > { %v949_v49 = vadd.f32 %v1556_v34, %v844_v43 }
 0x140   : > { %v1406_v50 = vpack.c.bf16 %v1096_v47, %v1095_v45 }
 0x141   : > { %v1557_v51 = vpop.f32.mrb[36].mxu1  ;;  %v1050_v40 = vpop.f32.mrb[36].mxu0 }
 0x142   : > { %1435 = vst [vmem:[%s2038_s21 + $0x18] sm:$0xff] %v1406_v50   ;;  %v1051_v10 = vadd.f32 %v1050_v40, %v946_v44  ;;  %v1558_v54 = vpop.f32.mrb[37].mxu1  ;;  %v1620_v55 = vpop.f32.mrb[37].mxu0 }
 0x143   : > { %v1559_v57 = vadd.f32 %v1558_v54, %v1557_v51  ;;  %v1560_v59 = vpop.f32.mrb[38].mxu1  ;;  %v1053_v60 = vpop.f32.mrb[38].mxu0 }
 0x144   : > { %v1054_v17 = vadd.f32 %v1053_v60, %v949_v49  ;;  %v1561_v61 = vpop.f32.mrb[39].mxu1  ;;  %v1621_v63 = vpop.f32.mrb[39].mxu0  ;;  %v1097_v6 = vmax.f32 %v1051_v10, 0.0 }
 0x145   : > { %v1562_v3 = vadd.f32 %v1561_v61, %v1560_v59  ;;  %v954_v5 = vadd.f32 %v1559_v57, %v849_v56 }
 0x146   : > { %v1098_v7 = vmax.f32 %v1054_v17, 0.0 }
 0x147   : > { %v957_v8 = vadd.f32 %v1562_v3, %v852_v0 }
 0x148   : > { %v1411_v9 = vpack.c.bf16 %v1098_v7, %v1097_v6 }
 0x149   : > { %v1563_v46 = vpop.f32.mrb[40].mxu1  ;;  %v1058_v11 = vpop.f32.mrb[40].mxu0 }
 0x14a   : > { %1436 = vst [vmem:[%s2038_s21 + $0x20] sm:$0xff] %v1411_v9   ;;  %v1059_v25 = vadd.f32 %v1058_v11, %v954_v5  ;;  %v1564_v12 = vpop.f32.mrb[41].mxu1  ;;  %v1624_v13 = vpop.f32.mrb[41].mxu0 }
 0x14b   : > { %v1565_v15 = vadd.f32 %v1564_v12, %v1563_v46  ;;  %v1566_v16 = vpop.f32.mrb[42].mxu1  ;;  %v1061_v52 = vpop.f32.mrb[42].mxu0 }
 0x14c   : > { %v1062_v30 = vadd.f32 %v1061_v52, %v957_v8  ;;  %v1567_v18 = vpop.f32.mrb[43].mxu1  ;;  %v1625_v19 = vpop.f32.mrb[43].mxu0  ;;  %v1099_v26 = vmax.f32 %v1059_v25, 0.0 }
 0x14d   : > { %v1568_v21 = vadd.f32 %v1567_v18, %v1566_v16  ;;  %v962_v23 = vadd.f32 %v1565_v15, %v857_v14 }
 0x14e   : > { %v1100_v27 = vmax.f32 %v1062_v30, 0.0 }
 0x14f   : > { %v965_v22 = vadd.f32 %v1568_v21, %v860_v20 }
 0x150   : > { %v1416_v28 = vpack.c.bf16 %v1100_v27, %v1099_v26 }
 0x151   : > { %v1569_v31 = vpop.f32.mrb[44].mxu1  ;;  %v1066_v32 = vpop.f32.mrb[44].mxu0 }
 0x152   : > { %1437 = vst [vmem:[%s2038_s21 + $0x28] sm:$0xff] %v1416_v28   ;;  %v1067_v36 = vadd.f32 %v1066_v32, %v962_v23  ;;  %v1570_v58 = vpop.f32.mrb[45].mxu1  ;;  %v1628_v24 = vpop.f32.mrb[45].mxu0 }
 0x153   : > { %v1571_v35 = vadd.f32 %v1570_v58, %v1569_v31  ;;  %v1572_v37 = vpop.f32.mrb[46].mxu1  ;;  %v1069_v29 = vpop.f32.mrb[46].mxu0 }
 0x154   : > { %v1070_v41 = vadd.f32 %v1069_v29, %v965_v22  ;;  %v1573_v38 = vpop.f32.mrb[47].mxu1  ;;  %v1629_v2 = vpop.f32.mrb[47].mxu0  ;;  %v1101_v34 = vmax.f32 %v1067_v36, 0.0 }
 0x155   : > { %v1574_v42 = vadd.f32 %v1573_v38, %v1572_v37  ;;  %v970_v43 = vadd.f32 %v1571_v35, %v865_v33 }
 0x156   : > { %v1102_v44 = vmax.f32 %v1070_v41, 0.0 }
 0x157   : > { %v973_v45 = vadd.f32 %v1574_v42, %v868_v39 }
 0x158   : > { %v1421_v47 = vpack.c.bf16 %v1102_v44, %v1101_v34 }
 0x159   : > { %v1575_v49 = vpop.f32.mrb[48].mxu1  ;;  %v1074_v50 = vpop.f32.mrb[48].mxu0 }
 0x15a   : > { %1438 = vst [vmem:[%s2038_s21 + $0x30] sm:$0xff] %v1421_v47   ;;  %v1075_v48 = vadd.f32 %v1074_v50, %v970_v43  ;;  %v1576_v51 = vpop.f32.mrb[49].mxu1  ;;  %v1632_v40 = vpop.f32.mrb[49].mxu0 }
 0x15b   : > { %v1577_v10 = vadd.f32 %v1576_v51, %v1575_v49  ;;  %v1578_v54 = vpop.f32.mrb[50].mxu1  ;;  %v1077_v55 = vpop.f32.mrb[50].mxu0 }
 0x15c   : > { %v1078_v56 = vadd.f32 %v1077_v55, %v973_v45  ;;  %v1579_v57 = vpop.f32.mrb[51].mxu1  ;;  %v1633_v59 = vpop.f32.mrb[51].mxu0  ;;  %v1103_v60 = vmax.f32 %v1075_v48, 0.0 }
 0x15d   : > { %v1580_v53 = vadd.f32 %v1579_v57, %v1578_v54  ;;  %v978_v62 = vadd.f32 %v1577_v10, %v2019_v1 }
 0x15e   : > { %v1104_v17 = vmax.f32 %v1078_v56, 0.0 }
 0x15f   : > { %v981_v61 = vadd.f32 %v1580_v53, %v2024_v4 }
 0x160   : > { %v1426_v63 = vpack.c.bf16 %v1104_v17, %v1103_v60 }
 0x161   : > { %v1082_v0 = vpop.f32.mrb[52].mxu0 }
 0x162   : > { %1439 = vst [vmem:[%s2038_s21 + $0x38] sm:$0xff] %v1426_v63   ;;  %v1083_v3 = vadd.f32 %v1082_v0, %v978_v62  ;;  %v1636_v5 = vpop.f32.mrb[53].mxu0 }
 0x163   : > { %v1085_v6 = vpop.f32.mrb[54].mxu0 }
 0x164   : > { %v1086_v7 = vadd.f32 %v1085_v6, %v981_v61  ;;  %v1637_v8 = vpop.f32.mrb[55].mxu0  ;;  %v1105_v9 = vmax.f32 %v1083_v3, 0.0 }
 0x166   : > { %v1106_v46 = vmax.f32 %v1086_v7, 0.0 }
 0x168   : > { %v1431_v11 = vpack.c.bf16 %v1106_v46, %v1105_v9 }
 0x16a   : > { %1440 = vst [vmem:[%s2038_s21 + $0x40] sm:$0xff] %v1431_v11  }
 0x16b PF: > { %s13_s12 = sadd.s32 1, %s1771_s12  }
 0x16c   : > { %p10_p4 = scmp.ge.s32.totalorder %s13_s12, 4  }
 0x16e   :  { %12 = sbr.rel (!%p10_p4) target bundleno = 1 (0x1), region = 62 }

// kernel: classifier_forward.7
= control target key start
LH: loop header
LB: loop body
LE: loop exit
PB: predicated region body
PF: predicated region fallthrough
CT: control target
= control target key end

     0   :  { %10 = vsyncpa [#allocation4], 0  ;;  %s4855_s18 = smov 0   ;;  %s5303_s0 = inlined_call_operand.vmem [shape: bf16[2,18432], index: 0, kind: input, shape index: {}]   ;;  %s5304_s1 = inlined_call_operand.vmem [shape: bf16[18432,128], index: 1, kind: input, shape index: {}]   ;;  %s5305_s2 = inlined_call_operand.vmem [shape: f32[1,128], index: 2, kind: input, shape index: {}]   ;;  %s5306_s3 = inlined_call_operand.vmem [shape: f32[128,4], index: 3, kind: input, shape index: {}]   ;;  %s5307_s4 = inlined_call_operand.vmem [shape: f32[1,4], index: 4, kind: input, shape index: {}]   ;;  %s5308_s5 = inlined_call_operand.hbm [shape: f32[2,4], index: 5, kind: output, shape index: {}]  }
   0x1 LB: > { %s4861_s19 = sadd.s32 4294967295, %s4817_s18   ;;  %p3698_p0 = scmp.ge.s32.totalorder %s4817_s18, 1  ;;  %s4817_s18 = sphi %s4855_s18, %s16_s18  }
   0x2   : > { %p194_p1 = scmp.lt.s32.totalorder %s4817_s18, 5 }
   0x4   : > { %p195_p2 = pnand %p3698_p0, %p194_p1 }
   0x5   : > { %s221_s20 = smul.u32 (!%p195_p2), 36, %s4861_s19  ;;  %p3700_p5 = scmp.ne.s32.totalorder (!%p195_p2), %s4861_s19, 0 }
   0x6   : > { %198 = sbr.rel (%p195_p2) target bundleno = 785 (0x311), region = 40 }
   0x7   : > { %s226_s21 = smul.u32 (!%p195_p2), 576, %s4861_s19  ;;  %p222_p3 = scmp.lt.s32.totalorder (!%p195_p2), %s221_s20, 143 }
   0x9   : > { %p227_p4 = scmp.lt.s32.totalorder (!%p195_p2), %s226_s21, 2303 }
   0xd   : > { %s5310_s20 = smov (!%p222_p3, %s221_s20), 143  ;;  %s5312_s21 = smov (!%p227_p4, %s226_s21), 2303 }
   0xe   : > { %s4870_s24 = scalar_lea.vmem %s5303_s0, %s5310_s20  ;;  %s3699_s25 = sshll.u32 %s5312_s21, 2  ;;  %v4819_v0 = vmov (!%p3700_p5), 0.0  }
   0xf   : > { %s4875_s28 = scalar_lea.vmem %s5304_s1, %s3699_s25  ;;  %236 = sbr.rel (%p3700_p5) target bundleno = 22 (0x16), region = 44  ;;  %237 = vst [vmem:[#allocation2] sm:$0x3] (!%p3700_p5), %v4819_v0 }
  0x16 PF: > { %v4489_v1 = vld [vmem:[%s4875_s28 + $0x40] sm:$0xff]   ;;  %v4493_v5 = vld [vmem:[%s4875_s28 + $0x48] sm:$0xff]   ;;  %v4497_v9 = vld [vmem:[%s4875_s28 + $0x50] sm:$0xff]   ;;  %v829_v29 = vlaneseq  ;;  %v4820_v37 = vmov 1966171168   ;;  %p3990_p6 = scmp.ne.s32.totalorder %s4861_s19, 3 }
  0x17   : > { %v4490_v2 = vld [vmem:[%s4875_s28 + $0xc0] sm:$0xff]   ;;  %3997 = vmatprep.subr.bf16.mxu0 %v4489_v1  ;;  %v4494_v6 = vld [vmem:[%s4875_s28 + $0xc8] sm:$0xff]   ;;  %v4498_v10 = vld [vmem:[%s4875_s28 + $0xd0] sm:$0xff]   ;;  %v827_v38 = vunpack.c.l.s4 %v4820_v37  ;;  %vm4822_vm0 = vmmov (!%p3990_p6), 0   ;;  %vm3638_vm1 = vcmask (!%p3990_p6), 25600  }
  0x18   : > { %v4491_v3 = vld [vmem:[%s4875_s28] sm:$0xff]   ;;  %4019 = vmatprep.subr.bf16.mxu1 %v4490_v2  ;;  %v4495_v7 = vld [vmem:[%s4875_s28 + $0x8] sm:$0xff]   ;;  %v4499_v11 = vld [vmem:[%s4875_s28 + $0x10] sm:$0xff]   ;;  %v830_v34 = vshrl.u32 %v829_v29, 7 }
  0x19   : > { %v4492_v4 = vld [vmem:[%s4875_s28 + $0x80] sm:$0xff]   ;;  %3998 = vmatpush3.bf16.msra.mxu0 %v4491_v3  ;;  %v4496_v8 = vld [vmem:[%s4875_s28 + $0x88] sm:$0xff]   ;;  %v4500_v12 = vld [vmem:[%s4875_s28 + $0x90] sm:$0xff]   ;;  %v828_v41 = vunpack.c.0.s8 %v827_v38 }
  0x1a   : > { %4020 = vmatpush3.bf16.msra.mxu1 %v4492_v4  ;;  %3999 = vmatprep.subr.bf16.mxu0 %v4493_v5  ;;  %v4501_v13 = vld [vmem:[%s4875_s28 + $0x58] sm:$0xff]   ;;  %v4505_v17 = vld [vmem:[%s4875_s28 + $0x60] sm:$0xff]   ;;  %v4509_v21 = vld [vmem:[%s4875_s28 + $0x68] sm:$0xff]  }
  0x1b   : > { %4021 = vmatprep.subr.bf16.mxu1 %v4494_v6  ;;  %v4502_v14 = vld [vmem:[%s4875_s28 + $0xd8] sm:$0xff]   ;;  %v4506_v18 = vld [vmem:[%s4875_s28 + $0xe0] sm:$0xff]   ;;  %v4510_v22 = vld [vmem:[%s4875_s28 + $0xe8] sm:$0xff]   ;;  %v4913_v42 = vsub.s32 %v828_v41, %v830_v34 }
  0x1c   : > { %v4503_v15 = vld [vmem:[%s4875_s28 + $0x18] sm:$0xff]   ;;  %v4507_v19 = vld [vmem:[%s4875_s28 + $0x20] sm:$0xff]   ;;  %v4511_v23 = vld [vmem:[%s4875_s28 + $0x28] sm:$0xff]  }
  0x1d   : > { %4000 = vmatpush3.bf16.msra.mxu0 %v4495_v7  ;;  %v4504_v16 = vld [vmem:[%s4875_s28 + $0x98] sm:$0xff]   ;;  %v4508_v20 = vld [vmem:[%s4875_s28 + $0xa0] sm:$0xff]   ;;  %v4512_v24 = vld [vmem:[%s4875_s28 + $0xa8] sm:$0xff]  }
  0x1e   : > { %4022 = vmatpush3.bf16.msra.mxu1 %v4496_v8  ;;  %4001 = vmatprep.subr.bf16.mxu0 %v4497_v9  ;;  %v4513_v25 = vld [vmem:[%s4875_s28 + $0x70] sm:$0xff]   ;;  %v4517_v30 = vld [vmem:[%s4875_s28 + $0x78] sm:$0xff]   ;;  %v239_v35 = vld [vmem:[%s4870_s24] sm:$0xff] }
  0x1f   : > { %4023 = vmatprep.subr.bf16.mxu1 %v4498_v10  ;;  %v4514_v26 = vld [vmem:[%s4875_s28 + $0xf0] sm:$0xff]   ;;  %v4518_v31 = vld [vmem:[%s4875_s28 + $0xf8] sm:$0xff]   ;;  %v4522_v36 = vld [vmem:[%s4875_s28 + $0x140] sm:$0xff]   ;;  %v825_v40 = vcombine.high %v239_v35, %v239_v35  ;;  %v832_v43 = vrot.slane %v239_v35, %v4913_v42 }
  0x20   : > { %v4515_v27 = vld [vmem:[%s4875_s28 + $0x30] sm:$0xff]   ;;  %v4519_v32 = vld [vmem:[%s4875_s28 + $0x38] sm:$0xff]   ;;  %v4523_v39 = vld [vmem:[%s4875_s28 + $0x1c0] sm:$0xff]  }
  0x21   : > { %4002 = vmatpush3.bf16.msra.mxu0 %v4499_v11  ;;  %v4516_v28 = vld [vmem:[%s4875_s28 + $0xb0] sm:$0xff]   ;;  %v4520_v33 = vld [vmem:[%s4875_s28 + $0xb8] sm:$0xff]   ;;  %v4917_v44 = vrot.slane %v825_v40, %v4913_v42  ;;  %v840_v45 = vcombine.high %v832_v43, %v832_v43  ;;  %v848_v46 = vrot.slane %v832_v43, %v4913_v42  ;;  %v4524_v48 = vld [vmem:[%s4875_s28 + $0x100] sm:$0xff]  }
  0x22   : > { %4024 = vmatpush3.bf16.msra.mxu1 %v4500_v12  ;;  %4003 = vmatprep.subr.bf16.mxu0 %v4501_v13  ;;  %v4525_v50 = vld [vmem:[%s4875_s28 + $0x180] sm:$0xff]   ;;  %v4526_v53 = vld [vmem:[%s4875_s28 + $0x148] sm:$0xff]   ;;  %v4530_v59 = vld [vmem:[%s4875_s28 + $0x150] sm:$0xff]  }
  0x23   : > { %4025 = vmatprep.subr.bf16.mxu1 %v4502_v14  ;;  %v841_v47 = vcombine.high %v4917_v44, %v4917_v44  ;;  %v862_v49 = vrot.slane %v840_v45, %v4913_v42  ;;  %v870_v52 = vcombine.high %v848_v46, %v848_v46  ;;  %v4527_v55 = vld [vmem:[%s4875_s28 + $0x1c8] sm:$0xff]   ;;  %v4531_v60 = vld [vmem:[%s4875_s28 + $0x1d0] sm:$0xff]   ;;  %v4534_v63 = vld [vmem:[%s4875_s28 + $0x158] sm:$0xff]  }
  0x24   : > { %v4528_v56 = vld [vmem:[%s4875_s28 + $0x108] sm:$0xff]   ;;  %v4532_v61 = vld [vmem:[%s4875_s28 + $0x110] sm:$0xff]   ;;  %v4535_v0 = vld [vmem:[%s4875_s28 + $0x1d8] sm:$0xff]  }
  0x25   : > { %4004 = vmatpush3.bf16.msra.mxu0 %v4503_v15  ;;  %v869_v51 = vrot.slane %v841_v47, %v4913_v42  ;;  %2841 = vmatprep.mubr.bf16.mxu0 %v862_v49  ;;  %v872_v54 = vcombine.high %v862_v49, %v862_v49  ;;  %v4529_v58 = vld [vmem:[%s4875_s28 + $0x188] sm:$0xff]   ;;  %v4533_v62 = vld [vmem:[%s4875_s28 + $0x190] sm:$0xff]   ;;  %v4536_v1 = vld [vmem:[%s4875_s28 + $0x118] sm:$0xff]  }
  0x26   : > { %4026 = vmatpush3.bf16.msra.mxu1 %v4504_v16  ;;  %4005 = vmatprep.subr.bf16.mxu0 %v4505_v17  ;;  %v4537_v2 = vld [vmem:[%s4875_s28 + $0x198] sm:$0xff]   ;;  %v4538_v3 = vld [vmem:[%s4875_s28 + $0x160] sm:$0xff]   ;;  %v4542_v7 = vld [vmem:[%s4875_s28 + $0x168] sm:$0xff]  }
  0x27   : > { %4027 = vmatprep.subr.bf16.mxu1 %v4506_v18  ;;  %v873_v57 = vcombine.high %v869_v51, %v869_v51  ;;  %2881 = vmatprep.mubr.bf16.mxu1 %v872_v54  ;;  %v4539_v4 = vld [vmem:[%s4875_s28 + $0x1e0] sm:$0xff]   ;;  %v4543_v8 = vld [vmem:[%s4875_s28 + $0x1e8] sm:$0xff]   ;;  %v4546_v11 = vld [vmem:[%s4875_s28 + $0x170] sm:$0xff]  }
  0x28   : > { %v4540_v5 = vld [vmem:[%s4875_s28 + $0x120] sm:$0xff]   ;;  %v4544_v9 = vld [vmem:[%s4875_s28 + $0x128] sm:$0xff]   ;;  %v4547_v12 = vld [vmem:[%s4875_s28 + $0x1f0] sm:$0xff]  }
  0x29   : > { %4006 = vmatpush3.bf16.msra.mxu0 %v4507_v19  ;;  %v4541_v6 = vld [vmem:[%s4875_s28 + $0x1a0] sm:$0xff]   ;;  %v4545_v10 = vld [vmem:[%s4875_s28 + $0x1a8] sm:$0xff]   ;;  %v4548_v13 = vld [vmem:[%s4875_s28 + $0x130] sm:$0xff]   ;;  %v855_v19 = vrot.slane %v4917_v44, %v4913_v42 }
  0x2a   : > { %4028 = vmatpush3.bf16.msra.mxu1 %v4508_v20  ;;  %4007 = vmatprep.subr.bf16.mxu0 %v4509_v21  ;;  %v4549_v14 = vld [vmem:[%s4875_s28 + $0x1b0] sm:$0xff]   ;;  %v4550_v15 = vld [vmem:[%s4875_s28 + $0x178] sm:$0xff]   ;;  %v4554_v20 = vld [vmem:[%s4875_s28 + $0x240] sm:$0xff]  }
  0x2b   : > { %4029 = vmatprep.subr.bf16.mxu1 %v4510_v22  ;;  %v4551_v16 = vld [vmem:[%s4875_s28 + $0x1f8] sm:$0xff]   ;;  %v4555_v21 = vld [vmem:[%s4875_s28 + $0x2c0] sm:$0xff]   ;;  %v4562_v29 = vld [vmem:[%s4875_s28 + $0x250] sm:$0xff]  }
  0x2c   : > { %v4552_v17 = vld [vmem:[%s4875_s28 + $0x138] sm:$0xff]   ;;  %v4556_v22 = vld [vmem:[%s4875_s28 + $0x200] sm:$0xff]   ;;  %v4574_v41 = vld [vmem:[%s4875_s28 + $0x268] sm:$0xff]  }
  0x2d   : > { %4008 = vmatpush3.bf16.msra.mxu0 %v4511_v23  ;;  %v4553_v18 = vld [vmem:[%s4875_s28 + $0x1b8] sm:$0xff]   ;;  %v4557_v23 = vld [vmem:[%s4875_s28 + $0x280] sm:$0xff]   ;;  %v4575_v43 = vld [vmem:[%s4875_s28 + $0x2e8] sm:$0xff]  }
  0x2e   : > { %4030 = vmatpush3.bf16.msra.mxu1 %v4512_v24  ;;  %4009 = vmatprep.subr.bf16.mxu0 %v4513_v25  ;;  %v871_v24 = vcombine.high %v855_v19, %v855_v19  ;;  %v4558_v25 = vld [vmem:[%s4875_s28 + $0x248] sm:$0xff]   ;;  %v4567_v34 = vld [vmem:[%s4875_s28 + $0x2d8] sm:$0xff]   ;;  %v4570_v37 = vld [vmem:[%s4875_s28 + $0x260] sm:$0xff]  }
  0x2f   : > { %4031 = vmatprep.subr.bf16.mxu1 %v4514_v26  ;;  %v4559_v26 = vld [vmem:[%s4875_s28 + $0x2c8] sm:$0xff]   ;;  %v4568_v35 = vld [vmem:[%s4875_s28 + $0x218] sm:$0xff]   ;;  %v4571_v38 = vld [vmem:[%s4875_s28 + $0x2e0] sm:$0xff]  }
  0x30   : > { %v4573_v40 = vld [vmem:[%s4875_s28 + $0x2a0] sm:$0xff]   ;;  %v4576_v44 = vld [vmem:[%s4875_s28 + $0x228] sm:$0xff]  }
  0x31   : > { %4010 = vmatpush3.bf16.msra.mxu0 %v4515_v27  ;;  %v4560_v27 = vld [vmem:[%s4875_s28 + $0x208] sm:$0xff]  }
  0x32   : > { %4032 = vmatpush3.bf16.msra.mxu1 %v4516_v28  ;;  %4011 = vmatprep.subr.bf16.mxu0 %v4517_v30  ;;  %v4561_v28 = vld [vmem:[%s4875_s28 + $0x288] sm:$0xff]   ;;  %v4563_v30 = vld [vmem:[%s4875_s28 + $0x2d0] sm:$0xff]  }
  0x33   : > { %4033 = vmatprep.subr.bf16.mxu1 %v4518_v31  ;;  %v4564_v31 = vld [vmem:[%s4875_s28 + $0x210] sm:$0xff]   ;;  %v4577_v45 = vld [vmem:[%s4875_s28 + $0x2a8] sm:$0xff]  }
  0x34   : > { %v240_v47 = vld [vmem:[%s4870_s24 + $0x8] sm:$0xff] }
  0x35   : > { %4012 = vmatpush3.bf16.msra.mxu0 %v4519_v32  ;;  %v4565_v32 = vld [vmem:[%s4875_s28 + $0x290] sm:$0xff]   ;;  %v881_v49 = vrot.slane %v240_v47, %v4913_v42 }
  0x36   : > { %4034 = vmatpush3.bf16.msra.mxu1 %v4520_v33  ;;  %4041 = vmatprep.subr.bf16.mxu0 %v4522_v36  ;;  %v4566_v33 = vld [vmem:[%s4875_s28 + $0x258] sm:$0xff]  }
  0x37   : > { %4063 = vmatprep.subr.bf16.mxu1 %v4523_v39  ;;  %v4569_v36 = vld [vmem:[%s4875_s28 + $0x298] sm:$0xff]   ;;  %v4572_v39 = vld [vmem:[%s4875_s28 + $0x220] sm:$0xff]  }
  0x38   : > { %2842 = vmatmul.mubr.bf16.vlgmr.msra.gmra.mrb[0].mxu0 %v848_v46  ;;  %v4578_v46 = vld [vmem:[%s4875_s28 + $0x270] sm:$0xff]  }
  0x39   : > { %4042 = vmatpush3.bf16.msra.mxu0 %v4524_v48  ;;  %2882 = vmatmul.mubr.bf16.vlgmr.msra.gmra.mrb[0].mxu1 %v870_v52  ;;  %v4579_v48 = vld [vmem:[%s4875_s28 + $0x2f0] sm:$0xff]  }
  0x3a   : > { %4043 = vmatprep.subr.bf16.mxu0 %v4526_v53  ;;  %4064 = vmatpush3.bf16.msra.mxu1 %v4525_v50  ;;  %v874_v50 = vcombine.high %v240_v47, %v240_v47  ;;  %v4581_v52 = vld [vmem:[%s4875_s28 + $0x2b0] sm:$0xff]   ;;  %v889_v53 = vcombine.high %v881_v49, %v881_v49 }
  0x3b   : > { %2921 = vmatprep.mubr.bf16.mxu0 %v869_v51  ;;  %4065 = vmatprep.subr.bf16.mxu1 %v4527_v55  ;;  %v4580_v51 = vld [vmem:[%s4875_s28 + $0x230] sm:$0xff]   ;;  %v4582_v55 = vld [vmem:[%s4875_s28 + $0x278] sm:$0xff]  }
  0x3c   : > { %2961 = vmatprep.mubr.bf16.mxu1 %v873_v57  ;;  %v4987_v54 = vrot.slane %v874_v50, %v4913_v42  ;;  %v911_v57 = vrot.slane %v889_v53, %v4913_v42  ;;  %v4629_v47 = vld [vmem:[%s4875_s28 + $0x410] sm:$0xff]   ;;  %v4632_v50 = vld [vmem:[%s4875_s28 + $0x4d8] sm:$0xff]   ;;  %v4635_v53 = vld [vmem:[%s4875_s28 + $0x460] sm:$0xff]  }
  0x3d   : > { %4044 = vmatpush3.bf16.msra.mxu0 %v4528_v56  ;;  %v4583_v56 = vld [vmem:[%s4875_s28 + $0x2f8] sm:$0xff]  }
  0x3e   : > { %4045 = vmatprep.subr.bf16.mxu0 %v4530_v59  ;;  %4066 = vmatpush3.bf16.msra.mxu1 %v4529_v58  ;;  %v890_v58 = vcombine.high %v4987_v54, %v4987_v54  ;;  %v4584_v59 = vld [vmem:[%s4875_s28 + $0x238] sm:$0xff]  }
  0x3f   : > { %4067 = vmatprep.subr.bf16.mxu1 %v4531_v60  ;;  %v4585_v60 = vld [vmem:[%s4875_s28 + $0x2b8] sm:$0xff]  }
  0x41   : > { %4046 = vmatpush3.bf16.msra.mxu0 %v4532_v61  ;;  %v921_v61 = vcombine.high %v911_v57, %v911_v57 }
  0x42   : > { %4047 = vmatprep.subr.bf16.mxu0 %v4534_v63  ;;  %4068 = vmatpush3.bf16.msra.mxu1 %v4533_v62  ;;  %v897_v62 = vrot.slane %v881_v49, %v4913_v42  ;;  %v4586_v63 = vld [vmem:[%s4875_s28 + $0x340] sm:$0xff]   ;;  %v4631_v49 = vld [vmem:[%s4875_s28 + $0x458] sm:$0xff]  }
  0x43   : > { %4069 = vmatprep.subr.bf16.mxu1 %v4535_v0  ;;  %v4587_v0 = vld [vmem:[%s4875_s28 + $0x3c0] sm:$0xff]  }
  0x45   : > { %4048 = vmatpush3.bf16.msra.mxu0 %v4536_v1  ;;  %v918_v1 = vrot.slane %v890_v58, %v4913_v42  ;;  %v4640_v58 = vld [vmem:[%s4875_s28 + $0x4e8] sm:$0xff]  }
  0x46   : > { %4049 = vmatprep.subr.bf16.mxu0 %v4538_v3  ;;  %4070 = vmatpush3.bf16.msra.mxu1 %v4537_v2  ;;  %v4588_v2 = vld [vmem:[%s4875_s28 + $0x300] sm:$0xff]  }
  0x47   : > { %4071 = vmatprep.subr.bf16.mxu1 %v4539_v4  ;;  %v4589_v3 = vld [vmem:[%s4875_s28 + $0x380] sm:$0xff]   ;;  %v919_v4 = vcombine.high %v897_v62, %v897_v62 }
  0x49   : > { %4050 = vmatpush3.bf16.msra.mxu0 %v4540_v5  ;;  %v4590_v5 = vld [vmem:[%s4875_s28 + $0x348] sm:$0xff]  }
  0x4a   : > { %4051 = vmatprep.subr.bf16.mxu0 %v4542_v7  ;;  %4072 = vmatpush3.bf16.msra.mxu1 %v4541_v6  ;;  %v4591_v6 = vld [vmem:[%s4875_s28 + $0x3c8] sm:$0xff]   ;;  %v922_v7 = vcombine.high %v918_v1, %v918_v1 }
  0x4b   : > { %4073 = vmatprep.subr.bf16.mxu1 %v4543_v8  ;;  %v4592_v8 = vld [vmem:[%s4875_s28 + $0x308] sm:$0xff]  }
  0x4d   : > { %4052 = vmatpush3.bf16.msra.mxu0 %v4544_v9  ;;  %v4593_v9 = vld [vmem:[%s4875_s28 + $0x388] sm:$0xff]  }
  0x4e   : > { %4053 = vmatprep.subr.bf16.mxu0 %v4546_v11  ;;  %4074 = vmatpush3.bf16.msra.mxu1 %v4545_v10  ;;  %v4594_v10 = vld [vmem:[%s4875_s28 + $0x350] sm:$0xff]  }
  0x4f   : > { %4075 = vmatprep.subr.bf16.mxu1 %v4547_v12  ;;  %v4595_v11 = vld [vmem:[%s4875_s28 + $0x3d0] sm:$0xff]  }
  0x50   : > { %v4596_v12 = vld [vmem:[%s4875_s28 + $0x310] sm:$0xff]  }
  0x51   : > { %4054 = vmatpush3.bf16.msra.mxu0 %v4548_v13  ;;  %v4597_v13 = vld [vmem:[%s4875_s28 + $0x390] sm:$0xff]  }
  0x52   : > { %4055 = vmatprep.subr.bf16.mxu0 %v4550_v15  ;;  %4076 = vmatpush3.bf16.msra.mxu1 %v4549_v14  ;;  %v4598_v14 = vld [vmem:[%s4875_s28 + $0x358] sm:$0xff]  }
  0x53   : > { %4077 = vmatprep.subr.bf16.mxu1 %v4551_v16  ;;  %v4599_v15 = vld [vmem:[%s4875_s28 + $0x3d8] sm:$0xff]  }
  0x54   : > { %v4600_v16 = vld [vmem:[%s4875_s28 + $0x318] sm:$0xff]  }
  0x55   : > { %4056 = vmatpush3.bf16.msra.mxu0 %v4552_v17  ;;  %v4601_v17 = vld [vmem:[%s4875_s28 + $0x398] sm:$0xff]  }
  0x56   : > { %4085 = vmatprep.subr.bf16.mxu0 %v4554_v20  ;;  %4078 = vmatpush3.bf16.msra.mxu1 %v4553_v18  ;;  %v4602_v18 = vld [vmem:[%s4875_s28 + $0x360] sm:$0xff]  }
  0x57   : > { %4107 = vmatprep.subr.bf16.mxu1 %v4555_v21  ;;  %v4604_v20 = vld [vmem:[%s4875_s28 + $0x320] sm:$0xff]  }
  0x58   : > { %2922 = vmatmul.mubr.bf16.vlgmr.msra.gmra.mrb[4].mxu0 %v855_v19  ;;  %v4603_v19 = vld [vmem:[%s4875_s28 + $0x3e0] sm:$0xff]  }
  0x59   : > { %4086 = vmatpush3.bf16.msra.mxu0 %v4556_v22  ;;  %2962 = vmatmul.mubr.bf16.vlgmr.msra.gmra.mrb[4].mxu1 %v871_v24  ;;  %v4605_v21 = vld [vmem:[%s4875_s28 + $0x3a0] sm:$0xff]   ;;  %v4606_v22 = vld [vmem:[%s4875_s28 + $0x368] sm:$0xff]  }
  0x5a   : > { %4087 = vmatprep.subr.bf16.mxu0 %v4558_v25  ;;  %4108 = vmatpush3.bf16.msra.mxu1 %v4557_v23  ;;  %v4607_v23 = vld [vmem:[%s4875_s28 + $0x3e8] sm:$0xff]  }
  0x5b   : > { %4109 = vmatprep.subr.bf16.mxu1 %v4559_v26  ;;  %3001 = vmatprep.mubr.bf16.mxu0 %v911_v57  ;;  %v4608_v24 = vld [vmem:[%s4875_s28 + $0x328] sm:$0xff]   ;;  %v4610_v26 = vld [vmem:[%s4875_s28 + $0x370] sm:$0xff]  }
  0x5c   : > { %3041 = vmatprep.mubr.bf16.mxu1 %v921_v61  ;;  %v4609_v25 = vld [vmem:[%s4875_s28 + $0x3a8] sm:$0xff]   ;;  %v4643_v61 = vld [vmem:[%s4875_s28 + $0x470] sm:$0xff]  }
  0x5d   : > { %4088 = vmatpush3.bf16.msra.mxu0 %v4560_v27  ;;  %v4611_v27 = vld [vmem:[%s4875_s28 + $0x3f0] sm:$0xff]   ;;  %v4639_v57 = vld [vmem:[%s4875_s28 + $0x468] sm:$0xff]  }
  0x5e   : > { %4089 = vmatprep.subr.bf16.mxu0 %v4562_v29  ;;  %4110 = vmatpush3.bf16.msra.mxu1 %v4561_v28  ;;  %v4612_v28 = vld [vmem:[%s4875_s28 + $0x330] sm:$0xff]  }
  0x5f   : > { %4111 = vmatprep.subr.bf16.mxu1 %v4563_v30  ;;  %v4613_v29 = vld [vmem:[%s4875_s28 + $0x3b0] sm:$0xff]   ;;  %v4614_v30 = vld [vmem:[%s4875_s28 + $0x378] sm:$0xff]  }
  0x61   : > { %4090 = vmatpush3.bf16.msra.mxu0 %v4564_v31  ;;  %v4615_v31 = vld [vmem:[%s4875_s28 + $0x3f8] sm:$0xff]  }
  0x62   : > { %4091 = vmatprep.subr.bf16.mxu0 %v4566_v33  ;;  %4112 = vmatpush3.bf16.msra.mxu1 %v4565_v32  ;;  %v4616_v32 = vld [vmem:[%s4875_s28 + $0x338] sm:$0xff]  }
  0x63   : > { %4113 = vmatprep.subr.bf16.mxu1 %v4567_v34  ;;  %v4617_v33 = vld [vmem:[%s4875_s28 + $0x3b8] sm:$0xff]   ;;  %v904_v34 = vrot.slane %v4987_v54, %v4913_v42  ;;  %v4636_v54 = vld [vmem:[%s4875_s28 + $0x4e0] sm:$0xff]  }
  0x65   : > { %4092 = vmatpush3.bf16.msra.mxu0 %v4568_v35  ;;  %v4619_v35 = vld [vmem:[%s4875_s28 + $0x440] sm:$0xff]  }
  0x66   : > { %4093 = vmatprep.subr.bf16.mxu0 %v4570_v37  ;;  %4114 = vmatpush3.bf16.msra.mxu1 %v4569_v36  ;;  %v4620_v36 = vld [vmem:[%s4875_s28 + $0x4c0] sm:$0xff]  }
  0x67   : > { %4115 = vmatprep.subr.bf16.mxu1 %v4571_v38  ;;  %v4621_v37 = vld [vmem:[%s4875_s28 + $0x400] sm:$0xff]  }
  0x68   : > { %v4622_v38 = vld [vmem:[%s4875_s28 + $0x480] sm:$0xff]  }
  0x69   : > { %4094 = vmatpush3.bf16.msra.mxu0 %v4572_v39  ;;  %v920_v39 = vcombine.high %v904_v34, %v904_v34 }
  0x6a   : > { %4095 = vmatprep.subr.bf16.mxu0 %v4574_v41  ;;  %4116 = vmatpush3.bf16.msra.mxu1 %v4573_v40  ;;  %v4623_v40 = vld [vmem:[%s4875_s28 + $0x448] sm:$0xff]  }
  0x6b   : > { %4117 = vmatprep.subr.bf16.mxu1 %v4575_v43  ;;  %v4624_v41 = vld [vmem:[%s4875_s28 + $0x4c8] sm:$0xff]  }
  0x6c   : > { %v4625_v43 = vld [vmem:[%s4875_s28 + $0x408] sm:$0xff]  }
  0x6d   : > { %4096 = vmatpush3.bf16.msra.mxu0 %v4576_v44  ;;  %v4626_v44 = vld [vmem:[%s4875_s28 + $0x488] sm:$0xff]  }
  0x6e   : > { %4097 = vmatprep.subr.bf16.mxu0 %v4578_v46  ;;  %4118 = vmatpush3.bf16.msra.mxu1 %v4577_v45  ;;  %v4627_v45 = vld [vmem:[%s4875_s28 + $0x450] sm:$0xff]  }
  0x6f   : > { %4119 = vmatprep.subr.bf16.mxu1 %v4579_v48  ;;  %v4628_v46 = vld [vmem:[%s4875_s28 + $0x4d0] sm:$0xff]  }
  0x70   : > { %v4630_v48 = vld [vmem:[%s4875_s28 + $0x490] sm:$0xff]  }
  0x71   : > { %4098 = vmatpush3.bf16.msra.mxu0 %v4580_v51  ;;  %v4633_v51 = vld [vmem:[%s4875_s28 + $0x418] sm:$0xff]  }
  0x72   : > { %4099 = vmatprep.subr.bf16.mxu0 %v4582_v55  ;;  %4120 = vmatpush3.bf16.msra.mxu1 %v4581_v52  ;;  %v4634_v52 = vld [vmem:[%s4875_s28 + $0x498] sm:$0xff]   ;;  %v4637_v55 = vld [vmem:[%s4875_s28 + $0x420] sm:$0xff]  }
  0x73   : > { %4121 = vmatprep.subr.bf16.mxu1 %v4583_v56  ;;  %v4638_v56 = vld [vmem:[%s4875_s28 + $0x4a0] sm:$0xff]  }
  0x75   : > { %4100 = vmatpush3.bf16.msra.mxu0 %v4584_v59  ;;  %v4641_v59 = vld [vmem:[%s4875_s28 + $0x428] sm:$0xff]  }
  0x76   : > { %4129 = vmatprep.subr.bf16.mxu0 %v4586_v63  ;;  %4122 = vmatpush3.bf16.msra.mxu1 %v4585_v60  ;;  %v4642_v60 = vld [vmem:[%s4875_s28 + $0x4a8] sm:$0xff]   ;;  %v4644_v63 = vld [vmem:[%s4875_s28 + $0x4f0] sm:$0xff]  }
  0x77   : > { %4151 = vmatprep.subr.bf16.mxu1 %v4587_v0 }
  0x78   : > { %3002 = vmatmul.mubr.bf16.vlgmr.msra.gmra.mrb[8].mxu0 %v897_v62  ;;  %v241_v62 = vld [vmem:[%s4870_s24 + $0x10] sm:$0xff] }
  0x79   : > { %4130 = vmatpush3.bf16.msra.mxu0 %v4588_v2  ;;  %3081 = vmatprep.mubr.bf16.mxu0 %v918_v1  ;;  %v930_v0 = vrot.slane %v241_v62, %v4913_v42  ;;  %v923_v1 = vcombine.high %v241_v62, %v241_v62  ;;  %v4645_v2 = vld [vmem:[%s4875_s28 + $0x430] sm:$0xff]  }
  0x7a   : > { %3042 = vmatmul.mubr.bf16.vlgmr.msra.gmra.mrb[8].mxu1 %v919_v4  ;;  %4131 = vmatprep.subr.bf16.mxu0 %v4590_v5  ;;  %v4694_v62 = vld [vmem:[%s4875_s28 + $0x610] sm:$0xff]  }
  0x7b   : > { %4152 = vmatpush3.bf16.msra.mxu1 %v4589_v3  ;;  %3121 = vmatprep.mubr.bf16.mxu1 %v922_v7  ;;  %v4646_v3 = vld [vmem:[%s4875_s28 + $0x4b0] sm:$0xff]   ;;  %v938_v4 = vcombine.high %v930_v0, %v930_v0  ;;  %v5063_v5 = vrot.slane %v923_v1, %v4913_v42  ;;  %v4648_v7 = vld [vmem:[%s4875_s28 + $0x4f8] sm:$0xff]  }
  0x7c   : > { %4153 = vmatprep.subr.bf16.mxu1 %v4591_v6  ;;  %v4647_v6 = vld [vmem:[%s4875_s28 + $0x478] sm:$0xff]  }
  0x7d   : > { %4132 = vmatpush3.bf16.msra.mxu0 %v4592_v8  ;;  %v960_v8 = vrot.slane %v938_v4, %v4913_v42  ;;  %v4697_v1 = vld [vmem:[%s4875_s28 + $0x6d8] sm:$0xff]   ;;  %v4700_v4 = vld [vmem:[%s4875_s28 + $0x660] sm:$0xff]  }
  0x7e   : > { %4133 = vmatprep.subr.bf16.mxu0 %v4594_v10  ;;  %v4649_v10 = vld [vmem:[%s4875_s28 + $0x438] sm:$0xff]  }
  0x7f   : > { %4154 = vmatpush3.bf16.msra.mxu1 %v4593_v9  ;;  %v939_v9 = vcombine.high %v5063_v5, %v5063_v5 }
  0x80   : > { %4155 = vmatprep.subr.bf16.mxu1 %v4595_v11  ;;  %v4650_v11 = vld [vmem:[%s4875_s28 + $0x4b8] sm:$0xff]  }
  0x81   : > { %4134 = vmatpush3.bf16.msra.mxu0 %v4596_v12  ;;  %v970_v12 = vcombine.high %v960_v8, %v960_v8 }
  0x82   : > { %4135 = vmatprep.subr.bf16.mxu0 %v4598_v14  ;;  %v4651_v14 = vld [vmem:[%s4875_s28 + $0x540] sm:$0xff]  }
  0x83   : > { %4156 = vmatpush3.bf16.msra.mxu1 %v4597_v13  ;;  %v946_v13 = vrot.slane %v930_v0, %v4913_v42  ;;  %v4696_v0 = vld [vmem:[%s4875_s28 + $0x658] sm:$0xff]  }
  0x84   : > { %4157 = vmatprep.subr.bf16.mxu1 %v4599_v15  ;;  %v4652_v15 = vld [vmem:[%s4875_s28 + $0x5c0] sm:$0xff]  }
  0x85   : > { %4136 = vmatpush3.bf16.msra.mxu0 %v4600_v16  ;;  %v967_v16 = vrot.slane %v939_v9, %v4913_v42  ;;  %v4705_v9 = vld [vmem:[%s4875_s28 + $0x6e8] sm:$0xff]  }
  0x86   : > { %4137 = vmatprep.subr.bf16.mxu0 %v4602_v18  ;;  %v4654_v18 = vld [vmem:[%s4875_s28 + $0x580] sm:$0xff]  }
  0x87   : > { %4158 = vmatpush3.bf16.msra.mxu1 %v4601_v17  ;;  %v4653_v17 = vld [vmem:[%s4875_s28 + $0x500] sm:$0xff]  }
  0x88   : > { %4159 = vmatprep.subr.bf16.mxu1 %v4603_v19  ;;  %v968_v19 = vcombine.high %v946_v13, %v946_v13 }
  0x89   : > { %4138 = vmatpush3.bf16.msra.mxu0 %v4604_v20  ;;  %v4655_v20 = vld [vmem:[%s4875_s28 + $0x548] sm:$0xff]  }
  0x8a   : > { %4139 = vmatprep.subr.bf16.mxu0 %v4606_v22  ;;  %v971_v22 = vcombine.high %v967_v16, %v967_v16 }
  0x8b   : > { %4160 = vmatpush3.bf16.msra.mxu1 %v4605_v21  ;;  %v4656_v21 = vld [vmem:[%s4875_s28 + $0x5c8] sm:$0xff]  }
  0x8c   : > { %4161 = vmatprep.subr.bf16.mxu1 %v4607_v23  ;;  %v4657_v23 = vld [vmem:[%s4875_s28 + $0x508] sm:$0xff]  }
  0x8d   : > { %4140 = vmatpush3.bf16.msra.mxu0 %v4608_v24  ;;  %v4658_v24 = vld [vmem:[%s4875_s28 + $0x588] sm:$0xff]  }
  0x8e   : > { %4141 = vmatprep.subr.bf16.mxu0 %v4610_v26  ;;  %v4660_v26 = vld [vmem:[%s4875_s28 + $0x5d0] sm:$0xff]  }
  0x8f   : > { %4162 = vmatpush3.bf16.msra.mxu1 %v4609_v25  ;;  %v4659_v25 = vld [vmem:[%s4875_s28 + $0x550] sm:$0xff]  }
  0x90   : > { %4163 = vmatprep.subr.bf16.mxu1 %v4611_v27  ;;  %v4661_v27 = vld [vmem:[%s4875_s28 + $0x510] sm:$0xff]  }
  0x91   : > { %4142 = vmatpush3.bf16.msra.mxu0 %v4612_v28  ;;  %v4662_v28 = vld [vmem:[%s4875_s28 + $0x590] sm:$0xff]  }
  0x92   : > { %4143 = vmatprep.subr.bf16.mxu0 %v4614_v30  ;;  %v4664_v30 = vld [vmem:[%s4875_s28 + $0x5d8] sm:$0xff]  }
  0x93   : > { %4164 = vmatpush3.bf16.msra.mxu1 %v4613_v29  ;;  %v4663_v29 = vld [vmem:[%s4875_s28 + $0x558] sm:$0xff]  }
  0x94   : > { %4165 = vmatprep.subr.bf16.mxu1 %v4615_v31  ;;  %v4665_v31 = vld [vmem:[%s4875_s28 + $0x518] sm:$0xff]  }
  0x95   : > { %4144 = vmatpush3.bf16.msra.mxu0 %v4616_v32  ;;  %v4666_v32 = vld [vmem:[%s4875_s28 + $0x598] sm:$0xff]  }
  0x96   : > { %4173 = vmatprep.subr.bf16.mxu0 %v4619_v35  ;;  %v4669_v35 = vld [vmem:[%s4875_s28 + $0x520] sm:$0xff]  }
  0x97   : > { %4166 = vmatpush3.bf16.msra.mxu1 %v4617_v33  ;;  %v4667_v33 = vld [vmem:[%s4875_s28 + $0x560] sm:$0xff]  }
  0x98   : > { %3082 = vmatmul.mubr.bf16.vlgmr.msra.gmra.mrb[12].mxu0 %v904_v34  ;;  %4195 = vmatprep.subr.bf16.mxu1 %v4620_v36  ;;  %v4668_v34 = vld [vmem:[%s4875_s28 + $0x5e0] sm:$0xff]  }
  0x99   : > { %4174 = vmatpush3.bf16.msra.mxu0 %v4621_v37  ;;  %3161 = vmatprep.mubr.bf16.mxu0 %v960_v8  ;;  %v4670_v36 = vld [vmem:[%s4875_s28 + $0x5a0] sm:$0xff]   ;;  %v4671_v37 = vld [vmem:[%s4875_s28 + $0x568] sm:$0xff]  }
  0x9a   : > { %3122 = vmatmul.mubr.bf16.vlgmr.msra.gmra.mrb[12].mxu1 %v920_v39  ;;  %4175 = vmatprep.subr.bf16.mxu0 %v4623_v40  ;;  %v4673_v39 = vld [vmem:[%s4875_s28 + $0x528] sm:$0xff]  }
  0x9b   : > { %4196 = vmatpush3.bf16.msra.mxu1 %v4622_v38  ;;  %3201 = vmatprep.mubr.bf16.mxu1 %v970_v12  ;;  %v4672_v38 = vld [vmem:[%s4875_s28 + $0x5e8] sm:$0xff]   ;;  %v4708_v12 = vld [vmem:[%s4875_s28 + $0x670] sm:$0xff]  }
  0x9c   : > { %4197 = vmatprep.subr.bf16.mxu1 %v4624_v41  ;;  %v4674_v40 = vld [vmem:[%s4875_s28 + $0x5a8] sm:$0xff]   ;;  %v4675_v41 = vld [vmem:[%s4875_s28 + $0x570] sm:$0xff]  }
  0x9d   : > { %4176 = vmatpush3.bf16.msra.mxu0 %v4625_v43  ;;  %v4676_v43 = vld [vmem:[%s4875_s28 + $0x5f0] sm:$0xff]   ;;  %v4704_v8 = vld [vmem:[%s4875_s28 + $0x668] sm:$0xff]  }
  0x9e   : > { %4177 = vmatprep.subr.bf16.mxu0 %v4627_v45  ;;  %v4678_v45 = vld [vmem:[%s4875_s28 + $0x5b0] sm:$0xff]  }
  0x9f   : > { %4198 = vmatpush3.bf16.msra.mxu1 %v4626_v44  ;;  %v4677_v44 = vld [vmem:[%s4875_s28 + $0x530] sm:$0xff]  }
  0xa0   : > { %4199 = vmatprep.subr.bf16.mxu1 %v4628_v46  ;;  %v4679_v46 = vld [vmem:[%s4875_s28 + $0x578] sm:$0xff]  }
  0xa1   : > { %4178 = vmatpush3.bf16.msra.mxu0 %v4629_v47  ;;  %v4680_v47 = vld [vmem:[%s4875_s28 + $0x5f8] sm:$0xff]  }
  0xa2   : > { %4179 = vmatprep.subr.bf16.mxu0 %v4631_v49  ;;  %v4682_v49 = vld [vmem:[%s4875_s28 + $0x5b8] sm:$0xff]  }
  0xa3   : > { %4200 = vmatpush3.bf16.msra.mxu1 %v4630_v48  ;;  %v4681_v48 = vld [vmem:[%s4875_s28 + $0x538] sm:$0xff]  }
  0xa4   : > { %4201 = vmatprep.subr.bf16.mxu1 %v4632_v50  ;;  %v953_v50 = vrot.slane %v5063_v5, %v4913_v42  ;;  %v4701_v5 = vld [vmem:[%s4875_s28 + $0x6e0] sm:$0xff]  }
  0xa5   : > { %4180 = vmatpush3.bf16.msra.mxu0 %v4633_v51  ;;  %v4684_v51 = vld [vmem:[%s4875_s28 + $0x640] sm:$0xff]  }
  0xa6   : > { %4181 = vmatprep.subr.bf16.mxu0 %v4635_v53  ;;  %v4686_v53 = vld [vmem:[%s4875_s28 + $0x600] sm:$0xff]  }
  0xa7   : > { %4202 = vmatpush3.bf16.msra.mxu1 %v4634_v52  ;;  %v4685_v52 = vld [vmem:[%s4875_s28 + $0x6c0] sm:$0xff]  }
  0xa8   : > { %4203 = vmatprep.subr.bf16.mxu1 %v4636_v54  ;;  %v4687_v54 = vld [vmem:[%s4875_s28 + $0x680] sm:$0xff]  }
  0xa9   : > { %4182 = vmatpush3.bf16.msra.mxu0 %v4637_v55  ;;  %v969_v55 = vcombine.high %v953_v50, %v953_v50 }
  0xaa   : > { %4183 = vmatprep.subr.bf16.mxu0 %v4639_v57  ;;  %v4689_v57 = vld [vmem:[%s4875_s28 + $0x6c8] sm:$0xff]  }
  0xab   : > { %4204 = vmatpush3.bf16.msra.mxu1 %v4638_v56  ;;  %v4688_v56 = vld [vmem:[%s4875_s28 + $0x648] sm:$0xff]  }
  0xac   : > { %4205 = vmatprep.subr.bf16.mxu1 %v4640_v58  ;;  %v4690_v58 = vld [vmem:[%s4875_s28 + $0x608] sm:$0xff]  }
  0xad   : > { %4184 = vmatpush3.bf16.msra.mxu0 %v4641_v59  ;;  %v4691_v59 = vld [vmem:[%s4875_s28 + $0x688] sm:$0xff]  }
  0xae   : > { %4185 = vmatprep.subr.bf16.mxu0 %v4643_v61  ;;  %v4693_v61 = vld [vmem:[%s4875_s28 + $0x6d0] sm:$0xff]  }
  0xaf   : > { %4206 = vmatpush3.bf16.msra.mxu1 %v4642_v60  ;;  %v4692_v60 = vld [vmem:[%s4875_s28 + $0x650] sm:$0xff]  }
  0xb0   : > { %4207 = vmatprep.subr.bf16.mxu1 %v4644_v63  ;;  %v4695_v63 = vld [vmem:[%s4875_s28 + $0x690] sm:$0xff]  }
  0xb1   : > { %4186 = vmatpush3.bf16.msra.mxu0 %v4645_v2  ;;  %v4698_v2 = vld [vmem:[%s4875_s28 + $0x618] sm:$0xff]  }
  0xb2   : > { %4187 = vmatprep.subr.bf16.mxu0 %v4647_v6  ;;  %v4702_v6 = vld [vmem:[%s4875_s28 + $0x620] sm:$0xff]  }
  0xb3   : > { %4208 = vmatpush3.bf16.msra.mxu1 %v4646_v3  ;;  %v4699_v3 = vld [vmem:[%s4875_s28 + $0x698] sm:$0xff]  }
  0xb4   : > { %4209 = vmatprep.subr.bf16.mxu1 %v4648_v7  ;;  %v4703_v7 = vld [vmem:[%s4875_s28 + $0x6a0] sm:$0xff]  }
  0xb5   : > { %4188 = vmatpush3.bf16.msra.mxu0 %v4649_v10  ;;  %v4706_v10 = vld [vmem:[%s4875_s28 + $0x628] sm:$0xff]  }
  0xb6   : > { %4217 = vmatprep.subr.bf16.mxu0 %v4651_v14  ;;  %v4709_v14 = vld [vmem:[%s4875_s28 + $0x6f0] sm:$0xff]  }
  0xb7   : > { %4210 = vmatpush3.bf16.msra.mxu1 %v4650_v11  ;;  %v4707_v11 = vld [vmem:[%s4875_s28 + $0x6a8] sm:$0xff]  }
  0xb8   : > { %3162 = vmatmul.mubr.bf16.vlgmr.msra.gmra.mrb[16].mxu0 %v946_v13  ;;  %4239 = vmatprep.subr.bf16.mxu1 %v4652_v15  ;;  %v242_v13 = vld [vmem:[%s4870_s24 + $0x18] sm:$0xff] }
  0xb9   : > { %4218 = vmatpush3.bf16.msra.mxu0 %v4653_v17  ;;  %3241 = vmatprep.mubr.bf16.mxu0 %v967_v16  ;;  %v979_v15 = vrot.slane %v242_v13, %v4913_v42  ;;  %v972_v16 = vcombine.high %v242_v13, %v242_v13  ;;  %v4710_v17 = vld [vmem:[%s4875_s28 + $0x630] sm:$0xff]   ;;  %v4747_v13 = vld [vmem:[%s4875_s28 + $0x7b8] sm:$0xff]  }
  0xba   : > { %3202 = vmatmul.mubr.bf16.vlgmr.msra.gmra.mrb[16].mxu1 %v968_v19  ;;  %4219 = vmatprep.subr.bf16.mxu0 %v4655_v20 }
  0xbb   : > { %4240 = vmatpush3.bf16.msra.mxu1 %v4654_v18  ;;  %3281 = vmatprep.mubr.bf16.mxu1 %v971_v22  ;;  %v4712_v18 = vld [vmem:[%s4875_s28 + $0x678] sm:$0xff]   ;;  %v987_v19 = vcombine.high %v979_v15, %v979_v15  ;;  %v5139_v20 = vrot.slane %v972_v16, %v4913_v42 }
  0xbc   : > { %4241 = vmatprep.subr.bf16.mxu1 %v4656_v21  ;;  %v4711_v21 = vld [vmem:[%s4875_s28 + $0x6b0] sm:$0xff]   ;;  %v4713_v22 = vld [vmem:[%s4875_s28 + $0x6f8] sm:$0xff]  }
  0xbd   : > { %4220 = vmatpush3.bf16.msra.mxu0 %v4657_v23  ;;  %v1009_v23 = vrot.slane %v987_v19, %v4913_v42  ;;  %v4754_v19 = vld [vmem:[%s4875_s28 + $0x8c8] sm:$0xff]  }
  0xbe   : > { %4221 = vmatprep.subr.bf16.mxu0 %v4659_v25  ;;  %v4714_v25 = vld [vmem:[%s4875_s28 + $0x638] sm:$0xff]  }
  0xbf   : > { %4242 = vmatpush3.bf16.msra.mxu1 %v4658_v24  ;;  %v988_v24 = vcombine.high %v5139_v20, %v5139_v20 }
  0xc0   : > { %4243 = vmatprep.subr.bf16.mxu1 %v4660_v26  ;;  %v1019_v26 = vcombine.high %v1009_v23, %v1009_v23 }
  0xc1   : > { %4222 = vmatpush3.bf16.msra.mxu0 %v4661_v27  ;;  %v995_v27 = vrot.slane %v979_v15, %v4913_v42  ;;  %v4751_v15 = vld [vmem:[%s4875_s28 + $0x800] sm:$0xff]  }
  0xc2   : > { %4223 = vmatprep.subr.bf16.mxu0 %v4663_v29  ;;  %v4715_v29 = vld [vmem:[%s4875_s28 + $0x6b8] sm:$0xff]  }
  0xc3   : > { %4244 = vmatpush3.bf16.msra.mxu1 %v4662_v28  ;;  %v4716_v28 = vld [vmem:[%s4875_s28 + $0x740] sm:$0xff]  }
  0xc4   : > { %4245 = vmatprep.subr.bf16.mxu1 %v4664_v30  ;;  %v1016_v30 = vrot.slane %v988_v24, %v4913_v42  ;;  %v4759_v24 = vld [vmem:[%s4875_s28 + $0x810] sm:$0xff]  }
  0xc5   : > { %4224 = vmatpush3.bf16.msra.mxu0 %v4665_v31  ;;  %v4717_v31 = vld [vmem:[%s4875_s28 + $0x7c0] sm:$0xff]  }
  0xc6   : > { %4225 = vmatprep.subr.bf16.mxu0 %v4667_v33  ;;  %v1017_v33 = vcombine.high %v995_v27, %v995_v27 }
  0xc7   : > { %4246 = vmatpush3.bf16.msra.mxu1 %v4666_v32  ;;  %v4718_v32 = vld [vmem:[%s4875_s28 + $0x700] sm:$0xff]  }
  0xc8   : > { %4247 = vmatprep.subr.bf16.mxu1 %v4668_v34  ;;  %v4720_v34 = vld [vmem:[%s4875_s28 + $0x748] sm:$0xff]  }
  0xc9   : > { %4226 = vmatpush3.bf16.msra.mxu0 %v4669_v35  ;;  %v4719_v35 = vld [vmem:[%s4875_s28 + $0x780] sm:$0xff]  }
  0xca   : > { %4227 = vmatprep.subr.bf16.mxu0 %v4671_v37  ;;  %v4721_v37 = vld [vmem:[%s4875_s28 + $0x7c8] sm:$0xff]  }
  0xcb   : > { %4248 = vmatpush3.bf16.msra.mxu1 %v4670_v36  ;;  %v1020_v36 = vcombine.high %v1016_v30, %v1016_v30 }
  0xcc   : > { %4249 = vmatprep.subr.bf16.mxu1 %v4672_v38  ;;  %v4722_v38 = vld [vmem:[%s4875_s28 + $0x708] sm:$0xff]  }
  0xcd   : > { %4228 = vmatpush3.bf16.msra.mxu0 %v4673_v39  ;;  %v4724_v39 = vld [vmem:[%s4875_s28 + $0x750] sm:$0xff]  }
  0xce   : > { %4229 = vmatprep.subr.bf16.mxu0 %v4675_v41  ;;  %v4725_v41 = vld [vmem:[%s4875_s28 + $0x7d0] sm:$0xff]  }
  0xcf   : > { %4250 = vmatpush3.bf16.msra.mxu1 %v4674_v40  ;;  %v4723_v40 = vld [vmem:[%s4875_s28 + $0x788] sm:$0xff]  }
  0xd0   : > { %4251 = vmatprep.subr.bf16.mxu1 %v4676_v43  ;;  %v4726_v43 = vld [vmem:[%s4875_s28 + $0x710] sm:$0xff]  }
  0xd1   : > { %4230 = vmatpush3.bf16.msra.mxu0 %v4677_v44  ;;  %v4728_v44 = vld [vmem:[%s4875_s28 + $0x758] sm:$0xff]  }
  0xd2   : > { %4231 = vmatprep.subr.bf16.mxu0 %v4679_v46  ;;  %v4729_v46 = vld [vmem:[%s4875_s28 + $0x7d8] sm:$0xff]  }
  0xd3   : > { %4252 = vmatpush3.bf16.msra.mxu1 %v4678_v45  ;;  %v4727_v45 = vld [vmem:[%s4875_s28 + $0x790] sm:$0xff]  }
  0xd4   : > { %4253 = vmatprep.subr.bf16.mxu1 %v4680_v47  ;;  %v4730_v47 = vld [vmem:[%s4875_s28 + $0x718] sm:$0xff]  }
  0xd5   : > { %4232 = vmatpush3.bf16.msra.mxu0 %v4681_v48  ;;  %v4732_v48 = vld [vmem:[%s4875_s28 + $0x760] sm:$0xff]  }
  0xd6   : > { %4261 = vmatprep.subr.bf16.mxu0 %v4684_v51  ;;  %v4734_v51 = vld [vmem:[%s4875_s28 + $0x720] sm:$0xff]  }
  0xd7   : > { %4254 = vmatpush3.bf16.msra.mxu1 %v4682_v49  ;;  %v4731_v49 = vld [vmem:[%s4875_s28 + $0x798] sm:$0xff]  }
  0xd8   : > { %3242 = vmatmul.mubr.bf16.vlgmr.msra.gmra.mrb[20].mxu0 %v953_v50  ;;  %4283 = vmatprep.subr.bf16.mxu1 %v4685_v52  ;;  %v4733_v50 = vld [vmem:[%s4875_s28 + $0x7e0] sm:$0xff]   ;;  %v4736_v52 = vld [vmem:[%s4875_s28 + $0x768] sm:$0xff]  }
  0xd9   : > { %4262 = vmatpush3.bf16.msra.mxu0 %v4686_v53  ;;  %3321 = vmatprep.mubr.bf16.mxu0 %v1009_v23  ;;  %v4735_v53 = vld [vmem:[%s4875_s28 + $0x7a0] sm:$0xff]   ;;  %v4758_v23 = vld [vmem:[%s4875_s28 + $0x8d0] sm:$0xff]  }
  0xda   : > { %3282 = vmatmul.mubr.bf16.vlgmr.msra.gmra.mrb[20].mxu1 %v969_v55  ;;  %4263 = vmatprep.subr.bf16.mxu0 %v4688_v56  ;;  %v4738_v55 = vld [vmem:[%s4875_s28 + $0x728] sm:$0xff]   ;;  %v4740_v56 = vld [vmem:[%s4875_s28 + $0x770] sm:$0xff]  }
  0xdb   : > { %4284 = vmatpush3.bf16.msra.mxu1 %v4687_v54  ;;  %3361 = vmatprep.mubr.bf16.mxu1 %v1019_v26  ;;  %v4737_v54 = vld [vmem:[%s4875_s28 + $0x7e8] sm:$0xff]   ;;  %v4760_v26 = vld [vmem:[%s4875_s28 + $0x890] sm:$0xff]  }
  0xdc   : > { %4285 = vmatprep.subr.bf16.mxu1 %v4689_v57 }
  0xdd   : > { %4264 = vmatpush3.bf16.msra.mxu0 %v4690_v58  ;;  %v4739_v58 = vld [vmem:[%s4875_s28 + $0x7a8] sm:$0xff]  }
  0xde   : > { %4265 = vmatprep.subr.bf16.mxu0 %v4692_v60  ;;  %v4741_v60 = vld [vmem:[%s4875_s28 + $0x7f0] sm:$0xff]  }
  0xdf   : > { %4286 = vmatpush3.bf16.msra.mxu1 %v4691_v59 }
  0xe0   : > { %4287 = vmatprep.subr.bf16.mxu1 %v4693_v61 }
  0xe1   : > { %4266 = vmatpush3.bf16.msra.mxu0 %v4694_v62 }
  0xe2   : > { %4267 = vmatprep.subr.bf16.mxu0 %v4696_v0  ;;  %v4742_v0 = vld [vmem:[%s4875_s28 + $0x730] sm:$0xff]  }
  0xe3   : > { %4288 = vmatpush3.bf16.msra.mxu1 %v4695_v63 }
  0xe4   : > { %4289 = vmatprep.subr.bf16.mxu1 %v4697_v1  ;;  %v4744_v1 = vld [vmem:[%s4875_s28 + $0x778] sm:$0xff]  }
  0xe5   : > { %4268 = vmatpush3.bf16.msra.mxu0 %v4698_v2 }
  0xe6   : > { %4269 = vmatprep.subr.bf16.mxu0 %v4700_v4 }
  0xe7   : > { %4290 = vmatpush3.bf16.msra.mxu1 %v4699_v3 }
  0xe8   : > { %4291 = vmatprep.subr.bf16.mxu1 %v4701_v5 }
  0xe9   : > { %4270 = vmatpush3.bf16.msra.mxu0 %v4702_v6  ;;  %v4743_v6 = vld [vmem:[%s4875_s28 + $0x7b0] sm:$0xff]  }
  0xea   : > { %4271 = vmatprep.subr.bf16.mxu0 %v4704_v8  ;;  %v4745_v8 = vld [vmem:[%s4875_s28 + $0x7f8] sm:$0xff]  }
  0xeb   : > { %4292 = vmatpush3.bf16.msra.mxu1 %v4703_v7 }
  0xec   : > { %4293 = vmatprep.subr.bf16.mxu1 %v4705_v9 }
  0xed   : > { %4272 = vmatpush3.bf16.msra.mxu0 %v4706_v10  ;;  %v4746_v10 = vld [vmem:[%s4875_s28 + $0x738] sm:$0xff]  }
  0xee   : > { %4273 = vmatprep.subr.bf16.mxu0 %v4708_v12  ;;  %v4749_v12 = vld [vmem:[%s4875_s28 + $0x840] sm:$0xff]  }
  0xef   : > { %4294 = vmatpush3.bf16.msra.mxu1 %v4707_v11  ;;  %v1002_v11 = vrot.slane %v5139_v20, %v4913_v42  ;;  %v4755_v20 = vld [vmem:[%s4875_s28 + $0x808] sm:$0xff]  }
  0xf0   : > { %4295 = vmatprep.subr.bf16.mxu1 %v4709_v14  ;;  %v4750_v14 = vld [vmem:[%s4875_s28 + $0x8c0] sm:$0xff]  }
  0xf1   : > { %4274 = vmatpush3.bf16.msra.mxu0 %v4710_v17  ;;  %v1018_v16 = vcombine.high %v1002_v11, %v1002_v11  ;;  %v4753_v17 = vld [vmem:[%s4875_s28 + $0x848] sm:$0xff]  }
  0xf2   : > { %4275 = vmatprep.subr.bf16.mxu0 %v4712_v18  ;;  %v4752_v18 = vld [vmem:[%s4875_s28 + $0x880] sm:$0xff]  }
  0xf3   : > { %4296 = vmatpush3.bf16.msra.mxu1 %v4711_v21  ;;  %v4757_v21 = vld [vmem:[%s4875_s28 + $0x850] sm:$0xff]  }
  0xf4   : > { %4297 = vmatprep.subr.bf16.mxu1 %v4713_v22  ;;  %v4756_v22 = vld [vmem:[%s4875_s28 + $0x888] sm:$0xff]  }
  0xf5   : > { %4276 = vmatpush3.bf16.msra.mxu0 %v4714_v25  ;;  %v4761_v25 = vld [vmem:[%s4875_s28 + $0x858] sm:$0xff]  }
  0xf6   : > { %4305 = vmatprep.subr.bf16.mxu0 %v4716_v28  ;;  %v4763_v28 = vld [vmem:[%s4875_s28 + $0x818] sm:$0xff]  }
  0xf7   : > { %4298 = vmatpush3.bf16.msra.mxu1 %v4715_v29  ;;  %v4765_v29 = vld [vmem:[%s4875_s28 + $0x860] sm:$0xff]  }
  0xf8   : > { %3322 = vmatmul.mubr.bf16.vlgmr.msra.gmra.mrb[24].mxu0 %v995_v27  ;;  %4327 = vmatprep.subr.bf16.mxu1 %v4717_v31  ;;  %v4762_v27 = vld [vmem:[%s4875_s28 + $0x8d8] sm:$0xff]   ;;  %v4766_v31 = vld [vmem:[%s4875_s28 + $0x8e0] sm:$0xff]  }
  0xf9   : > { %4306 = vmatpush3.bf16.msra.mxu0 %v4718_v32  ;;  %3401 = vmatprep.mubr.bf16.mxu0 %v1016_v30  ;;  %v4764_v30 = vld [vmem:[%s4875_s28 + $0x898] sm:$0xff]   ;;  %v4767_v32 = vld [vmem:[%s4875_s28 + $0x820] sm:$0xff]  }
  0xfa   : > { %3362 = vmatmul.mubr.bf16.vlgmr.msra.gmra.mrb[24].mxu1 %v1017_v33  ;;  %4307 = vmatprep.subr.bf16.mxu0 %v4720_v34  ;;  %v4769_v33 = vld [vmem:[%s4875_s28 + $0x868] sm:$0xff]   ;;  %v4768_v34 = vld [vmem:[%s4875_s28 + $0x8a0] sm:$0xff]  }
  0xfb   : > { %4328 = vmatpush3.bf16.msra.mxu1 %v4719_v35  ;;  %3441 = vmatprep.mubr.bf16.mxu1 %v1020_v36  ;;  %v4770_v35 = vld [vmem:[%s4875_s28 + $0x8e8] sm:$0xff]  }
  0xfc   : > { %4329 = vmatprep.subr.bf16.mxu1 %v4721_v37  ;;  %v4771_v36 = vld [vmem:[%s4875_s28 + $0x828] sm:$0xff]   ;;  %v4773_v37 = vld [vmem:[%s4875_s28 + $0x870] sm:$0xff]  }
  0xfd   : > { %4308 = vmatpush3.bf16.msra.mxu0 %v4722_v38 }
  0xfe   : > { %4309 = vmatprep.subr.bf16.mxu0 %v4724_v39  ;;  %v4772_v39 = vld [vmem:[%s4875_s28 + $0x8a8] sm:$0xff]  }
  0xff   : > { %4330 = vmatpush3.bf16.msra.mxu1 %v4723_v40 }
 0x100   : > { %4331 = vmatprep.subr.bf16.mxu1 %v4725_v41  ;;  %v4774_v41 = vld [vmem:[%s4875_s28 + $0x8f0] sm:$0xff]  }
 0x101   : > { %4310 = vmatpush3.bf16.msra.mxu0 %v4726_v43  ;;  %v3701_v43 = vld.sshfl [vmem:[%s4870_s24 + $0x20] sm:$0x33 pattern:$0x75316420] }
 0x102   : > { %4311 = vmatprep.subr.bf16.mxu0 %v4728_v44 }
 0x103   : > { %4332 = vmatpush3.bf16.msra.mxu1 %v4727_v45 }
 0x104   : > { %4333 = vmatprep.subr.bf16.mxu1 %v4729_v46 }
 0x105   : > { %4312 = vmatpush3.bf16.msra.mxu0 %v4730_v47  ;;  %v4775_v47 = vld [vmem:[%s4875_s28 + $0x830] sm:$0xff]  }
 0x106   : > { %4313 = vmatprep.subr.bf16.mxu0 %v4732_v48  ;;  %v1028_v48 = vcombine.high %v3701_v43, %v3701_v43 }
 0x107   : > { %4334 = vmatpush3.bf16.msra.mxu1 %v4731_v49 }
 0x108   : > { %4335 = vmatprep.subr.bf16.mxu1 %v4733_v50 }
 0x109   : > { %4314 = vmatpush3.bf16.msra.mxu0 %v4734_v51  ;;  %v4777_v51 = vld [vmem:[%s4875_s28 + $0x878] sm:$0xff]  }
 0x10a   : > { %4315 = vmatprep.subr.bf16.mxu0 %v4736_v52 }
 0x10b   : > { %4336 = vmatpush3.bf16.msra.mxu1 %v4735_v53  ;;  %v4013_v57 = vpop.f32.mrb[0].mxu0 }
 0x10c   : > { %v4014_v59 = vpop.f32.mrb[1].mxu0  ;;  %4337 = vmatprep.subr.bf16.mxu1 %v4737_v54  ;;  %v4035_v61 = vpop.f32.mrb[0].mxu1 }
 0x10d   : > { %v4015_v62 = vadd.f32 %v4014_v59, %v4013_v57  ;;  %v4016_v63 = vpop.f32.mrb[2].mxu0  ;;  %4316 = vmatpush3.bf16.msra.mxu0 %v4738_v55  ;;  %v4036_v2 = vpop.f32.mrb[1].mxu1  ;;  %v4776_v55 = vld [vmem:[%s4875_s28 + $0x8b0] sm:$0xff]  }
 0x10e   : > { %v4017_v3 = vpop.f32.mrb[3].mxu0  ;;  %4317 = vmatprep.subr.bf16.mxu0 %v4740_v56  ;;  %v4037_v4 = vadd.f32 %v4036_v2, %v4035_v61  ;;  %v4038_v5 = vpop.f32.mrb[2].mxu1  ;;  %v1042_v56 = vrot.slane %v1028_v48, %v4913_v42  ;;  %v4780_v63 = vld [vmem:[%s4875_s28 + $0x8b8] sm:$0xff]  }
 0x10f   : > { %4338 = vmatpush3.bf16.msra.mxu1 %v4739_v58  ;;  %v4039_v7 = vpop.f32.mrb[3].mxu1  ;;  %v4778_v58 = vld [vmem:[%s4875_s28 + $0x8f8] sm:$0xff]  }
 0x110   : > { %4339 = vmatprep.subr.bf16.mxu1 %v4741_v60  ;;  %v5180_v9 = vadd.f32 %v4037_v4, %v4015_v62  ;;  %v4779_v60 = vld [vmem:[%s4875_s28 + $0x838] sm:$0xff]   ;;  %v1044_v61 = vcombine.high %v1042_v56, %v1042_v56  ;;  %v1035_v62 = vrot.slane %v3701_v43, %v4913_v42 }
 0x111   : > { %4318 = vmatpush3.bf16.msra.mxu0 %v4742_v0 }
 0x112   : > { %4319 = vmatprep.subr.bf16.mxu0 %v4744_v1  ;;  %v1043_v0 = vcombine.high %v1035_v62, %v1035_v62 }
 0x113   : > { %4340 = vmatpush3.bf16.msra.mxu1 %v4743_v6 }
 0x114   : > { %4341 = vmatprep.subr.bf16.mxu1 %v4745_v8 }
 0x115   : > { %4320 = vmatpush3.bf16.msra.mxu0 %v4746_v10 }
 0x116   : > { %4349 = vmatprep.subr.bf16.mxu0 %v4749_v12 }
 0x117   : > { %4342 = vmatpush3.bf16.msra.mxu1 %v4747_v13 }
 0x118   : > { %3402 = vmatmul.mubr.bf16.vlgmr.msra.gmra.mrb[28].mxu0 %v1002_v11  ;;  %4371 = vmatprep.subr.bf16.mxu1 %v4750_v14 }
 0x119   : > { %4350 = vmatpush3.bf16.msra.mxu0 %v4751_v15  ;;  %3481 = vmatprep.mubr.bf16.mxu0 %v1042_v56 }
 0x11a   : > { %3442 = vmatmul.mubr.bf16.vlgmr.msra.gmra.mrb[28].mxu1 %v1018_v16  ;;  %4351 = vmatprep.subr.bf16.mxu0 %v4753_v17 }
 0x11b   : > { %4372 = vmatpush3.bf16.msra.mxu1 %v4752_v18  ;;  %3521 = vmatprep.mubr.bf16.mxu1 %v1044_v61 }
 0x11c   : > { %4373 = vmatprep.subr.bf16.mxu1 %v4754_v19 }
 0x11d   : > { %4352 = vmatpush3.bf16.msra.mxu0 %v4755_v20 }
 0x11e   : > { %4353 = vmatprep.subr.bf16.mxu0 %v4757_v21 }
 0x11f   : > { %4374 = vmatpush3.bf16.msra.mxu1 %v4756_v22 }
 0x120   : > { %4375 = vmatprep.subr.bf16.mxu1 %v4758_v23 }
 0x121   : > { %4354 = vmatpush3.bf16.msra.mxu0 %v4759_v24 }
 0x122   : > { %4355 = vmatprep.subr.bf16.mxu0 %v4761_v25 }
 0x123   : > { %4376 = vmatpush3.bf16.msra.mxu1 %v4760_v26 }
 0x124   : > { %4377 = vmatprep.subr.bf16.mxu1 %v4762_v27 }
 0x125   : > { %4356 = vmatpush3.bf16.msra.mxu0 %v4763_v28 }
 0x126   : > { %4357 = vmatprep.subr.bf16.mxu0 %v4765_v29 }
 0x127   : > { %4378 = vmatpush3.bf16.msra.mxu1 %v4764_v30 }
 0x128   : > { %4379 = vmatprep.subr.bf16.mxu1 %v4766_v31 }
 0x129   : > { %4358 = vmatpush3.bf16.msra.mxu0 %v4767_v32 }
 0x12a   : > { %4359 = vmatprep.subr.bf16.mxu0 %v4769_v33 }
 0x12b   : > { %4380 = vmatpush3.bf16.msra.mxu1 %v4768_v34  ;;  %v4057_v38 = vpop.f32.mrb[4].mxu0 }
 0x12c   : > { %v4058_v40 = vpop.f32.mrb[5].mxu0  ;;  %4381 = vmatprep.subr.bf16.mxu1 %v4770_v35  ;;  %v4079_v44 = vpop.f32.mrb[4].mxu1 }
 0x12d   : > { %v4059_v45 = vadd.f32 %v4058_v40, %v4057_v38  ;;  %v4060_v46 = vpop.f32.mrb[6].mxu0  ;;  %4360 = vmatpush3.bf16.msra.mxu0 %v4771_v36  ;;  %v4080_v49 = vpop.f32.mrb[5].mxu1 }
 0x12e   : > { %v4061_v50 = vpop.f32.mrb[7].mxu0  ;;  %4361 = vmatprep.subr.bf16.mxu0 %v4773_v37  ;;  %v4081_v53 = vadd.f32 %v4080_v49, %v4079_v44  ;;  %v4082_v54 = vpop.f32.mrb[6].mxu1 }
 0x12f   : > { %v2924_v52 = vadd.f32 %v4059_v45, %v5180_v9  ;;  %4382 = vmatpush3.bf16.msra.mxu1 %v4772_v39  ;;  %v4083_v57 = vpop.f32.mrb[7].mxu1 }
 0x130   : > { %4383 = vmatprep.subr.bf16.mxu1 %v4774_v41 }
 0x131   : > { %v2964_v59 = vadd.f32 %v4081_v53, %v2924_v52  ;;  %4362 = vmatpush3.bf16.msra.mxu0 %v4775_v47 }
 0x132   : > { %4363 = vmatprep.subr.bf16.mxu0 %v4777_v51 }
 0x133   : > { %4384 = vmatpush3.bf16.msra.mxu1 %v4776_v55 }
 0x134   : > { %4385 = vmatprep.subr.bf16.mxu1 %v4778_v58 }
 0x135   : > { %4364 = vmatpush3.bf16.msra.mxu0 %v4779_v60 }
 0x137   : > { %4386 = vmatpush3.bf16.msra.mxu1 %v4780_v63 }
 0x138   : > { %3482 = vmatmul.mubr.bf16.vlgmr.msra.gmra.mrb[32].mxu0 %v1035_v62 }
 0x13a   : > { %3522 = vmatmul.mubr.bf16.vlgmr.msra.gmra.mrb[32].mxu1 %v1043_v0 }
 0x14b   : > { %v4101_v1 = vpop.f32.mrb[8].mxu0 }
 0x14c   : > { %v4102_v2 = vpop.f32.mrb[9].mxu0 }
 0x14d   : > { %v4123_v3 = vpop.f32.mrb[8].mxu1  ;;  %v4103_v4 = vadd.f32 %v4102_v2, %v4101_v1  ;;  %v4104_v5 = vpop.f32.mrb[10].mxu0 }
 0x14e   : > { %v4124_v6 = vpop.f32.mrb[9].mxu1  ;;  %v4105_v7 = vpop.f32.mrb[11].mxu0 }
 0x14f   : > { %v3004_v8 = vadd.f32 %v4103_v4, %v2964_v59  ;;  %v4125_v9 = vadd.f32 %v4124_v6, %v4123_v3  ;;  %v4126_v10 = vpop.f32.mrb[10].mxu1 }
 0x150   : > { %v4127_v42 = vpop.f32.mrb[11].mxu1 }
 0x151   : > { %v3044_v11 = vadd.f32 %v4125_v9, %v3004_v8 }
 0x16b   : > { %v4145_v12 = vpop.f32.mrb[12].mxu0 }
 0x16c   : > { %v4146_v13 = vpop.f32.mrb[13].mxu0 }
 0x16d   : > { %v4167_v14 = vpop.f32.mrb[12].mxu1  ;;  %v4147_v15 = vadd.f32 %v4146_v13, %v4145_v12  ;;  %v4148_v16 = vpop.f32.mrb[14].mxu0 }
 0x16e   : > { %v4168_v17 = vpop.f32.mrb[13].mxu1  ;;  %v4149_v18 = vpop.f32.mrb[15].mxu0 }
 0x16f   : > { %v3084_v19 = vadd.f32 %v4147_v15, %v3044_v11  ;;  %v4169_v20 = vadd.f32 %v4168_v17, %v4167_v14  ;;  %v4170_v21 = vpop.f32.mrb[14].mxu1  ;;  %v238_v18 = vld [vmem:[#allocation2] sm:$0x3] }
 0x170   : > { %v4171_v22 = vpop.f32.mrb[15].mxu1 }
 0x171   : > { %v3124_v23 = vadd.f32 %v4169_v20, %v3084_v19  ;;  %v3545_v22 = vld [vmem:[%s5306_s3] sm:$0xff] (!%p3990_p6) }
 0x18b   : > { %v4189_v24 = vpop.f32.mrb[16].mxu0 }
 0x18c   : > { %v4190_v25 = vpop.f32.mrb[17].mxu0 }
 0x18d   : > { %v4211_v26 = vpop.f32.mrb[16].mxu1  ;;  %v4191_v27 = vadd.f32 %v4190_v25, %v4189_v24  ;;  %v4192_v28 = vpop.f32.mrb[18].mxu0  ;;  %v3547_v24 = vld [vmem:[%s5306_s3 + $0x10] sm:$0xff] (!%p3990_p6)  ;;  %v4821_v25 = vmov (!%p3990_p6), 0.0|0.0  }
 0x18e   : > { %v4212_v29 = vpop.f32.mrb[17].mxu1  ;;  %v4193_v30 = vpop.f32.mrb[19].mxu0  ;;  %4445 = vmatprep.subr.bf16.mxu0 (!%p3990_p6), %v4821_v25  ;;  %v4823_v28 = vmov (!%p3990_p6), 0.0  }
 0x18f   : > { %v3164_v31 = vadd.f32 %v4191_v27, %v3124_v23  ;;  %v4213_v32 = vadd.f32 %v4212_v29, %v4211_v26  ;;  %v4214_v33 = vpop.f32.mrb[18].mxu1  ;;  %v3546_v23 = vld [vmem:[%s5306_s3 + $0x8] sm:$0xff] (!%p3990_p6)  ;;  %v3548_v27 = vld [vmem:[%s5306_s3 + $0x18] sm:$0xff] (!%p3990_p6)  ;;  %4442 = vmatprep.mubr.msk.f32.mxu0 (!%p3990_p6), %vm4822_vm0, %v4823_v28  ;;  %v3549_v30 = vld [vmem:[%s5306_s3 + $0x20] sm:$0xff] (!%p3990_p6) }
 0x190   : > { %v4215_v34 = vpop.f32.mrb[19].mxu1  ;;  %v4446_v26 = vpack.c.bf16 (!%p3990_p6), %v3546_v23, %v3545_v22  ;;  %v4449_v29 = vpack.c.bf16 (!%p3990_p6), %v3548_v27, %v3547_v24  ;;  %v3551_v33 = vld [vmem:[%s5306_s3 + $0x30] sm:$0xff] (!%p3990_p6) }
 0x191   : > { %v3204_v35 = vadd.f32 %v4213_v32, %v3164_v31  ;;  %v3550_v31 = vld [vmem:[%s5306_s3 + $0x28] sm:$0xff] (!%p3990_p6)  ;;  %v3552_v34 = vld [vmem:[%s5306_s3 + $0x38] sm:$0xff] (!%p3990_p6) }
 0x192   : > { %4447 = vmatpush3.bf16.msra.mxu0 (!%p3990_p6), %v4446_v26  ;;  %v4452_v32 = vpack.c.bf16 (!%p3990_p6), %v3550_v31, %v3549_v30 }
 0x193   : > { %4448 = vmatprep.subr.bf16.mxu0 (!%p3990_p6), %v4821_v25 }
 0x196   : > { %4450 = vmatpush3.bf16.msra.mxu0 (!%p3990_p6), %v4449_v29 }
 0x197   : > { %4451 = vmatprep.subr.bf16.mxu0 (!%p3990_p6), %v4821_v25 }
 0x19a   : > { %4453 = vmatpush3.bf16.msra.mxu0 (!%p3990_p6), %v4452_v32 }
 0x19b   : > { %4454 = vmatprep.subr.bf16.mxu0 (!%p3990_p6), %v4821_v25 }
 0x1ab   : > { %v4233_v36 = vpop.f32.mrb[20].mxu0 }
 0x1ac   : > { %v4234_v37 = vpop.f32.mrb[21].mxu0 }
 0x1ad   : > { %v4255_v38 = vpop.f32.mrb[20].mxu1  ;;  %v4235_v39 = vadd.f32 %v4234_v37, %v4233_v36  ;;  %v4236_v40 = vpop.f32.mrb[22].mxu0  ;;  %v3553_v36 = vld [vmem:[%s5306_s3 + $0x40] sm:$0xff] (!%p3990_p6)  ;;  %v3554_v37 = vld [vmem:[%s5306_s3 + $0x48] sm:$0xff] (!%p3990_p6) }
 0x1ae   : > { %v4256_v41 = vpop.f32.mrb[21].mxu1  ;;  %v4237_v43 = vpop.f32.mrb[23].mxu0  ;;  %v3556_v40 = vld [vmem:[%s5306_s3 + $0x58] sm:$0xff] (!%p3990_p6) }
 0x1af   : > { %v3244_v44 = vadd.f32 %v4235_v39, %v3204_v35  ;;  %v4257_v45 = vadd.f32 %v4256_v41, %v4255_v38  ;;  %v4258_v46 = vpop.f32.mrb[22].mxu1  ;;  %v4455_v35 = vpack.c.bf16 (!%p3990_p6), %v3552_v34, %v3551_v33  ;;  %v4458_v38 = vpack.c.bf16 (!%p3990_p6), %v3554_v37, %v3553_v36  ;;  %v3555_v39 = vld [vmem:[%s5306_s3 + $0x50] sm:$0xff] (!%p3990_p6)  ;;  %v3557_v43 = vld [vmem:[%s5306_s3 + $0x60] sm:$0xff] (!%p3990_p6) }
 0x1b0   : > { %v4259_v47 = vpop.f32.mrb[23].mxu1  ;;  %v4461_v41 = vpack.c.bf16 (!%p3990_p6), %v3556_v40, %v3555_v39 }
 0x1b1   : > { %v3284_v48 = vadd.f32 %v4257_v45, %v3244_v44  ;;  %4456 = vmatpush3.bf16.msra.mxu0 (!%p3990_p6), %v4455_v35  ;;  %v3558_v44 = vld [vmem:[%s5306_s3 + $0x68] sm:$0xff] (!%p3990_p6)  ;;  %v3991_v47 = vld [vmem:[%s5305_s2] ss:$0 sm:$0xff] (!%p3990_p6) }
 0x1b2   : > { %4457 = vmatprep.subr.bf16.mxu0 (!%p3990_p6), %v4821_v25  ;;  %v4464_v45 = vpack.c.bf16 (!%p3990_p6), %v3558_v44, %v3557_v43 }
 0x1b5   : > { %4459 = vmatpush3.bf16.msra.mxu0 (!%p3990_p6), %v4458_v38 }
 0x1b6   : > { %4460 = vmatprep.subr.bf16.mxu0 (!%p3990_p6), %v4821_v25 }
 0x1b9   : > { %4462 = vmatpush3.bf16.msra.mxu0 (!%p3990_p6), %v4461_v41 }
 0x1ba   : > { %4463 = vmatprep.subr.bf16.mxu0 (!%p3990_p6), %v4821_v25 }
 0x1bd   : > { %4465 = vmatpush3.bf16.msra.mxu0 (!%p3990_p6), %v4464_v45 }
 0x1be   : > { %4466 = vmatprep.subr.bf16.mxu0 (!%p3990_p6), %v4821_v25 }
 0x1cb   : > { %v4277_v49 = vpop.f32.mrb[24].mxu0 }
 0x1cc   : > { %v4278_v50 = vpop.f32.mrb[25].mxu0 }
 0x1cd   : > { %v4299_v51 = vpop.f32.mrb[24].mxu1  ;;  %v4279_v52 = vadd.f32 %v4278_v50, %v4277_v49  ;;  %v4280_v53 = vpop.f32.mrb[26].mxu0  ;;  %v3560_v49 = vld [vmem:[%s5306_s3 + $0x78] sm:$0xff] (!%p3990_p6) }
 0x1ce   : > { %v4300_v54 = vpop.f32.mrb[25].mxu1  ;;  %v4281_v55 = vpop.f32.mrb[27].mxu0  ;;  %v3992_v53 = vld [vmem:[%s5307_s4] ss:$0 sm:$0xff] (!%p3990_p6) }
 0x1cf   : > { %v3324_v56 = vadd.f32 %v4279_v52, %v3284_v48  ;;  %v4301_v57 = vadd.f32 %v4300_v54, %v4299_v51  ;;  %v4302_v58 = vpop.f32.mrb[26].mxu1  ;;  %v3559_v48 = vld [vmem:[%s5306_s3 + $0x70] sm:$0xff] (!%p3990_p6) }
 0x1d0   : > { %v4303_v59 = vpop.f32.mrb[27].mxu1  ;;  %v4467_v51 = vpack.c.bf16 (!%p3990_p6), %v3560_v49, %v3559_v48 }
 0x1d1   : > { %v3364_v60 = vadd.f32 %v4301_v57, %v3324_v56 }
 0x1d2   : > { %4468 = vmatpush3.bf16.msra.mxu0 (!%p3990_p6), %v4467_v51 }
 0x1eb   : > { %v4321_v61 = vpop.f32.mrb[28].mxu0 }
 0x1ec   : > { %v4322_v62 = vpop.f32.mrb[29].mxu0 }
 0x1ed   : > { %v4343_v63 = vpop.f32.mrb[28].mxu1  ;;  %v4323_v0 = vadd.f32 %v4322_v62, %v4321_v61  ;;  %v4324_v1 = vpop.f32.mrb[30].mxu0 }
 0x1ee   : > { %v4344_v2 = vpop.f32.mrb[29].mxu1  ;;  %v4325_v3 = vpop.f32.mrb[31].mxu0 }
 0x1ef   : > { %v3404_v4 = vadd.f32 %v4323_v0, %v3364_v60  ;;  %v4345_v5 = vadd.f32 %v4344_v2, %v4343_v63  ;;  %v4346_v6 = vpop.f32.mrb[30].mxu1 }
 0x1f0   : > { %v4347_v7 = vpop.f32.mrb[31].mxu1 }
 0x1f1   : > { %v3444_v8 = vadd.f32 %v4345_v5, %v3404_v4 }
 0x20b   : > { %v4365_v9 = vpop.f32.mrb[32].mxu0 }
 0x20c   : > { %v4366_v10 = vpop.f32.mrb[33].mxu0 }
 0x20d   : > { %v4387_v42 = vpop.f32.mrb[32].mxu1  ;;  %v4367_v11 = vadd.f32 %v4366_v10, %v4365_v9  ;;  %v4368_v12 = vpop.f32.mrb[34].mxu0 }
 0x20e   : > { %v4388_v13 = vpop.f32.mrb[33].mxu1  ;;  %v4369_v14 = vpop.f32.mrb[35].mxu0 }
 0x20f   : > { %v3484_v15 = vadd.f32 %v4367_v11, %v3444_v8  ;;  %v4389_v16 = vadd.f32 %v4388_v13, %v4387_v42  ;;  %v4390_v17 = vpop.f32.mrb[34].mxu1  ;;  %3534 = sbr.rel (%p3990_p6) target bundleno = 760 (0x2f8), region = 48 }
 0x210   : > { %v4391_v19 = vpop.f32.mrb[35].mxu1 }
 0x211   : > { %v3524_v20 = vadd.f32 %v4389_v16, %v3484_v15 }
 0x213   : > { %v3529_v21 = vadd.f32 %v3524_v20, %v238_v18 }
 0x215   : > { %3530 = vst [vmem:[#allocation2] sm:$0x3] %v3529_v21 }
 0x21c   : > { %v3535_v46 = vld [vmem:[#allocation2] sm:$0x3] }
 0x21d   : > { %v3543_v50 = vadd.f32 %v3991_v47, %v3535_v46 }
 0x21f   : > { %v3544_v52 = vmax.f32 %v3543_v50, 0.0 }
 0x221   : > { %4443 = vmatmul.mubr.f32.vlgmr.msra.gmra.mrb[0].mxu0 %v3544_v52 }
 0x2f4   : > { %v3634_v54 = vpop.f32.mrb[0].mxu0 }
 0x2f5   : > { %v3635_v55 = vadd.f32 %v3992_v53, %v3634_v54  ;;  %v4444_v56 = vpop.f32.mrb[1].mxu0 }
 0x2f7   : > { %3639 = vst.msk [vmem:[#allocation3] sm:$0x3] %vm3638_vm1, %v3635_v55 }
 0x2f8 PF: > { %p4473_p7 = scmp.eq.s32.totalorder %s4861_s19, 3  ;;  %s4824_s17 = smov [#allocation3]  }
 0x2f9   : > { %s3647_s20 = sshll.u32 %s4824_s17, 4  ;;  %s3648_s20 = int_to_ptr.vmem [resolvable:$true] %s3647_s20 }
 0x2fa   : > { %s4781_s21 = scalar_lea.vmem %s3648_s20, 32  ;;  %p4788_p11 = scmp.lt.s32.totalorder %s3648_s20, %s3648_s20 }
 0x2fb   : > { %p4782_p8 = scmp.ne.s32.totalorder %s3648_s20, %s4781_s21  ;;  %p4789_p12 = scmp.lt.s32.totalorder %s4781_s21, %s4781_s21 }
 0x2fd   : > { %p4783_p9 = pnand %p4782_p8, %p4473_p7  ;;  %p4790_p13 = por %p4789_p12, %p4788_p11 }
 0x2ff   : > { %p4784_p10 = pneg %p4783_p9 }
 0x301   : > { %p4791_p0 = pnand %p4790_p13, %p4784_p10 }
 0x303   : > { %4794 = shalt.err (!%p4791_p0)
}
 0x304   : > { %s4795_s24 = scalar_lea.hbm %s5308_s5, 32 }
 0x305   : > { %p4796_p1 = scmp.ne.s32.totalorder %s5308_s5, %s4795_s24  ;;  %p4801_p4 = scmp.lt.u32.totalorder %s4795_s24, %s5308_s5 }
 0x307   : > { %p4797_p2 = pnand %p4796_p1, %p4473_p7 }
 0x309   : > { %p4798_p3 = pneg %p4797_p2 }
 0x30b   : > { %p4803_p5 = pnand %p4801_p4, %p4798_p3 }
 0x30d   : > { %4806 = shalt.err (!%p4803_p5)
}
 0x30e   : > { %4470 = dma.vmem_to_hbm [thread:$0]  (%p4473_p7), %s3648_s20, 32, %s5308_s5, [#allocation4]  }
 0x30f   : > { %4812 = dma.done.wait (%p4473_p7), [#allocation4], 32  }
 0x310   : > { %4814 = vsyncadd (%p4473_p7), [#allocation4], 4294967264 }
 0x311 PF: > { %s16_s18 = sadd.s32 1, %s4817_s18  }
 0x312   : > { %p13_p6 = scmp.ge.s32.totalorder %s16_s18, 6  }
 0x314   :  { %15 = sbr.rel (!%p13_p6) target bundleno = 1 (0x1), region = 78 }
 0x31b   :  { %3660 = vsyncpa [#allocation4], 1 }
 0x31c   :  { %3662 = vsyncpa [#allocation4 + $0x1], 1 }

</bundles_post_ra>
